<compile_context>
chip_gen: v7x
topology: tpu7x:2x2x1
jax: 0.10.0
libtpu: 0.0.40
codegen_flags: <defaults>
</compile_context>

<pallas_src>
import jax
import jax.numpy as jnp
from jax import lax
from jax.experimental import pallas as pl
from jax.experimental.pallas import tpu as pltpu

# ----- small BERT-for-MLM config ---------------------------------------------
VOCAB = 256
HIDDEN = 64
N_HEADS = 4
HEAD_DIM = HIDDEN // N_HEADS
INTERMEDIATE = 256
N_LAYERS = 6          # matches Model(num_hidden_layers=6)
MAX_POS = 64
LN_EPS = 1e-12
IGNORE_INDEX = -100


# ---------------- in-kernel helpers (f32 elementwise math) --------------------
def _gelu(x):
    # erf-based gelu (HF BERT default)
    return 0.5 * x * (1.0 + lax.erf(x * 0.7071067811865475))


def _ln(x, g, b):
    mu = jnp.mean(x, axis=-1, keepdims=True)
    var = jnp.mean(jnp.square(x - mu), axis=-1, keepdims=True)
    return (x - mu) * lax.rsqrt(var + LN_EPS) * g + b


def _split_heads(x):
    # (S, H) -> (NH, S, Dh) via lane slices stacked along a new leading axis
    return jnp.stack(
        [x[:, i * HEAD_DIM:(i + 1) * HEAD_DIM] for i in range(N_HEADS)], axis=0)


# ---------------- fully fused encoder + MLM head + CE kernel ------------------
# grid = (batch,): one grid step per batch; all weights resident in VMEM.
def _bert_kernel(emb_ref, mask_ref, eg_ref, eb_ref,
                 qkv_w_ref, qkv_b_ref, ao_w_ref, ao_b_ref,
                 ag_ref, ab_ref, i_w_ref, i_b_ref,
                 o_w_ref, o_b_ref, og_ref, ob_ref,
                 t_w_ref, t_b_ref, tg_ref, tb_ref,
                 dec_w_ref, dec_b_ref, labels_ref,
                 logits_ref, tok_loss_ref):
    # embedding LayerNorm (residual stream `h` lives in registers from here on)
    h = _ln(emb_ref[...].astype(jnp.float32), eg_ref[...], eb_ref[...])
    mask = mask_ref[...]                           # (1, 1, S) additive key bias
    scale = 1.0 / (HEAD_DIM ** 0.5)

    for l in range(N_LAYERS):                      # unrolled: weights resident
        # fused Q|K|V projection: one bf16 MXU pass, lane-dense (S, 3H) result
        qkv = jnp.dot(h.astype(jnp.bfloat16), qkv_w_ref[l],
                      preferred_element_type=jnp.float32) + qkv_b_ref[l]
        q = _split_heads(qkv[:, :HIDDEN])                      # (NH, S, Dh)
        k = _split_heads(qkv[:, HIDDEN:2 * HIDDEN])
        v = _split_heads(qkv[:, 2 * HIDDEN:])

        # all heads batched: one score tensor, ONE softmax pass
        s = jnp.einsum('hqd,hkd->hqk', q, k,
                       preferred_element_type=jnp.float32) * scale + mask
        s = s - jnp.max(s, axis=-1, keepdims=True)
        e = jnp.exp(s)
        p = e / jnp.sum(e, axis=-1, keepdims=True)
        ctx = jnp.einsum('hqk,hkd->hqd', p, v,
                         preferred_element_type=jnp.float32)   # (NH, S, Dh)
        ctx = jnp.concatenate([ctx[i] for i in range(N_HEADS)], axis=-1)  # (S, H)

        # attn output projection + residual LayerNorm (all in registers/VMEM)
        attn = jnp.dot(ctx.astype(jnp.bfloat16), ao_w_ref[l],
                       preferred_element_type=jnp.float32) + ao_b_ref[l]
        h1 = _ln(attn + h, ag_ref[l], ab_ref[l])

        # FFN (gelu) + residual LayerNorm
        inter = _gelu(jnp.dot(h1.astype(jnp.bfloat16), i_w_ref[l],
                              preferred_element_type=jnp.float32) + i_b_ref[l])
        ffn = jnp.dot(inter.astype(jnp.bfloat16), o_w_ref[l],
                      preferred_element_type=jnp.float32) + o_b_ref[l]
        h = _ln(ffn + h1, og_ref[l], ob_ref[l])

    # MLM prediction head (transform + LN + tied decoder), fused in the same call
    t = _gelu(jnp.dot(h.astype(jnp.bfloat16), t_w_ref[...],
                      preferred_element_type=jnp.float32) + t_b_ref[...])
    t = _ln(t, tg_ref[...], tb_ref[...])
    logits = jnp.dot(t.astype(jnp.bfloat16), dec_w_ref[...],
                     preferred_element_type=jnp.float32) + dec_b_ref[...]
    logits_ref[...] = logits

    # per-token masked cross-entropy contribution (final mean happens in wrapper)
    lbl = labels_ref[...]                                       # (S, 1) int32
    m = jnp.max(logits, axis=-1, keepdims=True)
    lse = jnp.log(jnp.sum(jnp.exp(logits - m), axis=-1, keepdims=True)) + m
    col = lax.broadcasted_iota(jnp.int32, logits.shape, 1)
    picked = jnp.sum(jnp.where(col == lbl, logits, 0.0), axis=-1, keepdims=True)
    valid = (lbl != IGNORE_INDEX).astype(jnp.float32)
    tok_loss_ref[...] = (lse - picked) * valid


def fused_bert_call(emb, mask_bias, labels_col, p, batch, seq):
    BS, H = emb.shape

    def resident(arr):
        # full-stack block, constant index_map -> DMA'd once, stays in VMEM
        nd = arr.ndim
        return pl.BlockSpec(arr.shape, lambda b, _n=nd: (0,) * _n)

    weight_args = (p["emb_ln_g"], p["emb_ln_b"],
                   p["qkv_w"], p["qkv_b"], p["ao_w"], p["ao_b"],
                   p["attn_ln_g"], p["attn_ln_b"], p["i_w"], p["i_b"],
                   p["o_w"], p["o_b"], p["out_ln_g"], p["out_ln_b"],
                   p["t_w"], p["t_b"], p["t_ln_g"], p["t_ln_b"],
                   p["dec_w"], p["dec_b"])

    in_specs = ([pl.BlockSpec((seq, H), lambda b: (b, 0)),          # emb slab
                 pl.BlockSpec((1, 1, seq), lambda b: (b, 0, 0))]    # mask bias
                + [resident(a) for a in weight_args]
                + [pl.BlockSpec((seq, 1), lambda b: (b, 0))])       # labels

    return pl.pallas_call(
        _bert_kernel,
        out_shape=(jax.ShapeDtypeStruct((BS, VOCAB), jnp.float32),  # logits
                   jax.ShapeDtypeStruct((BS, 1), jnp.float32)),     # per-token loss
        grid=(batch,),
        in_specs=in_specs,
        out_specs=(pl.BlockSpec((seq, VOCAB), lambda b: (b, 0)),
                   pl.BlockSpec((seq, 1), lambda b: (b, 0))),
        compiler_params=pltpu.CompilerParams(
            dimension_semantics=("parallel",)),
    )(emb, mask_bias, *weight_args, labels_col)


# ---------------- parameters ---------------------------------------------------
def init_params(key):
    keys = iter(jax.random.split(key, 16))

    def nrm(shape, dtype=jnp.float32):
        return (0.02 * jax.random.normal(next(keys), shape, jnp.float32)).astype(dtype)

    L, H, I = N_LAYERS, HIDDEN, INTERMEDIATE
    params = {
        "word_emb": nrm((VOCAB, H)),
        "pos_emb": nrm((MAX_POS, H)),
        "type_emb": nrm((2, H)),
        "emb_ln_g": jnp.ones((1, H), jnp.float32),
        "emb_ln_b": jnp.zeros((1, H), jnp.float32),
        # layer-stacked weights (bf16 for the MXU, f32 biases / LN params)
        "qkv_w": nrm((L, H, 3 * H), jnp.bfloat16),
        "qkv_b": jnp.zeros((L, 1, 3 * H), jnp.float32),
        "ao_w": nrm((L, H, H), jnp.bfloat16),
        "ao_b": jnp.zeros((L, 1, H), jnp.float32),
        "attn_ln_g": jnp.ones((L, 1, H), jnp.float32),
        "attn_ln_b": jnp.zeros((L, 1, H), jnp.float32),
        "i_w": nrm((L, H, I), jnp.bfloat16),
        "i_b": jnp.zeros((L, 1, I), jnp.float32),
        "o_w": nrm((L, I, H), jnp.bfloat16),
        "o_b": jnp.zeros((L, 1, H), jnp.float32),
        "out_ln_g": jnp.ones((L, 1, H), jnp.float32),
        "out_ln_b": jnp.zeros((L, 1, H), jnp.float32),
        # MLM prediction head (decoder tied to word embeddings, as in HF)
        "t_w": nrm((H, H), jnp.bfloat16),
        "t_b": jnp.zeros((1, H), jnp.float32),
        "t_ln_g": jnp.ones((1, H), jnp.float32),
        "t_ln_b": jnp.zeros((1, H), jnp.float32),
        "dec_b": jnp.zeros((1, VOCAB), jnp.float32),
    }
    params["dec_w"] = params["word_emb"].T.astype(jnp.bfloat16)
    return params


# ---------------- forward (Model.forward equivalent) ---------------------------
def bert_mlm_forward(params, input_ids, attention_mask, labels):
    B, S = input_ids.shape

    # TODO(synk): embedding-table gathers have no clean Pallas equivalent at this
    # scale; they are done in plain JAX, everything downstream is one Pallas call.
    tok = params["word_emb"][input_ids]                                  # (B,S,H)
    pos = params["pos_emb"][:S][None, :, :]                              # (1,S,H)
    typ = params["type_emb"][0][None, None, :]                           # (1,1,H)
    emb = (tok + pos + typ).reshape(B * S, HIDDEN)

    # additive attention-mask bias over keys, (B, 1, S)
    mask_bias = ((1.0 - attention_mask.astype(jnp.float32)) * -1e9).reshape(B, 1, S)
    labels_col = labels.reshape(B * S, 1).astype(jnp.int32)

    # embedding-LN + 6 encoder layers + MLM head + token CE: ONE pallas_call
    logits_flat, tok_loss = fused_bert_call(emb, mask_bias, labels_col, params, B, S)

    # final scalar mean over all batches (cross-batch reduction; trivial XLA op).
    # NOTE: like torch CrossEntropyLoss, loss is NaN if every label == IGNORE_INDEX.
    valid_cnt = jnp.sum((labels != IGNORE_INDEX).astype(jnp.float32))
    loss = jnp.sum(tok_loss) / valid_cnt

    logits = logits_flat.reshape(B, S, VOCAB)
    # output[0] = loss, output[1][:, 0, :] = logits of first token
    return loss, logits[:, 0, :]


if __name__ == "__main__":
    key = jax.random.PRNGKey(0)
    pkey, ikey, lkey = jax.random.split(key, 3)
    params = init_params(pkey)

    B, S = 2, 16
    input_ids = jax.random.randint(ikey, (B, S), 0, VOCAB, dtype=jnp.int32)
    attention_mask = jnp.ones((B, S), jnp.int32).at[1, 12:].set(0)       # some padding
    labels = jax.random.randint(lkey, (B, S), 0, VOCAB, dtype=jnp.int32)
    labels = labels.at[:, ::4].set(IGNORE_INDEX)                         # MLM ignores most positions

    loss, cls_logits = jax.jit(bert_mlm_forward)(params, input_ids, attention_mask, labels)
    loss = jax.block_until_ready(loss)
    cls_logits = jax.block_until_ready(cls_logits)

    assert loss.shape == () and jnp.isfinite(loss)
    assert cls_logits.shape == (B, VOCAB)
    print("KERNEL_OK")
</pallas_src>

<mosaic_0001>
module attributes {stable_mosaic.version = 11 : i64} {
  func.func @_bert_kernel(%arg0: i32, %arg1: memref<16x64xf32, #tpu.memory_space<vmem>>, %arg2: memref<1x1x16xf32, #tpu.memory_space<vmem>>, %arg3: memref<1x64xf32, #tpu.memory_space<vmem>>, %arg4: memref<1x64xf32, #tpu.memory_space<vmem>>, %arg5: memref<6x64x192xbf16, #tpu.memory_space<vmem>>, %arg6: memref<6x1x192xf32, #tpu.memory_space<vmem>>, %arg7: memref<6x64x64xbf16, #tpu.memory_space<vmem>>, %arg8: memref<6x1x64xf32, #tpu.memory_space<vmem>>, %arg9: memref<6x1x64xf32, #tpu.memory_space<vmem>>, %arg10: memref<6x1x64xf32, #tpu.memory_space<vmem>>, %arg11: memref<6x64x256xbf16, #tpu.memory_space<vmem>>, %arg12: memref<6x1x256xf32, #tpu.memory_space<vmem>>, %arg13: memref<6x256x64xbf16, #tpu.memory_space<vmem>>, %arg14: memref<6x1x64xf32, #tpu.memory_space<vmem>>, %arg15: memref<6x1x64xf32, #tpu.memory_space<vmem>>, %arg16: memref<6x1x64xf32, #tpu.memory_space<vmem>>, %arg17: memref<64x64xbf16, #tpu.memory_space<vmem>>, %arg18: memref<1x64xf32, #tpu.memory_space<vmem>>, %arg19: memref<1x64xf32, #tpu.memory_space<vmem>>, %arg20: memref<1x64xf32, #tpu.memory_space<vmem>>, %arg21: memref<64x256xbf16, #tpu.memory_space<vmem>>, %arg22: memref<1x256xf32, #tpu.memory_space<vmem>>, %arg23: memref<16x1xi32, #tpu.memory_space<vmem>>, %arg24: memref<16x256xf32, #tpu.memory_space<vmem>>, %arg25: memref<16x1xf32, #tpu.memory_space<vmem>>) attributes {dimension_semantics = [#tpu.dimension_semantics<parallel>], iteration_bounds = array<i64: 2>, scalar_prefetch = 0 : i64, scratch_operands = 0 : i64, tpu.core_type = #tpu.core_type<tc>, window_params = [{transform_indices = @transform_0, window_bounds = array<i64: 16, 64>}, {transform_indices = @transform_1, window_bounds = array<i64: 1, 1, 16>}, {pipeline_mode = #tpu.pipeline_mode<synchronous>, transform_indices = @transform_2, window_bounds = array<i64: 1, 64>}, {pipeline_mode = #tpu.pipeline_mode<synchronous>, transform_indices = @transform_3, window_bounds = array<i64: 1, 64>}, {pipeline_mode = #tpu.pipeline_mode<synchronous>, transform_indices = @transform_4, window_bounds = array<i64: 6, 64, 192>}, {pipeline_mode = #tpu.pipeline_mode<synchronous>, transform_indices = @transform_5, window_bounds = array<i64: 6, 1, 192>}, {pipeline_mode = #tpu.pipeline_mode<synchronous>, transform_indices = @transform_6, window_bounds = array<i64: 6, 64, 64>}, {pipeline_mode = #tpu.pipeline_mode<synchronous>, transform_indices = @transform_7, window_bounds = array<i64: 6, 1, 64>}, {pipeline_mode = #tpu.pipeline_mode<synchronous>, transform_indices = @transform_8, window_bounds = array<i64: 6, 1, 64>}, {pipeline_mode = #tpu.pipeline_mode<synchronous>, transform_indices = @transform_9, window_bounds = array<i64: 6, 1, 64>}, {pipeline_mode = #tpu.pipeline_mode<synchronous>, transform_indices = @transform_10, window_bounds = array<i64: 6, 64, 256>}, {pipeline_mode = #tpu.pipeline_mode<synchronous>, transform_indices = @transform_11, window_bounds = array<i64: 6, 1, 256>}, {pipeline_mode = #tpu.pipeline_mode<synchronous>, transform_indices = @transform_12, window_bounds = array<i64: 6, 256, 64>}, {pipeline_mode = #tpu.pipeline_mode<synchronous>, transform_indices = @transform_13, window_bounds = array<i64: 6, 1, 64>}, {pipeline_mode = #tpu.pipeline_mode<synchronous>, transform_indices = @transform_14, window_bounds = array<i64: 6, 1, 64>}, {pipeline_mode = #tpu.pipeline_mode<synchronous>, transform_indices = @transform_15, window_bounds = array<i64: 6, 1, 64>}, {pipeline_mode = #tpu.pipeline_mode<synchronous>, transform_indices = @transform_16, window_bounds = array<i64: 64, 64>}, {pipeline_mode = #tpu.pipeline_mode<synchronous>, transform_indices = @transform_17, window_bounds = array<i64: 1, 64>}, {pipeline_mode = #tpu.pipeline_mode<synchronous>, transform_indices = @transform_18, window_bounds = array<i64: 1, 64>}, {pipeline_mode = #tpu.pipeline_mode<synchronous>, transform_indices = @transform_19, window_bounds = array<i64: 1, 64>}, {pipeline_mode = #tpu.pipeline_mode<synchronous>, transform_indices = @transform_20, window_bounds = array<i64: 64, 256>}, {pipeline_mode = #tpu.pipeline_mode<synchronous>, transform_indices = @transform_21, window_bounds = array<i64: 1, 256>}, {transform_indices = @transform_22, window_bounds = array<i64: 16, 1>}, {transform_indices = @transform_23, window_bounds = array<i64: 16, 256>}, {transform_indices = @transform_24, window_bounds = array<i64: 16, 1>}]} {
    %c0 = arith.constant 0 : index
    %c0_0 = arith.constant 0 : index
    %0 = vector.load %arg1[%c0, %c0_0] : memref<16x64xf32, #tpu.memory_space<vmem>>, vector<16x64xf32>
    %c0_1 = arith.constant 0 : index
    %c0_2 = arith.constant 0 : index
    %1 = vector.load %arg3[%c0_1, %c0_2] : memref<1x64xf32, #tpu.memory_space<vmem>>, vector<1x64xf32>
    %c0_3 = arith.constant 0 : index
    %c0_4 = arith.constant 0 : index
    %2 = vector.load %arg4[%c0_3, %c0_4] : memref<1x64xf32, #tpu.memory_space<vmem>>, vector<1x64xf32>
    %cst = arith.constant dense<0.000000e+00> : vector<16xf32>
    %3 = vector.multi_reduction <add>, %0, %cst [1] : vector<16x64xf32> to vector<16xf32>
    %4 = vector.shape_cast %3 : vector<16xf32> to vector<16x1xf32>
    %cst_5 = arith.constant 6.400000e+01 : f32
    %5 = vector.broadcast %cst_5 : f32 to vector<16x1xf32>
    %6 = arith.divf %4, %5 : vector<16x1xf32>
    %7 = vector.broadcast %6 : vector<16x1xf32> to vector<16x64xf32>
    %8 = arith.subf %0, %7 : vector<16x64xf32>
    %9 = arith.mulf %8, %8 : vector<16x64xf32>
    %cst_6 = arith.constant dense<0.000000e+00> : vector<16xf32>
    %10 = vector.multi_reduction <add>, %9, %cst_6 [1] : vector<16x64xf32> to vector<16xf32>
    %11 = vector.shape_cast %10 : vector<16xf32> to vector<16x1xf32>
    %cst_7 = arith.constant 6.400000e+01 : f32
    %12 = vector.broadcast %cst_7 : f32 to vector<16x1xf32>
    %13 = arith.divf %11, %12 : vector<16x1xf32>
    %14 = vector.broadcast %6 : vector<16x1xf32> to vector<16x64xf32>
    %15 = arith.subf %0, %14 : vector<16x64xf32>
    %cst_8 = arith.constant 9.99999996E-13 : f32
    %16 = vector.broadcast %cst_8 : f32 to vector<16x1xf32>
    %17 = arith.addf %13, %16 : vector<16x1xf32>
    %18 = math.rsqrt %17 : vector<16x1xf32>
    %19 = vector.broadcast %18 : vector<16x1xf32> to vector<16x64xf32>
    %20 = arith.mulf %15, %19 : vector<16x64xf32>
    %21 = vector.broadcast %1 : vector<1x64xf32> to vector<16x64xf32>
    %22 = arith.mulf %20, %21 : vector<16x64xf32>
    %23 = vector.broadcast %2 : vector<1x64xf32> to vector<16x64xf32>
    %24 = arith.addf %22, %23 : vector<16x64xf32>
    %c0_9 = arith.constant 0 : index
    %c0_10 = arith.constant 0 : index
    %c0_11 = arith.constant 0 : index
    %25 = vector.load %arg2[%c0_9, %c0_10, %c0_11] : memref<1x1x16xf32, #tpu.memory_space<vmem>>, vector<1x1x16xf32>
    %26 = arith.truncf %24 : vector<16x64xf32> to vector<16x64xbf16>
    %c0_12 = arith.constant 0 : index
    %c0_13 = arith.constant 0 : index
    %c0_14 = arith.constant 0 : index
    %27 = vector.load %arg5[%c0_12, %c0_13, %c0_14] : memref<6x64x192xbf16, #tpu.memory_space<vmem>>, vector<1x64x192xbf16>
    %28 = vector.shape_cast %27 : vector<1x64x192xbf16> to vector<64x192xbf16>
    %cst_15 = arith.constant dense<0.000000e+00> : vector<16x192xf32>
    %29 = tpu.matmul %26, %28, %cst_15 {dimension_numbers = #tpu.dot_dimension_numbers<[1], [0], [0], [1], [0, 0, 1, 1], [], []>} : vector<16x64xbf16>, vector<64x192xbf16>, vector<16x192xf32> -> vector<16x192xf32>
    %c0_16 = arith.constant 0 : index
    %c0_17 = arith.constant 0 : index
    %c0_18 = arith.constant 0 : index
    %30 = vector.load %arg6[%c0_16, %c0_17, %c0_18] : memref<6x1x192xf32, #tpu.memory_space<vmem>>, vector<1x1x192xf32>
    %31 = vector.shape_cast %30 : vector<1x1x192xf32> to vector<1x192xf32>
    %32 = vector.broadcast %31 : vector<1x192xf32> to vector<16x192xf32>
    %33 = arith.addf %29, %32 : vector<16x192xf32>
    %34 = vector.extract_strided_slice %33 {offsets = [0, 0], sizes = [16, 64], strides = [1, 1]} : vector<16x192xf32> to vector<16x64xf32>
    %35 = vector.extract_strided_slice %34 {offsets = [0, 0], sizes = [16, 16], strides = [1, 1]} : vector<16x64xf32> to vector<16x16xf32>
    %36 = vector.extract_strided_slice %34 {offsets = [0, 16], sizes = [16, 16], strides = [1, 1]} : vector<16x64xf32> to vector<16x16xf32>
    %37 = vector.extract_strided_slice %34 {offsets = [0, 32], sizes = [16, 16], strides = [1, 1]} : vector<16x64xf32> to vector<16x16xf32>
    %38 = vector.extract_strided_slice %34 {offsets = [0, 48], sizes = [16, 16], strides = [1, 1]} : vector<16x64xf32> to vector<16x16xf32>
    %39 = vector.shape_cast %35 : vector<16x16xf32> to vector<1x16x16xf32>
    %40 = vector.shape_cast %36 : vector<16x16xf32> to vector<1x16x16xf32>
    %41 = vector.shape_cast %37 : vector<16x16xf32> to vector<1x16x16xf32>
    %42 = vector.shape_cast %38 : vector<16x16xf32> to vector<1x16x16xf32>
    %43 = tpu.concatenate %39, %40, %41, %42 in 0 : vector<1x16x16xf32>, vector<1x16x16xf32>, vector<1x16x16xf32>, vector<1x16x16xf32> -> vector<4x16x16xf32>
    %44 = vector.extract_strided_slice %33 {offsets = [0, 64], sizes = [16, 64], strides = [1, 1]} : vector<16x192xf32> to vector<16x64xf32>
    %45 = vector.extract_strided_slice %44 {offsets = [0, 0], sizes = [16, 16], strides = [1, 1]} : vector<16x64xf32> to vector<16x16xf32>
    %46 = vector.extract_strided_slice %44 {offsets = [0, 16], sizes = [16, 16], strides = [1, 1]} : vector<16x64xf32> to vector<16x16xf32>
    %47 = vector.extract_strided_slice %44 {offsets = [0, 32], sizes = [16, 16], strides = [1, 1]} : vector<16x64xf32> to vector<16x16xf32>
    %48 = vector.extract_strided_slice %44 {offsets = [0, 48], sizes = [16, 16], strides = [1, 1]} : vector<16x64xf32> to vector<16x16xf32>
    %49 = vector.shape_cast %45 : vector<16x16xf32> to vector<1x16x16xf32>
    %50 = vector.shape_cast %46 : vector<16x16xf32> to vector<1x16x16xf32>
    %51 = vector.shape_cast %47 : vector<16x16xf32> to vector<1x16x16xf32>
    %52 = vector.shape_cast %48 : vector<16x16xf32> to vector<1x16x16xf32>
    %53 = tpu.concatenate %49, %50, %51, %52 in 0 : vector<1x16x16xf32>, vector<1x16x16xf32>, vector<1x16x16xf32>, vector<1x16x16xf32> -> vector<4x16x16xf32>
    %54 = vector.extract_strided_slice %33 {offsets = [0, 128], sizes = [16, 64], strides = [1, 1]} : vector<16x192xf32> to vector<16x64xf32>
    %55 = vector.extract_strided_slice %54 {offsets = [0, 0], sizes = [16, 16], strides = [1, 1]} : vector<16x64xf32> to vector<16x16xf32>
    %56 = vector.extract_strided_slice %54 {offsets = [0, 16], sizes = [16, 16], strides = [1, 1]} : vector<16x64xf32> to vector<16x16xf32>
    %57 = vector.extract_strided_slice %54 {offsets = [0, 32], sizes = [16, 16], strides = [1, 1]} : vector<16x64xf32> to vector<16x16xf32>
    %58 = vector.extract_strided_slice %54 {offsets = [0, 48], sizes = [16, 16], strides = [1, 1]} : vector<16x64xf32> to vector<16x16xf32>
    %59 = vector.shape_cast %55 : vector<16x16xf32> to vector<1x16x16xf32>
    %60 = vector.shape_cast %56 : vector<16x16xf32> to vector<1x16x16xf32>
    %61 = vector.shape_cast %57 : vector<16x16xf32> to vector<1x16x16xf32>
    %62 = vector.shape_cast %58 : vector<16x16xf32> to vector<1x16x16xf32>
    %63 = tpu.concatenate %59, %60, %61, %62 in 0 : vector<1x16x16xf32>, vector<1x16x16xf32>, vector<1x16x16xf32>, vector<1x16x16xf32> -> vector<4x16x16xf32>
    "tpu.trace_start"() <{level = 10 : i32, message = "hqd,hkd->hqk"}> : () -> ()
    %cst_19 = arith.constant dense<0.000000e+00> : vector<4x16x16xf32>
    %64 = tpu.matmul %43, %53, %cst_19 {dimension_numbers = #tpu.dot_dimension_numbers<[2], [2], [1], [1], [0, 0, 0, 1, 1, 1], [0], [0]>} : vector<4x16x16xf32>, vector<4x16x16xf32>, vector<4x16x16xf32> -> vector<4x16x16xf32>
    "tpu.trace_stop"() : () -> ()
    %cst_20 = arith.constant 2.500000e-01 : f32
    %65 = vector.broadcast %cst_20 : f32 to vector<4x16x16xf32>
    %66 = arith.mulf %64, %65 : vector<4x16x16xf32>
    %67 = vector.broadcast %25 : vector<1x1x16xf32> to vector<4x16x16xf32>
    %68 = arith.addf %66, %67 : vector<4x16x16xf32>
    %cst_21 = arith.constant dense<0xFF800000> : vector<4x16xf32>
    %69 = vector.multi_reduction <maximumf>, %68, %cst_21 [2] : vector<4x16x16xf32> to vector<4x16xf32>
    %70 = vector.shape_cast %69 : vector<4x16xf32> to vector<4x16x1xf32>
    %71 = vector.broadcast %70 : vector<4x16x1xf32> to vector<4x16x16xf32>
    %72 = arith.subf %68, %71 : vector<4x16x16xf32>
    %73 = math.exp %72 : vector<4x16x16xf32>
    %cst_22 = arith.constant dense<0.000000e+00> : vector<4x16xf32>
    %74 = vector.multi_reduction <add>, %73, %cst_22 [2] : vector<4x16x16xf32> to vector<4x16xf32>
    %75 = vector.shape_cast %74 : vector<4x16xf32> to vector<4x16x1xf32>
    %76 = vector.broadcast %75 : vector<4x16x1xf32> to vector<4x16x16xf32>
    %77 = arith.divf %73, %76 : vector<4x16x16xf32>
    "tpu.trace_start"() <{level = 10 : i32, message = "hqk,hkd->hqd"}> : () -> ()
    %cst_23 = arith.constant dense<0.000000e+00> : vector<4x16x16xf32>
    %78 = tpu.matmul %77, %63, %cst_23 {dimension_numbers = #tpu.dot_dimension_numbers<[2], [1], [1], [2], [0, 0, 0, 1, 1, 2], [0], [0]>} : vector<4x16x16xf32>, vector<4x16x16xf32>, vector<4x16x16xf32> -> vector<4x16x16xf32>
    "tpu.trace_stop"() : () -> ()
    %79 = vector.extract_strided_slice %78 {offsets = [0, 0, 0], sizes = [1, 16, 16], strides = [1, 1, 1]} : vector<4x16x16xf32> to vector<1x16x16xf32>
    %80 = vector.shape_cast %79 : vector<1x16x16xf32> to vector<16x16xf32>
    %81 = vector.extract_strided_slice %78 {offsets = [1, 0, 0], sizes = [1, 16, 16], strides = [1, 1, 1]} : vector<4x16x16xf32> to vector<1x16x16xf32>
    %82 = vector.shape_cast %81 : vector<1x16x16xf32> to vector<16x16xf32>
    %83 = vector.extract_strided_slice %78 {offsets = [2, 0, 0], sizes = [1, 16, 16], strides = [1, 1, 1]} : vector<4x16x16xf32> to vector<1x16x16xf32>
    %84 = vector.shape_cast %83 : vector<1x16x16xf32> to vector<16x16xf32>
    %85 = vector.extract_strided_slice %78 {offsets = [3, 0, 0], sizes = [1, 16, 16], strides = [1, 1, 1]} : vector<4x16x16xf32> to vector<1x16x16xf32>
    %86 = vector.shape_cast %85 : vector<1x16x16xf32> to vector<16x16xf32>
    %87 = tpu.concatenate %80, %82, %84, %86 in 1 : vector<16x16xf32>, vector<16x16xf32>, vector<16x16xf32>, vector<16x16xf32> -> vector<16x64xf32>
    %88 = arith.truncf %87 : vector<16x64xf32> to vector<16x64xbf16>
    %c0_24 = arith.constant 0 : index
    %c0_25 = arith.constant 0 : index
    %c0_26 = arith.constant 0 : index
    %89 = vector.load %arg7[%c0_24, %c0_25, %c0_26] : memref<6x64x64xbf16, #tpu.memory_space<vmem>>, vector<1x64x64xbf16>
    %90 = vector.shape_cast %89 : vector<1x64x64xbf16> to vector<64x64xbf16>
    %cst_27 = arith.constant dense<0.000000e+00> : vector<16x64xf32>
    %91 = tpu.matmul %88, %90, %cst_27 {dimension_numbers = #tpu.dot_dimension_numbers<[1], [0], [0], [1], [0, 0, 1, 1], [], []>} : vector<16x64xbf16>, vector<64x64xbf16>, vector<16x64xf32> -> vector<16x64xf32>
    %c0_28 = arith.constant 0 : index
    %c0_29 = arith.constant 0 : index
    %c0_30 = arith.constant 0 : index
    %92 = vector.load %arg8[%c0_28, %c0_29, %c0_30] : memref<6x1x64xf32, #tpu.memory_space<vmem>>, vector<1x1x64xf32>
    %93 = vector.shape_cast %92 : vector<1x1x64xf32> to vector<1x64xf32>
    %94 = vector.broadcast %93 : vector<1x64xf32> to vector<16x64xf32>
    %95 = arith.addf %91, %94 : vector<16x64xf32>
    %96 = arith.addf %95, %24 : vector<16x64xf32>
    %c0_31 = arith.constant 0 : index
    %c0_32 = arith.constant 0 : index
    %c0_33 = arith.constant 0 : index
    %97 = vector.load %arg9[%c0_31, %c0_32, %c0_33] : memref<6x1x64xf32, #tpu.memory_space<vmem>>, vector<1x1x64xf32>
    %98 = vector.shape_cast %97 : vector<1x1x64xf32> to vector<1x64xf32>
    %c0_34 = arith.constant 0 : index
    %c0_35 = arith.constant 0 : index
    %c0_36 = arith.constant 0 : index
    %99 = vector.load %arg10[%c0_34, %c0_35, %c0_36] : memref<6x1x64xf32, #tpu.memory_space<vmem>>, vector<1x1x64xf32>
    %100 = vector.shape_cast %99 : vector<1x1x64xf32> to vector<1x64xf32>
    %cst_37 = arith.constant dense<0.000000e+00> : vector<16xf32>
    %101 = vector.multi_reduction <add>, %96, %cst_37 [1] : vector<16x64xf32> to vector<16xf32>
    %102 = vector.shape_cast %101 : vector<16xf32> to vector<16x1xf32>
    %cst_38 = arith.constant 6.400000e+01 : f32
    %103 = vector.broadcast %cst_38 : f32 to vector<16x1xf32>
    %104 = arith.divf %102, %103 : vector<16x1xf32>
    %105 = vector.broadcast %104 : vector<16x1xf32> to vector<16x64xf32>
    %106 = arith.subf %96, %105 : vector<16x64xf32>
    %107 = arith.mulf %106, %106 : vector<16x64xf32>
    %cst_39 = arith.constant dense<0.000000e+00> : vector<16xf32>
    %108 = vector.multi_reduction <add>, %107, %cst_39 [1] : vector<16x64xf32> to vector<16xf32>
    %109 = vector.shape_cast %108 : vector<16xf32> to vector<16x1xf32>
    %cst_40 = arith.constant 6.400000e+01 : f32
    %110 = vector.broadcast %cst_40 : f32 to vector<16x1xf32>
    %111 = arith.divf %109, %110 : vector<16x1xf32>
    %112 = vector.broadcast %104 : vector<16x1xf32> to vector<16x64xf32>
    %113 = arith.subf %96, %112 : vector<16x64xf32>
    %cst_41 = arith.constant 9.99999996E-13 : f32
    %114 = vector.broadcast %cst_41 : f32 to vector<16x1xf32>
    %115 = arith.addf %111, %114 : vector<16x1xf32>
    %116 = math.rsqrt %115 : vector<16x1xf32>
    %117 = vector.broadcast %116 : vector<16x1xf32> to vector<16x64xf32>
    %118 = arith.mulf %113, %117 : vector<16x64xf32>
    %119 = vector.broadcast %98 : vector<1x64xf32> to vector<16x64xf32>
    %120 = arith.mulf %118, %119 : vector<16x64xf32>
    %121 = vector.broadcast %100 : vector<1x64xf32> to vector<16x64xf32>
    %122 = arith.addf %120, %121 : vector<16x64xf32>
    %123 = arith.truncf %122 : vector<16x64xf32> to vector<16x64xbf16>
    %c0_42 = arith.constant 0 : index
    %c0_43 = arith.constant 0 : index
    %c0_44 = arith.constant 0 : index
    %124 = vector.load %arg11[%c0_42, %c0_43, %c0_44] : memref<6x64x256xbf16, #tpu.memory_space<vmem>>, vector<1x64x256xbf16>
    %125 = vector.shape_cast %124 : vector<1x64x256xbf16> to vector<64x256xbf16>
    %cst_45 = arith.constant dense<0.000000e+00> : vector<16x256xf32>
    %126 = tpu.matmul %123, %125, %cst_45 {dimension_numbers = #tpu.dot_dimension_numbers<[1], [0], [0], [1], [0, 0, 1, 1], [], []>} : vector<16x64xbf16>, vector<64x256xbf16>, vector<16x256xf32> -> vector<16x256xf32>
    %c0_46 = arith.constant 0 : index
    %c0_47 = arith.constant 0 : index
    %c0_48 = arith.constant 0 : index
    %127 = vector.load %arg12[%c0_46, %c0_47, %c0_48] : memref<6x1x256xf32, #tpu.memory_space<vmem>>, vector<1x1x256xf32>
    %128 = vector.shape_cast %127 : vector<1x1x256xf32> to vector<1x256xf32>
    %129 = vector.broadcast %128 : vector<1x256xf32> to vector<16x256xf32>
    %130 = arith.addf %126, %129 : vector<16x256xf32>
    %cst_49 = arith.constant 5.000000e-01 : f32
    %131 = vector.broadcast %cst_49 : f32 to vector<16x256xf32>
    %132 = arith.mulf %131, %130 : vector<16x256xf32>
    %cst_50 = arith.constant 0.707106769 : f32
    %133 = vector.broadcast %cst_50 : f32 to vector<16x256xf32>
    %134 = arith.mulf %130, %133 : vector<16x256xf32>
    %135 = math.erf %134 : vector<16x256xf32>
    %cst_51 = arith.constant 1.000000e+00 : f32
    %136 = vector.broadcast %cst_51 : f32 to vector<16x256xf32>
    %137 = arith.addf %136, %135 : vector<16x256xf32>
    %138 = arith.mulf %132, %137 : vector<16x256xf32>
    %139 = arith.truncf %138 : vector<16x256xf32> to vector<16x256xbf16>
    %c0_52 = arith.constant 0 : index
    %c0_53 = arith.constant 0 : index
    %c0_54 = arith.constant 0 : index
    %140 = vector.load %arg13[%c0_52, %c0_53, %c0_54] : memref<6x256x64xbf16, #tpu.memory_space<vmem>>, vector<1x256x64xbf16>
    %141 = vector.shape_cast %140 : vector<1x256x64xbf16> to vector<256x64xbf16>
    %cst_55 = arith.constant dense<0.000000e+00> : vector<16x64xf32>
    %142 = tpu.matmul %139, %141, %cst_55 {dimension_numbers = #tpu.dot_dimension_numbers<[1], [0], [0], [1], [0, 0, 1, 1], [], []>} : vector<16x256xbf16>, vector<256x64xbf16>, vector<16x64xf32> -> vector<16x64xf32>
    %c0_56 = arith.constant 0 : index
    %c0_57 = arith.constant 0 : index
    %c0_58 = arith.constant 0 : index
    %143 = vector.load %arg14[%c0_56, %c0_57, %c0_58] : memref<6x1x64xf32, #tpu.memory_space<vmem>>, vector<1x1x64xf32>
    %144 = vector.shape_cast %143 : vector<1x1x64xf32> to vector<1x64xf32>
    %145 = vector.broadcast %144 : vector<1x64xf32> to vector<16x64xf32>
    %146 = arith.addf %142, %145 : vector<16x64xf32>
    %147 = arith.addf %146, %122 : vector<16x64xf32>
    %c0_59 = arith.constant 0 : index
    %c0_60 = arith.constant 0 : index
    %c0_61 = arith.constant 0 : index
    %148 = vector.load %arg15[%c0_59, %c0_60, %c0_61] : memref<6x1x64xf32, #tpu.memory_space<vmem>>, vector<1x1x64xf32>
    %149 = vector.shape_cast %148 : vector<1x1x64xf32> to vector<1x64xf32>
    %c0_62 = arith.constant 0 : index
    %c0_63 = arith.constant 0 : index
    %c0_64 = arith.constant 0 : index
    %150 = vector.load %arg16[%c0_62, %c0_63, %c0_64] : memref<6x1x64xf32, #tpu.memory_space<vmem>>, vector<1x1x64xf32>
    %151 = vector.shape_cast %150 : vector<1x1x64xf32> to vector<1x64xf32>
    %cst_65 = arith.constant dense<0.000000e+00> : vector<16xf32>
    %152 = vector.multi_reduction <add>, %147, %cst_65 [1] : vector<16x64xf32> to vector<16xf32>
    %153 = vector.shape_cast %152 : vector<16xf32> to vector<16x1xf32>
    %cst_66 = arith.constant 6.400000e+01 : f32
    %154 = vector.broadcast %cst_66 : f32 to vector<16x1xf32>
    %155 = arith.divf %153, %154 : vector<16x1xf32>
    %156 = vector.broadcast %155 : vector<16x1xf32> to vector<16x64xf32>
    %157 = arith.subf %147, %156 : vector<16x64xf32>
    %158 = arith.mulf %157, %157 : vector<16x64xf32>
    %cst_67 = arith.constant dense<0.000000e+00> : vector<16xf32>
    %159 = vector.multi_reduction <add>, %158, %cst_67 [1] : vector<16x64xf32> to vector<16xf32>
    %160 = vector.shape_cast %159 : vector<16xf32> to vector<16x1xf32>
    %cst_68 = arith.constant 6.400000e+01 : f32
    %161 = vector.broadcast %cst_68 : f32 to vector<16x1xf32>
    %162 = arith.divf %160, %161 : vector<16x1xf32>
    %163 = vector.broadcast %155 : vector<16x1xf32> to vector<16x64xf32>
    %164 = arith.subf %147, %163 : vector<16x64xf32>
    %cst_69 = arith.constant 9.99999996E-13 : f32
    %165 = vector.broadcast %cst_69 : f32 to vector<16x1xf32>
    %166 = arith.addf %162, %165 : vector<16x1xf32>
    %167 = math.rsqrt %166 : vector<16x1xf32>
    %168 = vector.broadcast %167 : vector<16x1xf32> to vector<16x64xf32>
    %169 = arith.mulf %164, %168 : vector<16x64xf32>
    %170 = vector.broadcast %149 : vector<1x64xf32> to vector<16x64xf32>
    %171 = arith.mulf %169, %170 : vector<16x64xf32>
    %172 = vector.broadcast %151 : vector<1x64xf32> to vector<16x64xf32>
    %173 = arith.addf %171, %172 : vector<16x64xf32>
    %174 = arith.truncf %173 : vector<16x64xf32> to vector<16x64xbf16>
    %c1 = arith.constant 1 : index
    %c0_70 = arith.constant 0 : index
    %c0_71 = arith.constant 0 : index
    %175 = vector.load %arg5[%c1, %c0_70, %c0_71] : memref<6x64x192xbf16, #tpu.memory_space<vmem>>, vector<1x64x192xbf16>
    %176 = vector.shape_cast %175 : vector<1x64x192xbf16> to vector<64x192xbf16>
    %cst_72 = arith.constant dense<0.000000e+00> : vector<16x192xf32>
    %177 = tpu.matmul %174, %176, %cst_72 {dimension_numbers = #tpu.dot_dimension_numbers<[1], [0], [0], [1], [0, 0, 1, 1], [], []>} : vector<16x64xbf16>, vector<64x192xbf16>, vector<16x192xf32> -> vector<16x192xf32>
    %c1_73 = arith.constant 1 : index
    %c0_74 = arith.constant 0 : index
    %c0_75 = arith.constant 0 : index
    %178 = vector.load %arg6[%c1_73, %c0_74, %c0_75] : memref<6x1x192xf32, #tpu.memory_space<vmem>>, vector<1x1x192xf32>
    %179 = vector.shape_cast %178 : vector<1x1x192xf32> to vector<1x192xf32>
    %180 = vector.broadcast %179 : vector<1x192xf32> to vector<16x192xf32>
    %181 = arith.addf %177, %180 : vector<16x192xf32>
    %182 = vector.extract_strided_slice %181 {offsets = [0, 0], sizes = [16, 64], strides = [1, 1]} : vector<16x192xf32> to vector<16x64xf32>
    %183 = vector.extract_strided_slice %182 {offsets = [0, 0], sizes = [16, 16], strides = [1, 1]} : vector<16x64xf32> to vector<16x16xf32>
    %184 = vector.extract_strided_slice %182 {offsets = [0, 16], sizes = [16, 16], strides = [1, 1]} : vector<16x64xf32> to vector<16x16xf32>
    %185 = vector.extract_strided_slice %182 {offsets = [0, 32], sizes = [16, 16], strides = [1, 1]} : vector<16x64xf32> to vector<16x16xf32>
    %186 = vector.extract_strided_slice %182 {offsets = [0, 48], sizes = [16, 16], strides = [1, 1]} : vector<16x64xf32> to vector<16x16xf32>
    %187 = vector.shape_cast %183 : vector<16x16xf32> to vector<1x16x16xf32>
    %188 = vector.shape_cast %184 : vector<16x16xf32> to vector<1x16x16xf32>
    %189 = vector.shape_cast %185 : vector<16x16xf32> to vector<1x16x16xf32>
    %190 = vector.shape_cast %186 : vector<16x16xf32> to vector<1x16x16xf32>
    %191 = tpu.concatenate %187, %188, %189, %190 in 0 : vector<1x16x16xf32>, vector<1x16x16xf32>, vector<1x16x16xf32>, vector<1x16x16xf32> -> vector<4x16x16xf32>
    %192 = vector.extract_strided_slice %181 {offsets = [0, 64], sizes = [16, 64], strides = [1, 1]} : vector<16x192xf32> to vector<16x64xf32>
    %193 = vector.extract_strided_slice %192 {offsets = [0, 0], sizes = [16, 16], strides = [1, 1]} : vector<16x64xf32> to vector<16x16xf32>
    %194 = vector.extract_strided_slice %192 {offsets = [0, 16], sizes = [16, 16], strides = [1, 1]} : vector<16x64xf32> to vector<16x16xf32>
    %195 = vector.extract_strided_slice %192 {offsets = [0, 32], sizes = [16, 16], strides = [1, 1]} : vector<16x64xf32> to vector<16x16xf32>
    %196 = vector.extract_strided_slice %192 {offsets = [0, 48], sizes = [16, 16], strides = [1, 1]} : vector<16x64xf32> to vector<16x16xf32>
    %197 = vector.shape_cast %193 : vector<16x16xf32> to vector<1x16x16xf32>
    %198 = vector.shape_cast %194 : vector<16x16xf32> to vector<1x16x16xf32>
    %199 = vector.shape_cast %195 : vector<16x16xf32> to vector<1x16x16xf32>
    %200 = vector.shape_cast %196 : vector<16x16xf32> to vector<1x16x16xf32>
    %201 = tpu.concatenate %197, %198, %199, %200 in 0 : vector<1x16x16xf32>, vector<1x16x16xf32>, vector<1x16x16xf32>, vector<1x16x16xf32> -> vector<4x16x16xf32>
    %202 = vector.extract_strided_slice %181 {offsets = [0, 128], sizes = [16, 64], strides = [1, 1]} : vector<16x192xf32> to vector<16x64xf32>
    %203 = vector.extract_strided_slice %202 {offsets = [0, 0], sizes = [16, 16], strides = [1, 1]} : vector<16x64xf32> to vector<16x16xf32>
    %204 = vector.extract_strided_slice %202 {offsets = [0, 16], sizes = [16, 16], strides = [1, 1]} : vector<16x64xf32> to vector<16x16xf32>
    %205 = vector.extract_strided_slice %202 {offsets = [0, 32], sizes = [16, 16], strides = [1, 1]} : vector<16x64xf32> to vector<16x16xf32>
    %206 = vector.extract_strided_slice %202 {offsets = [0, 48], sizes = [16, 16], strides = [1, 1]} : vector<16x64xf32> to vector<16x16xf32>
    %207 = vector.shape_cast %203 : vector<16x16xf32> to vector<1x16x16xf32>
    %208 = vector.shape_cast %204 : vector<16x16xf32> to vector<1x16x16xf32>
    %209 = vector.shape_cast %205 : vector<16x16xf32> to vector<1x16x16xf32>
    %210 = vector.shape_cast %206 : vector<16x16xf32> to vector<1x16x16xf32>
    %211 = tpu.concatenate %207, %208, %209, %210 in 0 : vector<1x16x16xf32>, vector<1x16x16xf32>, vector<1x16x16xf32>, vector<1x16x16xf32> -> vector<4x16x16xf32>
    "tpu.trace_start"() <{level = 10 : i32, message = "hqd,hkd->hqk"}> : () -> ()
    %cst_76 = arith.constant dense<0.000000e+00> : vector<4x16x16xf32>
    %212 = tpu.matmul %191, %201, %cst_76 {dimension_numbers = #tpu.dot_dimension_numbers<[2], [2], [1], [1], [0, 0, 0, 1, 1, 1], [0], [0]>} : vector<4x16x16xf32>, vector<4x16x16xf32>, vector<4x16x16xf32> -> vector<4x16x16xf32>
    "tpu.trace_stop"() : () -> ()
    %cst_77 = arith.constant 2.500000e-01 : f32
    %213 = vector.broadcast %cst_77 : f32 to vector<4x16x16xf32>
    %214 = arith.mulf %212, %213 : vector<4x16x16xf32>
    %215 = vector.broadcast %25 : vector<1x1x16xf32> to vector<4x16x16xf32>
    %216 = arith.addf %214, %215 : vector<4x16x16xf32>
    %cst_78 = arith.constant dense<0xFF800000> : vector<4x16xf32>
    %217 = vector.multi_reduction <maximumf>, %216, %cst_78 [2] : vector<4x16x16xf32> to vector<4x16xf32>
    %218 = vector.shape_cast %217 : vector<4x16xf32> to vector<4x16x1xf32>
    %219 = vector.broadcast %218 : vector<4x16x1xf32> to vector<4x16x16xf32>
    %220 = arith.subf %216, %219 : vector<4x16x16xf32>
    %221 = math.exp %220 : vector<4x16x16xf32>
    %cst_79 = arith.constant dense<0.000000e+00> : vector<4x16xf32>
    %222 = vector.multi_reduction <add>, %221, %cst_79 [2] : vector<4x16x16xf32> to vector<4x16xf32>
    %223 = vector.shape_cast %222 : vector<4x16xf32> to vector<4x16x1xf32>
    %224 = vector.broadcast %223 : vector<4x16x1xf32> to vector<4x16x16xf32>
    %225 = arith.divf %221, %224 : vector<4x16x16xf32>
    "tpu.trace_start"() <{level = 10 : i32, message = "hqk,hkd->hqd"}> : () -> ()
    %cst_80 = arith.constant dense<0.000000e+00> : vector<4x16x16xf32>
    %226 = tpu.matmul %225, %211, %cst_80 {dimension_numbers = #tpu.dot_dimension_numbers<[2], [1], [1], [2], [0, 0, 0, 1, 1, 2], [0], [0]>} : vector<4x16x16xf32>, vector<4x16x16xf32>, vector<4x16x16xf32> -> vector<4x16x16xf32>
    "tpu.trace_stop"() : () -> ()
    %227 = vector.extract_strided_slice %226 {offsets = [0, 0, 0], sizes = [1, 16, 16], strides = [1, 1, 1]} : vector<4x16x16xf32> to vector<1x16x16xf32>
    %228 = vector.shape_cast %227 : vector<1x16x16xf32> to vector<16x16xf32>
    %229 = vector.extract_strided_slice %226 {offsets = [1, 0, 0], sizes = [1, 16, 16], strides = [1, 1, 1]} : vector<4x16x16xf32> to vector<1x16x16xf32>
    %230 = vector.shape_cast %229 : vector<1x16x16xf32> to vector<16x16xf32>
    %231 = vector.extract_strided_slice %226 {offsets = [2, 0, 0], sizes = [1, 16, 16], strides = [1, 1, 1]} : vector<4x16x16xf32> to vector<1x16x16xf32>
    %232 = vector.shape_cast %231 : vector<1x16x16xf32> to vector<16x16xf32>
    %233 = vector.extract_strided_slice %226 {offsets = [3, 0, 0], sizes = [1, 16, 16], strides = [1, 1, 1]} : vector<4x16x16xf32> to vector<1x16x16xf32>
    %234 = vector.shape_cast %233 : vector<1x16x16xf32> to vector<16x16xf32>
    %235 = tpu.concatenate %228, %230, %232, %234 in 1 : vector<16x16xf32>, vector<16x16xf32>, vector<16x16xf32>, vector<16x16xf32> -> vector<16x64xf32>
    %236 = arith.truncf %235 : vector<16x64xf32> to vector<16x64xbf16>
    %c1_81 = arith.constant 1 : index
    %c0_82 = arith.constant 0 : index
    %c0_83 = arith.constant 0 : index
    %237 = vector.load %arg7[%c1_81, %c0_82, %c0_83] : memref<6x64x64xbf16, #tpu.memory_space<vmem>>, vector<1x64x64xbf16>
    %238 = vector.shape_cast %237 : vector<1x64x64xbf16> to vector<64x64xbf16>
    %cst_84 = arith.constant dense<0.000000e+00> : vector<16x64xf32>
    %239 = tpu.matmul %236, %238, %cst_84 {dimension_numbers = #tpu.dot_dimension_numbers<[1], [0], [0], [1], [0, 0, 1, 1], [], []>} : vector<16x64xbf16>, vector<64x64xbf16>, vector<16x64xf32> -> vector<16x64xf32>
    %c1_85 = arith.constant 1 : index
    %c0_86 = arith.constant 0 : index
    %c0_87 = arith.constant 0 : index
    %240 = vector.load %arg8[%c1_85, %c0_86, %c0_87] : memref<6x1x64xf32, #tpu.memory_space<vmem>>, vector<1x1x64xf32>
    %241 = vector.shape_cast %240 : vector<1x1x64xf32> to vector<1x64xf32>
    %242 = vector.broadcast %241 : vector<1x64xf32> to vector<16x64xf32>
    %243 = arith.addf %239, %242 : vector<16x64xf32>
    %244 = arith.addf %243, %173 : vector<16x64xf32>
    %c1_88 = arith.constant 1 : index
    %c0_89 = arith.constant 0 : index
    %c0_90 = arith.constant 0 : index
    %245 = vector.load %arg9[%c1_88, %c0_89, %c0_90] : memref<6x1x64xf32, #tpu.memory_space<vmem>>, vector<1x1x64xf32>
    %246 = vector.shape_cast %245 : vector<1x1x64xf32> to vector<1x64xf32>
    %c1_91 = arith.constant 1 : index
    %c0_92 = arith.constant 0 : index
    %c0_93 = arith.constant 0 : index
    %247 = vector.load %arg10[%c1_91, %c0_92, %c0_93] : memref<6x1x64xf32, #tpu.memory_space<vmem>>, vector<1x1x64xf32>
    %248 = vector.shape_cast %247 : vector<1x1x64xf32> to vector<1x64xf32>
    %cst_94 = arith.constant dense<0.000000e+00> : vector<16xf32>
    %249 = vector.multi_reduction <add>, %244, %cst_94 [1] : vector<16x64xf32> to vector<16xf32>
    %250 = vector.shape_cast %249 : vector<16xf32> to vector<16x1xf32>
    %cst_95 = arith.constant 6.400000e+01 : f32
    %251 = vector.broadcast %cst_95 : f32 to vector<16x1xf32>
    %252 = arith.divf %250, %251 : vector<16x1xf32>
    %253 = vector.broadcast %252 : vector<16x1xf32> to vector<16x64xf32>
    %254 = arith.subf %244, %253 : vector<16x64xf32>
    %255 = arith.mulf %254, %254 : vector<16x64xf32>
    %cst_96 = arith.constant dense<0.000000e+00> : vector<16xf32>
    %256 = vector.multi_reduction <add>, %255, %cst_96 [1] : vector<16x64xf32> to vector<16xf32>
    %257 = vector.shape_cast %256 : vector<16xf32> to vector<16x1xf32>
    %cst_97 = arith.constant 6.400000e+01 : f32
    %258 = vector.broadcast %cst_97 : f32 to vector<16x1xf32>
    %259 = arith.divf %257, %258 : vector<16x1xf32>
    %260 = vector.broadcast %252 : vector<16x1xf32> to vector<16x64xf32>
    %261 = arith.subf %244, %260 : vector<16x64xf32>
    %cst_98 = arith.constant 9.99999996E-13 : f32
    %262 = vector.broadcast %cst_98 : f32 to vector<16x1xf32>
    %263 = arith.addf %259, %262 : vector<16x1xf32>
    %264 = math.rsqrt %263 : vector<16x1xf32>
    %265 = vector.broadcast %264 : vector<16x1xf32> to vector<16x64xf32>
    %266 = arith.mulf %261, %265 : vector<16x64xf32>
    %267 = vector.broadcast %246 : vector<1x64xf32> to vector<16x64xf32>
    %268 = arith.mulf %266, %267 : vector<16x64xf32>
    %269 = vector.broadcast %248 : vector<1x64xf32> to vector<16x64xf32>
    %270 = arith.addf %268, %269 : vector<16x64xf32>
    %271 = arith.truncf %270 : vector<16x64xf32> to vector<16x64xbf16>
    %c1_99 = arith.constant 1 : index
    %c0_100 = arith.constant 0 : index
    %c0_101 = arith.constant 0 : index
    %272 = vector.load %arg11[%c1_99, %c0_100, %c0_101] : memref<6x64x256xbf16, #tpu.memory_space<vmem>>, vector<1x64x256xbf16>
    %273 = vector.shape_cast %272 : vector<1x64x256xbf16> to vector<64x256xbf16>
    %cst_102 = arith.constant dense<0.000000e+00> : vector<16x256xf32>
    %274 = tpu.matmul %271, %273, %cst_102 {dimension_numbers = #tpu.dot_dimension_numbers<[1], [0], [0], [1], [0, 0, 1, 1], [], []>} : vector<16x64xbf16>, vector<64x256xbf16>, vector<16x256xf32> -> vector<16x256xf32>
    %c1_103 = arith.constant 1 : index
    %c0_104 = arith.constant 0 : index
    %c0_105 = arith.constant 0 : index
    %275 = vector.load %arg12[%c1_103, %c0_104, %c0_105] : memref<6x1x256xf32, #tpu.memory_space<vmem>>, vector<1x1x256xf32>
    %276 = vector.shape_cast %275 : vector<1x1x256xf32> to vector<1x256xf32>
    %277 = vector.broadcast %276 : vector<1x256xf32> to vector<16x256xf32>
    %278 = arith.addf %274, %277 : vector<16x256xf32>
    %cst_106 = arith.constant 5.000000e-01 : f32
    %279 = vector.broadcast %cst_106 : f32 to vector<16x256xf32>
    %280 = arith.mulf %279, %278 : vector<16x256xf32>
    %cst_107 = arith.constant 0.707106769 : f32
    %281 = vector.broadcast %cst_107 : f32 to vector<16x256xf32>
    %282 = arith.mulf %278, %281 : vector<16x256xf32>
    %283 = math.erf %282 : vector<16x256xf32>
    %cst_108 = arith.constant 1.000000e+00 : f32
    %284 = vector.broadcast %cst_108 : f32 to vector<16x256xf32>
    %285 = arith.addf %284, %283 : vector<16x256xf32>
    %286 = arith.mulf %280, %285 : vector<16x256xf32>
    %287 = arith.truncf %286 : vector<16x256xf32> to vector<16x256xbf16>
    %c1_109 = arith.constant 1 : index
    %c0_110 = arith.constant 0 : index
    %c0_111 = arith.constant 0 : index
    %288 = vector.load %arg13[%c1_109, %c0_110, %c0_111] : memref<6x256x64xbf16, #tpu.memory_space<vmem>>, vector<1x256x64xbf16>
    %289 = vector.shape_cast %288 : vector<1x256x64xbf16> to vector<256x64xbf16>
    %cst_112 = arith.constant dense<0.000000e+00> : vector<16x64xf32>
    %290 = tpu.matmul %287, %289, %cst_112 {dimension_numbers = #tpu.dot_dimension_numbers<[1], [0], [0], [1], [0, 0, 1, 1], [], []>} : vector<16x256xbf16>, vector<256x64xbf16>, vector<16x64xf32> -> vector<16x64xf32>
    %c1_113 = arith.constant 1 : index
    %c0_114 = arith.constant 0 : index
    %c0_115 = arith.constant 0 : index
    %291 = vector.load %arg14[%c1_113, %c0_114, %c0_115] : memref<6x1x64xf32, #tpu.memory_space<vmem>>, vector<1x1x64xf32>
    %292 = vector.shape_cast %291 : vector<1x1x64xf32> to vector<1x64xf32>
    %293 = vector.broadcast %292 : vector<1x64xf32> to vector<16x64xf32>
    %294 = arith.addf %290, %293 : vector<16x64xf32>
    %295 = arith.addf %294, %270 : vector<16x64xf32>
    %c1_116 = arith.constant 1 : index
    %c0_117 = arith.constant 0 : index
    %c0_118 = arith.constant 0 : index
    %296 = vector.load %arg15[%c1_116, %c0_117, %c0_118] : memref<6x1x64xf32, #tpu.memory_space<vmem>>, vector<1x1x64xf32>
    %297 = vector.shape_cast %296 : vector<1x1x64xf32> to vector<1x64xf32>
    %c1_119 = arith.constant 1 : index
    %c0_120 = arith.constant 0 : index
    %c0_121 = arith.constant 0 : index
    %298 = vector.load %arg16[%c1_119, %c0_120, %c0_121] : memref<6x1x64xf32, #tpu.memory_space<vmem>>, vector<1x1x64xf32>
    %299 = vector.shape_cast %298 : vector<1x1x64xf32> to vector<1x64xf32>
    %cst_122 = arith.constant dense<0.000000e+00> : vector<16xf32>
    %300 = vector.multi_reduction <add>, %295, %cst_122 [1] : vector<16x64xf32> to vector<16xf32>
    %301 = vector.shape_cast %300 : vector<16xf32> to vector<16x1xf32>
    %cst_123 = arith.constant 6.400000e+01 : f32
    %302 = vector.broadcast %cst_123 : f32 to vector<16x1xf32>
    %303 = arith.divf %301, %302 : vector<16x1xf32>
    %304 = vector.broadcast %303 : vector<16x1xf32> to vector<16x64xf32>
    %305 = arith.subf %295, %304 : vector<16x64xf32>
    %306 = arith.mulf %305, %305 : vector<16x64xf32>
    %cst_124 = arith.constant dense<0.000000e+00> : vector<16xf32>
    %307 = vector.multi_reduction <add>, %306, %cst_124 [1] : vector<16x64xf32> to vector<16xf32>
    %308 = vector.shape_cast %307 : vector<16xf32> to vector<16x1xf32>
    %cst_125 = arith.constant 6.400000e+01 : f32
    %309 = vector.broadcast %cst_125 : f32 to vector<16x1xf32>
    %310 = arith.divf %308, %309 : vector<16x1xf32>
    %311 = vector.broadcast %303 : vector<16x1xf32> to vector<16x64xf32>
    %312 = arith.subf %295, %311 : vector<16x64xf32>
    %cst_126 = arith.constant 9.99999996E-13 : f32
    %313 = vector.broadcast %cst_126 : f32 to vector<16x1xf32>
    %314 = arith.addf %310, %313 : vector<16x1xf32>
    %315 = math.rsqrt %314 : vector<16x1xf32>
    %316 = vector.broadcast %315 : vector<16x1xf32> to vector<16x64xf32>
    %317 = arith.mulf %312, %316 : vector<16x64xf32>
    %318 = vector.broadcast %297 : vector<1x64xf32> to vector<16x64xf32>
    %319 = arith.mulf %317, %318 : vector<16x64xf32>
    %320 = vector.broadcast %299 : vector<1x64xf32> to vector<16x64xf32>
    %321 = arith.addf %319, %320 : vector<16x64xf32>
    %322 = arith.truncf %321 : vector<16x64xf32> to vector<16x64xbf16>
    %c2 = arith.constant 2 : index
    %c0_127 = arith.constant 0 : index
    %c0_128 = arith.constant 0 : index
    %323 = vector.load %arg5[%c2, %c0_127, %c0_128] : memref<6x64x192xbf16, #tpu.memory_space<vmem>>, vector<1x64x192xbf16>
    %324 = vector.shape_cast %323 : vector<1x64x192xbf16> to vector<64x192xbf16>
    %cst_129 = arith.constant dense<0.000000e+00> : vector<16x192xf32>
    %325 = tpu.matmul %322, %324, %cst_129 {dimension_numbers = #tpu.dot_dimension_numbers<[1], [0], [0], [1], [0, 0, 1, 1], [], []>} : vector<16x64xbf16>, vector<64x192xbf16>, vector<16x192xf32> -> vector<16x192xf32>
    %c2_130 = arith.constant 2 : index
    %c0_131 = arith.constant 0 : index
    %c0_132 = arith.constant 0 : index
    %326 = vector.load %arg6[%c2_130, %c0_131, %c0_132] : memref<6x1x192xf32, #tpu.memory_space<vmem>>, vector<1x1x192xf32>
    %327 = vector.shape_cast %326 : vector<1x1x192xf32> to vector<1x192xf32>
    %328 = vector.broadcast %327 : vector<1x192xf32> to vector<16x192xf32>
    %329 = arith.addf %325, %328 : vector<16x192xf32>
    %330 = vector.extract_strided_slice %329 {offsets = [0, 0], sizes = [16, 64], strides = [1, 1]} : vector<16x192xf32> to vector<16x64xf32>
    %331 = vector.extract_strided_slice %330 {offsets = [0, 0], sizes = [16, 16], strides = [1, 1]} : vector<16x64xf32> to vector<16x16xf32>
    %332 = vector.extract_strided_slice %330 {offsets = [0, 16], sizes = [16, 16], strides = [1, 1]} : vector<16x64xf32> to vector<16x16xf32>
    %333 = vector.extract_strided_slice %330 {offsets = [0, 32], sizes = [16, 16], strides = [1, 1]} : vector<16x64xf32> to vector<16x16xf32>
    %334 = vector.extract_strided_slice %330 {offsets = [0, 48], sizes = [16, 16], strides = [1, 1]} : vector<16x64xf32> to vector<16x16xf32>
    %335 = vector.shape_cast %331 : vector<16x16xf32> to vector<1x16x16xf32>
    %336 = vector.shape_cast %332 : vector<16x16xf32> to vector<1x16x16xf32>
    %337 = vector.shape_cast %333 : vector<16x16xf32> to vector<1x16x16xf32>
    %338 = vector.shape_cast %334 : vector<16x16xf32> to vector<1x16x16xf32>
    %339 = tpu.concatenate %335, %336, %337, %338 in 0 : vector<1x16x16xf32>, vector<1x16x16xf32>, vector<1x16x16xf32>, vector<1x16x16xf32> -> vector<4x16x16xf32>
    %340 = vector.extract_strided_slice %329 {offsets = [0, 64], sizes = [16, 64], strides = [1, 1]} : vector<16x192xf32> to vector<16x64xf32>
    %341 = vector.extract_strided_slice %340 {offsets = [0, 0], sizes = [16, 16], strides = [1, 1]} : vector<16x64xf32> to vector<16x16xf32>
    %342 = vector.extract_strided_slice %340 {offsets = [0, 16], sizes = [16, 16], strides = [1, 1]} : vector<16x64xf32> to vector<16x16xf32>
    %343 = vector.extract_strided_slice %340 {offsets = [0, 32], sizes = [16, 16], strides = [1, 1]} : vector<16x64xf32> to vector<16x16xf32>
    %344 = vector.extract_strided_slice %340 {offsets = [0, 48], sizes = [16, 16], strides = [1, 1]} : vector<16x64xf32> to vector<16x16xf32>
    %345 = vector.shape_cast %341 : vector<16x16xf32> to vector<1x16x16xf32>
    %346 = vector.shape_cast %342 : vector<16x16xf32> to vector<1x16x16xf32>
    %347 = vector.shape_cast %343 : vector<16x16xf32> to vector<1x16x16xf32>
    %348 = vector.shape_cast %344 : vector<16x16xf32> to vector<1x16x16xf32>
    %349 = tpu.concatenate %345, %346, %347, %348 in 0 : vector<1x16x16xf32>, vector<1x16x16xf32>, vector<1x16x16xf32>, vector<1x16x16xf32> -> vector<4x16x16xf32>
    %350 = vector.extract_strided_slice %329 {offsets = [0, 128], sizes = [16, 64], strides = [1, 1]} : vector<16x192xf32> to vector<16x64xf32>
    %351 = vector.extract_strided_slice %350 {offsets = [0, 0], sizes = [16, 16], strides = [1, 1]} : vector<16x64xf32> to vector<16x16xf32>
    %352 = vector.extract_strided_slice %350 {offsets = [0, 16], sizes = [16, 16], strides = [1, 1]} : vector<16x64xf32> to vector<16x16xf32>
    %353 = vector.extract_strided_slice %350 {offsets = [0, 32], sizes = [16, 16], strides = [1, 1]} : vector<16x64xf32> to vector<16x16xf32>
    %354 = vector.extract_strided_slice %350 {offsets = [0, 48], sizes = [16, 16], strides = [1, 1]} : vector<16x64xf32> to vector<16x16xf32>
    %355 = vector.shape_cast %351 : vector<16x16xf32> to vector<1x16x16xf32>
    %356 = vector.shape_cast %352 : vector<16x16xf32> to vector<1x16x16xf32>
    %357 = vector.shape_cast %353 : vector<16x16xf32> to vector<1x16x16xf32>
    %358 = vector.shape_cast %354 : vector<16x16xf32> to vector<1x16x16xf32>
    %359 = tpu.concatenate %355, %356, %357, %358 in 0 : vector<1x16x16xf32>, vector<1x16x16xf32>, vector<1x16x16xf32>, vector<1x16x16xf32> -> vector<4x16x16xf32>
    "tpu.trace_start"() <{level = 10 : i32, message = "hqd,hkd->hqk"}> : () -> ()
    %cst_133 = arith.constant dense<0.000000e+00> : vector<4x16x16xf32>
    %360 = tpu.matmul %339, %349, %cst_133 {dimension_numbers = #tpu.dot_dimension_numbers<[2], [2], [1], [1], [0, 0, 0, 1, 1, 1], [0], [0]>} : vector<4x16x16xf32>, vector<4x16x16xf32>, vector<4x16x16xf32> -> vector<4x16x16xf32>
    "tpu.trace_stop"() : () -> ()
    %cst_134 = arith.constant 2.500000e-01 : f32
    %361 = vector.broadcast %cst_134 : f32 to vector<4x16x16xf32>
    %362 = arith.mulf %360, %361 : vector<4x16x16xf32>
    %363 = vector.broadcast %25 : vector<1x1x16xf32> to vector<4x16x16xf32>
    %364 = arith.addf %362, %363 : vector<4x16x16xf32>
    %cst_135 = arith.constant dense<0xFF800000> : vector<4x16xf32>
    %365 = vector.multi_reduction <maximumf>, %364, %cst_135 [2] : vector<4x16x16xf32> to vector<4x16xf32>
    %366 = vector.shape_cast %365 : vector<4x16xf32> to vector<4x16x1xf32>
    %367 = vector.broadcast %366 : vector<4x16x1xf32> to vector<4x16x16xf32>
    %368 = arith.subf %364, %367 : vector<4x16x16xf32>
    %369 = math.exp %368 : vector<4x16x16xf32>
    %cst_136 = arith.constant dense<0.000000e+00> : vector<4x16xf32>
    %370 = vector.multi_reduction <add>, %369, %cst_136 [2] : vector<4x16x16xf32> to vector<4x16xf32>
    %371 = vector.shape_cast %370 : vector<4x16xf32> to vector<4x16x1xf32>
    %372 = vector.broadcast %371 : vector<4x16x1xf32> to vector<4x16x16xf32>
    %373 = arith.divf %369, %372 : vector<4x16x16xf32>
    "tpu.trace_start"() <{level = 10 : i32, message = "hqk,hkd->hqd"}> : () -> ()
    %cst_137 = arith.constant dense<0.000000e+00> : vector<4x16x16xf32>
    %374 = tpu.matmul %373, %359, %cst_137 {dimension_numbers = #tpu.dot_dimension_numbers<[2], [1], [1], [2], [0, 0, 0, 1, 1, 2], [0], [0]>} : vector<4x16x16xf32>, vector<4x16x16xf32>, vector<4x16x16xf32> -> vector<4x16x16xf32>
    "tpu.trace_stop"() : () -> ()
    %375 = vector.extract_strided_slice %374 {offsets = [0, 0, 0], sizes = [1, 16, 16], strides = [1, 1, 1]} : vector<4x16x16xf32> to vector<1x16x16xf32>
    %376 = vector.shape_cast %375 : vector<1x16x16xf32> to vector<16x16xf32>
    %377 = vector.extract_strided_slice %374 {offsets = [1, 0, 0], sizes = [1, 16, 16], strides = [1, 1, 1]} : vector<4x16x16xf32> to vector<1x16x16xf32>
    %378 = vector.shape_cast %377 : vector<1x16x16xf32> to vector<16x16xf32>
    %379 = vector.extract_strided_slice %374 {offsets = [2, 0, 0], sizes = [1, 16, 16], strides = [1, 1, 1]} : vector<4x16x16xf32> to vector<1x16x16xf32>
    %380 = vector.shape_cast %379 : vector<1x16x16xf32> to vector<16x16xf32>
    %381 = vector.extract_strided_slice %374 {offsets = [3, 0, 0], sizes = [1, 16, 16], strides = [1, 1, 1]} : vector<4x16x16xf32> to vector<1x16x16xf32>
    %382 = vector.shape_cast %381 : vector<1x16x16xf32> to vector<16x16xf32>
    %383 = tpu.concatenate %376, %378, %380, %382 in 1 : vector<16x16xf32>, vector<16x16xf32>, vector<16x16xf32>, vector<16x16xf32> -> vector<16x64xf32>
    %384 = arith.truncf %383 : vector<16x64xf32> to vector<16x64xbf16>
    %c2_138 = arith.constant 2 : index
    %c0_139 = arith.constant 0 : index
    %c0_140 = arith.constant 0 : index
    %385 = vector.load %arg7[%c2_138, %c0_139, %c0_140] : memref<6x64x64xbf16, #tpu.memory_space<vmem>>, vector<1x64x64xbf16>
    %386 = vector.shape_cast %385 : vector<1x64x64xbf16> to vector<64x64xbf16>
    %cst_141 = arith.constant dense<0.000000e+00> : vector<16x64xf32>
    %387 = tpu.matmul %384, %386, %cst_141 {dimension_numbers = #tpu.dot_dimension_numbers<[1], [0], [0], [1], [0, 0, 1, 1], [], []>} : vector<16x64xbf16>, vector<64x64xbf16>, vector<16x64xf32> -> vector<16x64xf32>
    %c2_142 = arith.constant 2 : index
    %c0_143 = arith.constant 0 : index
    %c0_144 = arith.constant 0 : index
    %388 = vector.load %arg8[%c2_142, %c0_143, %c0_144] : memref<6x1x64xf32, #tpu.memory_space<vmem>>, vector<1x1x64xf32>
    %389 = vector.shape_cast %388 : vector<1x1x64xf32> to vector<1x64xf32>
    %390 = vector.broadcast %389 : vector<1x64xf32> to vector<16x64xf32>
    %391 = arith.addf %387, %390 : vector<16x64xf32>
    %392 = arith.addf %391, %321 : vector<16x64xf32>
    %c2_145 = arith.constant 2 : index
    %c0_146 = arith.constant 0 : index
    %c0_147 = arith.constant 0 : index
    %393 = vector.load %arg9[%c2_145, %c0_146, %c0_147] : memref<6x1x64xf32, #tpu.memory_space<vmem>>, vector<1x1x64xf32>
    %394 = vector.shape_cast %393 : vector<1x1x64xf32> to vector<1x64xf32>
    %c2_148 = arith.constant 2 : index
    %c0_149 = arith.constant 0 : index
    %c0_150 = arith.constant 0 : index
    %395 = vector.load %arg10[%c2_148, %c0_149, %c0_150] : memref<6x1x64xf32, #tpu.memory_space<vmem>>, vector<1x1x64xf32>
    %396 = vector.shape_cast %395 : vector<1x1x64xf32> to vector<1x64xf32>
    %cst_151 = arith.constant dense<0.000000e+00> : vector<16xf32>
    %397 = vector.multi_reduction <add>, %392, %cst_151 [1] : vector<16x64xf32> to vector<16xf32>
    %398 = vector.shape_cast %397 : vector<16xf32> to vector<16x1xf32>
    %cst_152 = arith.constant 6.400000e+01 : f32
    %399 = vector.broadcast %cst_152 : f32 to vector<16x1xf32>
    %400 = arith.divf %398, %399 : vector<16x1xf32>
    %401 = vector.broadcast %400 : vector<16x1xf32> to vector<16x64xf32>
    %402 = arith.subf %392, %401 : vector<16x64xf32>
    %403 = arith.mulf %402, %402 : vector<16x64xf32>
    %cst_153 = arith.constant dense<0.000000e+00> : vector<16xf32>
    %404 = vector.multi_reduction <add>, %403, %cst_153 [1] : vector<16x64xf32> to vector<16xf32>
    %405 = vector.shape_cast %404 : vector<16xf32> to vector<16x1xf32>
    %cst_154 = arith.constant 6.400000e+01 : f32
    %406 = vector.broadcast %cst_154 : f32 to vector<16x1xf32>
    %407 = arith.divf %405, %406 : vector<16x1xf32>
    %408 = vector.broadcast %400 : vector<16x1xf32> to vector<16x64xf32>
    %409 = arith.subf %392, %408 : vector<16x64xf32>
    %cst_155 = arith.constant 9.99999996E-13 : f32
    %410 = vector.broadcast %cst_155 : f32 to vector<16x1xf32>
    %411 = arith.addf %407, %410 : vector<16x1xf32>
    %412 = math.rsqrt %411 : vector<16x1xf32>
    %413 = vector.broadcast %412 : vector<16x1xf32> to vector<16x64xf32>
    %414 = arith.mulf %409, %413 : vector<16x64xf32>
    %415 = vector.broadcast %394 : vector<1x64xf32> to vector<16x64xf32>
    %416 = arith.mulf %414, %415 : vector<16x64xf32>
    %417 = vector.broadcast %396 : vector<1x64xf32> to vector<16x64xf32>
    %418 = arith.addf %416, %417 : vector<16x64xf32>
    %419 = arith.truncf %418 : vector<16x64xf32> to vector<16x64xbf16>
    %c2_156 = arith.constant 2 : index
    %c0_157 = arith.constant 0 : index
    %c0_158 = arith.constant 0 : index
    %420 = vector.load %arg11[%c2_156, %c0_157, %c0_158] : memref<6x64x256xbf16, #tpu.memory_space<vmem>>, vector<1x64x256xbf16>
    %421 = vector.shape_cast %420 : vector<1x64x256xbf16> to vector<64x256xbf16>
    %cst_159 = arith.constant dense<0.000000e+00> : vector<16x256xf32>
    %422 = tpu.matmul %419, %421, %cst_159 {dimension_numbers = #tpu.dot_dimension_numbers<[1], [0], [0], [1], [0, 0, 1, 1], [], []>} : vector<16x64xbf16>, vector<64x256xbf16>, vector<16x256xf32> -> vector<16x256xf32>
    %c2_160 = arith.constant 2 : index
    %c0_161 = arith.constant 0 : index
    %c0_162 = arith.constant 0 : index
    %423 = vector.load %arg12[%c2_160, %c0_161, %c0_162] : memref<6x1x256xf32, #tpu.memory_space<vmem>>, vector<1x1x256xf32>
    %424 = vector.shape_cast %423 : vector<1x1x256xf32> to vector<1x256xf32>
    %425 = vector.broadcast %424 : vector<1x256xf32> to vector<16x256xf32>
    %426 = arith.addf %422, %425 : vector<16x256xf32>
    %cst_163 = arith.constant 5.000000e-01 : f32
    %427 = vector.broadcast %cst_163 : f32 to vector<16x256xf32>
    %428 = arith.mulf %427, %426 : vector<16x256xf32>
    %cst_164 = arith.constant 0.707106769 : f32
    %429 = vector.broadcast %cst_164 : f32 to vector<16x256xf32>
    %430 = arith.mulf %426, %429 : vector<16x256xf32>
    %431 = math.erf %430 : vector<16x256xf32>
    %cst_165 = arith.constant 1.000000e+00 : f32
    %432 = vector.broadcast %cst_165 : f32 to vector<16x256xf32>
    %433 = arith.addf %432, %431 : vector<16x256xf32>
    %434 = arith.mulf %428, %433 : vector<16x256xf32>
    %435 = arith.truncf %434 : vector<16x256xf32> to vector<16x256xbf16>
    %c2_166 = arith.constant 2 : index
    %c0_167 = arith.constant 0 : index
    %c0_168 = arith.constant 0 : index
    %436 = vector.load %arg13[%c2_166, %c0_167, %c0_168] : memref<6x256x64xbf16, #tpu.memory_space<vmem>>, vector<1x256x64xbf16>
    %437 = vector.shape_cast %436 : vector<1x256x64xbf16> to vector<256x64xbf16>
    %cst_169 = arith.constant dense<0.000000e+00> : vector<16x64xf32>
    %438 = tpu.matmul %435, %437, %cst_169 {dimension_numbers = #tpu.dot_dimension_numbers<[1], [0], [0], [1], [0, 0, 1, 1], [], []>} : vector<16x256xbf16>, vector<256x64xbf16>, vector<16x64xf32> -> vector<16x64xf32>
    %c2_170 = arith.constant 2 : index
    %c0_171 = arith.constant 0 : index
    %c0_172 = arith.constant 0 : index
    %439 = vector.load %arg14[%c2_170, %c0_171, %c0_172] : memref<6x1x64xf32, #tpu.memory_space<vmem>>, vector<1x1x64xf32>
    %440 = vector.shape_cast %439 : vector<1x1x64xf32> to vector<1x64xf32>
    %441 = vector.broadcast %440 : vector<1x64xf32> to vector<16x64xf32>
    %442 = arith.addf %438, %441 : vector<16x64xf32>
    %443 = arith.addf %442, %418 : vector<16x64xf32>
    %c2_173 = arith.constant 2 : index
    %c0_174 = arith.constant 0 : index
    %c0_175 = arith.constant 0 : index
    %444 = vector.load %arg15[%c2_173, %c0_174, %c0_175] : memref<6x1x64xf32, #tpu.memory_space<vmem>>, vector<1x1x64xf32>
    %445 = vector.shape_cast %444 : vector<1x1x64xf32> to vector<1x64xf32>
    %c2_176 = arith.constant 2 : index
    %c0_177 = arith.constant 0 : index
    %c0_178 = arith.constant 0 : index
    %446 = vector.load %arg16[%c2_176, %c0_177, %c0_178] : memref<6x1x64xf32, #tpu.memory_space<vmem>>, vector<1x1x64xf32>
    %447 = vector.shape_cast %446 : vector<1x1x64xf32> to vector<1x64xf32>
    %cst_179 = arith.constant dense<0.000000e+00> : vector<16xf32>
    %448 = vector.multi_reduction <add>, %443, %cst_179 [1] : vector<16x64xf32> to vector<16xf32>
    %449 = vector.shape_cast %448 : vector<16xf32> to vector<16x1xf32>
    %cst_180 = arith.constant 6.400000e+01 : f32
    %450 = vector.broadcast %cst_180 : f32 to vector<16x1xf32>
    %451 = arith.divf %449, %450 : vector<16x1xf32>
    %452 = vector.broadcast %451 : vector<16x1xf32> to vector<16x64xf32>
    %453 = arith.subf %443, %452 : vector<16x64xf32>
    %454 = arith.mulf %453, %453 : vector<16x64xf32>
    %cst_181 = arith.constant dense<0.000000e+00> : vector<16xf32>
    %455 = vector.multi_reduction <add>, %454, %cst_181 [1] : vector<16x64xf32> to vector<16xf32>
    %456 = vector.shape_cast %455 : vector<16xf32> to vector<16x1xf32>
    %cst_182 = arith.constant 6.400000e+01 : f32
    %457 = vector.broadcast %cst_182 : f32 to vector<16x1xf32>
    %458 = arith.divf %456, %457 : vector<16x1xf32>
    %459 = vector.broadcast %451 : vector<16x1xf32> to vector<16x64xf32>
    %460 = arith.subf %443, %459 : vector<16x64xf32>
    %cst_183 = arith.constant 9.99999996E-13 : f32
    %461 = vector.broadcast %cst_183 : f32 to vector<16x1xf32>
    %462 = arith.addf %458, %461 : vector<16x1xf32>
    %463 = math.rsqrt %462 : vector<16x1xf32>
    %464 = vector.broadcast %463 : vector<16x1xf32> to vector<16x64xf32>
    %465 = arith.mulf %460, %464 : vector<16x64xf32>
    %466 = vector.broadcast %445 : vector<1x64xf32> to vector<16x64xf32>
    %467 = arith.mulf %465, %466 : vector<16x64xf32>
    %468 = vector.broadcast %447 : vector<1x64xf32> to vector<16x64xf32>
    %469 = arith.addf %467, %468 : vector<16x64xf32>
    %470 = arith.truncf %469 : vector<16x64xf32> to vector<16x64xbf16>
    %c3 = arith.constant 3 : index
    %c0_184 = arith.constant 0 : index
    %c0_185 = arith.constant 0 : index
    %471 = vector.load %arg5[%c3, %c0_184, %c0_185] : memref<6x64x192xbf16, #tpu.memory_space<vmem>>, vector<1x64x192xbf16>
    %472 = vector.shape_cast %471 : vector<1x64x192xbf16> to vector<64x192xbf16>
    %cst_186 = arith.constant dense<0.000000e+00> : vector<16x192xf32>
    %473 = tpu.matmul %470, %472, %cst_186 {dimension_numbers = #tpu.dot_dimension_numbers<[1], [0], [0], [1], [0, 0, 1, 1], [], []>} : vector<16x64xbf16>, vector<64x192xbf16>, vector<16x192xf32> -> vector<16x192xf32>
    %c3_187 = arith.constant 3 : index
    %c0_188 = arith.constant 0 : index
    %c0_189 = arith.constant 0 : index
    %474 = vector.load %arg6[%c3_187, %c0_188, %c0_189] : memref<6x1x192xf32, #tpu.memory_space<vmem>>, vector<1x1x192xf32>
    %475 = vector.shape_cast %474 : vector<1x1x192xf32> to vector<1x192xf32>
    %476 = vector.broadcast %475 : vector<1x192xf32> to vector<16x192xf32>
    %477 = arith.addf %473, %476 : vector<16x192xf32>
    %478 = vector.extract_strided_slice %477 {offsets = [0, 0], sizes = [16, 64], strides = [1, 1]} : vector<16x192xf32> to vector<16x64xf32>
    %479 = vector.extract_strided_slice %478 {offsets = [0, 0], sizes = [16, 16], strides = [1, 1]} : vector<16x64xf32> to vector<16x16xf32>
    %480 = vector.extract_strided_slice %478 {offsets = [0, 16], sizes = [16, 16], strides = [1, 1]} : vector<16x64xf32> to vector<16x16xf32>
    %481 = vector.extract_strided_slice %478 {offsets = [0, 32], sizes = [16, 16], strides = [1, 1]} : vector<16x64xf32> to vector<16x16xf32>
    %482 = vector.extract_strided_slice %478 {offsets = [0, 48], sizes = [16, 16], strides = [1, 1]} : vector<16x64xf32> to vector<16x16xf32>
    %483 = vector.shape_cast %479 : vector<16x16xf32> to vector<1x16x16xf32>
    %484 = vector.shape_cast %480 : vector<16x16xf32> to vector<1x16x16xf32>
    %485 = vector.shape_cast %481 : vector<16x16xf32> to vector<1x16x16xf32>
    %486 = vector.shape_cast %482 : vector<16x16xf32> to vector<1x16x16xf32>
    %487 = tpu.concatenate %483, %484, %485, %486 in 0 : vector<1x16x16xf32>, vector<1x16x16xf32>, vector<1x16x16xf32>, vector<1x16x16xf32> -> vector<4x16x16xf32>
    %488 = vector.extract_strided_slice %477 {offsets = [0, 64], sizes = [16, 64], strides = [1, 1]} : vector<16x192xf32> to vector<16x64xf32>
    %489 = vector.extract_strided_slice %488 {offsets = [0, 0], sizes = [16, 16], strides = [1, 1]} : vector<16x64xf32> to vector<16x16xf32>
    %490 = vector.extract_strided_slice %488 {offsets = [0, 16], sizes = [16, 16], strides = [1, 1]} : vector<16x64xf32> to vector<16x16xf32>
    %491 = vector.extract_strided_slice %488 {offsets = [0, 32], sizes = [16, 16], strides = [1, 1]} : vector<16x64xf32> to vector<16x16xf32>
    %492 = vector.extract_strided_slice %488 {offsets = [0, 48], sizes = [16, 16], strides = [1, 1]} : vector<16x64xf32> to vector<16x16xf32>
    %493 = vector.shape_cast %489 : vector<16x16xf32> to vector<1x16x16xf32>
    %494 = vector.shape_cast %490 : vector<16x16xf32> to vector<1x16x16xf32>
    %495 = vector.shape_cast %491 : vector<16x16xf32> to vector<1x16x16xf32>
    %496 = vector.shape_cast %492 : vector<16x16xf32> to vector<1x16x16xf32>
    %497 = tpu.concatenate %493, %494, %495, %496 in 0 : vector<1x16x16xf32>, vector<1x16x16xf32>, vector<1x16x16xf32>, vector<1x16x16xf32> -> vector<4x16x16xf32>
    %498 = vector.extract_strided_slice %477 {offsets = [0, 128], sizes = [16, 64], strides = [1, 1]} : vector<16x192xf32> to vector<16x64xf32>
    %499 = vector.extract_strided_slice %498 {offsets = [0, 0], sizes = [16, 16], strides = [1, 1]} : vector<16x64xf32> to vector<16x16xf32>
    %500 = vector.extract_strided_slice %498 {offsets = [0, 16], sizes = [16, 16], strides = [1, 1]} : vector<16x64xf32> to vector<16x16xf32>
    %501 = vector.extract_strided_slice %498 {offsets = [0, 32], sizes = [16, 16], strides = [1, 1]} : vector<16x64xf32> to vector<16x16xf32>
    %502 = vector.extract_strided_slice %498 {offsets = [0, 48], sizes = [16, 16], strides = [1, 1]} : vector<16x64xf32> to vector<16x16xf32>
    %503 = vector.shape_cast %499 : vector<16x16xf32> to vector<1x16x16xf32>
    %504 = vector.shape_cast %500 : vector<16x16xf32> to vector<1x16x16xf32>
    %505 = vector.shape_cast %501 : vector<16x16xf32> to vector<1x16x16xf32>
    %506 = vector.shape_cast %502 : vector<16x16xf32> to vector<1x16x16xf32>
    %507 = tpu.concatenate %503, %504, %505, %506 in 0 : vector<1x16x16xf32>, vector<1x16x16xf32>, vector<1x16x16xf32>, vector<1x16x16xf32> -> vector<4x16x16xf32>
    "tpu.trace_start"() <{level = 10 : i32, message = "hqd,hkd->hqk"}> : () -> ()
    %cst_190 = arith.constant dense<0.000000e+00> : vector<4x16x16xf32>
    %508 = tpu.matmul %487, %497, %cst_190 {dimension_numbers = #tpu.dot_dimension_numbers<[2], [2], [1], [1], [0, 0, 0, 1, 1, 1], [0], [0]>} : vector<4x16x16xf32>, vector<4x16x16xf32>, vector<4x16x16xf32> -> vector<4x16x16xf32>
    "tpu.trace_stop"() : () -> ()
    %cst_191 = arith.constant 2.500000e-01 : f32
    %509 = vector.broadcast %cst_191 : f32 to vector<4x16x16xf32>
    %510 = arith.mulf %508, %509 : vector<4x16x16xf32>
    %511 = vector.broadcast %25 : vector<1x1x16xf32> to vector<4x16x16xf32>
    %512 = arith.addf %510, %511 : vector<4x16x16xf32>
    %cst_192 = arith.constant dense<0xFF800000> : vector<4x16xf32>
    %513 = vector.multi_reduction <maximumf>, %512, %cst_192 [2] : vector<4x16x16xf32> to vector<4x16xf32>
    %514 = vector.shape_cast %513 : vector<4x16xf32> to vector<4x16x1xf32>
    %515 = vector.broadcast %514 : vector<4x16x1xf32> to vector<4x16x16xf32>
    %516 = arith.subf %512, %515 : vector<4x16x16xf32>
    %517 = math.exp %516 : vector<4x16x16xf32>
    %cst_193 = arith.constant dense<0.000000e+00> : vector<4x16xf32>
    %518 = vector.multi_reduction <add>, %517, %cst_193 [2] : vector<4x16x16xf32> to vector<4x16xf32>
    %519 = vector.shape_cast %518 : vector<4x16xf32> to vector<4x16x1xf32>
    %520 = vector.broadcast %519 : vector<4x16x1xf32> to vector<4x16x16xf32>
    %521 = arith.divf %517, %520 : vector<4x16x16xf32>
    "tpu.trace_start"() <{level = 10 : i32, message = "hqk,hkd->hqd"}> : () -> ()
    %cst_194 = arith.constant dense<0.000000e+00> : vector<4x16x16xf32>
    %522 = tpu.matmul %521, %507, %cst_194 {dimension_numbers = #tpu.dot_dimension_numbers<[2], [1], [1], [2], [0, 0, 0, 1, 1, 2], [0], [0]>} : vector<4x16x16xf32>, vector<4x16x16xf32>, vector<4x16x16xf32> -> vector<4x16x16xf32>
    "tpu.trace_stop"() : () -> ()
    %523 = vector.extract_strided_slice %522 {offsets = [0, 0, 0], sizes = [1, 16, 16], strides = [1, 1, 1]} : vector<4x16x16xf32> to vector<1x16x16xf32>
    %524 = vector.shape_cast %523 : vector<1x16x16xf32> to vector<16x16xf32>
    %525 = vector.extract_strided_slice %522 {offsets = [1, 0, 0], sizes = [1, 16, 16], strides = [1, 1, 1]} : vector<4x16x16xf32> to vector<1x16x16xf32>
    %526 = vector.shape_cast %525 : vector<1x16x16xf32> to vector<16x16xf32>
    %527 = vector.extract_strided_slice %522 {offsets = [2, 0, 0], sizes = [1, 16, 16], strides = [1, 1, 1]} : vector<4x16x16xf32> to vector<1x16x16xf32>
    %528 = vector.shape_cast %527 : vector<1x16x16xf32> to vector<16x16xf32>
    %529 = vector.extract_strided_slice %522 {offsets = [3, 0, 0], sizes = [1, 16, 16], strides = [1, 1, 1]} : vector<4x16x16xf32> to vector<1x16x16xf32>
    %530 = vector.shape_cast %529 : vector<1x16x16xf32> to vector<16x16xf32>
    %531 = tpu.concatenate %524, %526, %528, %530 in 1 : vector<16x16xf32>, vector<16x16xf32>, vector<16x16xf32>, vector<16x16xf32> -> vector<16x64xf32>
    %532 = arith.truncf %531 : vector<16x64xf32> to vector<16x64xbf16>
    %c3_195 = arith.constant 3 : index
    %c0_196 = arith.constant 0 : index
    %c0_197 = arith.constant 0 : index
    %533 = vector.load %arg7[%c3_195, %c0_196, %c0_197] : memref<6x64x64xbf16, #tpu.memory_space<vmem>>, vector<1x64x64xbf16>
    %534 = vector.shape_cast %533 : vector<1x64x64xbf16> to vector<64x64xbf16>
    %cst_198 = arith.constant dense<0.000000e+00> : vector<16x64xf32>
    %535 = tpu.matmul %532, %534, %cst_198 {dimension_numbers = #tpu.dot_dimension_numbers<[1], [0], [0], [1], [0, 0, 1, 1], [], []>} : vector<16x64xbf16>, vector<64x64xbf16>, vector<16x64xf32> -> vector<16x64xf32>
    %c3_199 = arith.constant 3 : index
    %c0_200 = arith.constant 0 : index
    %c0_201 = arith.constant 0 : index
    %536 = vector.load %arg8[%c3_199, %c0_200, %c0_201] : memref<6x1x64xf32, #tpu.memory_space<vmem>>, vector<1x1x64xf32>
    %537 = vector.shape_cast %536 : vector<1x1x64xf32> to vector<1x64xf32>
    %538 = vector.broadcast %537 : vector<1x64xf32> to vector<16x64xf32>
    %539 = arith.addf %535, %538 : vector<16x64xf32>
    %540 = arith.addf %539, %469 : vector<16x64xf32>
    %c3_202 = arith.constant 3 : index
    %c0_203 = arith.constant 0 : index
    %c0_204 = arith.constant 0 : index
    %541 = vector.load %arg9[%c3_202, %c0_203, %c0_204] : memref<6x1x64xf32, #tpu.memory_space<vmem>>, vector<1x1x64xf32>
    %542 = vector.shape_cast %541 : vector<1x1x64xf32> to vector<1x64xf32>
    %c3_205 = arith.constant 3 : index
    %c0_206 = arith.constant 0 : index
    %c0_207 = arith.constant 0 : index
    %543 = vector.load %arg10[%c3_205, %c0_206, %c0_207] : memref<6x1x64xf32, #tpu.memory_space<vmem>>, vector<1x1x64xf32>
    %544 = vector.shape_cast %543 : vector<1x1x64xf32> to vector<1x64xf32>
    %cst_208 = arith.constant dense<0.000000e+00> : vector<16xf32>
    %545 = vector.multi_reduction <add>, %540, %cst_208 [1] : vector<16x64xf32> to vector<16xf32>
    %546 = vector.shape_cast %545 : vector<16xf32> to vector<16x1xf32>
    %cst_209 = arith.constant 6.400000e+01 : f32
    %547 = vector.broadcast %cst_209 : f32 to vector<16x1xf32>
    %548 = arith.divf %546, %547 : vector<16x1xf32>
    %549 = vector.broadcast %548 : vector<16x1xf32> to vector<16x64xf32>
    %550 = arith.subf %540, %549 : vector<16x64xf32>
    %551 = arith.mulf %550, %550 : vector<16x64xf32>
    %cst_210 = arith.constant dense<0.000000e+00> : vector<16xf32>
    %552 = vector.multi_reduction <add>, %551, %cst_210 [1] : vector<16x64xf32> to vector<16xf32>
    %553 = vector.shape_cast %552 : vector<16xf32> to vector<16x1xf32>
    %cst_211 = arith.constant 6.400000e+01 : f32
    %554 = vector.broadcast %cst_211 : f32 to vector<16x1xf32>
    %555 = arith.divf %553, %554 : vector<16x1xf32>
    %556 = vector.broadcast %548 : vector<16x1xf32> to vector<16x64xf32>
    %557 = arith.subf %540, %556 : vector<16x64xf32>
    %cst_212 = arith.constant 9.99999996E-13 : f32
    %558 = vector.broadcast %cst_212 : f32 to vector<16x1xf32>
    %559 = arith.addf %555, %558 : vector<16x1xf32>
    %560 = math.rsqrt %559 : vector<16x1xf32>
    %561 = vector.broadcast %560 : vector<16x1xf32> to vector<16x64xf32>
    %562 = arith.mulf %557, %561 : vector<16x64xf32>
    %563 = vector.broadcast %542 : vector<1x64xf32> to vector<16x64xf32>
    %564 = arith.mulf %562, %563 : vector<16x64xf32>
    %565 = vector.broadcast %544 : vector<1x64xf32> to vector<16x64xf32>
    %566 = arith.addf %564, %565 : vector<16x64xf32>
    %567 = arith.truncf %566 : vector<16x64xf32> to vector<16x64xbf16>
    %c3_213 = arith.constant 3 : index
    %c0_214 = arith.constant 0 : index
    %c0_215 = arith.constant 0 : index
    %568 = vector.load %arg11[%c3_213, %c0_214, %c0_215] : memref<6x64x256xbf16, #tpu.memory_space<vmem>>, vector<1x64x256xbf16>
    %569 = vector.shape_cast %568 : vector<1x64x256xbf16> to vector<64x256xbf16>
    %cst_216 = arith.constant dense<0.000000e+00> : vector<16x256xf32>
    %570 = tpu.matmul %567, %569, %cst_216 {dimension_numbers = #tpu.dot_dimension_numbers<[1], [0], [0], [1], [0, 0, 1, 1], [], []>} : vector<16x64xbf16>, vector<64x256xbf16>, vector<16x256xf32> -> vector<16x256xf32>
    %c3_217 = arith.constant 3 : index
    %c0_218 = arith.constant 0 : index
    %c0_219 = arith.constant 0 : index
    %571 = vector.load %arg12[%c3_217, %c0_218, %c0_219] : memref<6x1x256xf32, #tpu.memory_space<vmem>>, vector<1x1x256xf32>
    %572 = vector.shape_cast %571 : vector<1x1x256xf32> to vector<1x256xf32>
    %573 = vector.broadcast %572 : vector<1x256xf32> to vector<16x256xf32>
    %574 = arith.addf %570, %573 : vector<16x256xf32>
    %cst_220 = arith.constant 5.000000e-01 : f32
    %575 = vector.broadcast %cst_220 : f32 to vector<16x256xf32>
    %576 = arith.mulf %575, %574 : vector<16x256xf32>
    %cst_221 = arith.constant 0.707106769 : f32
    %577 = vector.broadcast %cst_221 : f32 to vector<16x256xf32>
    %578 = arith.mulf %574, %577 : vector<16x256xf32>
    %579 = math.erf %578 : vector<16x256xf32>
    %cst_222 = arith.constant 1.000000e+00 : f32
    %580 = vector.broadcast %cst_222 : f32 to vector<16x256xf32>
    %581 = arith.addf %580, %579 : vector<16x256xf32>
    %582 = arith.mulf %576, %581 : vector<16x256xf32>
    %583 = arith.truncf %582 : vector<16x256xf32> to vector<16x256xbf16>
    %c3_223 = arith.constant 3 : index
    %c0_224 = arith.constant 0 : index
    %c0_225 = arith.constant 0 : index
    %584 = vector.load %arg13[%c3_223, %c0_224, %c0_225] : memref<6x256x64xbf16, #tpu.memory_space<vmem>>, vector<1x256x64xbf16>
    %585 = vector.shape_cast %584 : vector<1x256x64xbf16> to vector<256x64xbf16>
    %cst_226 = arith.constant dense<0.000000e+00> : vector<16x64xf32>
    %586 = tpu.matmul %583, %585, %cst_226 {dimension_numbers = #tpu.dot_dimension_numbers<[1], [0], [0], [1], [0, 0, 1, 1], [], []>} : vector<16x256xbf16>, vector<256x64xbf16>, vector<16x64xf32> -> vector<16x64xf32>
    %c3_227 = arith.constant 3 : index
    %c0_228 = arith.constant 0 : index
    %c0_229 = arith.constant 0 : index
    %587 = vector.load %arg14[%c3_227, %c0_228, %c0_229] : memref<6x1x64xf32, #tpu.memory_space<vmem>>, vector<1x1x64xf32>
    %588 = vector.shape_cast %587 : vector<1x1x64xf32> to vector<1x64xf32>
    %589 = vector.broadcast %588 : vector<1x64xf32> to vector<16x64xf32>
    %590 = arith.addf %586, %589 : vector<16x64xf32>
    %591 = arith.addf %590, %566 : vector<16x64xf32>
    %c3_230 = arith.constant 3 : index
    %c0_231 = arith.constant 0 : index
    %c0_232 = arith.constant 0 : index
    %592 = vector.load %arg15[%c3_230, %c0_231, %c0_232] : memref<6x1x64xf32, #tpu.memory_space<vmem>>, vector<1x1x64xf32>
    %593 = vector.shape_cast %592 : vector<1x1x64xf32> to vector<1x64xf32>
    %c3_233 = arith.constant 3 : index
    %c0_234 = arith.constant 0 : index
    %c0_235 = arith.constant 0 : index
    %594 = vector.load %arg16[%c3_233, %c0_234, %c0_235] : memref<6x1x64xf32, #tpu.memory_space<vmem>>, vector<1x1x64xf32>
    %595 = vector.shape_cast %594 : vector<1x1x64xf32> to vector<1x64xf32>
    %cst_236 = arith.constant dense<0.000000e+00> : vector<16xf32>
    %596 = vector.multi_reduction <add>, %591, %cst_236 [1] : vector<16x64xf32> to vector<16xf32>
    %597 = vector.shape_cast %596 : vector<16xf32> to vector<16x1xf32>
    %cst_237 = arith.constant 6.400000e+01 : f32
    %598 = vector.broadcast %cst_237 : f32 to vector<16x1xf32>
    %599 = arith.divf %597, %598 : vector<16x1xf32>
    %600 = vector.broadcast %599 : vector<16x1xf32> to vector<16x64xf32>
    %601 = arith.subf %591, %600 : vector<16x64xf32>
    %602 = arith.mulf %601, %601 : vector<16x64xf32>
    %cst_238 = arith.constant dense<0.000000e+00> : vector<16xf32>
    %603 = vector.multi_reduction <add>, %602, %cst_238 [1] : vector<16x64xf32> to vector<16xf32>
    %604 = vector.shape_cast %603 : vector<16xf32> to vector<16x1xf32>
    %cst_239 = arith.constant 6.400000e+01 : f32
    %605 = vector.broadcast %cst_239 : f32 to vector<16x1xf32>
    %606 = arith.divf %604, %605 : vector<16x1xf32>
    %607 = vector.broadcast %599 : vector<16x1xf32> to vector<16x64xf32>
    %608 = arith.subf %591, %607 : vector<16x64xf32>
    %cst_240 = arith.constant 9.99999996E-13 : f32
    %609 = vector.broadcast %cst_240 : f32 to vector<16x1xf32>
    %610 = arith.addf %606, %609 : vector<16x1xf32>
    %611 = math.rsqrt %610 : vector<16x1xf32>
    %612 = vector.broadcast %611 : vector<16x1xf32> to vector<16x64xf32>
    %613 = arith.mulf %608, %612 : vector<16x64xf32>
    %614 = vector.broadcast %593 : vector<1x64xf32> to vector<16x64xf32>
    %615 = arith.mulf %613, %614 : vector<16x64xf32>
    %616 = vector.broadcast %595 : vector<1x64xf32> to vector<16x64xf32>
    %617 = arith.addf %615, %616 : vector<16x64xf32>
    %618 = arith.truncf %617 : vector<16x64xf32> to vector<16x64xbf16>
    %c4 = arith.constant 4 : index
    %c0_241 = arith.constant 0 : index
    %c0_242 = arith.constant 0 : index
    %619 = vector.load %arg5[%c4, %c0_241, %c0_242] : memref<6x64x192xbf16, #tpu.memory_space<vmem>>, vector<1x64x192xbf16>
    %620 = vector.shape_cast %619 : vector<1x64x192xbf16> to vector<64x192xbf16>
    %cst_243 = arith.constant dense<0.000000e+00> : vector<16x192xf32>
    %621 = tpu.matmul %618, %620, %cst_243 {dimension_numbers = #tpu.dot_dimension_numbers<[1], [0], [0], [1], [0, 0, 1, 1], [], []>} : vector<16x64xbf16>, vector<64x192xbf16>, vector<16x192xf32> -> vector<16x192xf32>
    %c4_244 = arith.constant 4 : index
    %c0_245 = arith.constant 0 : index
    %c0_246 = arith.constant 0 : index
    %622 = vector.load %arg6[%c4_244, %c0_245, %c0_246] : memref<6x1x192xf32, #tpu.memory_space<vmem>>, vector<1x1x192xf32>
    %623 = vector.shape_cast %622 : vector<1x1x192xf32> to vector<1x192xf32>
    %624 = vector.broadcast %623 : vector<1x192xf32> to vector<16x192xf32>
    %625 = arith.addf %621, %624 : vector<16x192xf32>
    %626 = vector.extract_strided_slice %625 {offsets = [0, 0], sizes = [16, 64], strides = [1, 1]} : vector<16x192xf32> to vector<16x64xf32>
    %627 = vector.extract_strided_slice %626 {offsets = [0, 0], sizes = [16, 16], strides = [1, 1]} : vector<16x64xf32> to vector<16x16xf32>
    %628 = vector.extract_strided_slice %626 {offsets = [0, 16], sizes = [16, 16], strides = [1, 1]} : vector<16x64xf32> to vector<16x16xf32>
    %629 = vector.extract_strided_slice %626 {offsets = [0, 32], sizes = [16, 16], strides = [1, 1]} : vector<16x64xf32> to vector<16x16xf32>
    %630 = vector.extract_strided_slice %626 {offsets = [0, 48], sizes = [16, 16], strides = [1, 1]} : vector<16x64xf32> to vector<16x16xf32>
    %631 = vector.shape_cast %627 : vector<16x16xf32> to vector<1x16x16xf32>
    %632 = vector.shape_cast %628 : vector<16x16xf32> to vector<1x16x16xf32>
    %633 = vector.shape_cast %629 : vector<16x16xf32> to vector<1x16x16xf32>
    %634 = vector.shape_cast %630 : vector<16x16xf32> to vector<1x16x16xf32>
    %635 = tpu.concatenate %631, %632, %633, %634 in 0 : vector<1x16x16xf32>, vector<1x16x16xf32>, vector<1x16x16xf32>, vector<1x16x16xf32> -> vector<4x16x16xf32>
    %636 = vector.extract_strided_slice %625 {offsets = [0, 64], sizes = [16, 64], strides = [1, 1]} : vector<16x192xf32> to vector<16x64xf32>
    %637 = vector.extract_strided_slice %636 {offsets = [0, 0], sizes = [16, 16], strides = [1, 1]} : vector<16x64xf32> to vector<16x16xf32>
    %638 = vector.extract_strided_slice %636 {offsets = [0, 16], sizes = [16, 16], strides = [1, 1]} : vector<16x64xf32> to vector<16x16xf32>
    %639 = vector.extract_strided_slice %636 {offsets = [0, 32], sizes = [16, 16], strides = [1, 1]} : vector<16x64xf32> to vector<16x16xf32>
    %640 = vector.extract_strided_slice %636 {offsets = [0, 48], sizes = [16, 16], strides = [1, 1]} : vector<16x64xf32> to vector<16x16xf32>
    %641 = vector.shape_cast %637 : vector<16x16xf32> to vector<1x16x16xf32>
    %642 = vector.shape_cast %638 : vector<16x16xf32> to vector<1x16x16xf32>
    %643 = vector.shape_cast %639 : vector<16x16xf32> to vector<1x16x16xf32>
    %644 = vector.shape_cast %640 : vector<16x16xf32> to vector<1x16x16xf32>
    %645 = tpu.concatenate %641, %642, %643, %644 in 0 : vector<1x16x16xf32>, vector<1x16x16xf32>, vector<1x16x16xf32>, vector<1x16x16xf32> -> vector<4x16x16xf32>
    %646 = vector.extract_strided_slice %625 {offsets = [0, 128], sizes = [16, 64], strides = [1, 1]} : vector<16x192xf32> to vector<16x64xf32>
    %647 = vector.extract_strided_slice %646 {offsets = [0, 0], sizes = [16, 16], strides = [1, 1]} : vector<16x64xf32> to vector<16x16xf32>
    %648 = vector.extract_strided_slice %646 {offsets = [0, 16], sizes = [16, 16], strides = [1, 1]} : vector<16x64xf32> to vector<16x16xf32>
    %649 = vector.extract_strided_slice %646 {offsets = [0, 32], sizes = [16, 16], strides = [1, 1]} : vector<16x64xf32> to vector<16x16xf32>
    %650 = vector.extract_strided_slice %646 {offsets = [0, 48], sizes = [16, 16], strides = [1, 1]} : vector<16x64xf32> to vector<16x16xf32>
    %651 = vector.shape_cast %647 : vector<16x16xf32> to vector<1x16x16xf32>
    %652 = vector.shape_cast %648 : vector<16x16xf32> to vector<1x16x16xf32>
    %653 = vector.shape_cast %649 : vector<16x16xf32> to vector<1x16x16xf32>
    %654 = vector.shape_cast %650 : vector<16x16xf32> to vector<1x16x16xf32>
    %655 = tpu.concatenate %651, %652, %653, %654 in 0 : vector<1x16x16xf32>, vector<1x16x16xf32>, vector<1x16x16xf32>, vector<1x16x16xf32> -> vector<4x16x16xf32>
    "tpu.trace_start"() <{level = 10 : i32, message = "hqd,hkd->hqk"}> : () -> ()
    %cst_247 = arith.constant dense<0.000000e+00> : vector<4x16x16xf32>
    %656 = tpu.matmul %635, %645, %cst_247 {dimension_numbers = #tpu.dot_dimension_numbers<[2], [2], [1], [1], [0, 0, 0, 1, 1, 1], [0], [0]>} : vector<4x16x16xf32>, vector<4x16x16xf32>, vector<4x16x16xf32> -> vector<4x16x16xf32>
    "tpu.trace_stop"() : () -> ()
    %cst_248 = arith.constant 2.500000e-01 : f32
    %657 = vector.broadcast %cst_248 : f32 to vector<4x16x16xf32>
    %658 = arith.mulf %656, %657 : vector<4x16x16xf32>
    %659 = vector.broadcast %25 : vector<1x1x16xf32> to vector<4x16x16xf32>
    %660 = arith.addf %658, %659 : vector<4x16x16xf32>
    %cst_249 = arith.constant dense<0xFF800000> : vector<4x16xf32>
    %661 = vector.multi_reduction <maximumf>, %660, %cst_249 [2] : vector<4x16x16xf32> to vector<4x16xf32>
    %662 = vector.shape_cast %661 : vector<4x16xf32> to vector<4x16x1xf32>
    %663 = vector.broadcast %662 : vector<4x16x1xf32> to vector<4x16x16xf32>
    %664 = arith.subf %660, %663 : vector<4x16x16xf32>
    %665 = math.exp %664 : vector<4x16x16xf32>
    %cst_250 = arith.constant dense<0.000000e+00> : vector<4x16xf32>
    %666 = vector.multi_reduction <add>, %665, %cst_250 [2] : vector<4x16x16xf32> to vector<4x16xf32>
    %667 = vector.shape_cast %666 : vector<4x16xf32> to vector<4x16x1xf32>
    %668 = vector.broadcast %667 : vector<4x16x1xf32> to vector<4x16x16xf32>
    %669 = arith.divf %665, %668 : vector<4x16x16xf32>
    "tpu.trace_start"() <{level = 10 : i32, message = "hqk,hkd->hqd"}> : () -> ()
    %cst_251 = arith.constant dense<0.000000e+00> : vector<4x16x16xf32>
    %670 = tpu.matmul %669, %655, %cst_251 {dimension_numbers = #tpu.dot_dimension_numbers<[2], [1], [1], [2], [0, 0, 0, 1, 1, 2], [0], [0]>} : vector<4x16x16xf32>, vector<4x16x16xf32>, vector<4x16x16xf32> -> vector<4x16x16xf32>
    "tpu.trace_stop"() : () -> ()
    %671 = vector.extract_strided_slice %670 {offsets = [0, 0, 0], sizes = [1, 16, 16], strides = [1, 1, 1]} : vector<4x16x16xf32> to vector<1x16x16xf32>
    %672 = vector.shape_cast %671 : vector<1x16x16xf32> to vector<16x16xf32>
    %673 = vector.extract_strided_slice %670 {offsets = [1, 0, 0], sizes = [1, 16, 16], strides = [1, 1, 1]} : vector<4x16x16xf32> to vector<1x16x16xf32>
    %674 = vector.shape_cast %673 : vector<1x16x16xf32> to vector<16x16xf32>
    %675 = vector.extract_strided_slice %670 {offsets = [2, 0, 0], sizes = [1, 16, 16], strides = [1, 1, 1]} : vector<4x16x16xf32> to vector<1x16x16xf32>
    %676 = vector.shape_cast %675 : vector<1x16x16xf32> to vector<16x16xf32>
    %677 = vector.extract_strided_slice %670 {offsets = [3, 0, 0], sizes = [1, 16, 16], strides = [1, 1, 1]} : vector<4x16x16xf32> to vector<1x16x16xf32>
    %678 = vector.shape_cast %677 : vector<1x16x16xf32> to vector<16x16xf32>
    %679 = tpu.concatenate %672, %674, %676, %678 in 1 : vector<16x16xf32>, vector<16x16xf32>, vector<16x16xf32>, vector<16x16xf32> -> vector<16x64xf32>
    %680 = arith.truncf %679 : vector<16x64xf32> to vector<16x64xbf16>
    %c4_252 = arith.constant 4 : index
    %c0_253 = arith.constant 0 : index
    %c0_254 = arith.constant 0 : index
    %681 = vector.load %arg7[%c4_252, %c0_253, %c0_254] : memref<6x64x64xbf16, #tpu.memory_space<vmem>>, vector<1x64x64xbf16>
    %682 = vector.shape_cast %681 : vector<1x64x64xbf16> to vector<64x64xbf16>
    %cst_255 = arith.constant dense<0.000000e+00> : vector<16x64xf32>
    %683 = tpu.matmul %680, %682, %cst_255 {dimension_numbers = #tpu.dot_dimension_numbers<[1], [0], [0], [1], [0, 0, 1, 1], [], []>} : vector<16x64xbf16>, vector<64x64xbf16>, vector<16x64xf32> -> vector<16x64xf32>
    %c4_256 = arith.constant 4 : index
    %c0_257 = arith.constant 0 : index
    %c0_258 = arith.constant 0 : index
    %684 = vector.load %arg8[%c4_256, %c0_257, %c0_258] : memref<6x1x64xf32, #tpu.memory_space<vmem>>, vector<1x1x64xf32>
    %685 = vector.shape_cast %684 : vector<1x1x64xf32> to vector<1x64xf32>
    %686 = vector.broadcast %685 : vector<1x64xf32> to vector<16x64xf32>
    %687 = arith.addf %683, %686 : vector<16x64xf32>
    %688 = arith.addf %687, %617 : vector<16x64xf32>
    %c4_259 = arith.constant 4 : index
    %c0_260 = arith.constant 0 : index
    %c0_261 = arith.constant 0 : index
    %689 = vector.load %arg9[%c4_259, %c0_260, %c0_261] : memref<6x1x64xf32, #tpu.memory_space<vmem>>, vector<1x1x64xf32>
    %690 = vector.shape_cast %689 : vector<1x1x64xf32> to vector<1x64xf32>
    %c4_262 = arith.constant 4 : index
    %c0_263 = arith.constant 0 : index
    %c0_264 = arith.constant 0 : index
    %691 = vector.load %arg10[%c4_262, %c0_263, %c0_264] : memref<6x1x64xf32, #tpu.memory_space<vmem>>, vector<1x1x64xf32>
    %692 = vector.shape_cast %691 : vector<1x1x64xf32> to vector<1x64xf32>
    %cst_265 = arith.constant dense<0.000000e+00> : vector<16xf32>
    %693 = vector.multi_reduction <add>, %688, %cst_265 [1] : vector<16x64xf32> to vector<16xf32>
    %694 = vector.shape_cast %693 : vector<16xf32> to vector<16x1xf32>
    %cst_266 = arith.constant 6.400000e+01 : f32
    %695 = vector.broadcast %cst_266 : f32 to vector<16x1xf32>
    %696 = arith.divf %694, %695 : vector<16x1xf32>
    %697 = vector.broadcast %696 : vector<16x1xf32> to vector<16x64xf32>
    %698 = arith.subf %688, %697 : vector<16x64xf32>
    %699 = arith.mulf %698, %698 : vector<16x64xf32>
    %cst_267 = arith.constant dense<0.000000e+00> : vector<16xf32>
    %700 = vector.multi_reduction <add>, %699, %cst_267 [1] : vector<16x64xf32> to vector<16xf32>
    %701 = vector.shape_cast %700 : vector<16xf32> to vector<16x1xf32>
    %cst_268 = arith.constant 6.400000e+01 : f32
    %702 = vector.broadcast %cst_268 : f32 to vector<16x1xf32>
    %703 = arith.divf %701, %702 : vector<16x1xf32>
    %704 = vector.broadcast %696 : vector<16x1xf32> to vector<16x64xf32>
    %705 = arith.subf %688, %704 : vector<16x64xf32>
    %cst_269 = arith.constant 9.99999996E-13 : f32
    %706 = vector.broadcast %cst_269 : f32 to vector<16x1xf32>
    %707 = arith.addf %703, %706 : vector<16x1xf32>
    %708 = math.rsqrt %707 : vector<16x1xf32>
    %709 = vector.broadcast %708 : vector<16x1xf32> to vector<16x64xf32>
    %710 = arith.mulf %705, %709 : vector<16x64xf32>
    %711 = vector.broadcast %690 : vector<1x64xf32> to vector<16x64xf32>
    %712 = arith.mulf %710, %711 : vector<16x64xf32>
    %713 = vector.broadcast %692 : vector<1x64xf32> to vector<16x64xf32>
    %714 = arith.addf %712, %713 : vector<16x64xf32>
    %715 = arith.truncf %714 : vector<16x64xf32> to vector<16x64xbf16>
    %c4_270 = arith.constant 4 : index
    %c0_271 = arith.constant 0 : index
    %c0_272 = arith.constant 0 : index
    %716 = vector.load %arg11[%c4_270, %c0_271, %c0_272] : memref<6x64x256xbf16, #tpu.memory_space<vmem>>, vector<1x64x256xbf16>
    %717 = vector.shape_cast %716 : vector<1x64x256xbf16> to vector<64x256xbf16>
    %cst_273 = arith.constant dense<0.000000e+00> : vector<16x256xf32>
    %718 = tpu.matmul %715, %717, %cst_273 {dimension_numbers = #tpu.dot_dimension_numbers<[1], [0], [0], [1], [0, 0, 1, 1], [], []>} : vector<16x64xbf16>, vector<64x256xbf16>, vector<16x256xf32> -> vector<16x256xf32>
    %c4_274 = arith.constant 4 : index
    %c0_275 = arith.constant 0 : index
    %c0_276 = arith.constant 0 : index
    %719 = vector.load %arg12[%c4_274, %c0_275, %c0_276] : memref<6x1x256xf32, #tpu.memory_space<vmem>>, vector<1x1x256xf32>
    %720 = vector.shape_cast %719 : vector<1x1x256xf32> to vector<1x256xf32>
    %721 = vector.broadcast %720 : vector<1x256xf32> to vector<16x256xf32>
    %722 = arith.addf %718, %721 : vector<16x256xf32>
    %cst_277 = arith.constant 5.000000e-01 : f32
    %723 = vector.broadcast %cst_277 : f32 to vector<16x256xf32>
    %724 = arith.mulf %723, %722 : vector<16x256xf32>
    %cst_278 = arith.constant 0.707106769 : f32
    %725 = vector.broadcast %cst_278 : f32 to vector<16x256xf32>
    %726 = arith.mulf %722, %725 : vector<16x256xf32>
    %727 = math.erf %726 : vector<16x256xf32>
    %cst_279 = arith.constant 1.000000e+00 : f32
    %728 = vector.broadcast %cst_279 : f32 to vector<16x256xf32>
    %729 = arith.addf %728, %727 : vector<16x256xf32>
    %730 = arith.mulf %724, %729 : vector<16x256xf32>
    %731 = arith.truncf %730 : vector<16x256xf32> to vector<16x256xbf16>
    %c4_280 = arith.constant 4 : index
    %c0_281 = arith.constant 0 : index
    %c0_282 = arith.constant 0 : index
    %732 = vector.load %arg13[%c4_280, %c0_281, %c0_282] : memref<6x256x64xbf16, #tpu.memory_space<vmem>>, vector<1x256x64xbf16>
    %733 = vector.shape_cast %732 : vector<1x256x64xbf16> to vector<256x64xbf16>
    %cst_283 = arith.constant dense<0.000000e+00> : vector<16x64xf32>
    %734 = tpu.matmul %731, %733, %cst_283 {dimension_numbers = #tpu.dot_dimension_numbers<[1], [0], [0], [1], [0, 0, 1, 1], [], []>} : vector<16x256xbf16>, vector<256x64xbf16>, vector<16x64xf32> -> vector<16x64xf32>
    %c4_284 = arith.constant 4 : index
    %c0_285 = arith.constant 0 : index
    %c0_286 = arith.constant 0 : index
    %735 = vector.load %arg14[%c4_284, %c0_285, %c0_286] : memref<6x1x64xf32, #tpu.memory_space<vmem>>, vector<1x1x64xf32>
    %736 = vector.shape_cast %735 : vector<1x1x64xf32> to vector<1x64xf32>
    %737 = vector.broadcast %736 : vector<1x64xf32> to vector<16x64xf32>
    %738 = arith.addf %734, %737 : vector<16x64xf32>
    %739 = arith.addf %738, %714 : vector<16x64xf32>
    %c4_287 = arith.constant 4 : index
    %c0_288 = arith.constant 0 : index
    %c0_289 = arith.constant 0 : index
    %740 = vector.load %arg15[%c4_287, %c0_288, %c0_289] : memref<6x1x64xf32, #tpu.memory_space<vmem>>, vector<1x1x64xf32>
    %741 = vector.shape_cast %740 : vector<1x1x64xf32> to vector<1x64xf32>
    %c4_290 = arith.constant 4 : index
    %c0_291 = arith.constant 0 : index
    %c0_292 = arith.constant 0 : index
    %742 = vector.load %arg16[%c4_290, %c0_291, %c0_292] : memref<6x1x64xf32, #tpu.memory_space<vmem>>, vector<1x1x64xf32>
    %743 = vector.shape_cast %742 : vector<1x1x64xf32> to vector<1x64xf32>
    %cst_293 = arith.constant dense<0.000000e+00> : vector<16xf32>
    %744 = vector.multi_reduction <add>, %739, %cst_293 [1] : vector<16x64xf32> to vector<16xf32>
    %745 = vector.shape_cast %744 : vector<16xf32> to vector<16x1xf32>
    %cst_294 = arith.constant 6.400000e+01 : f32
    %746 = vector.broadcast %cst_294 : f32 to vector<16x1xf32>
    %747 = arith.divf %745, %746 : vector<16x1xf32>
    %748 = vector.broadcast %747 : vector<16x1xf32> to vector<16x64xf32>
    %749 = arith.subf %739, %748 : vector<16x64xf32>
    %750 = arith.mulf %749, %749 : vector<16x64xf32>
    %cst_295 = arith.constant dense<0.000000e+00> : vector<16xf32>
    %751 = vector.multi_reduction <add>, %750, %cst_295 [1] : vector<16x64xf32> to vector<16xf32>
    %752 = vector.shape_cast %751 : vector<16xf32> to vector<16x1xf32>
    %cst_296 = arith.constant 6.400000e+01 : f32
    %753 = vector.broadcast %cst_296 : f32 to vector<16x1xf32>
    %754 = arith.divf %752, %753 : vector<16x1xf32>
    %755 = vector.broadcast %747 : vector<16x1xf32> to vector<16x64xf32>
    %756 = arith.subf %739, %755 : vector<16x64xf32>
    %cst_297 = arith.constant 9.99999996E-13 : f32
    %757 = vector.broadcast %cst_297 : f32 to vector<16x1xf32>
    %758 = arith.addf %754, %757 : vector<16x1xf32>
    %759 = math.rsqrt %758 : vector<16x1xf32>
    %760 = vector.broadcast %759 : vector<16x1xf32> to vector<16x64xf32>
    %761 = arith.mulf %756, %760 : vector<16x64xf32>
    %762 = vector.broadcast %741 : vector<1x64xf32> to vector<16x64xf32>
    %763 = arith.mulf %761, %762 : vector<16x64xf32>
    %764 = vector.broadcast %743 : vector<1x64xf32> to vector<16x64xf32>
    %765 = arith.addf %763, %764 : vector<16x64xf32>
    %766 = arith.truncf %765 : vector<16x64xf32> to vector<16x64xbf16>
    %c5 = arith.constant 5 : index
    %c0_298 = arith.constant 0 : index
    %c0_299 = arith.constant 0 : index
    %767 = vector.load %arg5[%c5, %c0_298, %c0_299] : memref<6x64x192xbf16, #tpu.memory_space<vmem>>, vector<1x64x192xbf16>
    %768 = vector.shape_cast %767 : vector<1x64x192xbf16> to vector<64x192xbf16>
    %cst_300 = arith.constant dense<0.000000e+00> : vector<16x192xf32>
    %769 = tpu.matmul %766, %768, %cst_300 {dimension_numbers = #tpu.dot_dimension_numbers<[1], [0], [0], [1], [0, 0, 1, 1], [], []>} : vector<16x64xbf16>, vector<64x192xbf16>, vector<16x192xf32> -> vector<16x192xf32>
    %c5_301 = arith.constant 5 : index
    %c0_302 = arith.constant 0 : index
    %c0_303 = arith.constant 0 : index
    %770 = vector.load %arg6[%c5_301, %c0_302, %c0_303] : memref<6x1x192xf32, #tpu.memory_space<vmem>>, vector<1x1x192xf32>
    %771 = vector.shape_cast %770 : vector<1x1x192xf32> to vector<1x192xf32>
    %772 = vector.broadcast %771 : vector<1x192xf32> to vector<16x192xf32>
    %773 = arith.addf %769, %772 : vector<16x192xf32>
    %774 = vector.extract_strided_slice %773 {offsets = [0, 0], sizes = [16, 64], strides = [1, 1]} : vector<16x192xf32> to vector<16x64xf32>
    %775 = vector.extract_strided_slice %774 {offsets = [0, 0], sizes = [16, 16], strides = [1, 1]} : vector<16x64xf32> to vector<16x16xf32>
    %776 = vector.extract_strided_slice %774 {offsets = [0, 16], sizes = [16, 16], strides = [1, 1]} : vector<16x64xf32> to vector<16x16xf32>
    %777 = vector.extract_strided_slice %774 {offsets = [0, 32], sizes = [16, 16], strides = [1, 1]} : vector<16x64xf32> to vector<16x16xf32>
    %778 = vector.extract_strided_slice %774 {offsets = [0, 48], sizes = [16, 16], strides = [1, 1]} : vector<16x64xf32> to vector<16x16xf32>
    %779 = vector.shape_cast %775 : vector<16x16xf32> to vector<1x16x16xf32>
    %780 = vector.shape_cast %776 : vector<16x16xf32> to vector<1x16x16xf32>
    %781 = vector.shape_cast %777 : vector<16x16xf32> to vector<1x16x16xf32>
    %782 = vector.shape_cast %778 : vector<16x16xf32> to vector<1x16x16xf32>
    %783 = tpu.concatenate %779, %780, %781, %782 in 0 : vector<1x16x16xf32>, vector<1x16x16xf32>, vector<1x16x16xf32>, vector<1x16x16xf32> -> vector<4x16x16xf32>
    %784 = vector.extract_strided_slice %773 {offsets = [0, 64], sizes = [16, 64], strides = [1, 1]} : vector<16x192xf32> to vector<16x64xf32>
    %785 = vector.extract_strided_slice %784 {offsets = [0, 0], sizes = [16, 16], strides = [1, 1]} : vector<16x64xf32> to vector<16x16xf32>
    %786 = vector.extract_strided_slice %784 {offsets = [0, 16], sizes = [16, 16], strides = [1, 1]} : vector<16x64xf32> to vector<16x16xf32>
    %787 = vector.extract_strided_slice %784 {offsets = [0, 32], sizes = [16, 16], strides = [1, 1]} : vector<16x64xf32> to vector<16x16xf32>
    %788 = vector.extract_strided_slice %784 {offsets = [0, 48], sizes = [16, 16], strides = [1, 1]} : vector<16x64xf32> to vector<16x16xf32>
    %789 = vector.shape_cast %785 : vector<16x16xf32> to vector<1x16x16xf32>
    %790 = vector.shape_cast %786 : vector<16x16xf32> to vector<1x16x16xf32>
    %791 = vector.shape_cast %787 : vector<16x16xf32> to vector<1x16x16xf32>
    %792 = vector.shape_cast %788 : vector<16x16xf32> to vector<1x16x16xf32>
    %793 = tpu.concatenate %789, %790, %791, %792 in 0 : vector<1x16x16xf32>, vector<1x16x16xf32>, vector<1x16x16xf32>, vector<1x16x16xf32> -> vector<4x16x16xf32>
    %794 = vector.extract_strided_slice %773 {offsets = [0, 128], sizes = [16, 64], strides = [1, 1]} : vector<16x192xf32> to vector<16x64xf32>
    %795 = vector.extract_strided_slice %794 {offsets = [0, 0], sizes = [16, 16], strides = [1, 1]} : vector<16x64xf32> to vector<16x16xf32>
    %796 = vector.extract_strided_slice %794 {offsets = [0, 16], sizes = [16, 16], strides = [1, 1]} : vector<16x64xf32> to vector<16x16xf32>
    %797 = vector.extract_strided_slice %794 {offsets = [0, 32], sizes = [16, 16], strides = [1, 1]} : vector<16x64xf32> to vector<16x16xf32>
    %798 = vector.extract_strided_slice %794 {offsets = [0, 48], sizes = [16, 16], strides = [1, 1]} : vector<16x64xf32> to vector<16x16xf32>
    %799 = vector.shape_cast %795 : vector<16x16xf32> to vector<1x16x16xf32>
    %800 = vector.shape_cast %796 : vector<16x16xf32> to vector<1x16x16xf32>
    %801 = vector.shape_cast %797 : vector<16x16xf32> to vector<1x16x16xf32>
    %802 = vector.shape_cast %798 : vector<16x16xf32> to vector<1x16x16xf32>
    %803 = tpu.concatenate %799, %800, %801, %802 in 0 : vector<1x16x16xf32>, vector<1x16x16xf32>, vector<1x16x16xf32>, vector<1x16x16xf32> -> vector<4x16x16xf32>
    "tpu.trace_start"() <{level = 10 : i32, message = "hqd,hkd->hqk"}> : () -> ()
    %cst_304 = arith.constant dense<0.000000e+00> : vector<4x16x16xf32>
    %804 = tpu.matmul %783, %793, %cst_304 {dimension_numbers = #tpu.dot_dimension_numbers<[2], [2], [1], [1], [0, 0, 0, 1, 1, 1], [0], [0]>} : vector<4x16x16xf32>, vector<4x16x16xf32>, vector<4x16x16xf32> -> vector<4x16x16xf32>
    "tpu.trace_stop"() : () -> ()
    %cst_305 = arith.constant 2.500000e-01 : f32
    %805 = vector.broadcast %cst_305 : f32 to vector<4x16x16xf32>
    %806 = arith.mulf %804, %805 : vector<4x16x16xf32>
    %807 = vector.broadcast %25 : vector<1x1x16xf32> to vector<4x16x16xf32>
    %808 = arith.addf %806, %807 : vector<4x16x16xf32>
    %cst_306 = arith.constant dense<0xFF800000> : vector<4x16xf32>
    %809 = vector.multi_reduction <maximumf>, %808, %cst_306 [2] : vector<4x16x16xf32> to vector<4x16xf32>
    %810 = vector.shape_cast %809 : vector<4x16xf32> to vector<4x16x1xf32>
    %811 = vector.broadcast %810 : vector<4x16x1xf32> to vector<4x16x16xf32>
    %812 = arith.subf %808, %811 : vector<4x16x16xf32>
    %813 = math.exp %812 : vector<4x16x16xf32>
    %cst_307 = arith.constant dense<0.000000e+00> : vector<4x16xf32>
    %814 = vector.multi_reduction <add>, %813, %cst_307 [2] : vector<4x16x16xf32> to vector<4x16xf32>
    %815 = vector.shape_cast %814 : vector<4x16xf32> to vector<4x16x1xf32>
    %816 = vector.broadcast %815 : vector<4x16x1xf32> to vector<4x16x16xf32>
    %817 = arith.divf %813, %816 : vector<4x16x16xf32>
    "tpu.trace_start"() <{level = 10 : i32, message = "hqk,hkd->hqd"}> : () -> ()
    %cst_308 = arith.constant dense<0.000000e+00> : vector<4x16x16xf32>
    %818 = tpu.matmul %817, %803, %cst_308 {dimension_numbers = #tpu.dot_dimension_numbers<[2], [1], [1], [2], [0, 0, 0, 1, 1, 2], [0], [0]>} : vector<4x16x16xf32>, vector<4x16x16xf32>, vector<4x16x16xf32> -> vector<4x16x16xf32>
    "tpu.trace_stop"() : () -> ()
    %819 = vector.extract_strided_slice %818 {offsets = [0, 0, 0], sizes = [1, 16, 16], strides = [1, 1, 1]} : vector<4x16x16xf32> to vector<1x16x16xf32>
    %820 = vector.shape_cast %819 : vector<1x16x16xf32> to vector<16x16xf32>
    %821 = vector.extract_strided_slice %818 {offsets = [1, 0, 0], sizes = [1, 16, 16], strides = [1, 1, 1]} : vector<4x16x16xf32> to vector<1x16x16xf32>
    %822 = vector.shape_cast %821 : vector<1x16x16xf32> to vector<16x16xf32>
    %823 = vector.extract_strided_slice %818 {offsets = [2, 0, 0], sizes = [1, 16, 16], strides = [1, 1, 1]} : vector<4x16x16xf32> to vector<1x16x16xf32>
    %824 = vector.shape_cast %823 : vector<1x16x16xf32> to vector<16x16xf32>
    %825 = vector.extract_strided_slice %818 {offsets = [3, 0, 0], sizes = [1, 16, 16], strides = [1, 1, 1]} : vector<4x16x16xf32> to vector<1x16x16xf32>
    %826 = vector.shape_cast %825 : vector<1x16x16xf32> to vector<16x16xf32>
    %827 = tpu.concatenate %820, %822, %824, %826 in 1 : vector<16x16xf32>, vector<16x16xf32>, vector<16x16xf32>, vector<16x16xf32> -> vector<16x64xf32>
    %828 = arith.truncf %827 : vector<16x64xf32> to vector<16x64xbf16>
    %c5_309 = arith.constant 5 : index
    %c0_310 = arith.constant 0 : index
    %c0_311 = arith.constant 0 : index
    %829 = vector.load %arg7[%c5_309, %c0_310, %c0_311] : memref<6x64x64xbf16, #tpu.memory_space<vmem>>, vector<1x64x64xbf16>
    %830 = vector.shape_cast %829 : vector<1x64x64xbf16> to vector<64x64xbf16>
    %cst_312 = arith.constant dense<0.000000e+00> : vector<16x64xf32>
    %831 = tpu.matmul %828, %830, %cst_312 {dimension_numbers = #tpu.dot_dimension_numbers<[1], [0], [0], [1], [0, 0, 1, 1], [], []>} : vector<16x64xbf16>, vector<64x64xbf16>, vector<16x64xf32> -> vector<16x64xf32>
    %c5_313 = arith.constant 5 : index
    %c0_314 = arith.constant 0 : index
    %c0_315 = arith.constant 0 : index
    %832 = vector.load %arg8[%c5_313, %c0_314, %c0_315] : memref<6x1x64xf32, #tpu.memory_space<vmem>>, vector<1x1x64xf32>
    %833 = vector.shape_cast %832 : vector<1x1x64xf32> to vector<1x64xf32>
    %834 = vector.broadcast %833 : vector<1x64xf32> to vector<16x64xf32>
    %835 = arith.addf %831, %834 : vector<16x64xf32>
    %836 = arith.addf %835, %765 : vector<16x64xf32>
    %c5_316 = arith.constant 5 : index
    %c0_317 = arith.constant 0 : index
    %c0_318 = arith.constant 0 : index
    %837 = vector.load %arg9[%c5_316, %c0_317, %c0_318] : memref<6x1x64xf32, #tpu.memory_space<vmem>>, vector<1x1x64xf32>
    %838 = vector.shape_cast %837 : vector<1x1x64xf32> to vector<1x64xf32>
    %c5_319 = arith.constant 5 : index
    %c0_320 = arith.constant 0 : index
    %c0_321 = arith.constant 0 : index
    %839 = vector.load %arg10[%c5_319, %c0_320, %c0_321] : memref<6x1x64xf32, #tpu.memory_space<vmem>>, vector<1x1x64xf32>
    %840 = vector.shape_cast %839 : vector<1x1x64xf32> to vector<1x64xf32>
    %cst_322 = arith.constant dense<0.000000e+00> : vector<16xf32>
    %841 = vector.multi_reduction <add>, %836, %cst_322 [1] : vector<16x64xf32> to vector<16xf32>
    %842 = vector.shape_cast %841 : vector<16xf32> to vector<16x1xf32>
    %cst_323 = arith.constant 6.400000e+01 : f32
    %843 = vector.broadcast %cst_323 : f32 to vector<16x1xf32>
    %844 = arith.divf %842, %843 : vector<16x1xf32>
    %845 = vector.broadcast %844 : vector<16x1xf32> to vector<16x64xf32>
    %846 = arith.subf %836, %845 : vector<16x64xf32>
    %847 = arith.mulf %846, %846 : vector<16x64xf32>
    %cst_324 = arith.constant dense<0.000000e+00> : vector<16xf32>
    %848 = vector.multi_reduction <add>, %847, %cst_324 [1] : vector<16x64xf32> to vector<16xf32>
    %849 = vector.shape_cast %848 : vector<16xf32> to vector<16x1xf32>
    %cst_325 = arith.constant 6.400000e+01 : f32
    %850 = vector.broadcast %cst_325 : f32 to vector<16x1xf32>
    %851 = arith.divf %849, %850 : vector<16x1xf32>
    %852 = vector.broadcast %844 : vector<16x1xf32> to vector<16x64xf32>
    %853 = arith.subf %836, %852 : vector<16x64xf32>
    %cst_326 = arith.constant 9.99999996E-13 : f32
    %854 = vector.broadcast %cst_326 : f32 to vector<16x1xf32>
    %855 = arith.addf %851, %854 : vector<16x1xf32>
    %856 = math.rsqrt %855 : vector<16x1xf32>
    %857 = vector.broadcast %856 : vector<16x1xf32> to vector<16x64xf32>
    %858 = arith.mulf %853, %857 : vector<16x64xf32>
    %859 = vector.broadcast %838 : vector<1x64xf32> to vector<16x64xf32>
    %860 = arith.mulf %858, %859 : vector<16x64xf32>
    %861 = vector.broadcast %840 : vector<1x64xf32> to vector<16x64xf32>
    %862 = arith.addf %860, %861 : vector<16x64xf32>
    %863 = arith.truncf %862 : vector<16x64xf32> to vector<16x64xbf16>
    %c5_327 = arith.constant 5 : index
    %c0_328 = arith.constant 0 : index
    %c0_329 = arith.constant 0 : index
    %864 = vector.load %arg11[%c5_327, %c0_328, %c0_329] : memref<6x64x256xbf16, #tpu.memory_space<vmem>>, vector<1x64x256xbf16>
    %865 = vector.shape_cast %864 : vector<1x64x256xbf16> to vector<64x256xbf16>
    %cst_330 = arith.constant dense<0.000000e+00> : vector<16x256xf32>
    %866 = tpu.matmul %863, %865, %cst_330 {dimension_numbers = #tpu.dot_dimension_numbers<[1], [0], [0], [1], [0, 0, 1, 1], [], []>} : vector<16x64xbf16>, vector<64x256xbf16>, vector<16x256xf32> -> vector<16x256xf32>
    %c5_331 = arith.constant 5 : index
    %c0_332 = arith.constant 0 : index
    %c0_333 = arith.constant 0 : index
    %867 = vector.load %arg12[%c5_331, %c0_332, %c0_333] : memref<6x1x256xf32, #tpu.memory_space<vmem>>, vector<1x1x256xf32>
    %868 = vector.shape_cast %867 : vector<1x1x256xf32> to vector<1x256xf32>
    %869 = vector.broadcast %868 : vector<1x256xf32> to vector<16x256xf32>
    %870 = arith.addf %866, %869 : vector<16x256xf32>
    %cst_334 = arith.constant 5.000000e-01 : f32
    %871 = vector.broadcast %cst_334 : f32 to vector<16x256xf32>
    %872 = arith.mulf %871, %870 : vector<16x256xf32>
    %cst_335 = arith.constant 0.707106769 : f32
    %873 = vector.broadcast %cst_335 : f32 to vector<16x256xf32>
    %874 = arith.mulf %870, %873 : vector<16x256xf32>
    %875 = math.erf %874 : vector<16x256xf32>
    %cst_336 = arith.constant 1.000000e+00 : f32
    %876 = vector.broadcast %cst_336 : f32 to vector<16x256xf32>
    %877 = arith.addf %876, %875 : vector<16x256xf32>
    %878 = arith.mulf %872, %877 : vector<16x256xf32>
    %879 = arith.truncf %878 : vector<16x256xf32> to vector<16x256xbf16>
    %c5_337 = arith.constant 5 : index
    %c0_338 = arith.constant 0 : index
    %c0_339 = arith.constant 0 : index
    %880 = vector.load %arg13[%c5_337, %c0_338, %c0_339] : memref<6x256x64xbf16, #tpu.memory_space<vmem>>, vector<1x256x64xbf16>
    %881 = vector.shape_cast %880 : vector<1x256x64xbf16> to vector<256x64xbf16>
    %cst_340 = arith.constant dense<0.000000e+00> : vector<16x64xf32>
    %882 = tpu.matmul %879, %881, %cst_340 {dimension_numbers = #tpu.dot_dimension_numbers<[1], [0], [0], [1], [0, 0, 1, 1], [], []>} : vector<16x256xbf16>, vector<256x64xbf16>, vector<16x64xf32> -> vector<16x64xf32>
    %c5_341 = arith.constant 5 : index
    %c0_342 = arith.constant 0 : index
    %c0_343 = arith.constant 0 : index
    %883 = vector.load %arg14[%c5_341, %c0_342, %c0_343] : memref<6x1x64xf32, #tpu.memory_space<vmem>>, vector<1x1x64xf32>
    %884 = vector.shape_cast %883 : vector<1x1x64xf32> to vector<1x64xf32>
    %885 = vector.broadcast %884 : vector<1x64xf32> to vector<16x64xf32>
    %886 = arith.addf %882, %885 : vector<16x64xf32>
    %887 = arith.addf %886, %862 : vector<16x64xf32>
    %c5_344 = arith.constant 5 : index
    %c0_345 = arith.constant 0 : index
    %c0_346 = arith.constant 0 : index
    %888 = vector.load %arg15[%c5_344, %c0_345, %c0_346] : memref<6x1x64xf32, #tpu.memory_space<vmem>>, vector<1x1x64xf32>
    %889 = vector.shape_cast %888 : vector<1x1x64xf32> to vector<1x64xf32>
    %c5_347 = arith.constant 5 : index
    %c0_348 = arith.constant 0 : index
    %c0_349 = arith.constant 0 : index
    %890 = vector.load %arg16[%c5_347, %c0_348, %c0_349] : memref<6x1x64xf32, #tpu.memory_space<vmem>>, vector<1x1x64xf32>
    %891 = vector.shape_cast %890 : vector<1x1x64xf32> to vector<1x64xf32>
    %cst_350 = arith.constant dense<0.000000e+00> : vector<16xf32>
    %892 = vector.multi_reduction <add>, %887, %cst_350 [1] : vector<16x64xf32> to vector<16xf32>
    %893 = vector.shape_cast %892 : vector<16xf32> to vector<16x1xf32>
    %cst_351 = arith.constant 6.400000e+01 : f32
    %894 = vector.broadcast %cst_351 : f32 to vector<16x1xf32>
    %895 = arith.divf %893, %894 : vector<16x1xf32>
    %896 = vector.broadcast %895 : vector<16x1xf32> to vector<16x64xf32>
    %897 = arith.subf %887, %896 : vector<16x64xf32>
    %898 = arith.mulf %897, %897 : vector<16x64xf32>
    %cst_352 = arith.constant dense<0.000000e+00> : vector<16xf32>
    %899 = vector.multi_reduction <add>, %898, %cst_352 [1] : vector<16x64xf32> to vector<16xf32>
    %900 = vector.shape_cast %899 : vector<16xf32> to vector<16x1xf32>
    %cst_353 = arith.constant 6.400000e+01 : f32
    %901 = vector.broadcast %cst_353 : f32 to vector<16x1xf32>
    %902 = arith.divf %900, %901 : vector<16x1xf32>
    %903 = vector.broadcast %895 : vector<16x1xf32> to vector<16x64xf32>
    %904 = arith.subf %887, %903 : vector<16x64xf32>
    %cst_354 = arith.constant 9.99999996E-13 : f32
    %905 = vector.broadcast %cst_354 : f32 to vector<16x1xf32>
    %906 = arith.addf %902, %905 : vector<16x1xf32>
    %907 = math.rsqrt %906 : vector<16x1xf32>
    %908 = vector.broadcast %907 : vector<16x1xf32> to vector<16x64xf32>
    %909 = arith.mulf %904, %908 : vector<16x64xf32>
    %910 = vector.broadcast %889 : vector<1x64xf32> to vector<16x64xf32>
    %911 = arith.mulf %909, %910 : vector<16x64xf32>
    %912 = vector.broadcast %891 : vector<1x64xf32> to vector<16x64xf32>
    %913 = arith.addf %911, %912 : vector<16x64xf32>
    %914 = arith.truncf %913 : vector<16x64xf32> to vector<16x64xbf16>
    %c0_355 = arith.constant 0 : index
    %c0_356 = arith.constant 0 : index
    %915 = vector.load %arg17[%c0_355, %c0_356] : memref<64x64xbf16, #tpu.memory_space<vmem>>, vector<64x64xbf16>
    %cst_357 = arith.constant dense<0.000000e+00> : vector<16x64xf32>
    %916 = tpu.matmul %914, %915, %cst_357 {dimension_numbers = #tpu.dot_dimension_numbers<[1], [0], [0], [1], [0, 0, 1, 1], [], []>} : vector<16x64xbf16>, vector<64x64xbf16>, vector<16x64xf32> -> vector<16x64xf32>
    %c0_358 = arith.constant 0 : index
    %c0_359 = arith.constant 0 : index
    %917 = vector.load %arg18[%c0_358, %c0_359] : memref<1x64xf32, #tpu.memory_space<vmem>>, vector<1x64xf32>
    %918 = vector.broadcast %917 : vector<1x64xf32> to vector<16x64xf32>
    %919 = arith.addf %916, %918 : vector<16x64xf32>
    %cst_360 = arith.constant 5.000000e-01 : f32
    %920 = vector.broadcast %cst_360 : f32 to vector<16x64xf32>
    %921 = arith.mulf %920, %919 : vector<16x64xf32>
    %cst_361 = arith.constant 0.707106769 : f32
    %922 = vector.broadcast %cst_361 : f32 to vector<16x64xf32>
    %923 = arith.mulf %919, %922 : vector<16x64xf32>
    %924 = math.erf %923 : vector<16x64xf32>
    %cst_362 = arith.constant 1.000000e+00 : f32
    %925 = vector.broadcast %cst_362 : f32 to vector<16x64xf32>
    %926 = arith.addf %925, %924 : vector<16x64xf32>
    %927 = arith.mulf %921, %926 : vector<16x64xf32>
    %c0_363 = arith.constant 0 : index
    %c0_364 = arith.constant 0 : index
    %928 = vector.load %arg19[%c0_363, %c0_364] : memref<1x64xf32, #tpu.memory_space<vmem>>, vector<1x64xf32>
    %c0_365 = arith.constant 0 : index
    %c0_366 = arith.constant 0 : index
    %929 = vector.load %arg20[%c0_365, %c0_366] : memref<1x64xf32, #tpu.memory_space<vmem>>, vector<1x64xf32>
    %cst_367 = arith.constant dense<0.000000e+00> : vector<16xf32>
    %930 = vector.multi_reduction <add>, %927, %cst_367 [1] : vector<16x64xf32> to vector<16xf32>
    %931 = vector.shape_cast %930 : vector<16xf32> to vector<16x1xf32>
    %cst_368 = arith.constant 6.400000e+01 : f32
    %932 = vector.broadcast %cst_368 : f32 to vector<16x1xf32>
    %933 = arith.divf %931, %932 : vector<16x1xf32>
    %934 = vector.broadcast %933 : vector<16x1xf32> to vector<16x64xf32>
    %935 = arith.subf %927, %934 : vector<16x64xf32>
    %936 = arith.mulf %935, %935 : vector<16x64xf32>
    %cst_369 = arith.constant dense<0.000000e+00> : vector<16xf32>
    %937 = vector.multi_reduction <add>, %936, %cst_369 [1] : vector<16x64xf32> to vector<16xf32>
    %938 = vector.shape_cast %937 : vector<16xf32> to vector<16x1xf32>
    %cst_370 = arith.constant 6.400000e+01 : f32
    %939 = vector.broadcast %cst_370 : f32 to vector<16x1xf32>
    %940 = arith.divf %938, %939 : vector<16x1xf32>
    %941 = vector.broadcast %933 : vector<16x1xf32> to vector<16x64xf32>
    %942 = arith.subf %927, %941 : vector<16x64xf32>
    %cst_371 = arith.constant 9.99999996E-13 : f32
    %943 = vector.broadcast %cst_371 : f32 to vector<16x1xf32>
    %944 = arith.addf %940, %943 : vector<16x1xf32>
    %945 = math.rsqrt %944 : vector<16x1xf32>
    %946 = vector.broadcast %945 : vector<16x1xf32> to vector<16x64xf32>
    %947 = arith.mulf %942, %946 : vector<16x64xf32>
    %948 = vector.broadcast %928 : vector<1x64xf32> to vector<16x64xf32>
    %949 = arith.mulf %947, %948 : vector<16x64xf32>
    %950 = vector.broadcast %929 : vector<1x64xf32> to vector<16x64xf32>
    %951 = arith.addf %949, %950 : vector<16x64xf32>
    %952 = arith.truncf %951 : vector<16x64xf32> to vector<16x64xbf16>
    %c0_372 = arith.constant 0 : index
    %c0_373 = arith.constant 0 : index
    %953 = vector.load %arg21[%c0_372, %c0_373] : memref<64x256xbf16, #tpu.memory_space<vmem>>, vector<64x256xbf16>
    %cst_374 = arith.constant dense<0.000000e+00> : vector<16x256xf32>
    %954 = tpu.matmul %952, %953, %cst_374 {dimension_numbers = #tpu.dot_dimension_numbers<[1], [0], [0], [1], [0, 0, 1, 1], [], []>} : vector<16x64xbf16>, vector<64x256xbf16>, vector<16x256xf32> -> vector<16x256xf32>
    %c0_375 = arith.constant 0 : index
    %c0_376 = arith.constant 0 : index
    %955 = vector.load %arg22[%c0_375, %c0_376] : memref<1x256xf32, #tpu.memory_space<vmem>>, vector<1x256xf32>
    %956 = vector.broadcast %955 : vector<1x256xf32> to vector<16x256xf32>
    %957 = arith.addf %954, %956 : vector<16x256xf32>
    %c0_377 = arith.constant 0 : index
    %c0_378 = arith.constant 0 : index
    %958 = vector.load %arg24[%c0_377, %c0_378] : memref<16x256xf32, #tpu.memory_space<vmem>>, vector<16x256xf32>
    tpu.vector_store %arg24[%c0_377, %c0_378], %957 {strides = array<i32>} : memref<16x256xf32, #tpu.memory_space<vmem>>, vector<16x256xf32>,
    %c0_379 = arith.constant 0 : index
    %c0_380 = arith.constant 0 : index
    %959 = vector.load %arg23[%c0_379, %c0_380] : memref<16x1xi32, #tpu.memory_space<vmem>>, vector<16x1xi32>
    %cst_381 = arith.constant dense<0xFF800000> : vector<16xf32>
    %960 = vector.multi_reduction <maximumf>, %957, %cst_381 [1] : vector<16x256xf32> to vector<16xf32>
    %961 = vector.shape_cast %960 : vector<16xf32> to vector<16x1xf32>
    %962 = vector.broadcast %961 : vector<16x1xf32> to vector<16x256xf32>
    %963 = arith.subf %957, %962 : vector<16x256xf32>
    %964 = math.exp %963 : vector<16x256xf32>
    %cst_382 = arith.constant dense<0.000000e+00> : vector<16xf32>
    %965 = vector.multi_reduction <add>, %964, %cst_382 [1] : vector<16x256xf32> to vector<16xf32>
    %966 = vector.shape_cast %965 : vector<16xf32> to vector<16x1xf32>
    %967 = math.log %966 : vector<16x1xf32>
    %968 = arith.addf %967, %961 : vector<16x1xf32>
    %969 = tpu.iota {dimensions = array<i32: 1>} : vector<16x256xi32>
    %970 = vector.broadcast %959 : vector<16x1xi32> to vector<16x256xi32>
    %971 = arith.cmpi eq, %969, %970 : vector<16x256xi32>
    %cst_383 = arith.constant 0.000000e+00 : f32
    %972 = vector.broadcast %cst_383 : f32 to vector<16x256xf32>
    %973 = arith.select %971, %957, %972 : vector<16x256xi1>, vector<16x256xf32>
    %cst_384 = arith.constant dense<0.000000e+00> : vector<16xf32>
    %974 = vector.multi_reduction <add>, %973, %cst_384 [1] : vector<16x256xf32> to vector<16xf32>
    %975 = vector.shape_cast %974 : vector<16xf32> to vector<16x1xf32>
    %c-100_i32 = arith.constant -100 : i32
    %976 = vector.broadcast %c-100_i32 : i32 to vector<16x1xi32>
    %977 = arith.cmpi ne, %959, %976 : vector<16x1xi32>
    %978 = arith.extui %977 : vector<16x1xi1> to vector<16x1xi32>
    %979 = arith.sitofp %978 : vector<16x1xi32> to vector<16x1xf32>
    %980 = arith.subf %968, %975 : vector<16x1xf32>
    %981 = arith.mulf %980, %979 : vector<16x1xf32>
    %c0_385 = arith.constant 0 : index
    %c0_386 = arith.constant 0 : index
    %982 = vector.load %arg25[%c0_385, %c0_386] : memref<16x1xf32, #tpu.memory_space<vmem>>, vector<16x1xf32>
    tpu.vector_store %arg25[%c0_385, %c0_386], %981 {strides = array<i32>} : memref<16x1xf32, #tpu.memory_space<vmem>>, vector<16x1xf32>,
    return
  }
  func.func @transform_0(%arg0: i32) -> (i32, i32) {
    %c0_i32 = arith.constant 0 : i32
    %c0_i32_0 = arith.constant 0 : i32
    return %arg0, %c0_i32 : i32, i32
  }
  func.func @transform_1(%arg0: i32) -> (i32, i32, i32) {
    %c0_i32 = arith.constant 0 : i32
    %c0_i32_0 = arith.constant 0 : i32
    %c0_i32_1 = arith.constant 0 : i32
    return %arg0, %c0_i32, %c0_i32_0 : i32, i32, i32
  }
  func.func @transform_2(%arg0: i32) -> (i32, i32) {
    %c0_i32 = arith.constant 0 : i32
    %c0_i32_0 = arith.constant 0 : i32
    %c0_i32_1 = arith.constant 0 : i32
    return %c0_i32, %c0_i32_0 : i32, i32
  }
  func.func @transform_3(%arg0: i32) -> (i32, i32) {
    %c0_i32 = arith.constant 0 : i32
    %c0_i32_0 = arith.constant 0 : i32
    %c0_i32_1 = arith.constant 0 : i32
    return %c0_i32, %c0_i32_0 : i32, i32
  }
  func.func @transform_4(%arg0: i32) -> (i32, i32, i32) {
    %c0_i32 = arith.constant 0 : i32
    %c0_i32_0 = arith.constant 0 : i32
    %c0_i32_1 = arith.constant 0 : i32
    %c0_i32_2 = arith.constant 0 : i32
    return %c0_i32, %c0_i32_0, %c0_i32_1 : i32, i32, i32
  }
  func.func @transform_5(%arg0: i32) -> (i32, i32, i32) {
    %c0_i32 = arith.constant 0 : i32
    %c0_i32_0 = arith.constant 0 : i32
    %c0_i32_1 = arith.constant 0 : i32
    %c0_i32_2 = arith.constant 0 : i32
    return %c0_i32, %c0_i32_0, %c0_i32_1 : i32, i32, i32
  }
  func.func @transform_6(%arg0: i32) -> (i32, i32, i32) {
    %c0_i32 = arith.constant 0 : i32
    %c0_i32_0 = arith.constant 0 : i32
    %c0_i32_1 = arith.constant 0 : i32
    %c0_i32_2 = arith.constant 0 : i32
    return %c0_i32, %c0_i32_0, %c0_i32_1 : i32, i32, i32
  }
  func.func @transform_7(%arg0: i32) -> (i32, i32, i32) {
    %c0_i32 = arith.constant 0 : i32
    %c0_i32_0 = arith.constant 0 : i32
    %c0_i32_1 = arith.constant 0 : i32
    %c0_i32_2 = arith.constant 0 : i32
    return %c0_i32, %c0_i32_0, %c0_i32_1 : i32, i32, i32
  }
  func.func @transform_8(%arg0: i32) -> (i32, i32, i32) {
    %c0_i32 = arith.constant 0 : i32
    %c0_i32_0 = arith.constant 0 : i32
    %c0_i32_1 = arith.constant 0 : i32
    %c0_i32_2 = arith.constant 0 : i32
    return %c0_i32, %c0_i32_0, %c0_i32_1 : i32, i32, i32
  }
  func.func @transform_9(%arg0: i32) -> (i32, i32, i32) {
    %c0_i32 = arith.constant 0 : i32
    %c0_i32_0 = arith.constant 0 : i32
    %c0_i32_1 = arith.constant 0 : i32
    %c0_i32_2 = arith.constant 0 : i32
    return %c0_i32, %c0_i32_0, %c0_i32_1 : i32, i32, i32
  }
  func.func @transform_10(%arg0: i32) -> (i32, i32, i32) {
    %c0_i32 = arith.constant 0 : i32
    %c0_i32_0 = arith.constant 0 : i32
    %c0_i32_1 = arith.constant 0 : i32
    %c0_i32_2 = arith.constant 0 : i32
    return %c0_i32, %c0_i32_0, %c0_i32_1 : i32, i32, i32
  }
  func.func @transform_11(%arg0: i32) -> (i32, i32, i32) {
    %c0_i32 = arith.constant 0 : i32
    %c0_i32_0 = arith.constant 0 : i32
    %c0_i32_1 = arith.constant 0 : i32
    %c0_i32_2 = arith.constant 0 : i32
    return %c0_i32, %c0_i32_0, %c0_i32_1 : i32, i32, i32
  }
  func.func @transform_12(%arg0: i32) -> (i32, i32, i32) {
    %c0_i32 = arith.constant 0 : i32
    %c0_i32_0 = arith.constant 0 : i32
    %c0_i32_1 = arith.constant 0 : i32
    %c0_i32_2 = arith.constant 0 : i32
    return %c0_i32, %c0_i32_0, %c0_i32_1 : i32, i32, i32
  }
  func.func @transform_13(%arg0: i32) -> (i32, i32, i32) {
    %c0_i32 = arith.constant 0 : i32
    %c0_i32_0 = arith.constant 0 : i32
    %c0_i32_1 = arith.constant 0 : i32
    %c0_i32_2 = arith.constant 0 : i32
    return %c0_i32, %c0_i32_0, %c0_i32_1 : i32, i32, i32
  }
  func.func @transform_14(%arg0: i32) -> (i32, i32, i32) {
    %c0_i32 = arith.constant 0 : i32
    %c0_i32_0 = arith.constant 0 : i32
    %c0_i32_1 = arith.constant 0 : i32
    %c0_i32_2 = arith.constant 0 : i32
    return %c0_i32, %c0_i32_0, %c0_i32_1 : i32, i32, i32
  }
  func.func @transform_15(%arg0: i32) -> (i32, i32, i32) {
    %c0_i32 = arith.constant 0 : i32
    %c0_i32_0 = arith.constant 0 : i32
    %c0_i32_1 = arith.constant 0 : i32
    %c0_i32_2 = arith.constant 0 : i32
    return %c0_i32, %c0_i32_0, %c0_i32_1 : i32, i32, i32
  }
  func.func @transform_16(%arg0: i32) -> (i32, i32) {
    %c0_i32 = arith.constant 0 : i32
    %c0_i32_0 = arith.constant 0 : i32
    %c0_i32_1 = arith.constant 0 : i32
    return %c0_i32, %c0_i32_0 : i32, i32
  }
  func.func @transform_17(%arg0: i32) -> (i32, i32) {
    %c0_i32 = arith.constant 0 : i32
    %c0_i32_0 = arith.constant 0 : i32
    %c0_i32_1 = arith.constant 0 : i32
    return %c0_i32, %c0_i32_0 : i32, i32
  }
  func.func @transform_18(%arg0: i32) -> (i32, i32) {
    %c0_i32 = arith.constant 0 : i32
    %c0_i32_0 = arith.constant 0 : i32
    %c0_i32_1 = arith.constant 0 : i32
    return %c0_i32, %c0_i32_0 : i32, i32
  }
  func.func @transform_19(%arg0: i32) -> (i32, i32) {
    %c0_i32 = arith.constant 0 : i32
    %c0_i32_0 = arith.constant 0 : i32
    %c0_i32_1 = arith.constant 0 : i32
    return %c0_i32, %c0_i32_0 : i32, i32
  }
  func.func @transform_20(%arg0: i32) -> (i32, i32) {
    %c0_i32 = arith.constant 0 : i32
    %c0_i32_0 = arith.constant 0 : i32
    %c0_i32_1 = arith.constant 0 : i32
    return %c0_i32, %c0_i32_0 : i32, i32
  }
  func.func @transform_21(%arg0: i32) -> (i32, i32) {
    %c0_i32 = arith.constant 0 : i32
    %c0_i32_0 = arith.constant 0 : i32
    %c0_i32_1 = arith.constant 0 : i32
    return %c0_i32, %c0_i32_0 : i32, i32
  }
  func.func @transform_22(%arg0: i32) -> (i32, i32) {
    %c0_i32 = arith.constant 0 : i32
    %c0_i32_0 = arith.constant 0 : i32
    return %arg0, %c0_i32 : i32, i32
  }
  func.func @transform_23(%arg0: i32) -> (i32, i32) {
    %c0_i32 = arith.constant 0 : i32
    %c0_i32_0 = arith.constant 0 : i32
    return %arg0, %c0_i32 : i32, i32
  }
  func.func @transform_24(%arg0: i32) -> (i32, i32) {
    %c0_i32 = arith.constant 0 : i32
    %c0_i32_0 = arith.constant 0 : i32
    return %arg0, %c0_i32 : i32, i32
  }
}

</mosaic_0001>

<bundles_post_ra>
// kernel: bert_mlm_forward.1
= control target key start
LH: loop header
LB: loop body
LE: loop exit
PB: predicated region body
PF: predicated region fallthrough
CT: control target
= control target key end

     0   :  { %s14495_s0 = inlined_call_operand.vmem [shape: f32[32,64], index: 0, kind: input, shape index: {}]   ;;  %s14496_s1 = inlined_call_operand.vmem [shape: f32[2,1,16], index: 1, kind: input, shape index: {}]   ;;  %s14497_s2 = inlined_call_operand.vmem [shape: f32[1,64], index: 2, kind: input, shape index: {}]   ;;  %s14498_s3 = inlined_call_operand.vmem [shape: f32[1,64], index: 3, kind: input, shape index: {}]   ;;  %s14499_s4 = inlined_call_operand.vmem [shape: bf16[6,64,192], index: 4, kind: input, shape index: {}]   ;;  %s14500_s5 = inlined_call_operand.vmem [shape: f32[6,1,192], index: 5, kind: input, shape index: {}]   ;;  %s14501_s6 = inlined_call_operand.vmem [shape: bf16[6,64,64], index: 6, kind: input, shape index: {}]   ;;  %s14502_s7 = inlined_call_operand.vmem [shape: f32[6,1,64], index: 7, kind: input, shape index: {}]   ;;  %s14503_s8 = inlined_call_operand.vmem [shape: f32[6,1,64], index: 8, kind: input, shape index: {}]   ;;  %s14504_s9 = inlined_call_operand.vmem [shape: f32[6,1,64], index: 9, kind: input, shape index: {}]   ;;  %s14505_s10 = inlined_call_operand.vmem [shape: bf16[6,64,256], index: 10, kind: input, shape index: {}]   ;;  %s14506_s11 = inlined_call_operand.vmem [shape: f32[6,1,256], index: 11, kind: input, shape index: {}]   ;;  %s14507_s12 = inlined_call_operand.vmem [shape: bf16[6,256,64], index: 12, kind: input, shape index: {}]   ;;  %s14508_s13 = inlined_call_operand.vmem [shape: f32[6,1,64], index: 13, kind: input, shape index: {}]   ;;  %s14509_s14 = inlined_call_operand.vmem [shape: f32[6,1,64], index: 14, kind: input, shape index: {}]   ;;  %s14510_s15 = inlined_call_operand.vmem [shape: f32[6,1,64], index: 15, kind: input, shape index: {}]   ;;  %s14511_s16 = inlined_call_operand.vmem [shape: bf16[64,64], index: 16, kind: input, shape index: {}]   ;;  %s14512_s17 = inlined_call_operand.vmem [shape: f32[1,64], index: 17, kind: input, shape index: {}]   ;;  %s14513_s18 = inlined_call_operand.vmem [shape: f32[1,64], index: 18, kind: input, shape index: {}]   ;;  %s14514_s19 = inlined_call_operand.vmem [shape: f32[1,64], index: 19, kind: input, shape index: {}]   ;;  %s14515_s20 = inlined_call_operand.vmem [shape: bf16[64,256], index: 20, kind: input, shape index: {}]   ;;  %s14516_s21 = inlined_call_operand.vmem [shape: f32[1,256], index: 21, kind: input, shape index: {}]   ;;  %s14517_s22 = inlined_call_operand.vmem [shape: s32[32,1], index: 22, kind: input, shape index: {}]   ;;  %s14518_s23 = inlined_call_operand.vmem [shape: f32[32,256], index: 23, kind: output, shape index: {0}]   ;;  %s14519_s24 = inlined_call_operand.vmem [shape: f32[32,1], index: 24, kind: output, shape index: {1}]  }
   0x1   :  { %14544 = sst [smem:[#allocation5_spill]] %s14495_s0 }
   0x2   :  { %14545 = sst [smem:[#allocation6_spill]] %s14496_s1 }
   0x3   :  { %14546 = sst [smem:[#allocation7_spill]] %s14497_s2 }
   0x4   :  { %14547 = sst [smem:[#allocation8_spill]] %s14498_s3 }
   0x5   :  { %14548 = sst [smem:[#allocation9_spill]] %s14499_s4 }
   0x6   :  { %14549 = sst [smem:[#allocation10_spill]] %s14500_s5  ;;  %s12759_s5 = smov 0  }
   0x7   :  { %14550 = sst [smem:[#allocation11_spill]] %s14501_s6 }
   0x8   :  { %14551 = sst [smem:[#allocation12_spill]] %s14502_s7 }
   0x9   :  { %14552 = sst [smem:[#allocation13_spill]] %s14503_s8 }
   0xa   :  { %14553 = sst [smem:[#allocation14_spill]] %s14512_s17 }
   0xb   :  { %14554 = sst [smem:[#allocation15_spill]] %s14513_s18 }
   0xc   :  { %14555 = sst [smem:[#allocation16_spill]] %s14514_s19 }
   0xd   :  { %14556 = sst [smem:[#allocation17_spill]] %s14515_s20 }
   0xe   :  { %14557 = sst [smem:[#allocation18_spill]] %s14516_s21 }
   0xf   :  { %14558 = sst [smem:[#allocation19_spill]] %s14517_s22 }
  0x10   :  { %14559 = sst [smem:[#allocation20_spill]] %s14518_s23 }
  0x11   :  { %14560 = sst [smem:[#allocation21_spill]] %s14519_s24 }
  0x12 LB: > { %14561 = sst [smem:[#allocation2_spill]] %s12622_s5  ;;  %s12765_s26 = sadd.s32 4294967295, %s12622_s5   ;;  %s12622_s5 = sphi %s12759_s5, %s35_s5  }
  0x13   : > { %p9914_p0 = scmp.ge.s32.totalorder %s12622_s5, 1  ;;  %p685_p1 = scmp.lt.s32.totalorder %s12622_s5, 3 }
  0x15   : > { %p686_p2 = pnand %p9914_p0, %p685_p1 }
  0x17   : > { %689 = sbr.rel (%p686_p2) target bundleno = 17352 (0x43c8), region = 112 }
  0x1e   : > { %s9915_s27 = sshll.u32 %s12765_s26, 1  ;;  %vm798_vm0 = vcmask 523264   ;;  %s14564_s29 = sld [smem:[#allocation5_spill]]  ;;  %v12624_v18 = vmov 0   ;;  %v854_v40 = vlaneseq  ;;  %vm988_vm1 = vcmask 130048  }
  0x1f   : > { %p766_p3 = scmp.lt.s32.totalorder %s9915_s27, 3  ;;  %s14565_s3 = sld [smem:[#allocation9_spill]]  ;;  %939 = vmatprep.mubr.bf16.mxu0 %v12624_v18  ;;  %12021 = vset.pattern.permute.xlu1 %v12624_v18  ;;  %vm12847_vm2 = vmpackc.low %vm988_vm1, %vm988_vm1  ;;  %vm12630_vm3 = vmmov 0   ;;  %vm1793_vm4 = vcmask 261120   ;;  %vm1796_vm5 = vcmask 392192   ;;  %vm9794_vm12 = vcmask 7168  }
  0x20   : > { %12020 = vset.pattern.permute.xlu0 %v12624_v18  ;;  %s14567_s30 = sld [smem:[#allocation8_spill]]  ;;  %v855_v41 = vshrl.u32 %v854_v40, 7  ;;  %s14568_s4 = sld [smem:[#allocation10_spill]] }
  0x21   : > { %s14595_s27 = smov (!%p766_p3, %s9915_s27), 3  ;;  %s14537_s1 = smov 96  }
  0x22   : > { %14562 = sst [smem:[#allocation3_spill]] %s14595_s27  ;;  %s12773_s28 = sshll.u32 %s14595_s27, 3  ;;  %v12824_v42 = vsub.s32 0, %v855_v41  ;;  %v12829_v44 = vsub.s32 1, %v855_v41 }
  0x23   : > { %14563 = sst [smem:[#allocation4_spill]] %s12773_s28  ;;  %s14535_s6 = smov 112  }
  0x24   : > { %s769_s0 = scalar_lea.vmem %s14564_s29, %s12773_s28  ;;  %s14566_s29 = sld [smem:[#allocation7_spill]] }
  0x25   : > { %v794_v0 = vld [vmem:[%s769_s0] sm:$0xff]  ;;  %v795_v1 = vld [vmem:[%s769_s0 + $0x8] sm:$0xff]  ;;  %v12025_v16 = vld [vmem:[%s14565_s3 + $0x14] ss:$8 sps:$4 sm:$0xff]   ;;  %s14527_s2 = smov 80   ;;  %p771_p4 = scmp.lt.s32.totalorder %s12765_s26, 1 }
  0x26   : > { %v799_v2 = vsel %vm798_vm0, %v794_v0, 0.0  ;;  %v802_v3 = vsel %vm798_vm0, %v795_v1, 0.0  ;;  %v12022_v14 = vld [vmem:[%s14565_s3 + $0x4] ss:$8 sps:$4 sm:$0xff]   ;;  %v12024_v15 = vld [vmem:[%s14565_s3] ss:$8 sps:$4 sm:$0xff]  }
  0x27   : > { %800 = vadd.xlane.f32.xlu0 %v799_v2  ;;  %907 = vmatprep.subr.bf16.mxu0 %v12022_v14  ;;  %v12027_v17 = vld [vmem:[%s14565_s3 + $0x10] ss:$8 sps:$4 sm:$0xff]   ;;  %v12028_v19 = vld [vmem:[%s14565_s3 + $0x24] ss:$8 sps:$4 sm:$0xff]   ;;  %v12030_v20 = vld [vmem:[%s14565_s3 + $0x20] ss:$8 sps:$4 sm:$0xff]  }
  0x28   : > { %908 = vmatpush1.bf16.msra.mxu0 %v12024_v15  ;;  %v12031_v21 = vld [vmem:[%s14565_s3 + $0x34] ss:$8 sps:$4 sm:$0xff]   ;;  %v12033_v22 = vld [vmem:[%s14565_s3 + $0x30] ss:$8 sps:$4 sm:$0xff]   ;;  %v9925_v35 = vld [vmem:[%s14567_s30] ss:$0 sm:$0xff] }
  0x29   : > { %909 = vmatprep.subr.bf16.mxu0 %v12025_v16  ;;  %v852_v43 = vld [vmem:[%s14568_s4] sm:$0x3]  ;;  %s14597_s26 = smov (!%p771_p4, %s12765_s26), 1  ;;  %s14571_s30 = sld [smem:[#allocation6_spill]] }
  0x2a   : > { %v9924_v31 = vld [vmem:[%s14566_s29] ss:$0 sm:$0xff]  ;;  %v857_v45 = vrot.slane %v852_v43, %v12824_v42  ;;  %v861_v47 = vrot.slane %v852_v43, %v12829_v44  ;;  %s14525_s29 = smov 64   ;;  %s14572_s0 = sld [smem:[#allocation11_spill]] }
  0x2b   : > { %803 = vadd.xlane.f32.xlu0 %v802_v3  ;;  %s14529_s7 = smov 48   ;;  %s14573_s8 = sld [smem:[#allocation12_spill]] }
  0x2c   : > { %910 = vmatpush1.bf16.msra.mxu0 %v12027_v17  ;;  %s14574_s5 = sld [smem:[#allocation13_spill]]  ;;  %s14582_s22 = smov 48  }
  0x2d   : > { %911 = vmatprep.subr.bf16.mxu0 %v12028_v19  ;;  %s14584_s27 = sld [smem:[#allocation17_spill]]  ;;  %s14586_s17 = sld [smem:[#allocation15_spill]] }
  0x2e   : > { %s14590_s21 = sld [smem:[#allocation4_spill]]  ;;  %s14592_s24 = sld [smem:[#allocation21_spill]] }
  0x2f   : > { %s12880_s25 = scalar_lea.vmem %s14571_s30, %s14597_s26  ;;  %s14576_s30 = smov 96  }
  0x30   : > { %912 = vmatpush1.bf16.msra.mxu0 %v12030_v20  ;;  %s14577_s26 = smov 112  }
  0x31   : > { %913 = vmatprep.subr.bf16.mxu0 %v12031_v21 }
  0x34   : > { %914 = vmatpush1.bf16.msra.mxu0 %v12033_v22  ;;  %v12883_v22 = vld [vmem:[%s12880_s25] ss:$0 sm:$0xff] }
  0xb4   : > { %v801_v4 = vpop.xlane.xlu0 %800 }
  0xb5   : > { %v806_v5 = vmul.f32 0.015625, %v801_v4 }
  0xb7   : > { %v808_v6 = vsub.f32 %v794_v0, %v806_v5 }
  0xb8   : > { %v804_v7 = vpop.xlane.xlu0 %803 }
  0xb9   : > { %v807_v8 = vmul.f32 0.015625, %v804_v7  ;;  %v810_v9 = vmul.f32 %v808_v6, %v808_v6 }
  0xbb   : > { %v809_v10 = vsub.f32 %v795_v1, %v807_v8  ;;  %v812_v11 = vsel %vm798_vm0, %v810_v9, 0.0 }
  0xbc   : > { %813 = vadd.xlane.f32.xlu1 %v812_v11 }
  0xbd   : > { %v811_v12 = vmul.f32 %v809_v10, %v809_v10 }
  0xbf   : > { %v815_v13 = vsel %vm798_vm0, %v811_v12, 0.0 }
  0xc0   : > { %816 = vadd.xlane.f32.xlu1 %v815_v13 }
 0x149   : > { %v814_v23 = vpop.xlane.xlu1 %813 }
 0x14a   : > { %v818_v24 = vmul.f32 0.015625, %v814_v23 }
 0x14c   : > { %v820_v25 = vadd.f32 1e-12, %v818_v24 }
 0x14d   : > { %v817_v26 = vpop.xlane.xlu1 %816 }
 0x14e   : > { %12302 = vrsqrt.f32 %v820_v25  ;;  %v819_v27 = vmul.f32 0.015625, %v817_v26 }
 0x150   : > { %v821_v28 = vadd.f32 1e-12, %v819_v27 }
 0x152   : > { %12304 = vrsqrt.f32 %v821_v28 }
 0x158   : > { %v12303_v29 = vpop.eup %12302 }
 0x159   : > { %v824_v30 = vmul.f32 %v12303_v29, %v808_v6 }
 0x15b   : > { %v832_v34 = vmul.f32 %v9924_v31, %v824_v30 }
 0x15c   : > { %v12305_v32 = vpop.eup %12304 }
 0x15d   : > { %v825_v33 = vmul.f32 %v12305_v32, %v809_v10  ;;  %v12816_v37 = vadd.f32 %v9925_v35, %v832_v34 }
 0x15f   : > { %v833_v36 = vmul.f32 %v9924_v31, %v825_v33 }
 0x161   : > { %v12818_v38 = vadd.f32 %v9925_v35, %v833_v36 }
 0x163   : > { %v843_v39 = vpack.c.bf16 %v12818_v38, %v12816_v37 }
 0x165   : > { %9934 = vmatmul.mubr.msk.bf16.vlgmr.msra.gmra.mrb[0].mxu0 %vm798_vm0, %v843_v39 }
 0x238   : > { %v941_v46 = vpop.f32.mrb[0].mxu0 }
 0x239   : > { %v942_v48 = vadd.f32 %v941_v46, %v857_v45  ;;  %v943_v49 = vpop.f32.mrb[1].mxu0 }
 0x23a   : > { %v945_v50 = vpop.f32.mrb[2].mxu0  ;;  %v944_v52 = vadd.f32 %v943_v49, %v861_v47 }
 0x23b   : > { %v947_v51 = vpop.f32.mrb[3].mxu0  ;;  %956 = vrot.lane.b32.xlu1 %v942_v48, %s14537_s1  ;;  %952 = vrot.lane.b32.xlu0 %v942_v48, %s14535_s6  ;;  %v946_v54 = vadd.f32 %v945_v50, %v857_v45 }
 0x23c   : > { %v948_v53 = vadd.f32 %v947_v51, %v861_v47  ;;  %11046 = vmatprep.mubr.msk.f32.mxu1 %vm988_vm1, %v942_v48 }
 0x23d   : > { %v11720_v57 = vpack.i.bf16 %v946_v54, %v942_v48 }
 0x23e   : > { %v11486_v55 = vpack.c.bf16 %v948_v53, %v944_v52  ;;  %v12836_v56 = vpack.i.bf16 %v948_v53, %v944_v52 }
 0x23f   : > { %954 = vrot.lane.b32.xlu1 %v946_v54, %s14535_s6  ;;  %960 = vrot.lane.b32.xlu0 %v942_v48, %s14527_s2 }
 0x243   : > { %958 = vrot.lane.b32.xlu1 %v946_v54, %s14537_s1  ;;  %11721 = vrot.lane.b32.xlu0 %v11720_v57, %s14525_s29 }
 0x247   : > { %962 = vrot.lane.b32.xlu1 %v946_v54, %s14527_s2 }
 0x2ad   : > { %v957_v58 = vpop.permute.xlu1 %956  ;;  %v953_v59 = vpop.permute.xlu0 %952 }
 0x2ae   : > { %11060 = vmatprep.mubr.msk.f32.mxu0 %vm988_vm1, %v957_v58 }
 0x2b1   : > { %v955_v60 = vpop.permute.xlu1 %954  ;;  %v961_v61 = vpop.permute.xlu0 %960 }
 0x2b2   : > { %v11725_v62 = vpack.i.bf16 %v955_v60, %v953_v59 }
 0x2b4   : > { %11726 = vrot.lane.b32.xlu1 %v11725_v62, %s14525_s29 }
 0x2b5   : > { %v959_v63 = vpop.permute.xlu1 %958  ;;  %v11722_v0 = vpop.permute.xlu0 %11721 }
 0x2b6   : > { %v11730_v1 = vpack.i.bf16 %v959_v63, %v957_v58  ;;  %v11724_v2 = vunpack.i.h.bf16 %v11722_v0  ;;  %v11723_v3 = vunpack.i.l.bf16 %v11722_v0 }
 0x2b8   : > { %11731 = vrot.lane.b32.xlu0 %v11730_v1, %s14525_s29  ;;  %v11462_v5 = vpack.c.bf16 %v11724_v2, %v11723_v3 }
 0x2b9   : > { %v963_v6 = vpop.permute.xlu1 %962 }
 0x2ba   : > { %v11735_v7 = vpack.i.bf16 %v963_v6, %v961_v61  ;;  %11464 = vmatprep.subr.msk.bf16.mxu1 %vm12847_vm2, %v11462_v5 }
 0x2bb   : > { %11467 = vmatpush3.bf16.xpose.msk.msra.mxu1 %vm12847_vm2, %v11462_v5 }
 0x2bc   : > { %11736 = vrot.lane.b32.xlu1 %v11735_v7, %s14525_s29  ;;  %s14531_s29 = smov 16  }
 0x2c2   : > { %11047 = vmatmul.mubr.msk.f32.vlgmr.msra.gmra.mrb[0].mxu1 %vm988_vm1, %v946_v54 }
 0x2c3   : > { %11053 = vmatprep.mubr.msk.f32.mxu1 %vm988_vm1, %v953_v59 }
 0x326   : > { %v11727_v8 = vpop.permute.xlu1 %11726 }
 0x327   : > { %v11729_v9 = vunpack.i.h.bf16 %v11727_v8  ;;  %v11728_v10 = vunpack.i.l.bf16 %v11727_v8 }
 0x329   : > { %v11468_v11 = vpack.c.bf16 %v11729_v9, %v11728_v10 }
 0x32a   : > { %v11732_v12 = vpop.permute.xlu0 %11731 }
 0x32b   : > { %v11734_v13 = vunpack.i.h.bf16 %v11732_v12  ;;  %v11733_v14 = vunpack.i.l.bf16 %v11732_v12  ;;  %11470 = vmatprep.subr.msk.bf16.mxu1 %vm12847_vm2, %v11468_v11 }
 0x32c   : > { %11473 = vmatpush3.bf16.xpose.msk.msra.mxu1 %vm12847_vm2, %v11468_v11 }
 0x32d   : > { %v11474_v15 = vpack.c.bf16 %v11734_v13, %v11733_v14 }
 0x32e   : > { %v11737_v16 = vpop.permute.xlu1 %11736 }
 0x32f   : > { %v11739_v17 = vunpack.i.h.bf16 %v11737_v16  ;;  %v11738_v19 = vunpack.i.l.bf16 %v11737_v16  ;;  %11476 = vmatprep.subr.msk.bf16.mxu0 %vm12847_vm2, %v11474_v15 }
 0x330   : > { %11479 = vmatpush3.bf16.xpose.msk.msra.mxu0 %vm12847_vm2, %v11474_v15 }
 0x331   : > { %v11480_v20 = vpack.c.bf16 %v11739_v17, %v11738_v19  ;;  %11487 = vmatprep.subr.bf16.mxu0 %v11486_v55 }
 0x333   : > { %11054 = vmatmul.mubr.msk.f32.vlgmr.msra.gmra.mrb[2].mxu1 %vm988_vm1, %v955_v60  ;;  %11482 = vmatprep.subr.msk.bf16.mxu1 %vm12847_vm2, %v11480_v20 }
 0x334   : > { %11485 = vmatpush3.bf16.xpose.msk.msra.mxu1 %vm12847_vm2, %v11480_v20  ;;  %11067 = vmatprep.mubr.msk.f32.mxu1 %vm988_vm1, %v961_v61 }
 0x337   : > { %11061 = vmatmul.mubr.msk.f32.vlgmr.msra.gmra.mrb[4].mxu0 %vm988_vm1, %v959_v63 }
 0x338   : > { %11489 = vmatpush3.bf16.msra.mxu0 %v11486_v55 }
 0x33b   : > { %11068 = vmatmul.mubr.msk.f32.vlgmr.msra.gmra.mrb[4].mxu1 %vm988_vm1, %v963_v6 }
 0x395   : > { %v11048_v21 = vpop.f32.mrb[0].mxu1 }
 0x396   : > { %v1334_v23 = vmul.f32 0.25, %v11048_v21  ;;  %v1063_v24 = vpop.f32.mrb[1].mxu1 }
 0x397   : > { %v1333_v25 = vmul.f32 0.25, %v1063_v24 }
 0x398   : > { %v1348_v26 = vadd.f32 %v12883_v22, %v1334_v23 }
 0x399   : > { %v1347_v27 = vadd.f32 %v12883_v22, %v1333_v25 }
 0x39a   : > { %v1358_v28 = vsel %vm988_vm1, %v1348_v26, -inf }
 0x39b   : > { %1359 = vmax.xlane.f32.xlu1 %v1358_v28  ;;  %v1355_v29 = vsel %vm988_vm1, %v1347_v27, -inf }
 0x39c   : > { %1356 = vmax.xlane.f32.xlu0 %v1355_v29 }
 0x406   : > { %v11055_v30 = vpop.f32.mrb[2].mxu1 }
 0x407   : > { %v1336_v31 = vmul.f32 0.25, %v11055_v30  ;;  %v1150_v32 = vpop.f32.mrb[3].mxu1 }
 0x408   : > { %v1335_v33 = vmul.f32 0.25, %v1150_v32 }
 0x409   : > { %v1350_v34 = vadd.f32 %v12883_v22, %v1336_v31 }
 0x40a   : > { %v11062_v35 = vpop.f32.mrb[4].mxu0  ;;  %v1349_v43 = vadd.f32 %v12883_v22, %v1335_v33 }
 0x40b   : > { %v1338_v36 = vmul.f32 0.25, %v11062_v35  ;;  %v1237_v39 = vpop.f32.mrb[5].mxu0  ;;  %v1364_v41 = vsel %vm988_vm1, %v1350_v34, -inf }
 0x40c   : > { %v1337_v45 = vmul.f32 0.25, %v1237_v39  ;;  %1365 = vmax.xlane.f32.xlu0 %v1364_v41  ;;  %v1361_v51 = vsel %vm988_vm1, %v1349_v43, -inf }
 0x40d   : > { %v1352_v46 = vadd.f32 %v12883_v22, %v1338_v36 }
 0x40e   : > { %v11069_v47 = vpop.f32.mrb[4].mxu1  ;;  %v1351_v52 = vadd.f32 %v12883_v22, %v1337_v45 }
 0x40f   : > { %v1340_v48 = vmul.f32 0.25, %v11069_v47  ;;  %v1324_v49 = vpop.f32.mrb[5].mxu1  ;;  %v1370_v50 = vsel %vm988_vm1, %v1352_v46, -inf }
 0x410   : > { %v1339_v53 = vmul.f32 0.25, %v1324_v49  ;;  %1371 = vmax.xlane.f32.xlu1 %v1370_v50  ;;  %1362 = vmax.xlane.f32.xlu0 %v1361_v51  ;;  %v1367_v55 = vsel %vm988_vm1, %v1351_v52, -inf }
 0x411   : > { %v1354_v54 = vadd.f32 %v12883_v22, %v1340_v48 }
 0x412   : > { %v1353_v58 = vadd.f32 %v12883_v22, %v1339_v53 }
 0x413   : > { %v1376_v57 = vsel %vm988_vm1, %v1354_v54, -inf }
 0x414   : > { %1368 = vmax.xlane.f32.xlu0 %v1367_v55  ;;  %1377 = vmax.xlane.f32.xlu1 %v1376_v57  ;;  %v1373_v59 = vsel %vm988_vm1, %v1353_v58, -inf }
 0x418   : > { %1374 = vmax.xlane.f32.xlu0 %v1373_v59 }
 0x428   : > { %v1360_v60 = vpop.xlane.xlu1 %1359 }
 0x429   : > { %v1380_v61 = vsub.f32 %v1348_v26, %v1360_v60  ;;  %v1357_v62 = vpop.xlane.xlu0 %1356 }
 0x42a   : > { %v1379_v63 = vsub.f32 %v1347_v27, %v1357_v62 }
 0x42b   : > { %v1389_v0 = vmul.f32 1.442695, %v1380_v61 }
 0x42c   : > { %v1387_v1 = vmul.f32 1.442695, %v1379_v63 }
 0x42d   : > { %12306 = vpow2.f32 %v1389_v0 }
 0x42e   : > { %12308 = vpow2.f32 %v1387_v1 }
 0x437   : > { %v12307_v2 = vpop.eup %12306 }
 0x438   : > { %v12309_v3 = vpop.eup %12308  ;;  %v1406_v5 = vsel %vm988_vm1, %v12307_v2, 0.0 }
 0x439   : > { %1407 = vadd.xlane.f32.xlu1 %v1406_v5  ;;  %v1403_v6 = vsel %vm988_vm1, %v12309_v3, 0.0 }
 0x43a   : > { %1404 = vadd.xlane.f32.xlu0 %v1403_v6 }
 0x499   : > { %v1366_v7 = vpop.xlane.xlu0 %1365 }
 0x49a   : > { %v1382_v8 = vsub.f32 %v1350_v34, %v1366_v7 }
 0x49c   : > { %v1393_v9 = vmul.f32 1.442695, %v1382_v8 }
 0x49d   : > { %v1372_v10 = vpop.xlane.xlu1 %1371  ;;  %v1363_v11 = vpop.xlane.xlu0 %1362 }
 0x49e   : > { %12310 = vpow2.f32 %v1393_v9  ;;  %v1384_v12 = vsub.f32 %v1352_v46, %v1372_v10  ;;  %v1381_v13 = vsub.f32 %v1349_v43, %v1363_v11 }
 0x4a0   : > { %v1397_v14 = vmul.f32 1.442695, %v1384_v12  ;;  %v1391_v15 = vmul.f32 1.442695, %v1381_v13 }
 0x4a1   : > { %v1369_v16 = vpop.xlane.xlu0 %1368  ;;  %v1378_v17 = vpop.xlane.xlu1 %1377 }
 0x4a2   : > { %12312 = vpow2.f32 %v1397_v14  ;;  %v1383_v19 = vsub.f32 %v1351_v52, %v1369_v16  ;;  %v1386_v20 = vsub.f32 %v1354_v54, %v1378_v17 }
 0x4a3   : > { %12314 = vpow2.f32 %v1391_v15 }
 0x4a4   : > { %v1395_v21 = vmul.f32 1.442695, %v1383_v19  ;;  %v1401_v23 = vmul.f32 1.442695, %v1386_v20  ;;  %v12034_v20 = vld [vmem:[%s14572_s0] sm:$0xff]  }
 0x4a5   : > { %v1375_v24 = vpop.xlane.xlu0 %1374 }
 0x4a6   : > { %12316 = vpow2.f32 %v1395_v21  ;;  %v1385_v25 = vsub.f32 %v1353_v58, %v1375_v24  ;;  %v12629_v21 = vmov 0.0   ;;  %v12036_v24 = vld [vmem:[%s14572_s0 + $0x10] sm:$0xff]  }
 0x4a7   : > { %12318 = vpow2.f32 %v1401_v23  ;;  %v12035_v23 = vld [vmem:[%s14572_s0 + $0x8] sm:$0xff]  }
 0x4a8   : > { %v12903_v26 = vpop.eup %12310  ;;  %v1399_v27 = vmul.f32 1.442695, %v1385_v25  ;;  %v12037_v25 = vld [vmem:[%s14572_s0 + $0x18] sm:$0xff]  }
 0x4a9   : > { %v1412_v28 = vsel %vm988_vm1, %v12903_v26, 0.0 }
 0x4aa   : > { %12320 = vpow2.f32 %v1399_v27  ;;  %1413 = vadd.xlane.f32.xlu1 %v1412_v28 }
 0x4ac   : > { %v12907_v29 = vpop.eup %12312 }
 0x4ad   : > { %v12315_v30 = vpop.eup %12314  ;;  %v1418_v31 = vsel %vm988_vm1, %v12907_v29, 0.0 }
 0x4ae   : > { %1419 = vadd.xlane.f32.xlu1 %v1418_v31  ;;  %v1409_v32 = vsel %vm988_vm1, %v12315_v30, 0.0 }
 0x4af   : > { %1410 = vadd.xlane.f32.xlu0 %v1409_v32 }
 0x4b0   : > { %v12317_v33 = vpop.eup %12316 }
 0x4b1   : > { %v12912_v34 = vpop.eup %12318  ;;  %v1415_v35 = vsel %vm988_vm1, %v12317_v33, 0.0 }
 0x4b2   : > { %v1424_v36 = vsel %vm988_vm1, %v12912_v34, 0.0 }
 0x4b3   : > { %1425 = vadd.xlane.f32.xlu1 %v1424_v36  ;;  %1416 = vadd.xlane.f32.xlu0 %v1415_v35 }
 0x4b4   : > { %v12321_v39 = vpop.eup %12320 }
 0x4b5   : > { %v1421_v41 = vsel %vm988_vm1, %v12321_v39, 0.0 }
 0x4b7   : > { %1422 = vadd.xlane.f32.xlu0 %v1421_v41 }
 0x4c4   : > { %11746 = vrot.lane.b32.xlu1 %v12836_v56, %s14537_s1  ;;  %s14575_s1 = smov %s14574_s5 }
 0x4c6   : > { %v1408_v43 = vpop.xlane.xlu1 %1407 }
 0x4c7   : > { %12322 = vrcp.f32 %v1408_v43  ;;  %v1405_v45 = vpop.xlane.xlu0 %1404 }
 0x4c8   : > { %11751 = vrot.lane.b32.xlu1 %v12836_v56, %s14527_s2  ;;  %12324 = vrcp.f32 %v1405_v45  ;;  %s14533_s2 = smov 32  }
 0x4cd   : > { %11741 = vrot.lane.b32.xlu0 %v12836_v56, %s14535_s6  ;;  %s14587_s6 = sld [smem:[#allocation16_spill]] }
 0x4d1   : > { %v12323_v46 = vpop.eup %12322 }
 0x4d2   : > { %v12325_v47 = vpop.eup %12324  ;;  %v1430_v49 = vmul.f32 %v12323_v46, %v12307_v2 }
 0x4d3   : > { %v1428_v48 = vmul.f32 %v12325_v47, %v12309_v3 }
 0x4d5   : > { %11074 = vmatprep.mubr.msk.f32.mxu0 %vm988_vm1, %v1428_v48 }
 0x4d6   : > { %11075 = vmatmul.mubr.msk.f32.vlgmr.msra.gmra.mrb[6].mxu0 %vm988_vm1, %v1430_v49 }
 0x537   : > { %v1414_v50 = vpop.xlane.xlu1 %1413 }
 0x53b   : > { %v1420_v51 = vpop.xlane.xlu1 %1419 }
 0x53c   : > { %v1411_v52 = vpop.xlane.xlu0 %1410 }
 0x53d   : > { %12326 = vrcp.f32 %v1411_v52 }
 0x53e   : > { %12328 = vrcp.f32 %v1414_v50 }
 0x53f   : > { %12330 = vrcp.f32 %v1420_v51 }
 0x540   : > { %v1426_v53 = vpop.xlane.xlu1 %1425  ;;  %v1417_v54 = vpop.xlane.xlu0 %1416 }
 0x541   : > { %12332 = vrcp.f32 %v1417_v54 }
 0x544   : > { %v11747_v55 = vpop.permute.xlu1 %11746  ;;  %v1423_v57 = vpop.xlane.xlu0 %1422 }
 0x545   : > { %v11749_v56 = vunpack.i.h.bf16 %v11747_v55  ;;  %v11748_v58 = vunpack.i.l.bf16 %v11747_v55  ;;  %12334 = vrcp.f32 %v1423_v57  ;;  %v9960_v57 = vld [vmem:[%s14573_s8] ss:$0 sm:$0xff] }
 0x546   : > { %12336 = vrcp.f32 %v1426_v53 }
 0x547   : > { %v12327_v59 = vpop.eup %12326  ;;  %v11494_v60 = vpack.c.bf16 %v11749_v56, %v11748_v58 }
 0x548   : > { %v11752_v61 = vpop.permute.xlu1 %11751  ;;  %v11742_v62 = vpop.permute.xlu0 %11741  ;;  %v1432_v63 = vmul.f32 %v12327_v59, %v12315_v30 }
 0x549   : > { %v11754_v0 = vunpack.i.h.bf16 %v11752_v61  ;;  %v11753_v1 = vunpack.i.l.bf16 %v11752_v61  ;;  %v11744_v2 = vunpack.i.h.bf16 %v11742_v62  ;;  %v11743_v3 = vunpack.i.l.bf16 %v11742_v62  ;;  %11495 = vmatprep.subr.bf16.mxu0 %v11494_v60  ;;  %v12329_v5 = vpop.eup %12328 }
 0x54a   : > { %11081 = vmatprep.mubr.msk.f32.mxu1 %vm988_vm1, %v1432_v63  ;;  %11497 = vmatpush3.bf16.msra.mxu0 %v11494_v60  ;;  %v12331_v6 = vpop.eup %12330  ;;  %v1434_v13 = vmul.f32 %v12329_v5, %v12903_v26 }
 0x54b   : > { %v11490_v7 = vpack.c.bf16 %v11744_v2, %v11743_v3  ;;  %v12333_v8 = vpop.eup %12332  ;;  %v11498_v10 = vpack.c.bf16 %v11754_v0, %v11753_v1  ;;  %v1438_v11 = vmul.f32 %v12331_v6, %v12907_v29  ;;  %11098 = vmatprep.subr.bf16.mxu0 %v12629_v21 }
 0x54c   : > { %v1436_v9 = vmul.f32 %v12333_v8, %v12317_v33 }
 0x54d   : > { %11491 = vmatprep.subr.bf16.mxu1 %v11490_v7 }
 0x54e   : > { %11493 = vmatpush3.bf16.msra.mxu1 %v11490_v7  ;;  %11088 = vmatprep.mubr.msk.f32.mxu0 %vm988_vm1, %v1436_v9 }
 0x54f   : > { %v12335_v12 = vpop.eup %12334  ;;  %11499 = vmatprep.subr.bf16.mxu1 %v11498_v10  ;;  %11089 = vmatmul.mubr.msk.f32.vlgmr.msra.gmra.mrb[8].mxu0 %vm988_vm1, %v1438_v11 }
 0x550   : > { %v12337_v14 = vpop.eup %12336  ;;  %v1440_v15 = vmul.f32 %v12335_v12, %v12321_v39  ;;  %11099 = vmatpush3.bf16.msra.mxu0 %v12034_v20  ;;  %11106 = vmatprep.mubr.msk.bf16.mxu0 %vm12630_vm3, %v12629_v21  ;;  %v12049_v20 = vld [vmem:[%s14505_s10 + $0x34] ss:$8 sps:$4 sm:$0xff]  }
 0x551   : > { %11082 = vmatmul.mubr.msk.f32.vlgmr.msra.gmra.mrb[6].mxu1 %vm988_vm1, %v1434_v13  ;;  %v1442_v16 = vmul.f32 %v12337_v14, %v12912_v34  ;;  %11100 = vmatprep.subr.bf16.mxu0 %v12629_v21  ;;  %v12038_v13 = vld [vmem:[%s14505_s10] ss:$8 sps:$4 sm:$0xff]   ;;  %v12043_v14 = vld [vmem:[%s14505_s10 + $0x14] ss:$8 sps:$4 sm:$0xff]  }
 0x552   : > { %11501 = vmatpush3.bf16.msra.mxu1 %v11498_v10  ;;  %11095 = vmatprep.mubr.msk.f32.mxu1 %vm988_vm1, %v1440_v15  ;;  %v12041_v15 = vld [vmem:[%s14505_s10 + $0x10] ss:$8 sps:$4 sm:$0xff]  }
 0x554   : > { %11101 = vmatpush3.bf16.msra.mxu0 %v12035_v23  ;;  %v12050_v23 = vld [vmem:[%s14507_s12 + $0x40] sm:$0xff]  }
 0x555   : > { %11096 = vmatmul.mubr.msk.f32.vlgmr.msra.gmra.mrb[8].mxu1 %vm988_vm1, %v1442_v16  ;;  %11102 = vmatprep.subr.bf16.mxu0 %v12629_v21  ;;  %v12046_v16 = vld [vmem:[%s14505_s10 + $0x24] ss:$8 sps:$4 sm:$0xff]  }
 0x556   : > { %2025 = vmatprep.mubr.bf16.mxu1 %v12624_v18 }
 0x558   : > { %11103 = vmatpush3.bf16.msra.mxu0 %v12036_v24  ;;  %v12051_v24 = vld [vmem:[%s14507_s12] sm:$0xff]  }
 0x559   : > { %11104 = vmatprep.subr.bf16.mxu0 %v12629_v21 }
 0x55c   : > { %11105 = vmatpush3.bf16.msra.mxu0 %v12037_v25  ;;  %v12052_v25 = vld [vmem:[%s14507_s12 + $0x48] sm:$0xff]  }
 0x55d   : > { %10720 = vmatprep.subr.bf16.mxu0 %v12050_v23 }
 0x5a9   : > { %v11076_v17 = vpop.f32.mrb[6].mxu0 }
 0x5aa   : > { %v1515_v19 = vpop.f32.mrb[7].mxu0 }
 0x622   : > { %v11090_v26 = vpop.f32.mrb[8].mxu0 }
 0x623   : > { %v1677_v27 = vpop.f32.mrb[9].mxu0 }
 0x624   : > { %v11083_v28 = vpop.f32.mrb[6].mxu1  ;;  %v11760_v29 = vpack.i.bf16 %v11090_v26, %v1677_v27  ;;  %v12053_v26 = vld [vmem:[%s14507_s12 + $0x8] sm:$0xff]  }
 0x625   : > { %v1596_v30 = vpop.f32.mrb[7].mxu1 }
 0x626   : > { %v11755_v31 = vpack.i.bf16 %v11083_v28, %v1596_v30  ;;  %11761 = vrot.lane.b32.xlu0 %v11760_v29, %s14533_s2  ;;  %s14580_s2 = smov 32  }
 0x628   : > { %11756 = vrot.lane.b32.xlu1 %v11755_v31, %s14531_s29  ;;  %v11097_v32 = vpop.f32.mrb[8].mxu1  ;;  %s14578_s29 = smov 80  }
 0x629   : > { %v1758_v33 = vpop.f32.mrb[9].mxu1 }
 0x62a   : > { %v11765_v34 = vpack.i.bf16 %v11097_v32, %v1758_v33 }
 0x62c   : > { %11766 = vrot.lane.b32.xlu1 %v11765_v34, %s14529_s7  ;;  %s14579_s7 = smov 64  }
 0x698   : > { %v11762_v36 = vpop.permute.xlu0 %11761 }
 0x699   : > { %v11764_v46 = vunpack.i.h.bf16 %v11762_v36  ;;  %v11763_v47 = vunpack.i.l.bf16 %v11762_v36 }
 0x69a   : > { %v11757_v35 = vpop.permute.xlu1 %11756 }
 0x69b   : > { %v11759_v39 = vunpack.i.h.bf16 %v11757_v35  ;;  %v11758_v41 = vunpack.i.l.bf16 %v11757_v35  ;;  %v9966_v35 = vld [vmem:[%s14574_s5] ss:$0 sm:$0xff]  ;;  %s14581_s5 = smov 16  }
 0x69d   : > { %v1792_v43 = vsel %vm988_vm1, %v11076_v17, %v11759_v39  ;;  %v1791_v45 = vsel %vm988_vm1, %v1515_v19, %v11758_v41  ;;  %v12044_v17 = vld [vmem:[%s14505_s10 + $0x20] ss:$8 sps:$4 sm:$0xff]   ;;  %v12047_v19 = vld [vmem:[%s14505_s10 + $0x30] ss:$8 sps:$4 sm:$0xff]  }
 0x69e   : > { %v11767_v48 = vpop.permute.xlu1 %11766  ;;  %v1794_v51 = vsel %vm1793_vm4, %v1791_v45, %v11763_v47  ;;  %v1795_v52 = vsel %vm1793_vm4, %v1792_v43, %v11764_v46  ;;  %v9967_v43 = vld [vmem:[%s14504_s9] ss:$0 sm:$0xff] }
 0x69f   : > { %v11769_v49 = vunpack.i.h.bf16 %v11767_v48  ;;  %v11768_v50 = vunpack.i.l.bf16 %v11767_v48 }
 0x6a1   : > { %v1798_v53 = vsel %vm1796_vm5, %v1795_v52, %v11769_v49  ;;  %v1797_v54 = vsel %vm1796_vm5, %v1794_v51, %v11768_v50  ;;  %v12054_v49 = vld [vmem:[%s14507_s12 + $0x50] sm:$0xff]   ;;  %v12056_v51 = vld [vmem:[%s14507_s12 + $0x58] sm:$0xff]  }
 0x6a2   : > { %v1799_v55 = vpack.c.bf16 %v1798_v53, %v1797_v54  ;;  %v12055_v50 = vld [vmem:[%s14507_s12 + $0x10] sm:$0xff]   ;;  %v12057_v52 = vld [vmem:[%s14507_s12 + $0x18] sm:$0xff]   ;;  %v12058_v53 = vld [vmem:[%s14507_s12 + $0x60] sm:$0xff]  }
 0x6a3   : > { %v12059_v54 = vld [vmem:[%s14507_s12 + $0x20] sm:$0xff]  }
 0x6a4   : > { %11107 = vmatmul.mubr.msk.bf16.vlgmr.msra.gmra.mrb[12].mxu0 %vm798_vm0, %v1799_v55  ;;  %v12060_v55 = vld [vmem:[%s14507_s12 + $0x68] sm:$0xff]  }
 0x6a5   : > { %10721 = vmatpush3.bf16.msra.mxu0 %v12051_v24 }
 0x6a6   : > { %10722 = vmatprep.subr.bf16.mxu0 %v12052_v25 }
 0x6a9   : > { %10723 = vmatpush3.bf16.msra.mxu0 %v12053_v26 }
 0x6aa   : > { %10724 = vmatprep.subr.bf16.mxu0 %v12054_v49 }
 0x6ad   : > { %10725 = vmatpush3.bf16.msra.mxu0 %v12055_v50 }
 0x6ae   : > { %10726 = vmatprep.subr.bf16.mxu0 %v12056_v51 }
 0x6b1   : > { %10727 = vmatpush3.bf16.msra.mxu0 %v12057_v52 }
 0x6b2   : > { %10728 = vmatprep.subr.bf16.mxu0 %v12058_v53 }
 0x6b5   : > { %10729 = vmatpush3.bf16.msra.mxu0 %v12059_v54 }
 0x6b6   : > { %10730 = vmatprep.subr.bf16.mxu0 %v12060_v55 }
 0x777   : > { %v1876_v56 = vpop.f32.mrb[12].mxu0 }
 0x778   : > { %v1877_v58 = vadd.f32 %v9960_v57, %v1876_v56  ;;  %v11108_v59 = vpop.f32.mrb[13].mxu0  ;;  %v12062_v56 = vld [vmem:[%s14507_s12 + $0x70] sm:$0xff]  }
 0x779   : > { %v1879_v60 = vpop.f32.mrb[14].mxu0  ;;  %v12064_v59 = vld [vmem:[%s14507_s12 + $0x78] sm:$0xff]  }
 0x77a   : > { %v1880_v61 = vadd.f32 %v9960_v57, %v1879_v60  ;;  %v11109_v62 = vpop.f32.mrb[15].mxu0  ;;  %v1883_v63 = vadd.f32 %v1877_v58, %v12816_v37  ;;  %v12061_v57 = vld [vmem:[%s14507_s12 + $0x28] sm:$0xff]   ;;  %v12063_v58 = vld [vmem:[%s14507_s12 + $0x30] sm:$0xff]   ;;  %v12065_v60 = vld [vmem:[%s14507_s12 + $0x38] sm:$0xff]  }
 0x77b   : > { %10731 = vmatpush3.bf16.msra.mxu0 %v12061_v57 }
 0x77c   : > { %v1887_v0 = vsel %vm798_vm0, %v1883_v63, 0.0  ;;  %v1884_v1 = vadd.f32 %v1880_v61, %v12818_v38  ;;  %v12040_v38 = vld [vmem:[%s14505_s10 + $0x4] ss:$8 sps:$4 sm:$0xff]   ;;  %10732 = vmatprep.subr.bf16.mxu0 %v12062_v56  ;;  %v1938_v61 = vld [vmem:[%s14506_s11] sm:$0x3] }
 0x77d   : > { %1888 = vadd.xlane.f32.xlu0 %v1887_v0  ;;  %1993 = vmatprep.subr.bf16.mxu1 %v12040_v38  ;;  %v1943_v62 = vrot.slane %v1938_v61, %v12824_v42 }
 0x77e   : > { %v1890_v2 = vsel %vm798_vm0, %v1884_v1, 0.0  ;;  %1994 = vmatpush1.bf16.msra.mxu1 %v12038_v13 }
 0x77f   : > { %1891 = vadd.xlane.f32.xlu1 %v1890_v2  ;;  %1995 = vmatprep.subr.bf16.mxu1 %v12043_v14 }
 0x780   : > { %10733 = vmatpush3.bf16.msra.mxu0 %v12063_v58 }
 0x781   : > { %10734 = vmatprep.subr.bf16.mxu0 %v12064_v59 }
 0x782   : > { %1996 = vmatpush1.bf16.msra.mxu1 %v12041_v15 }
 0x783   : > { %1997 = vmatprep.subr.bf16.mxu1 %v12046_v16 }
 0x784   : > { %10735 = vmatpush3.bf16.msra.mxu0 %v12065_v60 }
 0x786   : > { %1998 = vmatpush1.bf16.msra.mxu1 %v12044_v17 }
 0x787   : > { %1999 = vmatprep.subr.bf16.mxu1 %v12049_v20 }
 0x78a   : > { %2000 = vmatpush1.bf16.msra.mxu1 %v12047_v19 }
 0x80a   : > { %v1889_v3 = vpop.xlane.xlu0 %1888 }
 0x80b   : > { %v1893_v5 = vmul.f32 0.015625, %v1889_v3 }
 0x80c   : > { %v1892_v6 = vpop.xlane.xlu1 %1891 }
 0x80d   : > { %v1895_v7 = vsub.f32 %v1883_v63, %v1893_v5  ;;  %v1894_v8 = vmul.f32 0.015625, %v1892_v6  ;;  %v1947_v63 = vrot.slane %v1938_v61, %v12829_v44  ;;  %v12066_v61 = vld [vmem:[%s14565_s3 + $0x40] ss:$8 sps:$4 sm:$0xff]  }
 0x80f   : > { %v1896_v9 = vsub.f32 %v1884_v1, %v1894_v8  ;;  %v1897_v10 = vmul.f32 %v1895_v7, %v1895_v7 }
 0x811   : > { %v1899_v11 = vsel %vm798_vm0, %v1897_v10, 0.0  ;;  %v1898_v12 = vmul.f32 %v1896_v9, %v1896_v9 }
 0x812   : > { %1900 = vadd.xlane.f32.xlu0 %v1899_v11 }
 0x813   : > { %v1902_v37 = vsel %vm798_vm0, %v1898_v12, 0.0 }
 0x816   : > { %1903 = vadd.xlane.f32.xlu0 %v1902_v37 }
 0x89f   : > { %v1901_v27 = vpop.xlane.xlu0 %1900 }
 0x8a0   : > { %v1905_v28 = vmul.f32 0.015625, %v1901_v27 }
 0x8a2   : > { %v1907_v29 = vadd.f32 1e-12, %v1905_v28 }
 0x8a3   : > { %v1904_v30 = vpop.xlane.xlu0 %1903 }
 0x8a4   : > { %12338 = vrsqrt.f32 %v1907_v29  ;;  %v1906_v31 = vmul.f32 0.015625, %v1904_v30 }
 0x8a6   : > { %v1908_v32 = vadd.f32 1e-12, %v1906_v31 }
 0x8a8   : > { %12340 = vrsqrt.f32 %v1908_v32 }
 0x8ae   : > { %v12339_v33 = vpop.eup %12338 }
 0x8af   : > { %v1911_v34 = vmul.f32 %v12339_v33, %v1895_v7  ;;  %v9977_v33 = vld [vmem:[%s14508_s13] ss:$0 sm:$0xff] }
 0x8b1   : > { %v1919_v39 = vmul.f32 %v9966_v35, %v1911_v34 }
 0x8b2   : > { %v12341_v36 = vpop.eup %12340 }
 0x8b3   : > { %v1912_v41 = vmul.f32 %v12341_v36, %v1896_v9  ;;  %v13015_v46 = vadd.f32 %v9967_v43, %v1919_v39 }
 0x8b5   : > { %v1920_v45 = vmul.f32 %v9966_v35, %v1912_v41 }
 0x8b7   : > { %v13017_v47 = vadd.f32 %v9967_v43, %v1920_v45 }
 0x8b9   : > { %v1929_v48 = vpack.c.bf16 %v13017_v47, %v13015_v46 }
 0x8bb   : > { %9976 = vmatmul.mubr.msk.bf16.vlgmr.msra.gmra.mrb[12].mxu1 %vm798_vm0, %v1929_v48 }
 0x8bc   : > { %2378 = vmatprep.mubr.bf16.mxu1 %v12624_v18 }
 0x98e   : > { %v2027_v0 = vpop.f32.mrb[12].mxu1 }
 0x98f   : > { %v2028_v1 = vadd.f32 %v2027_v0, %v1943_v62  ;;  %v2029_v2 = vpop.f32.mrb[13].mxu1  ;;  %v12074_v0 = vld [vmem:[%s14565_s3 + $0x64] ss:$8 sps:$4 sm:$0xff]  }
 0x990   : > { %v2030_v3 = vadd.f32 %v2029_v2, %v1947_v63  ;;  %v2031_v5 = vpop.f32.mrb[14].mxu1  ;;  %v12075_v2 = vld [vmem:[%s14565_s3 + $0x70] ss:$8 sps:$4 sm:$0xff]  }
 0x991   : > { %v2040_v6 = vmul.f32 0.70710677, %v2028_v1  ;;  %v2032_v7 = vadd.f32 %v2031_v5, %v1943_v62  ;;  %v2033_v8 = vpop.f32.mrb[15].mxu1  ;;  %v2036_v17 = vmul.f32 0.5, %v2028_v1  ;;  %v12071_v62 = vld [vmem:[%s14565_s3 + $0x54] ss:$8 sps:$4 sm:$0xff]  }
 0x992   : > { %v2041_v9 = vmul.f32 0.70710677, %v2030_v3  ;;  %v2034_v10 = vadd.f32 %v2033_v8, %v1947_v63  ;;  %v2037_v23 = vmul.f32 0.5, %v2030_v3  ;;  %v12069_v63 = vld [vmem:[%s14565_s3 + $0x50] ss:$8 sps:$4 sm:$0xff]  }
 0x993   : > { %12342 = verf.f32 %v2040_v6  ;;  %v2042_v11 = vmul.f32 0.70710677, %v2032_v7  ;;  %v2038_v19 = vmul.f32 0.5, %v2032_v7  ;;  %v12072_v1 = vld [vmem:[%s14565_s3 + $0x60] ss:$8 sps:$4 sm:$0xff]  }
 0x994   : > { %12344 = verf.f32 %v2041_v9  ;;  %v2043_v12 = vmul.f32 0.70710677, %v2034_v10  ;;  %v2039_v24 = vmul.f32 0.5, %v2034_v10  ;;  %v12077_v3 = vld [vmem:[%s14565_s3 + $0x74] ss:$8 sps:$4 sm:$0xff]  }
 0x995   : > { %12346 = verf.f32 %v2042_v11 }
 0x996   : > { %12348 = verf.f32 %v2043_v12  ;;  %v9994_v12 = vld [vmem:[%s14509_s14] ss:$0 sm:$0xff] }
 0x99d   : > { %v12343_v37 = vpop.eup %12342 }
 0x99e   : > { %v12345_v38 = vpop.eup %12344  ;;  %v2048_v13 = vadd.f32 1.0, %v12343_v37 }
 0x99f   : > { %v12347_v14 = vpop.eup %12346  ;;  %v2049_v15 = vadd.f32 1.0, %v12345_v38 }
 0x9a0   : > { %v12349_v16 = vpop.eup %12348  ;;  %v2050_v20 = vadd.f32 1.0, %v12347_v14  ;;  %v2052_v26 = vmul.f32 %v2048_v13, %v2036_v17 }
 0x9a1   : > { %v2051_v25 = vadd.f32 1.0, %v12349_v16  ;;  %v2053_v28 = vmul.f32 %v2049_v15, %v2037_v23  ;;  %v9995_v15 = vld [vmem:[%s14510_s15] ss:$0 sm:$0xff]  ;;  %v10004_v23 = vld [vmem:[%s14568_s4 + $0x2] sm:$0x3] }
 0x9a2   : > { %v2054_v27 = vmul.f32 %v2050_v20, %v2038_v19 }
 0x9a3   : > { %v2055_v29 = vmul.f32 %v2051_v25, %v2039_v24  ;;  %v2296_v24 = vrot.slane %v10004_v23, %v12824_v42 }
 0x9a4   : > { %v2056_v30 = vpack.c.bf16 %v2054_v27, %v2052_v26  ;;  %v2300_v26 = vrot.slane %v10004_v23, %v12829_v44 }
 0x9a5   : > { %v2057_v31 = vpack.c.bf16 %v2055_v29, %v2053_v28 }
 0x9a7   : > { %2225 = vmatprep.mubr.bf16.mxu0 %v2057_v31 }
 0x9a8   : > { %2226 = vmatmul.mubr.bf16.vlgmr.msra.gmra.mrb[16].mxu0 %v2056_v30 }
 0xa7b   : > { %v10736_v32 = vpop.f32.mrb[16].mxu0 }
 0xa7c   : > { %v10737_v34 = vpop.f32.mrb[17].mxu0 }
 0xa7d   : > { %v10738_v35 = vadd.f32 %v10737_v34, %v10736_v32  ;;  %v10739_v36 = vpop.f32.mrb[18].mxu0 }
 0xa7e   : > { %v10740_v39 = vpop.f32.mrb[19].mxu0 }
 0xa7f   : > { %v2228_v41 = vadd.f32 %v10738_v35, %v9977_v33  ;;  %v10741_v43 = vadd.f32 %v10740_v39, %v10739_v36 }
 0xa81   : > { %v2231_v45 = vadd.f32 %v10741_v43, %v9977_v33  ;;  %v2234_v48 = vadd.f32 %v2228_v41, %v13015_v46 }
 0xa83   : > { %v2238_v49 = vsel %vm798_vm0, %v2234_v48, 0.0  ;;  %v2235_v50 = vadd.f32 %v2231_v45, %v13017_v47  ;;  %v12068_v47 = vld [vmem:[%s14565_s3 + $0x44] ss:$8 sps:$4 sm:$0xff]  }
 0xa84   : > { %2239 = vadd.xlane.f32.xlu0 %v2238_v49  ;;  %2346 = vmatprep.subr.bf16.mxu1 %v12068_v47 }
 0xa85   : > { %v2241_v51 = vsel %vm798_vm0, %v2235_v50, 0.0  ;;  %2347 = vmatpush1.bf16.msra.mxu1 %v12066_v61 }
 0xa86   : > { %2242 = vadd.xlane.f32.xlu1 %v2241_v51  ;;  %2348 = vmatprep.subr.bf16.mxu1 %v12071_v62 }
 0xa89   : > { %2349 = vmatpush1.bf16.msra.mxu1 %v12069_v63 }
 0xa8a   : > { %2350 = vmatprep.subr.bf16.mxu1 %v12074_v0 }
 0xa8d   : > { %2351 = vmatpush1.bf16.msra.mxu1 %v12072_v1 }
 0xa8e   : > { %2352 = vmatprep.subr.bf16.mxu1 %v12077_v3 }
 0xa91   : > { %2353 = vmatpush1.bf16.msra.mxu1 %v12075_v2 }
 0xb11   : > { %v2240_v52 = vpop.xlane.xlu0 %2239 }
 0xb12   : > { %v2244_v53 = vmul.f32 0.015625, %v2240_v52 }
 0xb13   : > { %v2243_v54 = vpop.xlane.xlu1 %2242 }
 0xb14   : > { %v2246_v55 = vsub.f32 %v2234_v48, %v2244_v53  ;;  %v2245_v57 = vmul.f32 0.015625, %v2243_v54 }
 0xb16   : > { %v2247_v56 = vsub.f32 %v2235_v50, %v2245_v57  ;;  %v2248_v58 = vmul.f32 %v2246_v55, %v2246_v55 }
 0xb18   : > { %v2250_v59 = vsel %vm798_vm0, %v2248_v58, 0.0  ;;  %v2249_v60 = vmul.f32 %v2247_v56, %v2247_v56 }
 0xb19   : > { %2251 = vadd.xlane.f32.xlu0 %v2250_v59 }
 0xb1a   : > { %v2253_v46 = vsel %vm798_vm0, %v2249_v60, 0.0 }
 0xb1b   : > { %2254 = vadd.xlane.f32.xlu1 %v2253_v46 }
 0xba6   : > { %v2252_v5 = vpop.xlane.xlu0 %2251 }
 0xba7   : > { %v2256_v6 = vmul.f32 0.015625, %v2252_v5 }
 0xba8   : > { %v2255_v7 = vpop.xlane.xlu1 %2254 }
 0xba9   : > { %v2258_v8 = vadd.f32 1e-12, %v2256_v6  ;;  %v2257_v9 = vmul.f32 0.015625, %v2255_v7 }
 0xbab   : > { %12350 = vrsqrt.f32 %v2258_v8  ;;  %v2259_v10 = vadd.f32 1e-12, %v2257_v9 }
 0xbad   : > { %12352 = vrsqrt.f32 %v2259_v10 }
 0xbb5   : > { %v12351_v11 = vpop.eup %12350 }
 0xbb6   : > { %v2262_v37 = vmul.f32 %v12351_v11, %v2246_v55 }
 0xbb7   : > { %v12353_v38 = vpop.eup %12352 }
 0xbb8   : > { %v2270_v13 = vmul.f32 %v9994_v12, %v2262_v37  ;;  %v2263_v14 = vmul.f32 %v12353_v38, %v2247_v56 }
 0xbba   : > { %v2271_v16 = vmul.f32 %v9994_v12, %v2263_v14  ;;  %v13103_v17 = vadd.f32 %v9995_v15, %v2270_v13 }
 0xbbc   : > { %v13105_v19 = vadd.f32 %v9995_v15, %v2271_v16 }
 0xbbe   : > { %v2280_v20 = vpack.c.bf16 %v13105_v19, %v13103_v17 }
 0xbc0   : > { %10013 = vmatmul.mubr.msk.bf16.vlgmr.msra.gmra.mrb[16].mxu1 %vm798_vm0, %v2280_v20 }
 0xc93   : > { %v2380_v25 = vpop.f32.mrb[16].mxu1 }
 0xc94   : > { %v2381_v27 = vadd.f32 %v2380_v25, %v2296_v24  ;;  %v2382_v28 = vpop.f32.mrb[17].mxu1 }
 0xc95   : > { %v2384_v29 = vpop.f32.mrb[18].mxu1  ;;  %v2383_v31 = vadd.f32 %v2382_v28, %v2300_v26 }
 0xc96   : > { %v2386_v30 = vpop.f32.mrb[19].mxu1  ;;  %2395 = vrot.lane.b32.xlu1 %v2381_v27, %s14576_s30  ;;  %2391 = vrot.lane.b32.xlu0 %v2381_v27, %s14577_s26  ;;  %v2385_v33 = vadd.f32 %v2384_v29, %v2296_v24 }
 0xc97   : > { %v2387_v32 = vadd.f32 %v2386_v30, %v2300_v26  ;;  %11114 = vmatprep.mubr.msk.f32.mxu1 %vm988_vm1, %v2381_v27 }
 0xc98   : > { %v11770_v36 = vpack.i.bf16 %v2385_v33, %v2381_v27 }
 0xc99   : > { %v11526_v34 = vpack.c.bf16 %v2387_v32, %v2383_v31  ;;  %v13118_v35 = vpack.i.bf16 %v2387_v32, %v2383_v31 }
 0xc9a   : > { %2393 = vrot.lane.b32.xlu1 %v2385_v33, %s14577_s26  ;;  %2399 = vrot.lane.b32.xlu0 %v2381_v27, %s14578_s29 }
 0xc9e   : > { %2397 = vrot.lane.b32.xlu1 %v2385_v33, %s14576_s30  ;;  %11771 = vrot.lane.b32.xlu0 %v11770_v36, %s14579_s7 }
 0xca2   : > { %2401 = vrot.lane.b32.xlu1 %v2385_v33, %s14578_s29 }
 0xd08   : > { %v2396_v39 = vpop.permute.xlu1 %2395  ;;  %v2392_v41 = vpop.permute.xlu0 %2391 }
 0xd09   : > { %11128 = vmatprep.mubr.msk.f32.mxu0 %vm988_vm1, %v2396_v39 }
 0xd0c   : > { %v2394_v43 = vpop.permute.xlu1 %2393  ;;  %v2400_v45 = vpop.permute.xlu0 %2399 }
 0xd0d   : > { %v11775_v48 = vpack.i.bf16 %v2394_v43, %v2392_v41 }
 0xd0f   : > { %11776 = vrot.lane.b32.xlu1 %v11775_v48, %s14579_s7 }
 0xd10   : > { %v2398_v49 = vpop.permute.xlu1 %2397  ;;  %v11772_v50 = vpop.permute.xlu0 %11771 }
 0xd11   : > { %v11780_v51 = vpack.i.bf16 %v2398_v49, %v2396_v39  ;;  %v11774_v52 = vunpack.i.h.bf16 %v11772_v50  ;;  %v11773_v53 = vunpack.i.l.bf16 %v11772_v50 }
 0xd13   : > { %v11502_v54 = vpack.c.bf16 %v11774_v52, %v11773_v53  ;;  %11781 = vrot.lane.b32.xlu0 %v11780_v51, %s14579_s7 }
 0xd14   : > { %v2402_v55 = vpop.permute.xlu1 %2401 }
 0xd15   : > { %v11785_v57 = vpack.i.bf16 %v2402_v55, %v2400_v45  ;;  %11504 = vmatprep.subr.msk.bf16.mxu1 %vm12847_vm2, %v11502_v54 }
 0xd16   : > { %11507 = vmatpush3.bf16.xpose.msk.msra.mxu1 %vm12847_vm2, %v11502_v54 }
 0xd17   : > { %11786 = vrot.lane.b32.xlu1 %v11785_v57, %s14579_s7 }
 0xd1d   : > { %11115 = vmatmul.mubr.msk.f32.vlgmr.msra.gmra.mrb[10].mxu1 %vm988_vm1, %v2385_v33 }
 0xd1e   : > { %11121 = vmatprep.mubr.msk.f32.mxu1 %vm988_vm1, %v2392_v41 }
 0xd81   : > { %v11777_v56 = vpop.permute.xlu1 %11776 }
 0xd82   : > { %v11779_v58 = vunpack.i.h.bf16 %v11777_v56  ;;  %v11778_v59 = vunpack.i.l.bf16 %v11777_v56 }
 0xd84   : > { %v11508_v60 = vpack.c.bf16 %v11779_v58, %v11778_v59 }
 0xd85   : > { %v11782_v46 = vpop.permute.xlu0 %11781 }
 0xd86   : > { %v11784_v47 = vunpack.i.h.bf16 %v11782_v46  ;;  %v11783_v61 = vunpack.i.l.bf16 %v11782_v46  ;;  %11510 = vmatprep.subr.msk.bf16.mxu1 %vm12847_vm2, %v11508_v60 }
 0xd87   : > { %11513 = vmatpush3.bf16.xpose.msk.msra.mxu1 %vm12847_vm2, %v11508_v60 }
 0xd88   : > { %v11514_v62 = vpack.c.bf16 %v11784_v47, %v11783_v61 }
 0xd89   : > { %v11787_v63 = vpop.permute.xlu1 %11786 }
 0xd8a   : > { %v11789_v0 = vunpack.i.h.bf16 %v11787_v63  ;;  %v11788_v1 = vunpack.i.l.bf16 %v11787_v63  ;;  %11516 = vmatprep.subr.msk.bf16.mxu0 %vm12847_vm2, %v11514_v62 }
 0xd8b   : > { %11519 = vmatpush3.bf16.xpose.msk.msra.mxu0 %vm12847_vm2, %v11514_v62 }
 0xd8c   : > { %v11520_v2 = vpack.c.bf16 %v11789_v0, %v11788_v1  ;;  %11527 = vmatprep.subr.bf16.mxu0 %v11526_v34 }
 0xd8e   : > { %11122 = vmatmul.mubr.msk.f32.vlgmr.msra.gmra.mrb[20].mxu1 %vm988_vm1, %v2394_v43  ;;  %11522 = vmatprep.subr.msk.bf16.mxu1 %vm12847_vm2, %v11520_v2 }
 0xd8f   : > { %11525 = vmatpush3.bf16.xpose.msk.msra.mxu1 %vm12847_vm2, %v11520_v2  ;;  %11135 = vmatprep.mubr.msk.f32.mxu1 %vm988_vm1, %v2400_v45 }
 0xd92   : > { %11129 = vmatmul.mubr.msk.f32.vlgmr.msra.gmra.mrb[10].mxu0 %vm988_vm1, %v2398_v49 }
 0xd93   : > { %11529 = vmatpush3.bf16.msra.mxu0 %v11526_v34 }
 0xd96   : > { %11136 = vmatmul.mubr.msk.f32.vlgmr.msra.gmra.mrb[22].mxu1 %vm988_vm1, %v2402_v55 }
 0xdf0   : > { %v11116_v3 = vpop.f32.mrb[10].mxu1 }
 0xdf1   : > { %v2772_v5 = vmul.f32 0.25, %v11116_v3  ;;  %v2501_v6 = vpop.f32.mrb[11].mxu1 }
 0xdf2   : > { %v2771_v7 = vmul.f32 0.25, %v2501_v6 }
 0xdf3   : > { %v2780_v8 = vadd.f32 %v12883_v22, %v2772_v5 }
 0xdf4   : > { %v2779_v9 = vadd.f32 %v12883_v22, %v2771_v7 }
 0xdf5   : > { %v2790_v10 = vsel %vm988_vm1, %v2780_v8, -inf }
 0xdf6   : > { %2791 = vmax.xlane.f32.xlu1 %v2790_v10  ;;  %v2787_v11 = vsel %vm988_vm1, %v2779_v9, -inf }
 0xdf7   : > { %2788 = vmax.xlane.f32.xlu0 %v2787_v11 }
 0xe61   : > { %v11123_v12 = vpop.f32.mrb[20].mxu1 }
 0xe62   : > { %v2774_v37 = vmul.f32 0.25, %v11123_v12  ;;  %v2588_v38 = vpop.f32.mrb[21].mxu1 }
 0xe63   : > { %v2773_v13 = vmul.f32 0.25, %v2588_v38 }
 0xe64   : > { %v2782_v14 = vadd.f32 %v12883_v22, %v2774_v37 }
 0xe65   : > { %v11130_v15 = vpop.f32.mrb[10].mxu0  ;;  %v2781_v24 = vadd.f32 %v12883_v22, %v2773_v13 }
 0xe66   : > { %v2776_v16 = vmul.f32 0.25, %v11130_v15  ;;  %v2675_v20 = vpop.f32.mrb[11].mxu0  ;;  %v2796_v23 = vsel %vm988_vm1, %v2782_v14, -inf }
 0xe67   : > { %v2775_v25 = vmul.f32 0.25, %v2675_v20  ;;  %2797 = vmax.xlane.f32.xlu0 %v2796_v23  ;;  %v2793_v31 = vsel %vm988_vm1, %v2781_v24, -inf }
 0xe68   : > { %v2784_v26 = vadd.f32 %v12883_v22, %v2776_v16 }
 0xe69   : > { %v11137_v27 = vpop.f32.mrb[22].mxu1  ;;  %v2783_v32 = vadd.f32 %v12883_v22, %v2775_v25 }
 0xe6a   : > { %v2778_v28 = vmul.f32 0.25, %v11137_v27  ;;  %v2762_v29 = vpop.f32.mrb[23].mxu1  ;;  %v2802_v30 = vsel %vm988_vm1, %v2784_v26, -inf }
 0xe6b   : > { %v2777_v33 = vmul.f32 0.25, %v2762_v29  ;;  %2803 = vmax.xlane.f32.xlu1 %v2802_v30  ;;  %2794 = vmax.xlane.f32.xlu0 %v2793_v31  ;;  %v2799_v36 = vsel %vm988_vm1, %v2783_v32, -inf }
 0xe6c   : > { %v2786_v34 = vadd.f32 %v12883_v22, %v2778_v28 }
 0xe6d   : > { %v2785_v41 = vadd.f32 %v12883_v22, %v2777_v33 }
 0xe6e   : > { %v2808_v39 = vsel %vm988_vm1, %v2786_v34, -inf }
 0xe6f   : > { %2800 = vmax.xlane.f32.xlu0 %v2799_v36  ;;  %2809 = vmax.xlane.f32.xlu1 %v2808_v39  ;;  %v2805_v43 = vsel %vm988_vm1, %v2785_v41, -inf }
 0xe73   : > { %2806 = vmax.xlane.f32.xlu0 %v2805_v43 }
 0xe83   : > { %v2792_v45 = vpop.xlane.xlu1 %2791 }
 0xe84   : > { %v2812_v48 = vsub.f32 %v2780_v8, %v2792_v45  ;;  %v2789_v49 = vpop.xlane.xlu0 %2788 }
 0xe85   : > { %v2811_v50 = vsub.f32 %v2779_v9, %v2789_v49 }
 0xe86   : > { %v2821_v51 = vmul.f32 1.442695, %v2812_v48 }
 0xe87   : > { %v2819_v52 = vmul.f32 1.442695, %v2811_v50 }
 0xe88   : > { %12354 = vpow2.f32 %v2821_v51 }
 0xe89   : > { %12356 = vpow2.f32 %v2819_v52 }
 0xe92   : > { %v12355_v53 = vpop.eup %12354 }
 0xe93   : > { %v12357_v54 = vpop.eup %12356  ;;  %v2838_v55 = vsel %vm988_vm1, %v12355_v53, 0.0 }
 0xe94   : > { %2839 = vadd.xlane.f32.xlu1 %v2838_v55  ;;  %v2835_v22 = vsel %vm988_vm1, %v12357_v54, 0.0 }
 0xe95   : > { %2836 = vadd.xlane.f32.xlu0 %v2835_v22 }
 0xef4   : > { %v2798_v57 = vpop.xlane.xlu0 %2797 }
 0xef5   : > { %v2814_v56 = vsub.f32 %v2782_v14, %v2798_v57 }
 0xef7   : > { %v2825_v58 = vmul.f32 1.442695, %v2814_v56 }
 0xef8   : > { %v2804_v59 = vpop.xlane.xlu1 %2803  ;;  %v2795_v60 = vpop.xlane.xlu0 %2794 }
 0xef9   : > { %12358 = vpow2.f32 %v2825_v58  ;;  %v2816_v46 = vsub.f32 %v2784_v26, %v2804_v59  ;;  %v2813_v47 = vsub.f32 %v2781_v24, %v2795_v60 }
 0xefb   : > { %v2829_v61 = vmul.f32 1.442695, %v2816_v46  ;;  %v2823_v62 = vmul.f32 1.442695, %v2813_v47 }
 0xefc   : > { %v2801_v63 = vpop.xlane.xlu0 %2800  ;;  %v2810_v0 = vpop.xlane.xlu1 %2809 }
 0xefd   : > { %12360 = vpow2.f32 %v2829_v61  ;;  %v2815_v1 = vsub.f32 %v2783_v32, %v2801_v63  ;;  %v2818_v2 = vsub.f32 %v2786_v34, %v2810_v0 }
 0xefe   : > { %12362 = vpow2.f32 %v2823_v62 }
 0xeff   : > { %v2827_v3 = vmul.f32 1.442695, %v2815_v1  ;;  %v2833_v5 = vmul.f32 1.442695, %v2818_v2  ;;  %v12078_v2 = vld [vmem:[%s14572_s0 + $0x20] sm:$0xff]  }
 0xf00   : > { %v2807_v6 = vpop.xlane.xlu0 %2806 }
 0xf01   : > { %12364 = vpow2.f32 %v2827_v3  ;;  %v2817_v7 = vsub.f32 %v2785_v41, %v2807_v6  ;;  %v12079_v3 = vld [vmem:[%s14572_s0 + $0x28] sm:$0xff]   ;;  %v12081_v6 = vld [vmem:[%s14572_s0 + $0x38] sm:$0xff]  }
 0xf02   : > { %12366 = vpow2.f32 %v2833_v5  ;;  %v12080_v5 = vld [vmem:[%s14572_s0 + $0x30] sm:$0xff]  }
 0xf03   : > { %v13169_v8 = vpop.eup %12358  ;;  %v2831_v9 = vmul.f32 1.442695, %v2817_v7 }
 0xf04   : > { %v2844_v10 = vsel %vm988_vm1, %v13169_v8, 0.0 }
 0xf05   : > { %12368 = vpow2.f32 %v2831_v9  ;;  %2845 = vadd.xlane.f32.xlu1 %v2844_v10 }
 0xf07   : > { %v13173_v11 = vpop.eup %12360 }
 0xf08   : > { %v12363_v12 = vpop.eup %12362  ;;  %v2850_v37 = vsel %vm988_vm1, %v13173_v11, 0.0 }
 0xf09   : > { %2851 = vadd.xlane.f32.xlu1 %v2850_v37  ;;  %v2841_v38 = vsel %vm988_vm1, %v12363_v12, 0.0 }
 0xf0a   : > { %2842 = vadd.xlane.f32.xlu0 %v2841_v38 }
 0xf0b   : > { %v12365_v13 = vpop.eup %12364 }
 0xf0c   : > { %v13178_v14 = vpop.eup %12366  ;;  %v2847_v15 = vsel %vm988_vm1, %v12365_v13, 0.0 }
 0xf0d   : > { %v2856_v16 = vsel %vm988_vm1, %v13178_v14, 0.0 }
 0xf0e   : > { %2857 = vadd.xlane.f32.xlu1 %v2856_v16  ;;  %2848 = vadd.xlane.f32.xlu0 %v2847_v15 }
 0xf0f   : > { %v12369_v20 = vpop.eup %12368 }
 0xf10   : > { %v2853_v23 = vsel %vm988_vm1, %v12369_v20, 0.0 }
 0xf12   : > { %2854 = vadd.xlane.f32.xlu0 %v2853_v23 }
 0xf1f   : > { %11796 = vrot.lane.b32.xlu1 %v13118_v35, %s14576_s30 }
 0xf21   : > { %v2840_v24 = vpop.xlane.xlu1 %2839 }
 0xf22   : > { %12370 = vrcp.f32 %v2840_v24  ;;  %v2837_v25 = vpop.xlane.xlu0 %2836 }
 0xf23   : > { %11801 = vrot.lane.b32.xlu1 %v13118_v35, %s14578_s29  ;;  %12372 = vrcp.f32 %v2837_v25 }
 0xf28   : > { %11791 = vrot.lane.b32.xlu0 %v13118_v35, %s14577_s26 }
 0xf2c   : > { %v12371_v26 = vpop.eup %12370 }
 0xf2d   : > { %v12373_v27 = vpop.eup %12372  ;;  %v2862_v29 = vmul.f32 %v12371_v26, %v12355_v53 }
 0xf2e   : > { %v2860_v28 = vmul.f32 %v12373_v27, %v12357_v54 }
 0xf30   : > { %11142 = vmatprep.mubr.msk.f32.mxu0 %vm988_vm1, %v2860_v28 }
 0xf31   : > { %11143 = vmatmul.mubr.msk.f32.vlgmr.msra.gmra.mrb[20].mxu0 %vm988_vm1, %v2862_v29 }
 0xf92   : > { %v2846_v30 = vpop.xlane.xlu1 %2845 }
 0xf96   : > { %v2852_v31 = vpop.xlane.xlu1 %2851 }
 0xf97   : > { %v2843_v32 = vpop.xlane.xlu0 %2842 }
 0xf98   : > { %12374 = vrcp.f32 %v2843_v32 }
 0xf99   : > { %12376 = vrcp.f32 %v2846_v30 }
 0xf9a   : > { %12378 = vrcp.f32 %v2852_v31 }
 0xf9b   : > { %v2858_v33 = vpop.xlane.xlu1 %2857  ;;  %v2849_v34 = vpop.xlane.xlu0 %2848 }
 0xf9c   : > { %12380 = vrcp.f32 %v2849_v34 }
 0xf9f   : > { %v11797_v36 = vpop.permute.xlu1 %11796  ;;  %v2855_v39 = vpop.xlane.xlu0 %2854 }
 0xfa0   : > { %v11799_v35 = vunpack.i.h.bf16 %v11797_v36  ;;  %v11798_v41 = vunpack.i.l.bf16 %v11797_v36  ;;  %12382 = vrcp.f32 %v2855_v39  ;;  %v10047_v36 = vld [vmem:[%s14573_s8 + $0x1] ss:$0 sm:$0xff] }
 0xfa1   : > { %12384 = vrcp.f32 %v2858_v33 }
 0xfa2   : > { %v12375_v43 = vpop.eup %12374  ;;  %v11534_v45 = vpack.c.bf16 %v11799_v35, %v11798_v41 }
 0xfa3   : > { %v11802_v48 = vpop.permute.xlu1 %11801  ;;  %v11792_v49 = vpop.permute.xlu0 %11791  ;;  %v2864_v50 = vmul.f32 %v12375_v43, %v12363_v12 }
 0xfa4   : > { %v11804_v51 = vunpack.i.h.bf16 %v11802_v48  ;;  %v11803_v52 = vunpack.i.l.bf16 %v11802_v48  ;;  %v11794_v53 = vunpack.i.h.bf16 %v11792_v49  ;;  %v11793_v54 = vunpack.i.l.bf16 %v11792_v49  ;;  %11535 = vmatprep.subr.bf16.mxu0 %v11534_v45  ;;  %v12377_v55 = vpop.eup %12376 }
 0xfa5   : > { %11149 = vmatprep.mubr.msk.f32.mxu1 %vm988_vm1, %v2864_v50  ;;  %11537 = vmatpush3.bf16.msra.mxu0 %v11534_v45  ;;  %v12379_v22 = vpop.eup %12378  ;;  %v2866_v47 = vmul.f32 %v12377_v55, %v13169_v8 }
 0xfa6   : > { %v11530_v57 = vpack.c.bf16 %v11794_v53, %v11793_v54  ;;  %11166 = vmatprep.subr.bf16.mxu0 %v12629_v21  ;;  %v12381_v56 = vpop.eup %12380  ;;  %v11538_v59 = vpack.c.bf16 %v11804_v51, %v11803_v52  ;;  %v2870_v60 = vmul.f32 %v12379_v22, %v13173_v11 }
 0xfa7   : > { %v2868_v58 = vmul.f32 %v12381_v56, %v12365_v13 }
 0xfa8   : > { %11531 = vmatprep.subr.bf16.mxu1 %v11530_v57 }
 0xfa9   : > { %11533 = vmatpush3.bf16.msra.mxu1 %v11530_v57  ;;  %11156 = vmatprep.mubr.msk.f32.mxu0 %vm988_vm1, %v2868_v58 }
 0xfaa   : > { %v12383_v46 = vpop.eup %12382  ;;  %11539 = vmatprep.subr.bf16.mxu1 %v11538_v59  ;;  %11157 = vmatmul.mubr.msk.f32.vlgmr.msra.gmra.mrb[22].mxu0 %vm988_vm1, %v2870_v60 }
 0xfab   : > { %v12385_v61 = vpop.eup %12384  ;;  %v2872_v62 = vmul.f32 %v12383_v46, %v12369_v20  ;;  %11174 = vmatprep.mubr.msk.bf16.mxu0 %vm12630_vm3, %v12629_v21  ;;  %11167 = vmatpush3.bf16.msra.mxu0 %v12078_v2  ;;  %v12082_v46 = vld [vmem:[%s14505_s10 + $0x40] ss:$8 sps:$4 sm:$0xff]  }
 0xfac   : > { %11150 = vmatmul.mubr.msk.f32.vlgmr.msra.gmra.mrb[24].mxu1 %vm988_vm1, %v2866_v47  ;;  %v2874_v63 = vmul.f32 %v12385_v61, %v13178_v14  ;;  %11168 = vmatprep.subr.bf16.mxu0 %v12629_v21  ;;  %v12087_v47 = vld [vmem:[%s14505_s10 + $0x54] ss:$8 sps:$4 sm:$0xff]   ;;  %v12085_v61 = vld [vmem:[%s14505_s10 + $0x50] ss:$8 sps:$4 sm:$0xff]   ;;  %v12094_v2 = vld [vmem:[%s14507_s12 + $0xc0] sm:$0xff]  }
 0xfad   : > { %11541 = vmatpush3.bf16.msra.mxu1 %v11538_v59  ;;  %11163 = vmatprep.mubr.msk.f32.mxu1 %vm988_vm1, %v2872_v62  ;;  %v12090_v62 = vld [vmem:[%s14505_s10 + $0x64] ss:$8 sps:$4 sm:$0xff]  }
 0xfaf   : > { %11169 = vmatpush3.bf16.msra.mxu0 %v12079_v3  ;;  %v12095_v3 = vld [vmem:[%s14507_s12 + $0x80] sm:$0xff]  }
 0xfb0   : > { %11164 = vmatmul.mubr.msk.f32.vlgmr.msra.gmra.mrb[26].mxu1 %vm988_vm1, %v2874_v63  ;;  %11170 = vmatprep.subr.bf16.mxu0 %v12629_v21  ;;  %v12088_v63 = vld [vmem:[%s14505_s10 + $0x60] ss:$8 sps:$4 sm:$0xff]  }
 0xfb1   : > { %3461 = vmatprep.mubr.bf16.mxu1 %v12624_v18 }
 0xfb3   : > { %11171 = vmatpush3.bf16.msra.mxu0 %v12080_v5  ;;  %v12096_v5 = vld [vmem:[%s14507_s12 + $0xc8] sm:$0xff]  }
 0xfb4   : > { %11172 = vmatprep.subr.bf16.mxu0 %v12629_v21 }
 0xfb7   : > { %11173 = vmatpush3.bf16.msra.mxu0 %v12081_v6  ;;  %v12097_v6 = vld [vmem:[%s14507_s12 + $0x88] sm:$0xff]  }
 0xfb8   : > { %10779 = vmatprep.subr.bf16.mxu0 %v12094_v2 }
0x1004   : > { %v11144_v0 = vpop.f32.mrb[20].mxu0 }
0x1005   : > { %v2947_v1 = vpop.f32.mrb[21].mxu0 }
0x107d   : > { %v11158_v7 = vpop.f32.mrb[22].mxu0 }
0x107e   : > { %v3109_v8 = vpop.f32.mrb[23].mxu0 }
0x107f   : > { %v11151_v9 = vpop.f32.mrb[24].mxu1  ;;  %v11810_v10 = vpack.i.bf16 %v11158_v7, %v3109_v8 }
0x1080   : > { %v3028_v11 = vpop.f32.mrb[25].mxu1 }
0x1081   : > { %v11805_v12 = vpack.i.bf16 %v11151_v9, %v3028_v11  ;;  %11811 = vrot.lane.b32.xlu0 %v11810_v10, %s14580_s2 }
0x1083   : > { %11806 = vrot.lane.b32.xlu1 %v11805_v12, %s14581_s5  ;;  %v11165_v37 = vpop.f32.mrb[26].mxu1 }
0x1084   : > { %v3190_v38 = vpop.f32.mrb[27].mxu1 }
0x1085   : > { %v11815_v13 = vpack.i.bf16 %v11165_v37, %v3190_v38 }
0x1087   : > { %11816 = vrot.lane.b32.xlu1 %v11815_v13, %s14582_s22  ;;  %v10055_v13 = vld [vmem:[%s14575_s1 + $0x1] ss:$0 sm:$0xff] }
0x10f3   : > { %v11812_v15 = vpop.permute.xlu0 %11811 }
0x10f4   : > { %v11814_v25 = vunpack.i.h.bf16 %v11812_v15  ;;  %v11813_v26 = vunpack.i.l.bf16 %v11812_v15 }
0x10f5   : > { %v11807_v14 = vpop.permute.xlu1 %11806 }
0x10f6   : > { %v11809_v16 = vunpack.i.h.bf16 %v11807_v14  ;;  %v11808_v20 = vunpack.i.l.bf16 %v11807_v14 }
0x10f8   : > { %v3224_v23 = vsel %vm988_vm1, %v11144_v0, %v11809_v16  ;;  %v3223_v24 = vsel %vm988_vm1, %v2947_v1, %v11808_v20  ;;  %v12091_v0 = vld [vmem:[%s14505_s10 + $0x70] ss:$8 sps:$4 sm:$0xff]   ;;  %v12093_v1 = vld [vmem:[%s14505_s10 + $0x74] ss:$8 sps:$4 sm:$0xff]   ;;  %v10056_v20 = vld [vmem:[%s14504_s9 + $0x1] ss:$0 sm:$0xff] }
0x10f9   : > { %v11817_v27 = vpop.permute.xlu1 %11816  ;;  %v3225_v30 = vsel %vm1793_vm4, %v3223_v24, %v11813_v26  ;;  %v3226_v31 = vsel %vm1793_vm4, %v3224_v23, %v11814_v25 }
0x10fa   : > { %v11819_v28 = vunpack.i.h.bf16 %v11817_v27  ;;  %v11818_v29 = vunpack.i.l.bf16 %v11817_v27  ;;  %v12098_v27 = vld [vmem:[%s14507_s12 + $0xd0] sm:$0xff]  }
0x10fc   : > { %v3228_v32 = vsel %vm1796_vm5, %v3226_v31, %v11819_v28  ;;  %v3227_v33 = vsel %vm1796_vm5, %v3225_v30, %v11818_v29  ;;  %v12099_v28 = vld [vmem:[%s14507_s12 + $0x90] sm:$0xff]   ;;  %v12100_v29 = vld [vmem:[%s14507_s12 + $0xd8] sm:$0xff]   ;;  %v12102_v31 = vld [vmem:[%s14507_s12 + $0xe0] sm:$0xff]  }
0x10fd   : > { %v3229_v34 = vpack.c.bf16 %v3228_v32, %v3227_v33  ;;  %v12101_v30 = vld [vmem:[%s14507_s12 + $0x98] sm:$0xff]   ;;  %v12103_v32 = vld [vmem:[%s14507_s12 + $0xa0] sm:$0xff]   ;;  %v12104_v33 = vld [vmem:[%s14507_s12 + $0xe8] sm:$0xff]  }
0x10ff   : > { %11175 = vmatmul.mubr.msk.bf16.vlgmr.msra.gmra.mrb[24].mxu0 %vm798_vm0, %v3229_v34  ;;  %v12105_v34 = vld [vmem:[%s14507_s12 + $0xa8] sm:$0xff]  }
0x1100   : > { %10780 = vmatpush3.bf16.msra.mxu0 %v12095_v3 }
0x1101   : > { %10781 = vmatprep.subr.bf16.mxu0 %v12096_v5 }
0x1104   : > { %10782 = vmatpush3.bf16.msra.mxu0 %v12097_v6 }
0x1105   : > { %10783 = vmatprep.subr.bf16.mxu0 %v12098_v27 }
0x1108   : > { %10784 = vmatpush3.bf16.msra.mxu0 %v12099_v28 }
0x1109   : > { %10785 = vmatprep.subr.bf16.mxu0 %v12100_v29 }
0x110c   : > { %10786 = vmatpush3.bf16.msra.mxu0 %v12101_v30 }
0x110d   : > { %10787 = vmatprep.subr.bf16.mxu0 %v12102_v31 }
0x1110   : > { %10788 = vmatpush3.bf16.msra.mxu0 %v12103_v32 }
0x1111   : > { %10789 = vmatprep.subr.bf16.mxu0 %v12104_v33 }
0x1114   : > { %10790 = vmatpush3.bf16.msra.mxu0 %v12105_v34 }
0x11d2   : > { %v3308_v39 = vpop.f32.mrb[24].mxu0 }
0x11d3   : > { %v3309_v35 = vadd.f32 %v10047_v36, %v3308_v39  ;;  %v11176_v41 = vpop.f32.mrb[25].mxu0  ;;  %v12107_v39 = vld [vmem:[%s14507_s12 + $0xb0] sm:$0xff]  }
0x11d4   : > { %v3311_v43 = vpop.f32.mrb[26].mxu0  ;;  %v12109_v41 = vld [vmem:[%s14507_s12 + $0xb8] sm:$0xff]  }
0x11d5   : > { %v3312_v45 = vadd.f32 %v10047_v36, %v3311_v43  ;;  %v11177_v48 = vpop.f32.mrb[27].mxu0  ;;  %v3315_v49 = vadd.f32 %v3309_v35, %v13103_v17  ;;  %v12106_v36 = vld [vmem:[%s14507_s12 + $0xf0] sm:$0xff]   ;;  %v12108_v35 = vld [vmem:[%s14507_s12 + $0xf8] sm:$0xff]   ;;  %v10065_v43 = vld [vmem:[%s14506_s11 + $0x2] sm:$0x3] }
0x11d6   : > { %10791 = vmatprep.subr.bf16.mxu0 %v12106_v36  ;;  %v3383_v48 = vrot.slane %v10065_v43, %v12829_v44 }
0x11d7   : > { %v3321_v50 = vsel %vm798_vm0, %v3315_v49, 0.0  ;;  %v3316_v51 = vadd.f32 %v3312_v45, %v13105_v19  ;;  %v12084_v19 = vld [vmem:[%s14505_s10 + $0x44] ss:$8 sps:$4 sm:$0xff]   ;;  %10792 = vmatpush3.bf16.msra.mxu0 %v12107_v39  ;;  %v3379_v45 = vrot.slane %v10065_v43, %v12824_v42  ;;  %v12115_v43 = vld [vmem:[%s14565_s3 + $0x94] ss:$8 sps:$4 sm:$0xff]  }
0x11d8   : > { %3322 = vadd.xlane.f32.xlu0 %v3321_v50  ;;  %3429 = vmatprep.subr.bf16.mxu1 %v12084_v19 }
0x11d9   : > { %v3324_v52 = vsel %vm798_vm0, %v3316_v51, 0.0  ;;  %3430 = vmatpush1.bf16.msra.mxu1 %v12082_v46  ;;  %10793 = vmatprep.subr.bf16.mxu0 %v12108_v35 }
0x11da   : > { %3325 = vadd.xlane.f32.xlu1 %v3324_v52  ;;  %3431 = vmatprep.subr.bf16.mxu1 %v12087_v47 }
0x11db   : > { %10794 = vmatpush3.bf16.msra.mxu0 %v12109_v41  ;;  %v12110_v41 = vld [vmem:[%s14565_s3 + $0x80] ss:$8 sps:$4 sm:$0xff]  }
0x11dd   : > { %3432 = vmatpush1.bf16.msra.mxu1 %v12085_v61 }
0x11de   : > { %3433 = vmatprep.subr.bf16.mxu1 %v12090_v62 }
0x11e1   : > { %3434 = vmatpush1.bf16.msra.mxu1 %v12088_v63 }
0x11e2   : > { %3435 = vmatprep.subr.bf16.mxu1 %v12093_v1 }
0x11e5   : > { %3436 = vmatpush1.bf16.msra.mxu1 %v12091_v0 }
0x1265   : > { %v3323_v53 = vpop.xlane.xlu0 %3322 }
0x1266   : > { %v3327_v54 = vmul.f32 0.015625, %v3323_v53 }
0x1267   : > { %v3326_v55 = vpop.xlane.xlu1 %3325 }
0x1268   : > { %v3329_v22 = vsub.f32 %v3315_v49, %v3327_v54  ;;  %v3328_v57 = vmul.f32 0.015625, %v3326_v55 }
0x126a   : > { %v3330_v56 = vsub.f32 %v3316_v51, %v3328_v57  ;;  %v3331_v58 = vmul.f32 %v3329_v22, %v3329_v22 }
0x126c   : > { %v3333_v59 = vsel %vm798_vm0, %v3331_v58, 0.0  ;;  %v3332_v60 = vmul.f32 %v3330_v56, %v3330_v56 }
0x126d   : > { %3334 = vadd.xlane.f32.xlu0 %v3333_v59 }
0x126e   : > { %v3336_v17 = vsel %vm798_vm0, %v3332_v60, 0.0 }
0x1271   : > { %3337 = vadd.xlane.f32.xlu0 %v3336_v17 }
0x12fa   : > { %v3335_v7 = vpop.xlane.xlu0 %3334 }
0x12fb   : > { %v3339_v8 = vmul.f32 0.015625, %v3335_v7 }
0x12fd   : > { %v3341_v9 = vadd.f32 1e-12, %v3339_v8 }
0x12fe   : > { %v3338_v10 = vpop.xlane.xlu0 %3337 }
0x12ff   : > { %12386 = vrsqrt.f32 %v3341_v9  ;;  %v3340_v11 = vmul.f32 0.015625, %v3338_v10 }
0x1301   : > { %v3342_v12 = vadd.f32 1e-12, %v3340_v11 }
0x1303   : > { %12388 = vrsqrt.f32 %v3342_v12  ;;  %v10108_v12 = vld [vmem:[%s14508_s13 + $0x1] ss:$0 sm:$0xff] }
0x1309   : > { %v12387_v37 = vpop.eup %12386 }
0x130a   : > { %v3345_v38 = vmul.f32 %v12387_v37, %v3329_v22 }
0x130c   : > { %v3353_v15 = vmul.f32 %v10055_v13, %v3345_v38 }
0x130d   : > { %v12389_v14 = vpop.eup %12388 }
0x130e   : > { %v3346_v16 = vmul.f32 %v12389_v14, %v3330_v56  ;;  %v13281_v24 = vadd.f32 %v10056_v20, %v3353_v15 }
0x1310   : > { %v3354_v23 = vmul.f32 %v10055_v13, %v3346_v16 }
0x1312   : > { %v13283_v25 = vadd.f32 %v10056_v20, %v3354_v23 }
0x1314   : > { %v3363_v26 = vpack.c.bf16 %v13283_v25, %v13281_v24 }
0x1316   : > { %10074 = vmatmul.mubr.msk.bf16.vlgmr.msra.gmra.mrb[28].mxu1 %vm798_vm0, %v3363_v26 }
0x1317   : > { %3818 = vmatprep.mubr.bf16.mxu1 %v12624_v18 }
0x13e9   : > { %v3463_v49 = vpop.f32.mrb[28].mxu1 }
0x13ea   : > { %v3464_v50 = vadd.f32 %v3463_v49, %v3379_v45  ;;  %v3465_v51 = vpop.f32.mrb[29].mxu1  ;;  %v12116_v49 = vld [vmem:[%s14565_s3 + $0xa0] ss:$8 sps:$4 sm:$0xff]  }
0x13eb   : > { %v3466_v52 = vadd.f32 %v3465_v51, %v3383_v48  ;;  %v3467_v53 = vpop.f32.mrb[30].mxu1  ;;  %v12121_v51 = vld [vmem:[%s14565_s3 + $0xb4] ss:$8 sps:$4 sm:$0xff]  }
0x13ec   : > { %v3476_v54 = vmul.f32 0.70710677, %v3464_v50  ;;  %v3468_v55 = vadd.f32 %v3467_v53, %v3379_v45  ;;  %v3469_v22 = vpop.f32.mrb[31].mxu1  ;;  %v3472_v62 = vmul.f32 0.5, %v3464_v50  ;;  %v12113_v45 = vld [vmem:[%s14565_s3 + $0x90] ss:$8 sps:$4 sm:$0xff]  }
0x13ed   : > { %v3477_v57 = vmul.f32 0.70710677, %v3466_v52  ;;  %v3470_v56 = vadd.f32 %v3469_v22, %v3383_v48  ;;  %v3473_v1 = vmul.f32 0.5, %v3466_v52  ;;  %v12118_v48 = vld [vmem:[%s14565_s3 + $0xa4] ss:$8 sps:$4 sm:$0xff]  }
0x13ee   : > { %12390 = verf.f32 %v3476_v54  ;;  %v3478_v58 = vmul.f32 0.70710677, %v3468_v55  ;;  %v3474_v63 = vmul.f32 0.5, %v3468_v55  ;;  %v12119_v50 = vld [vmem:[%s14565_s3 + $0xb0] ss:$8 sps:$4 sm:$0xff]  }
0x13ef   : > { %12392 = verf.f32 %v3477_v57  ;;  %v3479_v59 = vmul.f32 0.70710677, %v3470_v56  ;;  %v3475_v2 = vmul.f32 0.5, %v3470_v56 }
0x13f0   : > { %12394 = verf.f32 %v3478_v58  ;;  %v10127_v58 = vld [vmem:[%s14509_s14 + $0x1] ss:$0 sm:$0xff] }
0x13f1   : > { %12396 = verf.f32 %v3479_v59 }
0x13f8   : > { %v12391_v60 = vpop.eup %12390 }
0x13f9   : > { %v12393_v17 = vpop.eup %12392  ;;  %v3484_v19 = vadd.f32 1.0, %v12391_v60 }
0x13fa   : > { %v12395_v46 = vpop.eup %12394  ;;  %v3485_v47 = vadd.f32 1.0, %v12393_v17 }
0x13fb   : > { %v12397_v61 = vpop.eup %12396  ;;  %v3486_v0 = vadd.f32 1.0, %v12395_v46  ;;  %v3488_v5 = vmul.f32 %v3484_v19, %v3472_v62  ;;  %v10128_v46 = vld [vmem:[%s14510_s15 + $0x1] ss:$0 sm:$0xff] }
0x13fc   : > { %v3487_v3 = vadd.f32 1.0, %v12397_v61  ;;  %v3489_v7 = vmul.f32 %v3485_v47, %v3473_v1 }
0x13fd   : > { %v3490_v6 = vmul.f32 %v3486_v0, %v3474_v63  ;;  %v10137_v0 = vld [vmem:[%s14568_s4 + $0x4] sm:$0x3] }
0x13fe   : > { %v3491_v8 = vmul.f32 %v3487_v3, %v3475_v2  ;;  %v3736_v1 = vrot.slane %v10137_v0, %v12824_v42  ;;  %v3740_v3 = vrot.slane %v10137_v0, %v12829_v44 }
0x13ff   : > { %v3492_v9 = vpack.c.bf16 %v3490_v6, %v3488_v5 }
0x1400   : > { %v3493_v10 = vpack.c.bf16 %v3491_v8, %v3489_v7 }
0x1402   : > { %3663 = vmatprep.mubr.bf16.mxu0 %v3493_v10 }
0x1403   : > { %3664 = vmatmul.mubr.bf16.vlgmr.msra.gmra.mrb[28].mxu0 %v3492_v9 }
0x14d6   : > { %v10795_v11 = vpop.f32.mrb[28].mxu0 }
0x14d7   : > { %v10796_v37 = vpop.f32.mrb[29].mxu0 }
0x14d8   : > { %v10797_v38 = vadd.f32 %v10796_v37, %v10795_v11  ;;  %v10798_v13 = vpop.f32.mrb[30].mxu0 }
0x14d9   : > { %v10799_v14 = vpop.f32.mrb[31].mxu0 }
0x14da   : > { %v3666_v15 = vadd.f32 %v10797_v38, %v10108_v12  ;;  %v10800_v16 = vadd.f32 %v10799_v14, %v10798_v13 }
0x14dc   : > { %v3669_v20 = vadd.f32 %v10800_v16, %v10108_v12  ;;  %v3672_v23 = vadd.f32 %v3666_v15, %v13281_v24 }
0x14de   : > { %v3678_v26 = vsel %vm798_vm0, %v3672_v23, 0.0  ;;  %v3673_v27 = vadd.f32 %v3669_v20, %v13283_v25  ;;  %v12112_v25 = vld [vmem:[%s14565_s3 + $0x84] ss:$8 sps:$4 sm:$0xff]  }
0x14df   : > { %3679 = vadd.xlane.f32.xlu0 %v3678_v26  ;;  %3786 = vmatprep.subr.bf16.mxu1 %v12112_v25 }
0x14e0   : > { %v3681_v28 = vsel %vm798_vm0, %v3673_v27, 0.0  ;;  %3787 = vmatpush1.bf16.msra.mxu1 %v12110_v41 }
0x14e1   : > { %3682 = vadd.xlane.f32.xlu1 %v3681_v28  ;;  %3788 = vmatprep.subr.bf16.mxu1 %v12115_v43 }
0x14e4   : > { %3789 = vmatpush1.bf16.msra.mxu1 %v12113_v45 }
0x14e5   : > { %3790 = vmatprep.subr.bf16.mxu1 %v12118_v48 }
0x14e8   : > { %3791 = vmatpush1.bf16.msra.mxu1 %v12116_v49 }
0x14e9   : > { %3792 = vmatprep.subr.bf16.mxu1 %v12121_v51 }
0x14ec   : > { %3793 = vmatpush1.bf16.msra.mxu1 %v12119_v50 }
0x156c   : > { %v3680_v29 = vpop.xlane.xlu0 %3679 }
0x156d   : > { %v3684_v30 = vmul.f32 0.015625, %v3680_v29 }
0x156e   : > { %v3683_v31 = vpop.xlane.xlu1 %3682 }
0x156f   : > { %v3686_v32 = vsub.f32 %v3672_v23, %v3684_v30  ;;  %v3685_v33 = vmul.f32 0.015625, %v3683_v31 }
0x1571   : > { %v3687_v34 = vsub.f32 %v3673_v27, %v3685_v33  ;;  %v3688_v36 = vmul.f32 %v3686_v32, %v3686_v32 }
0x1573   : > { %v3690_v39 = vsel %vm798_vm0, %v3688_v36, 0.0  ;;  %v3689_v35 = vmul.f32 %v3687_v34, %v3687_v34 }
0x1574   : > { %3691 = vadd.xlane.f32.xlu0 %v3690_v39 }
0x1575   : > { %v3693_v24 = vsel %vm798_vm0, %v3689_v35, 0.0 }
0x1576   : > { %3694 = vadd.xlane.f32.xlu1 %v3693_v24 }
0x1601   : > { %v3692_v52 = vpop.xlane.xlu0 %3691 }
0x1602   : > { %v3696_v53 = vmul.f32 0.015625, %v3692_v52 }
0x1603   : > { %v3695_v54 = vpop.xlane.xlu1 %3694 }
0x1604   : > { %v3698_v55 = vadd.f32 1e-12, %v3696_v53  ;;  %v3697_v22 = vmul.f32 0.015625, %v3695_v54  ;;  %v13418_v54 = vld [vmem:[%s12880_s25] ss:$0 sm:$0xff] }
0x1606   : > { %12398 = vrsqrt.f32 %v3698_v55  ;;  %v3699_v57 = vadd.f32 1e-12, %v3697_v22 }
0x1608   : > { %12400 = vrsqrt.f32 %v3699_v57 }
0x1610   : > { %v12399_v56 = vpop.eup %12398 }
0x1611   : > { %v3702_v59 = vmul.f32 %v12399_v56, %v3686_v32 }
0x1612   : > { %v12401_v60 = vpop.eup %12400 }
0x1613   : > { %v3710_v17 = vmul.f32 %v10127_v58, %v3702_v59  ;;  %v3703_v19 = vmul.f32 %v12401_v60, %v3687_v34 }
0x1615   : > { %v3711_v47 = vmul.f32 %v10127_v58, %v3703_v19  ;;  %v13369_v61 = vadd.f32 %v10128_v46, %v3710_v17 }
0x1617   : > { %v13371_v62 = vadd.f32 %v10128_v46, %v3711_v47 }
0x1619   : > { %v3720_v63 = vpack.c.bf16 %v13371_v62, %v13369_v61 }
0x161b   : > { %10146 = vmatmul.mubr.msk.bf16.vlgmr.msra.gmra.mrb[32].mxu1 %vm798_vm0, %v3720_v63 }
0x16ee   : > { %v3820_v2 = vpop.f32.mrb[32].mxu1 }
0x16ef   : > { %v3821_v5 = vadd.f32 %v3820_v2, %v3736_v1  ;;  %v3822_v6 = vpop.f32.mrb[33].mxu1 }
0x16f0   : > { %v3824_v7 = vpop.f32.mrb[34].mxu1  ;;  %v3823_v9 = vadd.f32 %v3822_v6, %v3740_v3 }
0x16f1   : > { %v3826_v8 = vpop.f32.mrb[35].mxu1  ;;  %3835 = vrot.lane.b32.xlu1 %v3821_v5, %s14576_s30  ;;  %3831 = vrot.lane.b32.xlu0 %v3821_v5, %s14577_s26  ;;  %v3825_v11 = vadd.f32 %v3824_v7, %v3736_v1 }
0x16f2   : > { %v3827_v10 = vadd.f32 %v3826_v8, %v3740_v3  ;;  %11182 = vmatprep.mubr.msk.f32.mxu1 %vm988_vm1, %v3821_v5 }
0x16f3   : > { %v11820_v38 = vpack.i.bf16 %v3825_v11, %v3821_v5 }
0x16f4   : > { %v11566_v12 = vpack.c.bf16 %v3827_v10, %v3823_v9  ;;  %v13384_v37 = vpack.i.bf16 %v3827_v10, %v3823_v9 }
0x16f5   : > { %3833 = vrot.lane.b32.xlu1 %v3825_v11, %s14577_s26  ;;  %3839 = vrot.lane.b32.xlu0 %v3821_v5, %s14578_s29 }
0x16f9   : > { %3837 = vrot.lane.b32.xlu1 %v3825_v11, %s14576_s30  ;;  %11821 = vrot.lane.b32.xlu0 %v11820_v38, %s14579_s7 }
0x16fd   : > { %3841 = vrot.lane.b32.xlu1 %v3825_v11, %s14578_s29 }
0x1763   : > { %v3836_v13 = vpop.permute.xlu1 %3835  ;;  %v3832_v14 = vpop.permute.xlu0 %3831 }
0x1764   : > { %11196 = vmatprep.mubr.msk.f32.mxu0 %vm988_vm1, %v3836_v13 }
0x1767   : > { %v3834_v15 = vpop.permute.xlu1 %3833  ;;  %v3840_v16 = vpop.permute.xlu0 %3839 }
0x1768   : > { %v11825_v20 = vpack.i.bf16 %v3834_v15, %v3832_v14 }
0x176a   : > { %11826 = vrot.lane.b32.xlu1 %v11825_v20, %s14579_s7 }
0x176b   : > { %v3838_v23 = vpop.permute.xlu1 %3837  ;;  %v11822_v26 = vpop.permute.xlu0 %11821 }
0x176c   : > { %v11830_v27 = vpack.i.bf16 %v3838_v23, %v3836_v13  ;;  %v11824_v28 = vunpack.i.h.bf16 %v11822_v26  ;;  %v11823_v29 = vunpack.i.l.bf16 %v11822_v26 }
0x176e   : > { %v11542_v30 = vpack.c.bf16 %v11824_v28, %v11823_v29  ;;  %11831 = vrot.lane.b32.xlu0 %v11830_v27, %s14579_s7 }
0x176f   : > { %v3842_v31 = vpop.permute.xlu1 %3841 }
0x1770   : > { %v11835_v32 = vpack.i.bf16 %v3842_v31, %v3840_v16  ;;  %11544 = vmatprep.subr.msk.bf16.mxu1 %vm12847_vm2, %v11542_v30 }
0x1771   : > { %11547 = vmatpush3.bf16.xpose.msk.msra.mxu1 %vm12847_vm2, %v11542_v30 }
0x1772   : > { %11836 = vrot.lane.b32.xlu1 %v11835_v32, %s14579_s7 }
0x1778   : > { %11183 = vmatmul.mubr.msk.f32.vlgmr.msra.gmra.mrb[36].mxu1 %vm988_vm1, %v3825_v11 }
0x1779   : > { %11189 = vmatprep.mubr.msk.f32.mxu1 %vm988_vm1, %v3832_v14 }
0x17dc   : > { %v11827_v33 = vpop.permute.xlu1 %11826 }
0x17dd   : > { %v11829_v34 = vunpack.i.h.bf16 %v11827_v33  ;;  %v11828_v36 = vunpack.i.l.bf16 %v11827_v33 }
0x17df   : > { %v11548_v39 = vpack.c.bf16 %v11829_v34, %v11828_v36 }
0x17e0   : > { %v11832_v35 = vpop.permute.xlu0 %11831 }
0x17e1   : > { %v11834_v24 = vunpack.i.h.bf16 %v11832_v35  ;;  %v11833_v25 = vunpack.i.l.bf16 %v11832_v35  ;;  %11550 = vmatprep.subr.msk.bf16.mxu1 %vm12847_vm2, %v11548_v39 }
0x17e2   : > { %11553 = vmatpush3.bf16.xpose.msk.msra.mxu1 %vm12847_vm2, %v11548_v39 }
0x17e3   : > { %v11554_v41 = vpack.c.bf16 %v11834_v24, %v11833_v25 }
0x17e4   : > { %v11837_v43 = vpop.permute.xlu1 %11836 }
0x17e5   : > { %v11839_v45 = vunpack.i.h.bf16 %v11837_v43  ;;  %v11838_v48 = vunpack.i.l.bf16 %v11837_v43  ;;  %11556 = vmatprep.subr.msk.bf16.mxu0 %vm12847_vm2, %v11554_v41 }
0x17e6   : > { %11559 = vmatpush3.bf16.xpose.msk.msra.mxu0 %vm12847_vm2, %v11554_v41 }
0x17e7   : > { %v11560_v49 = vpack.c.bf16 %v11839_v45, %v11838_v48  ;;  %11567 = vmatprep.subr.bf16.mxu0 %v11566_v12 }
0x17e9   : > { %11190 = vmatmul.mubr.msk.f32.vlgmr.msra.gmra.mrb[38].mxu1 %vm988_vm1, %v3834_v15  ;;  %11562 = vmatprep.subr.msk.bf16.mxu1 %vm12847_vm2, %v11560_v49 }
0x17ea   : > { %11565 = vmatpush3.bf16.xpose.msk.msra.mxu1 %vm12847_vm2, %v11560_v49  ;;  %11203 = vmatprep.mubr.msk.f32.mxu1 %vm988_vm1, %v3840_v16 }
0x17ed   : > { %11197 = vmatmul.mubr.msk.f32.vlgmr.msra.gmra.mrb[32].mxu0 %vm988_vm1, %v3838_v23 }
0x17ee   : > { %11569 = vmatpush3.bf16.msra.mxu0 %v11566_v12 }
0x17f1   : > { %11204 = vmatmul.mubr.msk.f32.vlgmr.msra.gmra.mrb[40].mxu1 %vm988_vm1, %v3842_v31 }
0x184b   : > { %v11184_v50 = vpop.f32.mrb[36].mxu1 }
0x184c   : > { %v4212_v51 = vmul.f32 0.25, %v11184_v50  ;;  %v3941_v52 = vpop.f32.mrb[37].mxu1 }
0x184d   : > { %v4211_v53 = vmul.f32 0.25, %v3941_v52 }
0x184e   : > { %v4220_v55 = vadd.f32 %v13418_v54, %v4212_v51 }
0x184f   : > { %v4219_v22 = vadd.f32 %v13418_v54, %v4211_v53 }
0x1850   : > { %v4230_v57 = vsel %vm988_vm1, %v4220_v55, -inf }
0x1851   : > { %4231 = vmax.xlane.f32.xlu1 %v4230_v57  ;;  %v4227_v56 = vsel %vm988_vm1, %v4219_v22, -inf }
0x1852   : > { %4228 = vmax.xlane.f32.xlu0 %v4227_v56 }
0x18bc   : > { %v11191_v58 = vpop.f32.mrb[38].mxu1 }
0x18bd   : > { %v4214_v59 = vmul.f32 0.25, %v11191_v58  ;;  %v4028_v60 = vpop.f32.mrb[39].mxu1 }
0x18be   : > { %v4213_v17 = vmul.f32 0.25, %v4028_v60 }
0x18bf   : > { %v4222_v19 = vadd.f32 %v13418_v54, %v4214_v59 }
0x18c0   : > { %v11198_v46 = vpop.f32.mrb[32].mxu0  ;;  %v4221_v1 = vadd.f32 %v13418_v54, %v4213_v17 }
0x18c1   : > { %v4216_v47 = vmul.f32 0.25, %v11198_v46  ;;  %v4115_v63 = vpop.f32.mrb[33].mxu0  ;;  %v4236_v0 = vsel %vm988_vm1, %v4222_v19, -inf }
0x18c2   : > { %v4215_v2 = vmul.f32 0.25, %v4115_v63  ;;  %4237 = vmax.xlane.f32.xlu0 %v4236_v0  ;;  %v4233_v10 = vsel %vm988_vm1, %v4221_v1, -inf }
0x18c3   : > { %v4224_v3 = vadd.f32 %v13418_v54, %v4216_v47 }
0x18c4   : > { %v11205_v5 = vpop.f32.mrb[40].mxu1  ;;  %v4223_v6 = vadd.f32 %v13418_v54, %v4215_v2 }
0x18c5   : > { %v4218_v7 = vmul.f32 0.25, %v11205_v5  ;;  %v4202_v8 = vpop.f32.mrb[41].mxu1  ;;  %v4242_v9 = vsel %vm988_vm1, %v4224_v3, -inf }
0x18c6   : > { %v4217_v11 = vmul.f32 0.25, %v4202_v8  ;;  %4243 = vmax.xlane.f32.xlu1 %v4242_v9  ;;  %4234 = vmax.xlane.f32.xlu0 %v4233_v10  ;;  %v4239_v13 = vsel %vm988_vm1, %v4223_v6, -inf }
0x18c7   : > { %v4226_v12 = vadd.f32 %v13418_v54, %v4218_v7 }
0x18c8   : > { %v4225_v38 = vadd.f32 %v13418_v54, %v4217_v11 }
0x18c9   : > { %v4248_v14 = vsel %vm988_vm1, %v4226_v12, -inf }
0x18ca   : > { %4240 = vmax.xlane.f32.xlu0 %v4239_v13  ;;  %4249 = vmax.xlane.f32.xlu1 %v4248_v14  ;;  %v4245_v15 = vsel %vm988_vm1, %v4225_v38, -inf }
0x18ce   : > { %4246 = vmax.xlane.f32.xlu0 %v4245_v15 }
0x18de   : > { %v4232_v16 = vpop.xlane.xlu1 %4231 }
0x18df   : > { %v4252_v20 = vsub.f32 %v4220_v55, %v4232_v16  ;;  %v4229_v23 = vpop.xlane.xlu0 %4228 }
0x18e0   : > { %v4251_v26 = vsub.f32 %v4219_v22, %v4229_v23 }
0x18e1   : > { %v4261_v27 = vmul.f32 1.442695, %v4252_v20 }
0x18e2   : > { %v4259_v28 = vmul.f32 1.442695, %v4251_v26 }
0x18e3   : > { %12402 = vpow2.f32 %v4261_v27 }
0x18e4   : > { %12404 = vpow2.f32 %v4259_v28 }
0x18ed   : > { %v12403_v29 = vpop.eup %12402 }
0x18ee   : > { %v12405_v30 = vpop.eup %12404  ;;  %v4278_v31 = vsel %vm988_vm1, %v12403_v29, 0.0 }
0x18ef   : > { %4279 = vadd.xlane.f32.xlu1 %v4278_v31  ;;  %v4275_v32 = vsel %vm988_vm1, %v12405_v30, 0.0 }
0x18f0   : > { %4276 = vadd.xlane.f32.xlu0 %v4275_v32 }
0x194f   : > { %v4238_v33 = vpop.xlane.xlu0 %4237 }
0x1950   : > { %v4254_v34 = vsub.f32 %v4222_v19, %v4238_v33 }
0x1952   : > { %v4265_v36 = vmul.f32 1.442695, %v4254_v34 }
0x1953   : > { %v4244_v39 = vpop.xlane.xlu1 %4243  ;;  %v4235_v35 = vpop.xlane.xlu0 %4234 }
0x1954   : > { %12406 = vpow2.f32 %v4265_v36  ;;  %v4256_v24 = vsub.f32 %v4224_v3, %v4244_v39  ;;  %v4253_v25 = vsub.f32 %v4221_v1, %v4235_v35 }
0x1956   : > { %v4269_v41 = vmul.f32 1.442695, %v4256_v24  ;;  %v4263_v43 = vmul.f32 1.442695, %v4253_v25 }
0x1957   : > { %v4241_v45 = vpop.xlane.xlu0 %4240  ;;  %v4250_v48 = vpop.xlane.xlu1 %4249 }
0x1958   : > { %12408 = vpow2.f32 %v4269_v41  ;;  %v4255_v49 = vsub.f32 %v4223_v6, %v4241_v45  ;;  %v4258_v50 = vsub.f32 %v4226_v12, %v4250_v48 }
0x1959   : > { %12410 = vpow2.f32 %v4263_v43 }
0x195a   : > { %v4267_v51 = vmul.f32 1.442695, %v4255_v49  ;;  %v4273_v52 = vmul.f32 1.442695, %v4258_v50 }
0x195b   : > { %v4247_v53 = vpop.xlane.xlu0 %4246 }
0x195c   : > { %12412 = vpow2.f32 %v4267_v51  ;;  %v4257_v55 = vsub.f32 %v4225_v38, %v4247_v53  ;;  %v12122_v51 = vld [vmem:[%s14572_s0 + $0x40] sm:$0xff]   ;;  %v12124_v53 = vld [vmem:[%s14572_s0 + $0x50] sm:$0xff]  }
0x195d   : > { %12414 = vpow2.f32 %v4273_v52  ;;  %v12123_v52 = vld [vmem:[%s14572_s0 + $0x48] sm:$0xff]  }
0x195e   : > { %v13438_v22 = vpop.eup %12406  ;;  %v4271_v57 = vmul.f32 1.442695, %v4257_v55  ;;  %v12125_v55 = vld [vmem:[%s14572_s0 + $0x58] sm:$0xff]  }
0x195f   : > { %v4284_v56 = vsel %vm988_vm1, %v13438_v22, 0.0 }
0x1960   : > { %12416 = vpow2.f32 %v4271_v57  ;;  %4285 = vadd.xlane.f32.xlu1 %v4284_v56 }
0x1962   : > { %v13442_v58 = vpop.eup %12408 }
0x1963   : > { %v12411_v59 = vpop.eup %12410  ;;  %v4290_v60 = vsel %vm988_vm1, %v13442_v58, 0.0 }
0x1964   : > { %4291 = vadd.xlane.f32.xlu1 %v4290_v60  ;;  %v4281_v17 = vsel %vm988_vm1, %v12411_v59, 0.0 }
0x1965   : > { %4282 = vadd.xlane.f32.xlu0 %v4281_v17 }
0x1966   : > { %v12413_v19 = vpop.eup %12412 }
0x1967   : > { %v13447_v46 = vpop.eup %12414  ;;  %v4287_v47 = vsel %vm988_vm1, %v12413_v19, 0.0 }
0x1968   : > { %v4296_v63 = vsel %vm988_vm1, %v13447_v46, 0.0 }
0x1969   : > { %4297 = vadd.xlane.f32.xlu1 %v4296_v63  ;;  %4288 = vadd.xlane.f32.xlu0 %v4287_v47 }
0x196a   : > { %v12417_v0 = vpop.eup %12416 }
0x196b   : > { %v4293_v1 = vsel %vm988_vm1, %v12417_v0, 0.0 }
0x196d   : > { %4294 = vadd.xlane.f32.xlu0 %v4293_v1 }
0x197a   : > { %11846 = vrot.lane.b32.xlu1 %v13384_v37, %s14576_s30 }
0x197c   : > { %v4280_v2 = vpop.xlane.xlu1 %4279 }
0x197d   : > { %12418 = vrcp.f32 %v4280_v2  ;;  %v4277_v3 = vpop.xlane.xlu0 %4276 }
0x197e   : > { %11851 = vrot.lane.b32.xlu1 %v13384_v37, %s14578_s29  ;;  %12420 = vrcp.f32 %v4277_v3 }
0x1983   : > { %11841 = vrot.lane.b32.xlu0 %v13384_v37, %s14577_s26 }
0x1987   : > { %v12419_v5 = vpop.eup %12418 }
0x1988   : > { %v12421_v6 = vpop.eup %12420  ;;  %v4302_v8 = vmul.f32 %v12419_v5, %v12403_v29 }
0x1989   : > { %v4300_v7 = vmul.f32 %v12421_v6, %v12405_v30 }
0x198b   : > { %11210 = vmatprep.mubr.msk.f32.mxu0 %vm988_vm1, %v4300_v7 }
0x198c   : > { %11211 = vmatmul.mubr.msk.f32.vlgmr.msra.gmra.mrb[34].mxu0 %vm988_vm1, %v4302_v8 }
0x19ed   : > { %v4286_v9 = vpop.xlane.xlu1 %4285 }
0x19f1   : > { %v4292_v10 = vpop.xlane.xlu1 %4291 }
0x19f2   : > { %v4283_v11 = vpop.xlane.xlu0 %4282 }
0x19f3   : > { %12422 = vrcp.f32 %v4283_v11 }
0x19f4   : > { %12424 = vrcp.f32 %v4286_v9 }
0x19f5   : > { %12426 = vrcp.f32 %v4292_v10 }
0x19f6   : > { %v4298_v12 = vpop.xlane.xlu1 %4297  ;;  %v4289_v38 = vpop.xlane.xlu0 %4288 }
0x19f7   : > { %12428 = vrcp.f32 %v4289_v38 }
0x19fa   : > { %v11847_v13 = vpop.permute.xlu1 %11846  ;;  %v4295_v14 = vpop.xlane.xlu0 %4294 }
0x19fb   : > { %v11849_v37 = vunpack.i.h.bf16 %v11847_v13  ;;  %v11848_v15 = vunpack.i.l.bf16 %v11847_v13  ;;  %12430 = vrcp.f32 %v4295_v14  ;;  %v10180_v14 = vld [vmem:[%s14573_s8 + $0x2] ss:$0 sm:$0xff] }
0x19fc   : > { %12432 = vrcp.f32 %v4298_v12 }
0x19fd   : > { %v12423_v16 = vpop.eup %12422  ;;  %v11574_v20 = vpack.c.bf16 %v11849_v37, %v11848_v15 }
0x19fe   : > { %v11852_v23 = vpop.permute.xlu1 %11851  ;;  %v11842_v26 = vpop.permute.xlu0 %11841  ;;  %v4304_v27 = vmul.f32 %v12423_v16, %v12411_v59 }
0x19ff   : > { %v11854_v28 = vunpack.i.h.bf16 %v11852_v23  ;;  %v11853_v29 = vunpack.i.l.bf16 %v11852_v23  ;;  %v11844_v30 = vunpack.i.h.bf16 %v11842_v26  ;;  %v11843_v31 = vunpack.i.l.bf16 %v11842_v26  ;;  %11575 = vmatprep.subr.bf16.mxu0 %v11574_v20  ;;  %v12425_v32 = vpop.eup %12424 }
0x1a00   : > { %11217 = vmatprep.mubr.msk.f32.mxu1 %vm988_vm1, %v4304_v27  ;;  %11577 = vmatpush3.bf16.msra.mxu0 %v11574_v20  ;;  %v12427_v33 = vpop.eup %12426  ;;  %v4306_v41 = vmul.f32 %v12425_v32, %v13438_v22 }
0x1a01   : > { %v11570_v34 = vpack.c.bf16 %v11844_v30, %v11843_v31  ;;  %11234 = vmatprep.subr.bf16.mxu0 %v12629_v21  ;;  %v12429_v36 = vpop.eup %12428  ;;  %v11578_v35 = vpack.c.bf16 %v11854_v28, %v11853_v29  ;;  %v4310_v24 = vmul.f32 %v12427_v33, %v13442_v58 }
0x1a02   : > { %v4308_v39 = vmul.f32 %v12429_v36, %v12413_v19 }
0x1a03   : > { %11571 = vmatprep.subr.bf16.mxu1 %v11570_v34 }
0x1a04   : > { %11573 = vmatpush3.bf16.msra.mxu1 %v11570_v34  ;;  %11224 = vmatprep.mubr.msk.f32.mxu0 %vm988_vm1, %v4308_v39 }
0x1a05   : > { %v12431_v25 = vpop.eup %12430  ;;  %11579 = vmatprep.subr.bf16.mxu1 %v11578_v35  ;;  %11225 = vmatmul.mubr.msk.f32.vlgmr.msra.gmra.mrb[36].mxu0 %vm988_vm1, %v4310_v24 }
0x1a06   : > { %v12433_v43 = vpop.eup %12432  ;;  %v4312_v45 = vmul.f32 %v12431_v25, %v12417_v0  ;;  %11242 = vmatprep.mubr.msk.bf16.mxu0 %vm12630_vm3, %v12629_v21  ;;  %11235 = vmatpush3.bf16.msra.mxu0 %v12122_v51  ;;  %v12137_v51 = vld [vmem:[%s14505_s10 + $0xb4] ss:$8 sps:$4 sm:$0xff]  }
0x1a07   : > { %11218 = vmatmul.mubr.msk.f32.vlgmr.msra.gmra.mrb[42].mxu1 %vm988_vm1, %v4306_v41  ;;  %v4314_v48 = vmul.f32 %v12433_v43, %v13447_v46  ;;  %11236 = vmatprep.subr.bf16.mxu0 %v12629_v21  ;;  %v12126_v41 = vld [vmem:[%s14505_s10 + $0x80] ss:$8 sps:$4 sm:$0xff]   ;;  %v12131_v43 = vld [vmem:[%s14505_s10 + $0x94] ss:$8 sps:$4 sm:$0xff]  }
0x1a08   : > { %11581 = vmatpush3.bf16.msra.mxu1 %v11578_v35  ;;  %11231 = vmatprep.mubr.msk.f32.mxu1 %vm988_vm1, %v4312_v45  ;;  %v12129_v45 = vld [vmem:[%s14505_s10 + $0x90] ss:$8 sps:$4 sm:$0xff]  }
0x1a0a   : > { %11237 = vmatpush3.bf16.msra.mxu0 %v12123_v52  ;;  %v12138_v52 = vld [vmem:[%s14507_s12 + $0x140] sm:$0xff]  }
0x1a0b   : > { %11232 = vmatmul.mubr.msk.f32.vlgmr.msra.gmra.mrb[44].mxu1 %vm988_vm1, %v4314_v48  ;;  %11238 = vmatprep.subr.bf16.mxu0 %v12629_v21  ;;  %v12134_v48 = vld [vmem:[%s14505_s10 + $0xa4] ss:$8 sps:$4 sm:$0xff]  }
0x1a0c   : > { %4901 = vmatprep.mubr.bf16.mxu1 %v12624_v18 }
0x1a0e   : > { %11239 = vmatpush3.bf16.msra.mxu0 %v12124_v53  ;;  %v12139_v53 = vld [vmem:[%s14507_s12 + $0x100] sm:$0xff]  }
0x1a0f   : > { %11240 = vmatprep.subr.bf16.mxu0 %v12629_v21 }
0x1a12   : > { %11241 = vmatpush3.bf16.msra.mxu0 %v12125_v55  ;;  %v12140_v55 = vld [vmem:[%s14507_s12 + $0x148] sm:$0xff]  }
0x1a13   : > { %10838 = vmatprep.subr.bf16.mxu0 %v12138_v52 }
0x1a5f   : > { %v11212_v49 = vpop.f32.mrb[34].mxu0 }
0x1a60   : > { %v4387_v50 = vpop.f32.mrb[35].mxu0 }
0x1ad8   : > { %v11226_v22 = vpop.f32.mrb[36].mxu0 }
0x1ad9   : > { %v4549_v57 = vpop.f32.mrb[37].mxu0 }
0x1ada   : > { %v11219_v56 = vpop.f32.mrb[42].mxu1  ;;  %v11860_v58 = vpack.i.bf16 %v11226_v22, %v4549_v57  ;;  %v12141_v22 = vld [vmem:[%s14507_s12 + $0x108] sm:$0xff]  }
0x1adb   : > { %v4468_v59 = vpop.f32.mrb[43].mxu1 }
0x1adc   : > { %v11855_v60 = vpack.i.bf16 %v11219_v56, %v4468_v59  ;;  %11861 = vrot.lane.b32.xlu0 %v11860_v58, %s14580_s2 }
0x1ade   : > { %11856 = vrot.lane.b32.xlu1 %v11855_v60, %s14581_s5  ;;  %v11233_v17 = vpop.f32.mrb[44].mxu1 }
0x1adf   : > { %v4630_v19 = vpop.f32.mrb[45].mxu1 }
0x1ae0   : > { %v11865_v46 = vpack.i.bf16 %v11233_v17, %v4630_v19 }
0x1ae2   : > { %11866 = vrot.lane.b32.xlu1 %v11865_v46, %s14582_s22 }
0x1b4e   : > { %v11862_v63 = vpop.permute.xlu0 %11861 }
0x1b4f   : > { %v11864_v5 = vunpack.i.h.bf16 %v11862_v63  ;;  %v11863_v6 = vunpack.i.l.bf16 %v11862_v63 }
0x1b50   : > { %v11857_v47 = vpop.permute.xlu1 %11856 }
0x1b51   : > { %v11859_v0 = vunpack.i.h.bf16 %v11857_v47  ;;  %v11858_v1 = vunpack.i.l.bf16 %v11857_v47  ;;  %v10188_v47 = vld [vmem:[%s14575_s1 + $0x2] ss:$0 sm:$0xff] }
0x1b53   : > { %v4664_v2 = vsel %vm988_vm1, %v11212_v49, %v11859_v0  ;;  %v4663_v3 = vsel %vm988_vm1, %v4387_v50, %v11858_v1  ;;  %v12132_v49 = vld [vmem:[%s14505_s10 + $0xa0] ss:$8 sps:$4 sm:$0xff]   ;;  %v12135_v50 = vld [vmem:[%s14505_s10 + $0xb0] ss:$8 sps:$4 sm:$0xff]  }
0x1b54   : > { %v11867_v7 = vpop.permute.xlu1 %11866  ;;  %v4665_v10 = vsel %vm1793_vm4, %v4663_v3, %v11863_v6  ;;  %v4666_v11 = vsel %vm1793_vm4, %v4664_v2, %v11864_v5  ;;  %v10189_v2 = vld [vmem:[%s14504_s9 + $0x2] ss:$0 sm:$0xff] }
0x1b55   : > { %v11869_v8 = vunpack.i.h.bf16 %v11867_v7  ;;  %v11868_v9 = vunpack.i.l.bf16 %v11867_v7 }
0x1b57   : > { %v4668_v12 = vsel %vm1796_vm5, %v4666_v11, %v11869_v8  ;;  %v4667_v38 = vsel %vm1796_vm5, %v4665_v10, %v11868_v9  ;;  %v12142_v8 = vld [vmem:[%s14507_s12 + $0x150] sm:$0xff]   ;;  %v12144_v10 = vld [vmem:[%s14507_s12 + $0x158] sm:$0xff]  }
0x1b58   : > { %v4669_v13 = vpack.c.bf16 %v4668_v12, %v4667_v38  ;;  %v12143_v9 = vld [vmem:[%s14507_s12 + $0x110] sm:$0xff]   ;;  %v12145_v11 = vld [vmem:[%s14507_s12 + $0x118] sm:$0xff]   ;;  %v12146_v12 = vld [vmem:[%s14507_s12 + $0x160] sm:$0xff]  }
0x1b59   : > { %v12147_v38 = vld [vmem:[%s14507_s12 + $0x120] sm:$0xff]  }
0x1b5a   : > { %11243 = vmatmul.mubr.msk.bf16.vlgmr.msra.gmra.mrb[40].mxu0 %vm798_vm0, %v4669_v13  ;;  %v12148_v13 = vld [vmem:[%s14507_s12 + $0x168] sm:$0xff]  }
0x1b5b   : > { %10839 = vmatpush3.bf16.msra.mxu0 %v12139_v53 }
0x1b5c   : > { %10840 = vmatprep.subr.bf16.mxu0 %v12140_v55 }
0x1b5f   : > { %10841 = vmatpush3.bf16.msra.mxu0 %v12141_v22 }
0x1b60   : > { %10842 = vmatprep.subr.bf16.mxu0 %v12142_v8 }
0x1b63   : > { %10843 = vmatpush3.bf16.msra.mxu0 %v12143_v9 }
0x1b64   : > { %10844 = vmatprep.subr.bf16.mxu0 %v12144_v10 }
0x1b67   : > { %10845 = vmatpush3.bf16.msra.mxu0 %v12145_v11 }
0x1b68   : > { %10846 = vmatprep.subr.bf16.mxu0 %v12146_v12 }
0x1b6b   : > { %10847 = vmatpush3.bf16.msra.mxu0 %v12147_v38 }
0x1b6c   : > { %10848 = vmatprep.subr.bf16.mxu0 %v12148_v13 }
0x1c2d   : > { %v4748_v37 = vpop.f32.mrb[40].mxu0 }
0x1c2e   : > { %v4749_v15 = vadd.f32 %v10180_v14, %v4748_v37  ;;  %v11244_v16 = vpop.f32.mrb[41].mxu0  ;;  %v12150_v37 = vld [vmem:[%s14507_s12 + $0x170] sm:$0xff]  }
0x1c2f   : > { %v4751_v20 = vpop.f32.mrb[42].mxu0  ;;  %v12152_v16 = vld [vmem:[%s14507_s12 + $0x178] sm:$0xff]  }
0x1c30   : > { %v4755_v23 = vadd.f32 %v4749_v15, %v13369_v61  ;;  %v4752_v26 = vadd.f32 %v10180_v14, %v4751_v20  ;;  %v11245_v27 = vpop.f32.mrb[43].mxu0  ;;  %v12149_v14 = vld [vmem:[%s14507_s12 + $0x128] sm:$0xff]   ;;  %v12151_v15 = vld [vmem:[%s14507_s12 + $0x130] sm:$0xff]   ;;  %v12153_v20 = vld [vmem:[%s14507_s12 + $0x138] sm:$0xff]  }
0x1c31   : > { %10849 = vmatpush3.bf16.msra.mxu0 %v12149_v14 }
0x1c32   : > { %v4756_v28 = vadd.f32 %v4752_v26, %v13371_v62  ;;  %v4761_v29 = vsel %vm798_vm0, %v4755_v23, 0.0  ;;  %v12128_v62 = vld [vmem:[%s14505_s10 + $0x84] ss:$8 sps:$4 sm:$0xff]   ;;  %10850 = vmatprep.subr.bf16.mxu0 %v12150_v37 }
0x1c33   : > { %4762 = vadd.xlane.f32.xlu0 %v4761_v29  ;;  %4869 = vmatprep.subr.bf16.mxu1 %v12128_v62 }
0x1c34   : > { %v4764_v30 = vsel %vm798_vm0, %v4756_v28, 0.0  ;;  %4870 = vmatpush1.bf16.msra.mxu1 %v12126_v41 }
0x1c35   : > { %4765 = vadd.xlane.f32.xlu1 %v4764_v30  ;;  %4871 = vmatprep.subr.bf16.mxu1 %v12131_v43 }
0x1c36   : > { %10851 = vmatpush3.bf16.msra.mxu0 %v12151_v15 }
0x1c37   : > { %10852 = vmatprep.subr.bf16.mxu0 %v12152_v16 }
0x1c38   : > { %4872 = vmatpush1.bf16.msra.mxu1 %v12129_v45 }
0x1c39   : > { %4873 = vmatprep.subr.bf16.mxu1 %v12134_v48 }
0x1c3a   : > { %10853 = vmatpush3.bf16.msra.mxu0 %v12153_v20 }
0x1c3c   : > { %4874 = vmatpush1.bf16.msra.mxu1 %v12132_v49 }
0x1c3d   : > { %4875 = vmatprep.subr.bf16.mxu1 %v12137_v51 }
0x1c40   : > { %4876 = vmatpush1.bf16.msra.mxu1 %v12135_v50 }
0x1cc0   : > { %v4763_v31 = vpop.xlane.xlu0 %4762 }
0x1cc1   : > { %v4767_v32 = vmul.f32 0.015625, %v4763_v31 }
0x1cc2   : > { %v4766_v33 = vpop.xlane.xlu1 %4765 }
0x1cc3   : > { %v4769_v34 = vsub.f32 %v4755_v23, %v4767_v32  ;;  %v4768_v36 = vmul.f32 0.015625, %v4766_v33  ;;  %v10198_v23 = vld [vmem:[%s14506_s11 + $0x4] sm:$0x3] }
0x1cc4   : > { %v4819_v26 = vrot.slane %v10198_v23, %v12824_v42  ;;  %v4823_v27 = vrot.slane %v10198_v23, %v12829_v44  ;;  %v12154_v23 = vld [vmem:[%s14565_s3 + $0xc0] ss:$8 sps:$4 sm:$0xff]  }
0x1cc5   : > { %v4770_v39 = vsub.f32 %v4756_v28, %v4768_v36  ;;  %v4771_v35 = vmul.f32 %v4769_v34, %v4769_v34 }
0x1cc7   : > { %v4773_v24 = vsel %vm798_vm0, %v4771_v35, 0.0  ;;  %v4772_v61 = vmul.f32 %v4770_v39, %v4770_v39 }
0x1cc8   : > { %4774 = vadd.xlane.f32.xlu0 %v4773_v24 }
0x1cc9   : > { %v4776_v25 = vsel %vm798_vm0, %v4772_v61, 0.0 }
0x1ccc   : > { %4777 = vadd.xlane.f32.xlu0 %v4776_v25 }
0x1d55   : > { %v4775_v57 = vpop.xlane.xlu0 %4774 }
0x1d56   : > { %v4779_v56 = vmul.f32 0.015625, %v4775_v57 }
0x1d58   : > { %v4781_v58 = vadd.f32 1e-12, %v4779_v56 }
0x1d59   : > { %v4778_v59 = vpop.xlane.xlu0 %4777 }
0x1d5a   : > { %12434 = vrsqrt.f32 %v4781_v58  ;;  %v4780_v60 = vmul.f32 0.015625, %v4778_v59 }
0x1d5c   : > { %v4782_v17 = vadd.f32 1e-12, %v4780_v60 }
0x1d5e   : > { %12436 = vrsqrt.f32 %v4782_v17 }
0x1d64   : > { %v12435_v19 = vpop.eup %12434 }
0x1d65   : > { %v4785_v46 = vmul.f32 %v12435_v19, %v4769_v34  ;;  %v10241_v19 = vld [vmem:[%s14508_s13 + $0x2] ss:$0 sm:$0xff] }
0x1d67   : > { %v4793_v0 = vmul.f32 %v10188_v47, %v4785_v46 }
0x1d68   : > { %v12437_v63 = vpop.eup %12436 }
0x1d69   : > { %v4786_v1 = vmul.f32 %v12437_v63, %v4770_v39  ;;  %v13550_v5 = vadd.f32 %v10189_v2, %v4793_v0 }
0x1d6b   : > { %v4794_v3 = vmul.f32 %v10188_v47, %v4786_v1 }
0x1d6d   : > { %v13552_v6 = vadd.f32 %v10189_v2, %v4794_v3 }
0x1d6f   : > { %v4803_v7 = vpack.c.bf16 %v13552_v6, %v13550_v5 }
0x1d71   : > { %10207 = vmatmul.mubr.msk.bf16.vlgmr.msra.gmra.mrb[48].mxu1 %vm798_vm0, %v4803_v7 }
0x1d72   : > { %5258 = vmatprep.mubr.bf16.mxu1 %v12624_v18 }
0x1e44   : > { %v4903_v28 = vpop.f32.mrb[48].mxu1 }
0x1e45   : > { %v4904_v29 = vadd.f32 %v4903_v28, %v4819_v26  ;;  %v4905_v30 = vpop.f32.mrb[49].mxu1  ;;  %v12162_v28 = vld [vmem:[%s14565_s3 + $0xe4] ss:$8 sps:$4 sm:$0xff]  }
0x1e46   : > { %v4906_v31 = vadd.f32 %v4905_v30, %v4823_v27  ;;  %v4907_v32 = vpop.f32.mrb[50].mxu1  ;;  %v12163_v30 = vld [vmem:[%s14565_s3 + $0xf0] ss:$8 sps:$4 sm:$0xff]  }
0x1e47   : > { %v4916_v33 = vmul.f32 0.70710677, %v4904_v29  ;;  %v4908_v34 = vadd.f32 %v4907_v32, %v4819_v26  ;;  %v4909_v36 = vpop.f32.mrb[51].mxu1  ;;  %v4912_v49 = vmul.f32 0.5, %v4904_v29  ;;  %v12159_v26 = vld [vmem:[%s14565_s3 + $0xd4] ss:$8 sps:$4 sm:$0xff]  }
0x1e48   : > { %v4917_v39 = vmul.f32 0.70710677, %v4906_v31  ;;  %v4910_v35 = vadd.f32 %v4909_v36, %v4823_v27  ;;  %v4913_v52 = vmul.f32 0.5, %v4906_v31  ;;  %v12157_v27 = vld [vmem:[%s14565_s3 + $0xd0] ss:$8 sps:$4 sm:$0xff]  }
0x1e49   : > { %12438 = verf.f32 %v4916_v33  ;;  %v4918_v24 = vmul.f32 0.70710677, %v4908_v34  ;;  %v4914_v50 = vmul.f32 0.5, %v4908_v34  ;;  %v12160_v29 = vld [vmem:[%s14565_s3 + $0xe0] ss:$8 sps:$4 sm:$0xff]  }
0x1e4a   : > { %12440 = verf.f32 %v4917_v39  ;;  %v4919_v61 = vmul.f32 0.70710677, %v4910_v35  ;;  %v4915_v53 = vmul.f32 0.5, %v4910_v35  ;;  %v12165_v31 = vld [vmem:[%s14565_s3 + $0xf4] ss:$8 sps:$4 sm:$0xff]  }
0x1e4b   : > { %12442 = verf.f32 %v4918_v24 }
0x1e4c   : > { %12444 = verf.f32 %v4919_v61  ;;  %v10260_v61 = vld [vmem:[%s14509_s14 + $0x2] ss:$0 sm:$0xff] }
0x1e53   : > { %v12439_v25 = vpop.eup %12438 }
0x1e54   : > { %v12441_v62 = vpop.eup %12440  ;;  %v4924_v41 = vadd.f32 1.0, %v12439_v25 }
0x1e55   : > { %v12443_v43 = vpop.eup %12442  ;;  %v4925_v45 = vadd.f32 1.0, %v12441_v62 }
0x1e56   : > { %v12445_v48 = vpop.eup %12444  ;;  %v4926_v51 = vadd.f32 1.0, %v12443_v43  ;;  %v4928_v22 = vmul.f32 %v4924_v41, %v4912_v49 }
0x1e57   : > { %v4927_v55 = vadd.f32 1.0, %v12445_v48  ;;  %v4929_v56 = vmul.f32 %v4925_v45, %v4913_v52  ;;  %v10261_v45 = vld [vmem:[%s14510_s15 + $0x2] ss:$0 sm:$0xff]  ;;  %v10270_v52 = vld [vmem:[%s14568_s4 + $0x6] sm:$0x3] }
0x1e58   : > { %v4930_v57 = vmul.f32 %v4926_v51, %v4914_v50 }
0x1e59   : > { %v4931_v58 = vmul.f32 %v4927_v55, %v4915_v53  ;;  %v5176_v53 = vrot.slane %v10270_v52, %v12824_v42 }
0x1e5a   : > { %v4932_v59 = vpack.c.bf16 %v4930_v57, %v4928_v22  ;;  %v5180_v22 = vrot.slane %v10270_v52, %v12829_v44 }
0x1e5b   : > { %v4933_v60 = vpack.c.bf16 %v4931_v58, %v4929_v56 }
0x1e5d   : > { %5103 = vmatprep.mubr.bf16.mxu0 %v4933_v60 }
0x1e5e   : > { %5104 = vmatmul.mubr.bf16.vlgmr.msra.gmra.mrb[44].mxu0 %v4932_v59 }
0x1f31   : > { %v10854_v17 = vpop.f32.mrb[44].mxu0 }
0x1f32   : > { %v10855_v46 = vpop.f32.mrb[45].mxu0 }
0x1f33   : > { %v10856_v47 = vadd.f32 %v10855_v46, %v10854_v17  ;;  %v10857_v63 = vpop.f32.mrb[46].mxu0 }
0x1f34   : > { %v10858_v0 = vpop.f32.mrb[47].mxu0 }
0x1f35   : > { %v5106_v1 = vadd.f32 %v10856_v47, %v10241_v19  ;;  %v10859_v2 = vadd.f32 %v10858_v0, %v10857_v63 }
0x1f37   : > { %v5109_v3 = vadd.f32 %v10859_v2, %v10241_v19  ;;  %v5112_v7 = vadd.f32 %v5106_v1, %v13550_v5 }
0x1f39   : > { %v5118_v8 = vsel %vm798_vm0, %v5112_v7, 0.0  ;;  %v5113_v9 = vadd.f32 %v5109_v3, %v13552_v6  ;;  %v12156_v6 = vld [vmem:[%s14565_s3 + $0xc4] ss:$8 sps:$4 sm:$0xff]  }
0x1f3a   : > { %5119 = vadd.xlane.f32.xlu0 %v5118_v8  ;;  %5226 = vmatprep.subr.bf16.mxu1 %v12156_v6 }
0x1f3b   : > { %v5121_v10 = vsel %vm798_vm0, %v5113_v9, 0.0  ;;  %5227 = vmatpush1.bf16.msra.mxu1 %v12154_v23 }
0x1f3c   : > { %5122 = vadd.xlane.f32.xlu1 %v5121_v10  ;;  %5228 = vmatprep.subr.bf16.mxu1 %v12159_v26 }
0x1f3f   : > { %5229 = vmatpush1.bf16.msra.mxu1 %v12157_v27 }
0x1f40   : > { %5230 = vmatprep.subr.bf16.mxu1 %v12162_v28 }
0x1f43   : > { %5231 = vmatpush1.bf16.msra.mxu1 %v12160_v29 }
0x1f44   : > { %5232 = vmatprep.subr.bf16.mxu1 %v12165_v31 }
0x1f47   : > { %5233 = vmatpush1.bf16.msra.mxu1 %v12163_v30 }
0x1fc7   : > { %v5120_v11 = vpop.xlane.xlu0 %5119 }
0x1fc8   : > { %v5124_v12 = vmul.f32 0.015625, %v5120_v11 }
0x1fc9   : > { %v5123_v38 = vpop.xlane.xlu1 %5122 }
0x1fca   : > { %v5126_v13 = vsub.f32 %v5112_v7, %v5124_v12  ;;  %v5125_v14 = vmul.f32 0.015625, %v5123_v38 }
0x1fcc   : > { %v5127_v37 = vsub.f32 %v5113_v9, %v5125_v14  ;;  %v5128_v15 = vmul.f32 %v5126_v13, %v5126_v13 }
0x1fce   : > { %v5130_v16 = vsel %vm798_vm0, %v5128_v15, 0.0  ;;  %v5129_v20 = vmul.f32 %v5127_v37, %v5127_v37 }
0x1fcf   : > { %5131 = vadd.xlane.f32.xlu0 %v5130_v16 }
0x1fd0   : > { %v5133_v5 = vsel %vm798_vm0, %v5129_v20, 0.0 }
0x1fd1   : > { %5134 = vadd.xlane.f32.xlu1 %v5133_v5 }
0x205c   : > { %v5132_v32 = vpop.xlane.xlu0 %5131 }
0x205d   : > { %v5136_v33 = vmul.f32 0.015625, %v5132_v32 }
0x205e   : > { %v5135_v34 = vpop.xlane.xlu1 %5134 }
0x205f   : > { %v5138_v36 = vadd.f32 1e-12, %v5136_v33  ;;  %v5137_v39 = vmul.f32 0.015625, %v5135_v34 }
0x2061   : > { %12446 = vrsqrt.f32 %v5138_v36  ;;  %v5139_v35 = vadd.f32 1e-12, %v5137_v39 }
0x2063   : > { %12448 = vrsqrt.f32 %v5139_v35 }
0x206b   : > { %v12447_v24 = vpop.eup %12446 }
0x206c   : > { %v5142_v25 = vmul.f32 %v12447_v24, %v5126_v13 }
0x206d   : > { %v12449_v62 = vpop.eup %12448 }
0x206e   : > { %v5150_v41 = vmul.f32 %v10260_v61, %v5142_v25  ;;  %v5143_v43 = vmul.f32 %v12449_v62, %v5127_v37 }
0x2070   : > { %v5151_v48 = vmul.f32 %v10260_v61, %v5143_v43  ;;  %v13638_v49 = vadd.f32 %v10261_v45, %v5150_v41 }
0x2072   : > { %v13640_v50 = vadd.f32 %v10261_v45, %v5151_v48 }
0x2074   : > { %v5160_v51 = vpack.c.bf16 %v13640_v50, %v13638_v49 }
0x2076   : > { %10279 = vmatmul.mubr.msk.bf16.vlgmr.msra.gmra.mrb[52].mxu1 %vm798_vm0, %v5160_v51 }
0x2149   : > { %v5260_v55 = vpop.f32.mrb[52].mxu1 }
0x214a   : > { %v5261_v57 = vadd.f32 %v5260_v55, %v5176_v53  ;;  %v5262_v56 = vpop.f32.mrb[53].mxu1 }
0x214b   : > { %v5264_v58 = vpop.f32.mrb[54].mxu1  ;;  %v5263_v60 = vadd.f32 %v5262_v56, %v5180_v22 }
0x214c   : > { %v5266_v59 = vpop.f32.mrb[55].mxu1  ;;  %5275 = vrot.lane.b32.xlu1 %v5261_v57, %s14576_s30  ;;  %5271 = vrot.lane.b32.xlu0 %v5261_v57, %s14577_s26  ;;  %v5265_v19 = vadd.f32 %v5264_v58, %v5176_v53 }
0x214d   : > { %v5267_v17 = vadd.f32 %v5266_v59, %v5180_v22  ;;  %11250 = vmatprep.mubr.msk.f32.mxu1 %vm988_vm1, %v5261_v57 }
0x214e   : > { %v11870_v63 = vpack.i.bf16 %v5265_v19, %v5261_v57 }
0x214f   : > { %v11606_v46 = vpack.c.bf16 %v5267_v17, %v5263_v60  ;;  %v13653_v47 = vpack.i.bf16 %v5267_v17, %v5263_v60 }
0x2150   : > { %5273 = vrot.lane.b32.xlu1 %v5265_v19, %s14577_s26  ;;  %5279 = vrot.lane.b32.xlu0 %v5261_v57, %s14578_s29 }
0x2154   : > { %5277 = vrot.lane.b32.xlu1 %v5265_v19, %s14576_s30  ;;  %11871 = vrot.lane.b32.xlu0 %v11870_v63, %s14579_s7 }
0x2158   : > { %5281 = vrot.lane.b32.xlu1 %v5265_v19, %s14578_s29 }
0x21be   : > { %v5276_v0 = vpop.permute.xlu1 %5275  ;;  %v5272_v1 = vpop.permute.xlu0 %5271 }
0x21bf   : > { %11264 = vmatprep.mubr.msk.f32.mxu0 %vm988_vm1, %v5276_v0 }
0x21c2   : > { %v5274_v2 = vpop.permute.xlu1 %5273  ;;  %v5280_v3 = vpop.permute.xlu0 %5279 }
0x21c3   : > { %v11875_v7 = vpack.i.bf16 %v5274_v2, %v5272_v1 }
0x21c5   : > { %11876 = vrot.lane.b32.xlu1 %v11875_v7, %s14579_s7 }
0x21c6   : > { %v5278_v8 = vpop.permute.xlu1 %5277  ;;  %v11872_v9 = vpop.permute.xlu0 %11871 }
0x21c7   : > { %v11880_v10 = vpack.i.bf16 %v5278_v8, %v5276_v0  ;;  %v11874_v11 = vunpack.i.h.bf16 %v11872_v9  ;;  %v11873_v12 = vunpack.i.l.bf16 %v11872_v9 }
0x21c9   : > { %v11582_v38 = vpack.c.bf16 %v11874_v11, %v11873_v12  ;;  %11881 = vrot.lane.b32.xlu0 %v11880_v10, %s14579_s7 }
0x21ca   : > { %v5282_v13 = vpop.permute.xlu1 %5281 }
0x21cb   : > { %v11885_v14 = vpack.i.bf16 %v5282_v13, %v5280_v3  ;;  %11584 = vmatprep.subr.msk.bf16.mxu1 %vm12847_vm2, %v11582_v38 }
0x21cc   : > { %11587 = vmatpush3.bf16.xpose.msk.msra.mxu1 %vm12847_vm2, %v11582_v38 }
0x21cd   : > { %11886 = vrot.lane.b32.xlu1 %v11885_v14, %s14579_s7 }
0x21d3   : > { %11251 = vmatmul.mubr.msk.f32.vlgmr.msra.gmra.mrb[46].mxu1 %vm988_vm1, %v5265_v19 }
0x21d4   : > { %11257 = vmatprep.mubr.msk.f32.mxu1 %vm988_vm1, %v5272_v1 }
0x2237   : > { %v11877_v37 = vpop.permute.xlu1 %11876 }
0x2238   : > { %v11879_v15 = vunpack.i.h.bf16 %v11877_v37  ;;  %v11878_v16 = vunpack.i.l.bf16 %v11877_v37 }
0x223a   : > { %v11588_v20 = vpack.c.bf16 %v11879_v15, %v11878_v16 }
0x223b   : > { %v11882_v5 = vpop.permute.xlu0 %11881 }
0x223c   : > { %v11884_v6 = vunpack.i.h.bf16 %v11882_v5  ;;  %v11883_v23 = vunpack.i.l.bf16 %v11882_v5  ;;  %11590 = vmatprep.subr.msk.bf16.mxu1 %vm12847_vm2, %v11588_v20 }
0x223d   : > { %11593 = vmatpush3.bf16.xpose.msk.msra.mxu1 %vm12847_vm2, %v11588_v20 }
0x223e   : > { %v11594_v26 = vpack.c.bf16 %v11884_v6, %v11883_v23 }
0x223f   : > { %v11887_v27 = vpop.permute.xlu1 %11886 }
0x2240   : > { %v11889_v28 = vunpack.i.h.bf16 %v11887_v27  ;;  %v11888_v29 = vunpack.i.l.bf16 %v11887_v27  ;;  %11596 = vmatprep.subr.msk.bf16.mxu0 %vm12847_vm2, %v11594_v26 }
0x2241   : > { %11599 = vmatpush3.bf16.xpose.msk.msra.mxu0 %vm12847_vm2, %v11594_v26 }
0x2242   : > { %v11600_v30 = vpack.c.bf16 %v11889_v28, %v11888_v29  ;;  %11607 = vmatprep.subr.bf16.mxu0 %v11606_v46 }
0x2244   : > { %11258 = vmatmul.mubr.msk.f32.vlgmr.msra.gmra.mrb[56].mxu1 %vm988_vm1, %v5274_v2  ;;  %11602 = vmatprep.subr.msk.bf16.mxu1 %vm12847_vm2, %v11600_v30 }
0x2245   : > { %11605 = vmatpush3.bf16.xpose.msk.msra.mxu1 %vm12847_vm2, %v11600_v30  ;;  %11271 = vmatprep.mubr.msk.f32.mxu1 %vm988_vm1, %v5280_v3 }
0x2248   : > { %11265 = vmatmul.mubr.msk.f32.vlgmr.msra.gmra.mrb[38].mxu0 %vm988_vm1, %v5278_v8 }
0x2249   : > { %11609 = vmatpush3.bf16.msra.mxu0 %v11606_v46 }
0x224c   : > { %11272 = vmatmul.mubr.msk.f32.vlgmr.msra.gmra.mrb[58].mxu1 %vm988_vm1, %v5282_v13 }
0x22a6   : > { %v11252_v31 = vpop.f32.mrb[46].mxu1 }
0x22a7   : > { %v5652_v32 = vmul.f32 0.25, %v11252_v31  ;;  %v5381_v33 = vpop.f32.mrb[47].mxu1 }
0x22a8   : > { %v5651_v34 = vmul.f32 0.25, %v5381_v33 }
0x22a9   : > { %v5660_v36 = vadd.f32 %v13418_v54, %v5652_v32 }
0x22aa   : > { %v5659_v39 = vadd.f32 %v13418_v54, %v5651_v34 }
0x22ab   : > { %v5670_v35 = vsel %vm988_vm1, %v5660_v36, -inf }
0x22ac   : > { %5671 = vmax.xlane.f32.xlu1 %v5670_v35  ;;  %v5667_v24 = vsel %vm988_vm1, %v5659_v39, -inf }
0x22ad   : > { %5668 = vmax.xlane.f32.xlu0 %v5667_v24 }
0x2317   : > { %v11259_v61 = vpop.f32.mrb[56].mxu1 }
0x2318   : > { %v5654_v25 = vmul.f32 0.25, %v11259_v61  ;;  %v5468_v62 = vpop.f32.mrb[57].mxu1 }
0x2319   : > { %v5653_v41 = vmul.f32 0.25, %v5468_v62 }
0x231a   : > { %v5662_v43 = vadd.f32 %v13418_v54, %v5654_v25 }
0x231b   : > { %v11266_v45 = vpop.f32.mrb[38].mxu0  ;;  %v5661_v48 = vadd.f32 %v13418_v54, %v5653_v41 }
0x231c   : > { %v5656_v51 = vmul.f32 0.25, %v11266_v45  ;;  %v5555_v52 = vpop.f32.mrb[39].mxu0  ;;  %v5676_v53 = vsel %vm988_vm1, %v5662_v43, -inf }
0x231d   : > { %v5655_v55 = vmul.f32 0.25, %v5555_v52  ;;  %5677 = vmax.xlane.f32.xlu0 %v5676_v53  ;;  %v5673_v17 = vsel %vm988_vm1, %v5661_v48, -inf }
0x231e   : > { %v5664_v22 = vadd.f32 %v13418_v54, %v5656_v51 }
0x231f   : > { %v11273_v57 = vpop.f32.mrb[58].mxu1  ;;  %v5663_v56 = vadd.f32 %v13418_v54, %v5655_v55 }
0x2320   : > { %v5658_v58 = vmul.f32 0.25, %v11273_v57  ;;  %v5642_v59 = vpop.f32.mrb[59].mxu1  ;;  %v5682_v60 = vsel %vm988_vm1, %v5664_v22, -inf }
0x2321   : > { %v5657_v19 = vmul.f32 0.25, %v5642_v59  ;;  %5683 = vmax.xlane.f32.xlu1 %v5682_v60  ;;  %5674 = vmax.xlane.f32.xlu0 %v5673_v17  ;;  %v5679_v0 = vsel %vm988_vm1, %v5663_v56, -inf }
0x2322   : > { %v5666_v46 = vadd.f32 %v13418_v54, %v5658_v58 }
0x2323   : > { %v5665_v63 = vadd.f32 %v13418_v54, %v5657_v19 }
0x2324   : > { %v5688_v1 = vsel %vm988_vm1, %v5666_v46, -inf }
0x2325   : > { %5680 = vmax.xlane.f32.xlu0 %v5679_v0  ;;  %5689 = vmax.xlane.f32.xlu1 %v5688_v1  ;;  %v5685_v2 = vsel %vm988_vm1, %v5665_v63, -inf }
0x2329   : > { %5686 = vmax.xlane.f32.xlu0 %v5685_v2 }
0x2339   : > { %v5672_v3 = vpop.xlane.xlu1 %5671 }
0x233a   : > { %v5692_v7 = vsub.f32 %v5660_v36, %v5672_v3  ;;  %v5669_v8 = vpop.xlane.xlu0 %5668 }
0x233b   : > { %v5691_v9 = vsub.f32 %v5659_v39, %v5669_v8 }
0x233c   : > { %v5701_v10 = vmul.f32 1.442695, %v5692_v7 }
0x233d   : > { %v5699_v11 = vmul.f32 1.442695, %v5691_v9 }
0x233e   : > { %12450 = vpow2.f32 %v5701_v10 }
0x233f   : > { %12452 = vpow2.f32 %v5699_v11 }
0x2348   : > { %v12451_v12 = vpop.eup %12450 }
0x2349   : > { %v12453_v38 = vpop.eup %12452  ;;  %v5718_v54 = vsel %vm988_vm1, %v12451_v12, 0.0 }
0x234a   : > { %5719 = vadd.xlane.f32.xlu1 %v5718_v54  ;;  %v5715_v13 = vsel %vm988_vm1, %v12453_v38, 0.0 }
0x234b   : > { %5716 = vadd.xlane.f32.xlu0 %v5715_v13 }
0x23aa   : > { %v5678_v14 = vpop.xlane.xlu0 %5677 }
0x23ab   : > { %v5694_v37 = vsub.f32 %v5662_v43, %v5678_v14 }
0x23ad   : > { %v5705_v15 = vmul.f32 1.442695, %v5694_v37 }
0x23ae   : > { %v5684_v16 = vpop.xlane.xlu1 %5683  ;;  %v5675_v20 = vpop.xlane.xlu0 %5674 }
0x23af   : > { %12454 = vpow2.f32 %v5705_v15  ;;  %v5696_v5 = vsub.f32 %v5664_v22, %v5684_v16  ;;  %v5693_v6 = vsub.f32 %v5661_v48, %v5675_v20 }
0x23b1   : > { %v5709_v23 = vmul.f32 1.442695, %v5696_v5  ;;  %v5703_v26 = vmul.f32 1.442695, %v5693_v6 }
0x23b2   : > { %v5681_v27 = vpop.xlane.xlu0 %5680  ;;  %v5690_v28 = vpop.xlane.xlu1 %5689 }
0x23b3   : > { %12456 = vpow2.f32 %v5709_v23  ;;  %v5695_v29 = vsub.f32 %v5663_v56, %v5681_v27  ;;  %v5698_v30 = vsub.f32 %v5666_v46, %v5690_v28 }
0x23b4   : > { %12458 = vpow2.f32 %v5703_v26 }
0x23b5   : > { %v5707_v31 = vmul.f32 1.442695, %v5695_v29  ;;  %v5713_v32 = vmul.f32 1.442695, %v5698_v30  ;;  %v12166_v30 = vld [vmem:[%s14572_s0 + $0x60] sm:$0xff]  }
0x23b6   : > { %v5687_v33 = vpop.xlane.xlu0 %5686 }
0x23b7   : > { %12460 = vpow2.f32 %v5707_v31  ;;  %v5697_v34 = vsub.f32 %v5665_v63, %v5687_v33  ;;  %v12167_v31 = vld [vmem:[%s14572_s0 + $0x68] sm:$0xff]   ;;  %v12169_v33 = vld [vmem:[%s14572_s0 + $0x78] sm:$0xff]  }
0x23b8   : > { %12462 = vpow2.f32 %v5713_v32  ;;  %v12168_v32 = vld [vmem:[%s14572_s0 + $0x70] sm:$0xff]  }
0x23b9   : > { %v13704_v36 = vpop.eup %12454  ;;  %v5711_v39 = vmul.f32 1.442695, %v5697_v34 }
0x23ba   : > { %v5724_v35 = vsel %vm988_vm1, %v13704_v36, 0.0 }
0x23bb   : > { %12464 = vpow2.f32 %v5711_v39  ;;  %5725 = vadd.xlane.f32.xlu1 %v5724_v35 }
0x23bd   : > { %v13708_v24 = vpop.eup %12456 }
0x23be   : > { %v12459_v61 = vpop.eup %12458  ;;  %v5730_v25 = vsel %vm988_vm1, %v13708_v24, 0.0 }
0x23bf   : > { %5731 = vadd.xlane.f32.xlu1 %v5730_v25  ;;  %v5721_v62 = vsel %vm988_vm1, %v12459_v61, 0.0 }
0x23c0   : > { %5722 = vadd.xlane.f32.xlu0 %v5721_v62 }
0x23c1   : > { %v12461_v41 = vpop.eup %12460 }
0x23c2   : > { %v13713_v43 = vpop.eup %12462  ;;  %v5727_v45 = vsel %vm988_vm1, %v12461_v41, 0.0 }
0x23c3   : > { %v5736_v48 = vsel %vm988_vm1, %v13713_v43, 0.0 }
0x23c4   : > { %5737 = vadd.xlane.f32.xlu1 %v5736_v48  ;;  %5728 = vadd.xlane.f32.xlu0 %v5727_v45 }
0x23c5   : > { %v12465_v51 = vpop.eup %12464 }
0x23c6   : > { %v5733_v52 = vsel %vm988_vm1, %v12465_v51, 0.0 }
0x23c8   : > { %5734 = vadd.xlane.f32.xlu0 %v5733_v52 }
0x23d5   : > { %11896 = vrot.lane.b32.xlu1 %v13653_v47, %s14576_s30 }
0x23d7   : > { %v5720_v53 = vpop.xlane.xlu1 %5719 }
0x23d8   : > { %12466 = vrcp.f32 %v5720_v53  ;;  %v5717_v55 = vpop.xlane.xlu0 %5716 }
0x23d9   : > { %11901 = vrot.lane.b32.xlu1 %v13653_v47, %s14578_s29  ;;  %12468 = vrcp.f32 %v5717_v55 }
0x23de   : > { %11891 = vrot.lane.b32.xlu0 %v13653_v47, %s14577_s26 }
0x23e2   : > { %v12467_v22 = vpop.eup %12466 }
0x23e3   : > { %v12469_v57 = vpop.eup %12468  ;;  %v5742_v58 = vmul.f32 %v12467_v22, %v12451_v12 }
0x23e4   : > { %v5740_v56 = vmul.f32 %v12469_v57, %v12453_v38 }
0x23e6   : > { %11278 = vmatprep.mubr.msk.f32.mxu0 %vm988_vm1, %v5740_v56 }
0x23e7   : > { %11279 = vmatmul.mubr.msk.f32.vlgmr.msra.gmra.mrb[48].mxu0 %vm988_vm1, %v5742_v58 }
0x2448   : > { %v5726_v59 = vpop.xlane.xlu1 %5725 }
0x244c   : > { %v5732_v60 = vpop.xlane.xlu1 %5731 }
0x244d   : > { %v5723_v17 = vpop.xlane.xlu0 %5722 }
0x244e   : > { %12470 = vrcp.f32 %v5723_v17 }
0x244f   : > { %12472 = vrcp.f32 %v5726_v59 }
0x2450   : > { %12474 = vrcp.f32 %v5732_v60 }
0x2451   : > { %v5738_v19 = vpop.xlane.xlu1 %5737  ;;  %v5729_v46 = vpop.xlane.xlu0 %5728 }
0x2452   : > { %12476 = vrcp.f32 %v5729_v46 }
0x2455   : > { %v11897_v63 = vpop.permute.xlu1 %11896  ;;  %v5735_v0 = vpop.xlane.xlu0 %5734 }
0x2456   : > { %v11899_v47 = vunpack.i.h.bf16 %v11897_v63  ;;  %v11898_v1 = vunpack.i.l.bf16 %v11897_v63  ;;  %12478 = vrcp.f32 %v5735_v0  ;;  %v10313_v63 = vld [vmem:[%s14573_s8 + $0x3] ss:$0 sm:$0xff] }
0x2457   : > { %12480 = vrcp.f32 %v5738_v19 }
0x2458   : > { %v12471_v2 = vpop.eup %12470  ;;  %v11614_v3 = vpack.c.bf16 %v11899_v47, %v11898_v1 }
0x2459   : > { %v11902_v7 = vpop.permute.xlu1 %11901  ;;  %v11892_v8 = vpop.permute.xlu0 %11891  ;;  %v5744_v9 = vmul.f32 %v12471_v2, %v12459_v61 }
0x245a   : > { %v11904_v10 = vunpack.i.h.bf16 %v11902_v7  ;;  %v11903_v11 = vunpack.i.l.bf16 %v11902_v7  ;;  %v11894_v12 = vunpack.i.h.bf16 %v11892_v8  ;;  %v11893_v38 = vunpack.i.l.bf16 %v11892_v8  ;;  %11615 = vmatprep.subr.bf16.mxu0 %v11614_v3  ;;  %v12473_v54 = vpop.eup %12472 }
0x245b   : > { %11285 = vmatprep.mubr.msk.f32.mxu1 %vm988_vm1, %v5744_v9  ;;  %11617 = vmatpush3.bf16.msra.mxu0 %v11614_v3  ;;  %v12475_v13 = vpop.eup %12474  ;;  %v5746_v6 = vmul.f32 %v12473_v54, %v13704_v36 }
0x245c   : > { %v11610_v14 = vpack.c.bf16 %v11894_v12, %v11893_v38  ;;  %11302 = vmatprep.subr.bf16.mxu0 %v12629_v21  ;;  %v12477_v37 = vpop.eup %12476  ;;  %v11618_v16 = vpack.c.bf16 %v11904_v10, %v11903_v11  ;;  %v5750_v20 = vmul.f32 %v12475_v13, %v13708_v24 }
0x245d   : > { %v5748_v15 = vmul.f32 %v12477_v37, %v12461_v41 }
0x245e   : > { %11611 = vmatprep.subr.bf16.mxu1 %v11610_v14 }
0x245f   : > { %11613 = vmatpush3.bf16.msra.mxu1 %v11610_v14  ;;  %11292 = vmatprep.mubr.msk.f32.mxu0 %vm988_vm1, %v5748_v15 }
0x2460   : > { %v12479_v5 = vpop.eup %12478  ;;  %11619 = vmatprep.subr.bf16.mxu1 %v11618_v16  ;;  %11293 = vmatmul.mubr.msk.f32.vlgmr.msra.gmra.mrb[50].mxu0 %vm988_vm1, %v5750_v20 }
0x2461   : > { %v12481_v23 = vpop.eup %12480  ;;  %v5752_v26 = vmul.f32 %v12479_v5, %v12465_v51  ;;  %11310 = vmatprep.mubr.msk.bf16.mxu0 %vm12630_vm3, %v12629_v21  ;;  %11303 = vmatpush3.bf16.msra.mxu0 %v12166_v30  ;;  %v12170_v5 = vld [vmem:[%s14505_s10 + $0xc0] ss:$8 sps:$4 sm:$0xff]  }
0x2462   : > { %11286 = vmatmul.mubr.msk.f32.vlgmr.msra.gmra.mrb[60].mxu1 %vm988_vm1, %v5746_v6  ;;  %v5754_v27 = vmul.f32 %v12481_v23, %v13713_v43  ;;  %11304 = vmatprep.subr.bf16.mxu0 %v12629_v21  ;;  %v12175_v6 = vld [vmem:[%s14505_s10 + $0xd4] ss:$8 sps:$4 sm:$0xff]   ;;  %v12173_v23 = vld [vmem:[%s14505_s10 + $0xd0] ss:$8 sps:$4 sm:$0xff]   ;;  %v12182_v30 = vld [vmem:[%s14507_s12 + $0x1c0] sm:$0xff]  }
0x2463   : > { %11621 = vmatpush3.bf16.msra.mxu1 %v11618_v16  ;;  %11299 = vmatprep.mubr.msk.f32.mxu1 %vm988_vm1, %v5752_v26  ;;  %v12178_v26 = vld [vmem:[%s14505_s10 + $0xe4] ss:$8 sps:$4 sm:$0xff]  }
0x2465   : > { %11305 = vmatpush3.bf16.msra.mxu0 %v12167_v31  ;;  %v12183_v31 = vld [vmem:[%s14507_s12 + $0x180] sm:$0xff]  }
0x2466   : > { %11300 = vmatmul.mubr.msk.f32.vlgmr.msra.gmra.mrb[62].mxu1 %vm988_vm1, %v5754_v27  ;;  %11306 = vmatprep.subr.bf16.mxu0 %v12629_v21  ;;  %v12176_v27 = vld [vmem:[%s14505_s10 + $0xe0] ss:$8 sps:$4 sm:$0xff]  }
0x2467   : > { %6341 = vmatprep.mubr.bf16.mxu1 %v12624_v18 }
0x2469   : > { %11307 = vmatpush3.bf16.msra.mxu0 %v12168_v32  ;;  %v12184_v32 = vld [vmem:[%s14507_s12 + $0x1c8] sm:$0xff]  }
0x246a   : > { %11308 = vmatprep.subr.bf16.mxu0 %v12629_v21 }
0x246d   : > { %11309 = vmatpush3.bf16.msra.mxu0 %v12169_v33  ;;  %v12185_v33 = vld [vmem:[%s14507_s12 + $0x188] sm:$0xff]  }
0x246e   : > { %10897 = vmatprep.subr.bf16.mxu0 %v12182_v30 }
0x24ba   : > { %v11280_v28 = vpop.f32.mrb[48].mxu0 }
0x24bb   : > { %v5827_v29 = vpop.f32.mrb[49].mxu0 }
0x2533   : > { %v11294_v34 = vpop.f32.mrb[50].mxu0 }
0x2534   : > { %v5989_v36 = vpop.f32.mrb[51].mxu0 }
0x2535   : > { %v11287_v39 = vpop.f32.mrb[60].mxu1  ;;  %v11910_v35 = vpack.i.bf16 %v11294_v34, %v5989_v36 }
0x2536   : > { %v5908_v24 = vpop.f32.mrb[61].mxu1 }
0x2537   : > { %v11905_v61 = vpack.i.bf16 %v11287_v39, %v5908_v24  ;;  %11911 = vrot.lane.b32.xlu0 %v11910_v35, %s14580_s2 }
0x2539   : > { %11906 = vrot.lane.b32.xlu1 %v11905_v61, %s14581_s5  ;;  %v11301_v25 = vpop.f32.mrb[62].mxu1 }
0x253a   : > { %v6070_v62 = vpop.f32.mrb[63].mxu1 }
0x253b   : > { %v11915_v41 = vpack.i.bf16 %v11301_v25, %v6070_v62 }
0x253d   : > { %11916 = vrot.lane.b32.xlu1 %v11915_v41, %s14582_s22  ;;  %v10321_v41 = vld [vmem:[%s14575_s1 + $0x3] ss:$0 sm:$0xff] }
0x25a9   : > { %v11912_v45 = vpop.permute.xlu0 %11911 }
0x25aa   : > { %v11914_v55 = vunpack.i.h.bf16 %v11912_v45  ;;  %v11913_v22 = vunpack.i.l.bf16 %v11912_v45 }
0x25ab   : > { %v11907_v43 = vpop.permute.xlu1 %11906 }
0x25ac   : > { %v11909_v48 = vunpack.i.h.bf16 %v11907_v43  ;;  %v11908_v51 = vunpack.i.l.bf16 %v11907_v43 }
0x25ae   : > { %v6104_v52 = vsel %vm988_vm1, %v11280_v28, %v11909_v48  ;;  %v6103_v53 = vsel %vm988_vm1, %v5827_v29, %v11908_v51  ;;  %v12179_v28 = vld [vmem:[%s14505_s10 + $0xf0] ss:$8 sps:$4 sm:$0xff]   ;;  %v12181_v29 = vld [vmem:[%s14505_s10 + $0xf4] ss:$8 sps:$4 sm:$0xff]   ;;  %v10322_v51 = vld [vmem:[%s14504_s9 + $0x3] ss:$0 sm:$0xff] }
0x25af   : > { %v11917_v57 = vpop.permute.xlu1 %11916  ;;  %v6105_v59 = vsel %vm1793_vm4, %v6103_v53, %v11913_v22  ;;  %v6106_v60 = vsel %vm1793_vm4, %v6104_v52, %v11914_v55 }
0x25b0   : > { %v11919_v56 = vunpack.i.h.bf16 %v11917_v57  ;;  %v11918_v58 = vunpack.i.l.bf16 %v11917_v57  ;;  %v12186_v57 = vld [vmem:[%s14507_s12 + $0x1d0] sm:$0xff]  }
0x25b2   : > { %v6108_v17 = vsel %vm1796_vm5, %v6106_v60, %v11919_v56  ;;  %v6107_v19 = vsel %vm1796_vm5, %v6105_v59, %v11918_v58  ;;  %v12187_v56 = vld [vmem:[%s14507_s12 + $0x190] sm:$0xff]   ;;  %v12188_v58 = vld [vmem:[%s14507_s12 + $0x1d8] sm:$0xff]   ;;  %v12190_v60 = vld [vmem:[%s14507_s12 + $0x1e0] sm:$0xff]  }
0x25b3   : > { %v6109_v46 = vpack.c.bf16 %v6108_v17, %v6107_v19  ;;  %v12189_v59 = vld [vmem:[%s14507_s12 + $0x198] sm:$0xff]   ;;  %v12191_v17 = vld [vmem:[%s14507_s12 + $0x1a0] sm:$0xff]   ;;  %v12192_v19 = vld [vmem:[%s14507_s12 + $0x1e8] sm:$0xff]  }
0x25b5   : > { %11311 = vmatmul.mubr.msk.bf16.vlgmr.msra.gmra.mrb[52].mxu0 %vm798_vm0, %v6109_v46  ;;  %v12193_v46 = vld [vmem:[%s14507_s12 + $0x1a8] sm:$0xff]  }
0x25b6   : > { %10898 = vmatpush3.bf16.msra.mxu0 %v12183_v31 }
0x25b7   : > { %10899 = vmatprep.subr.bf16.mxu0 %v12184_v32 }
0x25ba   : > { %10900 = vmatpush3.bf16.msra.mxu0 %v12185_v33 }
0x25bb   : > { %10901 = vmatprep.subr.bf16.mxu0 %v12186_v57 }
0x25be   : > { %10902 = vmatpush3.bf16.msra.mxu0 %v12187_v56 }
0x25bf   : > { %10903 = vmatprep.subr.bf16.mxu0 %v12188_v58 }
0x25c2   : > { %10904 = vmatpush3.bf16.msra.mxu0 %v12189_v59 }
0x25c3   : > { %10905 = vmatprep.subr.bf16.mxu0 %v12190_v60 }
0x25c6   : > { %10906 = vmatpush3.bf16.msra.mxu0 %v12191_v17 }
0x25c7   : > { %10907 = vmatprep.subr.bf16.mxu0 %v12192_v19 }
0x25ca   : > { %10908 = vmatpush3.bf16.msra.mxu0 %v12193_v46 }
0x2688   : > { %v6188_v0 = vpop.f32.mrb[52].mxu0 }
0x2689   : > { %v6189_v47 = vadd.f32 %v10313_v63, %v6188_v0  ;;  %v11312_v1 = vpop.f32.mrb[53].mxu0  ;;  %v12195_v0 = vld [vmem:[%s14507_s12 + $0x1b0] sm:$0xff]  }
0x268a   : > { %v6191_v2 = vpop.f32.mrb[54].mxu0  ;;  %v12197_v1 = vld [vmem:[%s14507_s12 + $0x1b8] sm:$0xff]  }
0x268b   : > { %v6195_v3 = vadd.f32 %v6189_v47, %v13638_v49  ;;  %v6192_v7 = vadd.f32 %v10313_v63, %v6191_v2  ;;  %v11313_v8 = vpop.f32.mrb[55].mxu0  ;;  %v12194_v63 = vld [vmem:[%s14507_s12 + $0x1f0] sm:$0xff]   ;;  %v12196_v47 = vld [vmem:[%s14507_s12 + $0x1f8] sm:$0xff]   ;;  %v10331_v2 = vld [vmem:[%s14506_s11 + $0x6] sm:$0x3] }
0x268c   : > { %10909 = vmatprep.subr.bf16.mxu0 %v12194_v63 }
0x268d   : > { %v6196_v9 = vadd.f32 %v6192_v7, %v13640_v50  ;;  %v6201_v10 = vsel %vm798_vm0, %v6195_v3, 0.0  ;;  %v12172_v50 = vld [vmem:[%s14505_s10 + $0xc4] ss:$8 sps:$4 sm:$0xff]   ;;  %10910 = vmatpush3.bf16.msra.mxu0 %v12195_v0  ;;  %v6263_v7 = vrot.slane %v10331_v2, %v12829_v44 }
0x268e   : > { %6202 = vadd.xlane.f32.xlu0 %v6201_v10  ;;  %6309 = vmatprep.subr.bf16.mxu1 %v12172_v50 }
0x268f   : > { %v6204_v11 = vsel %vm798_vm0, %v6196_v9, 0.0  ;;  %6310 = vmatpush1.bf16.msra.mxu1 %v12170_v5  ;;  %10911 = vmatprep.subr.bf16.mxu0 %v12196_v47 }
0x2690   : > { %6205 = vadd.xlane.f32.xlu1 %v6204_v11  ;;  %6311 = vmatprep.subr.bf16.mxu1 %v12175_v6 }
0x2691   : > { %10912 = vmatpush3.bf16.msra.mxu0 %v12197_v1  ;;  %v12198_v1 = vld [vmem:[%s14565_s3 + $0x100] ss:$8 sps:$4 sm:$0xff]  }
0x2693   : > { %6312 = vmatpush1.bf16.msra.mxu1 %v12173_v23 }
0x2694   : > { %6313 = vmatprep.subr.bf16.mxu1 %v12178_v26 }
0x2697   : > { %6314 = vmatpush1.bf16.msra.mxu1 %v12176_v27 }
0x2698   : > { %6315 = vmatprep.subr.bf16.mxu1 %v12181_v29 }
0x269b   : > { %6316 = vmatpush1.bf16.msra.mxu1 %v12179_v28 }
0x271b   : > { %v6203_v12 = vpop.xlane.xlu0 %6202 }
0x271c   : > { %v6207_v38 = vmul.f32 0.015625, %v6203_v12 }
0x271d   : > { %v6206_v54 = vpop.xlane.xlu1 %6205 }
0x271e   : > { %v6209_v13 = vsub.f32 %v6195_v3, %v6207_v38  ;;  %v6208_v14 = vmul.f32 0.015625, %v6206_v54  ;;  %v6259_v3 = vrot.slane %v10331_v2, %v12824_v42  ;;  %v12203_v2 = vld [vmem:[%s14565_s3 + $0x114] ss:$8 sps:$4 sm:$0xff]  }
0x2720   : > { %v6210_v37 = vsub.f32 %v6196_v9, %v6208_v14  ;;  %v6211_v15 = vmul.f32 %v6209_v13, %v6209_v13 }
0x2722   : > { %v6213_v16 = vsel %vm798_vm0, %v6211_v15, 0.0  ;;  %v6212_v49 = vmul.f32 %v6210_v37, %v6210_v37 }
0x2723   : > { %6214 = vadd.xlane.f32.xlu0 %v6213_v16 }
0x2724   : > { %v6216_v20 = vsel %vm798_vm0, %v6212_v49, 0.0 }
0x2727   : > { %6217 = vadd.xlane.f32.xlu0 %v6216_v20 }
0x27b0   : > { %v6215_v34 = vpop.xlane.xlu0 %6214 }
0x27b1   : > { %v6219_v36 = vmul.f32 0.015625, %v6215_v34 }
0x27b3   : > { %v6221_v39 = vadd.f32 1e-12, %v6219_v36 }
0x27b4   : > { %v6218_v35 = vpop.xlane.xlu0 %6217 }
0x27b5   : > { %12482 = vrsqrt.f32 %v6221_v39  ;;  %v6220_v24 = vmul.f32 0.015625, %v6218_v35 }
0x27b7   : > { %v6222_v61 = vadd.f32 1e-12, %v6220_v24 }
0x27b9   : > { %12484 = vrsqrt.f32 %v6222_v61  ;;  %v10374_v61 = vld [vmem:[%s14508_s13 + $0x3] ss:$0 sm:$0xff] }
0x27bf   : > { %v12483_v25 = vpop.eup %12482 }
0x27c0   : > { %v6225_v62 = vmul.f32 %v12483_v25, %v6209_v13 }
0x27c2   : > { %v6233_v45 = vmul.f32 %v10321_v41, %v6225_v62 }
0x27c3   : > { %v12485_v43 = vpop.eup %12484 }
0x27c4   : > { %v6226_v48 = vmul.f32 %v12485_v43, %v6210_v37  ;;  %v13816_v53 = vadd.f32 %v10322_v51, %v6233_v45 }
0x27c6   : > { %v6234_v52 = vmul.f32 %v10321_v41, %v6226_v48 }
0x27c8   : > { %v13818_v55 = vadd.f32 %v10322_v51, %v6234_v52 }
0x27ca   : > { %v6243_v22 = vpack.c.bf16 %v13818_v55, %v13816_v53 }
0x27cc   : > { %10340 = vmatmul.mubr.msk.bf16.vlgmr.msra.gmra.mrb[64].mxu1 %vm798_vm0, %v6243_v22 }
0x27cd   : > { %6698 = vmatprep.mubr.bf16.mxu1 %v12624_v18 }
0x289f   : > { %v6343_v8 = vpop.f32.mrb[64].mxu1 }
0x28a0   : > { %v6344_v9 = vadd.f32 %v6343_v8, %v6259_v3  ;;  %v6345_v10 = vpop.f32.mrb[65].mxu1  ;;  %v12204_v8 = vld [vmem:[%s14565_s3 + $0x120] ss:$8 sps:$4 sm:$0xff]  }
0x28a1   : > { %v6346_v11 = vadd.f32 %v6345_v10, %v6263_v7  ;;  %v6347_v12 = vpop.f32.mrb[66].mxu1  ;;  %v12209_v10 = vld [vmem:[%s14565_s3 + $0x134] ss:$8 sps:$4 sm:$0xff]  }
0x28a2   : > { %v6356_v38 = vmul.f32 0.70710677, %v6344_v9  ;;  %v6348_v54 = vadd.f32 %v6347_v12, %v6259_v3  ;;  %v6349_v13 = vpop.f32.mrb[67].mxu1  ;;  %v6352_v26 = vmul.f32 0.5, %v6344_v9  ;;  %v12201_v3 = vld [vmem:[%s14565_s3 + $0x110] ss:$8 sps:$4 sm:$0xff]  }
0x28a3   : > { %v6357_v14 = vmul.f32 0.70710677, %v6346_v11  ;;  %v6350_v37 = vadd.f32 %v6349_v13, %v6263_v7  ;;  %v6353_v29 = vmul.f32 0.5, %v6346_v11  ;;  %v12206_v7 = vld [vmem:[%s14565_s3 + $0x124] ss:$8 sps:$4 sm:$0xff]  }
0x28a4   : > { %12486 = verf.f32 %v6356_v38  ;;  %v6358_v15 = vmul.f32 0.70710677, %v6348_v54  ;;  %v6354_v27 = vmul.f32 0.5, %v6348_v54  ;;  %v12207_v9 = vld [vmem:[%s14565_s3 + $0x130] ss:$8 sps:$4 sm:$0xff]  }
0x28a5   : > { %12488 = verf.f32 %v6357_v14  ;;  %v6359_v16 = vmul.f32 0.70710677, %v6350_v37  ;;  %v6355_v30 = vmul.f32 0.5, %v6350_v37 }
0x28a6   : > { %12490 = verf.f32 %v6358_v15  ;;  %v10393_v15 = vld [vmem:[%s14509_s14 + $0x3] ss:$0 sm:$0xff] }
0x28a7   : > { %12492 = verf.f32 %v6359_v16 }
0x28ae   : > { %v12487_v49 = vpop.eup %12486 }
0x28af   : > { %v12489_v20 = vpop.eup %12488  ;;  %v6364_v50 = vadd.f32 1.0, %v12487_v49 }
0x28b0   : > { %v12491_v5 = vpop.eup %12490  ;;  %v6365_v6 = vadd.f32 1.0, %v12489_v20 }
0x28b1   : > { %v12493_v23 = vpop.eup %12492  ;;  %v6366_v28 = vadd.f32 1.0, %v12491_v5  ;;  %v6368_v32 = vmul.f32 %v6364_v50, %v6352_v26  ;;  %v10394_v5 = vld [vmem:[%s14510_s15 + $0x3] ss:$0 sm:$0xff] }
0x28b2   : > { %v6367_v31 = vadd.f32 1.0, %v12493_v23  ;;  %v6369_v34 = vmul.f32 %v6365_v6, %v6353_v29 }
0x28b3   : > { %v6370_v33 = vmul.f32 %v6366_v28, %v6354_v27  ;;  %v10403_v28 = vld [vmem:[%s14568_s4 + $0x8] sm:$0x3] }
0x28b4   : > { %v6371_v36 = vmul.f32 %v6367_v31, %v6355_v30  ;;  %v6616_v29 = vrot.slane %v10403_v28, %v12824_v42  ;;  %v6620_v31 = vrot.slane %v10403_v28, %v12829_v44 }
0x28b5   : > { %v6372_v39 = vpack.c.bf16 %v6370_v33, %v6368_v32 }
0x28b6   : > { %v6373_v35 = vpack.c.bf16 %v6371_v36, %v6369_v34 }
0x28b8   : > { %6543 = vmatprep.mubr.bf16.mxu0 %v6373_v35 }
0x28b9   : > { %6544 = vmatmul.mubr.bf16.vlgmr.msra.gmra.mrb[56].mxu0 %v6372_v39 }
0x298c   : > { %v10913_v24 = vpop.f32.mrb[56].mxu0 }
0x298d   : > { %v10914_v25 = vpop.f32.mrb[57].mxu0 }
0x298e   : > { %v10915_v62 = vadd.f32 %v10914_v25, %v10913_v24  ;;  %v10916_v41 = vpop.f32.mrb[58].mxu0 }
0x298f   : > { %v10917_v43 = vpop.f32.mrb[59].mxu0 }
0x2990   : > { %v6546_v45 = vadd.f32 %v10915_v62, %v10374_v61  ;;  %v10918_v48 = vadd.f32 %v10917_v43, %v10916_v41 }
0x2992   : > { %v6549_v51 = vadd.f32 %v10918_v48, %v10374_v61  ;;  %v6552_v52 = vadd.f32 %v6546_v45, %v13816_v53 }
0x2994   : > { %v6558_v22 = vsel %vm798_vm0, %v6552_v52, 0.0  ;;  %v6553_v57 = vadd.f32 %v6549_v51, %v13818_v55  ;;  %v12200_v55 = vld [vmem:[%s14565_s3 + $0x104] ss:$8 sps:$4 sm:$0xff]  }
0x2995   : > { %6559 = vadd.xlane.f32.xlu0 %v6558_v22  ;;  %6666 = vmatprep.subr.bf16.mxu1 %v12200_v55 }
0x2996   : > { %v6561_v56 = vsel %vm798_vm0, %v6553_v57, 0.0  ;;  %6667 = vmatpush1.bf16.msra.mxu1 %v12198_v1 }
0x2997   : > { %6562 = vadd.xlane.f32.xlu1 %v6561_v56  ;;  %6668 = vmatprep.subr.bf16.mxu1 %v12203_v2 }
0x299a   : > { %6669 = vmatpush1.bf16.msra.mxu1 %v12201_v3 }
0x299b   : > { %6670 = vmatprep.subr.bf16.mxu1 %v12206_v7 }
0x299e   : > { %6671 = vmatpush1.bf16.msra.mxu1 %v12204_v8 }
0x299f   : > { %6672 = vmatprep.subr.bf16.mxu1 %v12209_v10 }
0x29a2   : > { %6673 = vmatpush1.bf16.msra.mxu1 %v12207_v9 }
0x2a22   : > { %v6560_v58 = vpop.xlane.xlu0 %6559 }
0x2a23   : > { %v6564_v59 = vmul.f32 0.015625, %v6560_v58 }
0x2a24   : > { %v6563_v60 = vpop.xlane.xlu1 %6562 }
0x2a25   : > { %v6566_v17 = vsub.f32 %v6552_v52, %v6564_v59  ;;  %v6565_v19 = vmul.f32 0.015625, %v6563_v60 }
0x2a27   : > { %v6567_v46 = vsub.f32 %v6553_v57, %v6565_v19  ;;  %v6568_v63 = vmul.f32 %v6566_v17, %v6566_v17 }
0x2a29   : > { %v6570_v0 = vsel %vm798_vm0, %v6568_v63, 0.0  ;;  %v6569_v47 = vmul.f32 %v6567_v46, %v6567_v46 }
0x2a2a   : > { %6571 = vadd.xlane.f32.xlu0 %v6570_v0 }
0x2a2b   : > { %v6573_v53 = vsel %vm798_vm0, %v6569_v47, 0.0 }
0x2a2c   : > { %6574 = vadd.xlane.f32.xlu1 %v6573_v53 }
0x2ab7   : > { %v6572_v11 = vpop.xlane.xlu0 %6571 }
0x2ab8   : > { %v6576_v12 = vmul.f32 0.015625, %v6572_v11 }
0x2ab9   : > { %v6575_v38 = vpop.xlane.xlu1 %6574 }
0x2aba   : > { %v6578_v54 = vadd.f32 1e-12, %v6576_v12  ;;  %v6577_v13 = vmul.f32 0.015625, %v6575_v38  ;;  %v13953_v38 = vld [vmem:[%s12880_s25] ss:$0 sm:$0xff]  ;;  %s14589_s25 = sld [smem:[#allocation20_spill]] }
0x2abc   : > { %12494 = vrsqrt.f32 %v6578_v54  ;;  %v6579_v14 = vadd.f32 1e-12, %v6577_v13 }
0x2abe   : > { %12496 = vrsqrt.f32 %v6579_v14 }
0x2ac6   : > { %v12495_v37 = vpop.eup %12494 }
0x2ac7   : > { %v6582_v16 = vmul.f32 %v12495_v37, %v6566_v17 }
0x2ac8   : > { %v12497_v49 = vpop.eup %12496 }
0x2ac9   : > { %v6590_v20 = vmul.f32 %v10393_v15, %v6582_v16  ;;  %v6583_v50 = vmul.f32 %v12497_v49, %v6567_v46 }
0x2acb   : > { %v6591_v6 = vmul.f32 %v10393_v15, %v6583_v50  ;;  %v13904_v23 = vadd.f32 %v10394_v5, %v6590_v20 }
0x2acd   : > { %v13906_v26 = vadd.f32 %v10394_v5, %v6591_v6 }
0x2acf   : > { %v6600_v27 = vpack.c.bf16 %v13906_v26, %v13904_v23 }
0x2ad1   : > { %10412 = vmatmul.mubr.msk.bf16.vlgmr.msra.gmra.mrb[68].mxu1 %vm798_vm0, %v6600_v27 }
0x2ba4   : > { %v6700_v30 = vpop.f32.mrb[68].mxu1 }
0x2ba5   : > { %v6701_v32 = vadd.f32 %v6700_v30, %v6616_v29  ;;  %v6702_v33 = vpop.f32.mrb[69].mxu1 }
0x2ba6   : > { %v6704_v34 = vpop.f32.mrb[70].mxu1  ;;  %v6703_v39 = vadd.f32 %v6702_v33, %v6620_v31 }
0x2ba7   : > { %v6706_v36 = vpop.f32.mrb[71].mxu1  ;;  %6715 = vrot.lane.b32.xlu1 %v6701_v32, %s14576_s30  ;;  %6711 = vrot.lane.b32.xlu0 %v6701_v32, %s14577_s26  ;;  %v6705_v24 = vadd.f32 %v6704_v34, %v6616_v29 }
0x2ba8   : > { %v6707_v35 = vadd.f32 %v6706_v36, %v6620_v31  ;;  %11318 = vmatprep.mubr.msk.f32.mxu1 %vm988_vm1, %v6701_v32 }
0x2ba9   : > { %v11920_v62 = vpack.i.bf16 %v6705_v24, %v6701_v32 }
0x2baa   : > { %v11646_v61 = vpack.c.bf16 %v6707_v35, %v6703_v39  ;;  %v13919_v25 = vpack.i.bf16 %v6707_v35, %v6703_v39 }
0x2bab   : > { %6713 = vrot.lane.b32.xlu1 %v6705_v24, %s14577_s26  ;;  %6719 = vrot.lane.b32.xlu0 %v6701_v32, %s14578_s29 }
0x2baf   : > { %6717 = vrot.lane.b32.xlu1 %v6705_v24, %s14576_s30  ;;  %11921 = vrot.lane.b32.xlu0 %v11920_v62, %s14579_s7 }
0x2bb3   : > { %6721 = vrot.lane.b32.xlu1 %v6705_v24, %s14578_s29 }
0x2c19   : > { %v6716_v41 = vpop.permute.xlu1 %6715  ;;  %v6712_v43 = vpop.permute.xlu0 %6711 }
0x2c1a   : > { %11332 = vmatprep.mubr.msk.f32.mxu0 %vm988_vm1, %v6716_v41 }
0x2c1d   : > { %v6714_v45 = vpop.permute.xlu1 %6713  ;;  %v6720_v48 = vpop.permute.xlu0 %6719 }
0x2c1e   : > { %v11925_v51 = vpack.i.bf16 %v6714_v45, %v6712_v43 }
0x2c20   : > { %11926 = vrot.lane.b32.xlu1 %v11925_v51, %s14579_s7 }
0x2c21   : > { %v6718_v52 = vpop.permute.xlu1 %6717  ;;  %v11922_v22 = vpop.permute.xlu0 %11921 }
0x2c22   : > { %v11930_v57 = vpack.i.bf16 %v6718_v52, %v6716_v41  ;;  %v11924_v56 = vunpack.i.h.bf16 %v11922_v22  ;;  %v11923_v58 = vunpack.i.l.bf16 %v11922_v22 }
0x2c24   : > { %v11622_v59 = vpack.c.bf16 %v11924_v56, %v11923_v58  ;;  %11931 = vrot.lane.b32.xlu0 %v11930_v57, %s14579_s7 }
0x2c25   : > { %v6722_v60 = vpop.permute.xlu1 %6721 }
0x2c26   : > { %v11935_v17 = vpack.i.bf16 %v6722_v60, %v6720_v48  ;;  %11624 = vmatprep.subr.msk.bf16.mxu1 %vm12847_vm2, %v11622_v59 }
0x2c27   : > { %11627 = vmatpush3.bf16.xpose.msk.msra.mxu1 %vm12847_vm2, %v11622_v59 }
0x2c28   : > { %11936 = vrot.lane.b32.xlu1 %v11935_v17, %s14579_s7 }
0x2c2e   : > { %11319 = vmatmul.mubr.msk.f32.vlgmr.msra.gmra.mrb[72].mxu1 %vm988_vm1, %v6705_v24 }
0x2c2f   : > { %11325 = vmatprep.mubr.msk.f32.mxu1 %vm988_vm1, %v6712_v43 }
0x2c92   : > { %v11927_v19 = vpop.permute.xlu1 %11926 }
0x2c93   : > { %v11929_v46 = vunpack.i.h.bf16 %v11927_v19  ;;  %v11928_v63 = vunpack.i.l.bf16 %v11927_v19 }
0x2c95   : > { %v11628_v0 = vpack.c.bf16 %v11929_v46, %v11928_v63 }
0x2c96   : > { %v11932_v47 = vpop.permute.xlu0 %11931 }
0x2c97   : > { %v11934_v53 = vunpack.i.h.bf16 %v11932_v47  ;;  %v11933_v55 = vunpack.i.l.bf16 %v11932_v47  ;;  %11630 = vmatprep.subr.msk.bf16.mxu1 %vm12847_vm2, %v11628_v0 }
0x2c98   : > { %11633 = vmatpush3.bf16.xpose.msk.msra.mxu1 %vm12847_vm2, %v11628_v0 }
0x2c99   : > { %v11634_v1 = vpack.c.bf16 %v11934_v53, %v11933_v55 }
0x2c9a   : > { %v11937_v2 = vpop.permute.xlu1 %11936 }
0x2c9b   : > { %v11939_v3 = vunpack.i.h.bf16 %v11937_v2  ;;  %v11938_v7 = vunpack.i.l.bf16 %v11937_v2  ;;  %11636 = vmatprep.subr.msk.bf16.mxu0 %vm12847_vm2, %v11634_v1 }
0x2c9c   : > { %11639 = vmatpush3.bf16.xpose.msk.msra.mxu0 %vm12847_vm2, %v11634_v1 }
0x2c9d   : > { %v11640_v8 = vpack.c.bf16 %v11939_v3, %v11938_v7  ;;  %11647 = vmatprep.subr.bf16.mxu0 %v11646_v61 }
0x2c9f   : > { %11326 = vmatmul.mubr.msk.f32.vlgmr.msra.gmra.mrb[74].mxu1 %vm988_vm1, %v6714_v45  ;;  %11642 = vmatprep.subr.msk.bf16.mxu1 %vm12847_vm2, %v11640_v8 }
0x2ca0   : > { %11645 = vmatpush3.bf16.xpose.msk.msra.mxu1 %vm12847_vm2, %v11640_v8  ;;  %11339 = vmatprep.mubr.msk.f32.mxu1 %vm988_vm1, %v6720_v48 }
0x2ca3   : > { %11333 = vmatmul.mubr.msk.f32.vlgmr.msra.gmra.mrb[60].mxu0 %vm988_vm1, %v6718_v52 }
0x2ca4   : > { %11649 = vmatpush3.bf16.msra.mxu0 %v11646_v61 }
0x2ca7   : > { %11340 = vmatmul.mubr.msk.f32.vlgmr.msra.gmra.mrb[76].mxu1 %vm988_vm1, %v6722_v60 }
0x2d01   : > { %v11320_v9 = vpop.f32.mrb[72].mxu1 }
0x2d02   : > { %v7092_v10 = vmul.f32 0.25, %v11320_v9  ;;  %v6821_v11 = vpop.f32.mrb[73].mxu1 }
0x2d03   : > { %v7091_v12 = vmul.f32 0.25, %v6821_v11 }
0x2d04   : > { %v7100_v54 = vadd.f32 %v13953_v38, %v7092_v10 }
0x2d05   : > { %v7099_v13 = vadd.f32 %v13953_v38, %v7091_v12 }
0x2d06   : > { %v7110_v14 = vsel %vm988_vm1, %v7100_v54, -inf }
0x2d07   : > { %7111 = vmax.xlane.f32.xlu1 %v7110_v14  ;;  %v7107_v37 = vsel %vm988_vm1, %v7099_v13, -inf }
0x2d08   : > { %7108 = vmax.xlane.f32.xlu0 %v7107_v37 }
0x2d72   : > { %v11327_v15 = vpop.f32.mrb[74].mxu1 }
0x2d73   : > { %v7094_v16 = vmul.f32 0.25, %v11327_v15  ;;  %v6908_v49 = vpop.f32.mrb[75].mxu1 }
0x2d74   : > { %v7093_v20 = vmul.f32 0.25, %v6908_v49 }
0x2d75   : > { %v7102_v50 = vadd.f32 %v13953_v38, %v7094_v16 }
0x2d76   : > { %v11334_v5 = vpop.f32.mrb[60].mxu0  ;;  %v7101_v6 = vadd.f32 %v13953_v38, %v7093_v20 }
0x2d77   : > { %v7096_v27 = vmul.f32 0.25, %v11334_v5  ;;  %v6995_v28 = vpop.f32.mrb[61].mxu0  ;;  %v7116_v29 = vsel %vm988_vm1, %v7102_v50, -inf }
0x2d78   : > { %v7095_v30 = vmul.f32 0.25, %v6995_v28  ;;  %7117 = vmax.xlane.f32.xlu0 %v7116_v29  ;;  %v7113_v35 = vsel %vm988_vm1, %v7101_v6, -inf }
0x2d79   : > { %v7104_v31 = vadd.f32 %v13953_v38, %v7096_v27 }
0x2d7a   : > { %v11341_v32 = vpop.f32.mrb[76].mxu1  ;;  %v7103_v33 = vadd.f32 %v13953_v38, %v7095_v30 }
0x2d7b   : > { %v7098_v34 = vmul.f32 0.25, %v11341_v32  ;;  %v7082_v36 = vpop.f32.mrb[77].mxu1  ;;  %v7122_v39 = vsel %vm988_vm1, %v7104_v31, -inf }
0x2d7c   : > { %v7097_v24 = vmul.f32 0.25, %v7082_v36  ;;  %7123 = vmax.xlane.f32.xlu1 %v7122_v39  ;;  %7114 = vmax.xlane.f32.xlu0 %v7113_v35  ;;  %v7119_v41 = vsel %vm988_vm1, %v7103_v33, -inf }
0x2d7d   : > { %v7106_v61 = vadd.f32 %v13953_v38, %v7098_v34 }
0x2d7e   : > { %v7105_v62 = vadd.f32 %v13953_v38, %v7097_v24 }
0x2d7f   : > { %v7128_v43 = vsel %vm988_vm1, %v7106_v61, -inf }
0x2d80   : > { %7120 = vmax.xlane.f32.xlu0 %v7119_v41  ;;  %7129 = vmax.xlane.f32.xlu1 %v7128_v43  ;;  %v7125_v45 = vsel %vm988_vm1, %v7105_v62, -inf }
0x2d84   : > { %7126 = vmax.xlane.f32.xlu0 %v7125_v45 }
0x2d94   : > { %v7112_v48 = vpop.xlane.xlu1 %7111 }
0x2d95   : > { %v7132_v51 = vsub.f32 %v7100_v54, %v7112_v48  ;;  %v7109_v52 = vpop.xlane.xlu0 %7108 }
0x2d96   : > { %v7131_v22 = vsub.f32 %v7099_v13, %v7109_v52 }
0x2d97   : > { %v7141_v57 = vmul.f32 1.442695, %v7132_v51 }
0x2d98   : > { %v7139_v56 = vmul.f32 1.442695, %v7131_v22 }
0x2d99   : > { %12498 = vpow2.f32 %v7141_v57 }
0x2d9a   : > { %12500 = vpow2.f32 %v7139_v56 }
0x2da3   : > { %v12499_v58 = vpop.eup %12498 }
0x2da4   : > { %v12501_v59 = vpop.eup %12500  ;;  %v7158_v60 = vsel %vm988_vm1, %v12499_v58, 0.0 }
0x2da5   : > { %7159 = vadd.xlane.f32.xlu1 %v7158_v60  ;;  %v7155_v17 = vsel %vm988_vm1, %v12501_v59, 0.0 }
0x2da6   : > { %7156 = vadd.xlane.f32.xlu0 %v7155_v17 }
0x2e05   : > { %v7118_v19 = vpop.xlane.xlu0 %7117 }
0x2e06   : > { %v7134_v46 = vsub.f32 %v7102_v50, %v7118_v19 }
0x2e08   : > { %v7145_v63 = vmul.f32 1.442695, %v7134_v46 }
0x2e09   : > { %v7124_v0 = vpop.xlane.xlu1 %7123  ;;  %v7115_v47 = vpop.xlane.xlu0 %7114 }
0x2e0a   : > { %12502 = vpow2.f32 %v7145_v63  ;;  %v7136_v53 = vsub.f32 %v7104_v31, %v7124_v0  ;;  %v7133_v55 = vsub.f32 %v7101_v6, %v7115_v47 }
0x2e0c   : > { %v7149_v1 = vmul.f32 1.442695, %v7136_v53  ;;  %v7143_v2 = vmul.f32 1.442695, %v7133_v55 }
0x2e0d   : > { %v7121_v3 = vpop.xlane.xlu0 %7120  ;;  %v7130_v7 = vpop.xlane.xlu1 %7129 }
0x2e0e   : > { %12504 = vpow2.f32 %v7149_v1  ;;  %v7135_v8 = vsub.f32 %v7103_v33, %v7121_v3  ;;  %v7138_v9 = vsub.f32 %v7106_v61, %v7130_v7 }
0x2e0f   : > { %12506 = vpow2.f32 %v7143_v2 }
0x2e10   : > { %v7147_v10 = vmul.f32 1.442695, %v7135_v8  ;;  %v7153_v11 = vmul.f32 1.442695, %v7138_v9 }
0x2e11   : > { %v7127_v12 = vpop.xlane.xlu0 %7126 }
0x2e12   : > { %12508 = vpow2.f32 %v7147_v10  ;;  %v7137_v54 = vsub.f32 %v7105_v62, %v7127_v12  ;;  %v12210_v10 = vld [vmem:[%s14572_s0 + $0x80] sm:$0xff]   ;;  %v12212_v12 = vld [vmem:[%s14572_s0 + $0x90] sm:$0xff]  }
0x2e13   : > { %12510 = vpow2.f32 %v7153_v11  ;;  %v12211_v11 = vld [vmem:[%s14572_s0 + $0x88] sm:$0xff]  }
0x2e14   : > { %v13973_v13 = vpop.eup %12502  ;;  %v7151_v14 = vmul.f32 1.442695, %v7137_v54  ;;  %v12213_v54 = vld [vmem:[%s14572_s0 + $0x98] sm:$0xff]  }
0x2e15   : > { %v7164_v37 = vsel %vm988_vm1, %v13973_v13, 0.0 }
0x2e16   : > { %12512 = vpow2.f32 %v7151_v14  ;;  %7165 = vadd.xlane.f32.xlu1 %v7164_v37 }
0x2e18   : > { %v13977_v15 = vpop.eup %12504 }
0x2e19   : > { %v12507_v16 = vpop.eup %12506  ;;  %v7170_v49 = vsel %vm988_vm1, %v13977_v15, 0.0 }
0x2e1a   : > { %7171 = vadd.xlane.f32.xlu1 %v7170_v49  ;;  %v7161_v20 = vsel %vm988_vm1, %v12507_v16, 0.0 }
0x2e1b   : > { %7162 = vadd.xlane.f32.xlu0 %v7161_v20 }
0x2e1c   : > { %v12509_v50 = vpop.eup %12508 }
0x2e1d   : > { %v13982_v5 = vpop.eup %12510  ;;  %v7167_v6 = vsel %vm988_vm1, %v12509_v50, 0.0 }
0x2e1e   : > { %v7176_v27 = vsel %vm988_vm1, %v13982_v5, 0.0 }
0x2e1f   : > { %7177 = vadd.xlane.f32.xlu1 %v7176_v27  ;;  %7168 = vadd.xlane.f32.xlu0 %v7167_v6 }
0x2e20   : > { %v12513_v28 = vpop.eup %12512 }
0x2e21   : > { %v7173_v29 = vsel %vm988_vm1, %v12513_v28, 0.0 }
0x2e23   : > { %7174 = vadd.xlane.f32.xlu0 %v7173_v29 }
0x2e30   : > { %11946 = vrot.lane.b32.xlu1 %v13919_v25, %s14576_s30 }
0x2e32   : > { %v7160_v30 = vpop.xlane.xlu1 %7159 }
0x2e33   : > { %12514 = vrcp.f32 %v7160_v30  ;;  %v7157_v31 = vpop.xlane.xlu0 %7156 }
0x2e34   : > { %11951 = vrot.lane.b32.xlu1 %v13919_v25, %s14578_s29  ;;  %12516 = vrcp.f32 %v7157_v31 }
0x2e39   : > { %11941 = vrot.lane.b32.xlu0 %v13919_v25, %s14577_s26 }
0x2e3d   : > { %v12515_v32 = vpop.eup %12514 }
0x2e3e   : > { %v12517_v33 = vpop.eup %12516  ;;  %v7182_v36 = vmul.f32 %v12515_v32, %v12499_v58 }
0x2e3f   : > { %v7180_v34 = vmul.f32 %v12517_v33, %v12501_v59 }
0x2e41   : > { %11346 = vmatprep.mubr.msk.f32.mxu0 %vm988_vm1, %v7180_v34 }
0x2e42   : > { %11347 = vmatmul.mubr.msk.f32.vlgmr.msra.gmra.mrb[62].mxu0 %vm988_vm1, %v7182_v36 }
0x2ea3   : > { %v7166_v39 = vpop.xlane.xlu1 %7165 }
0x2ea7   : > { %v7172_v35 = vpop.xlane.xlu1 %7171 }
0x2ea8   : > { %v7163_v24 = vpop.xlane.xlu0 %7162 }
0x2ea9   : > { %12518 = vrcp.f32 %v7163_v24 }
0x2eaa   : > { %12520 = vrcp.f32 %v7166_v39 }
0x2eab   : > { %12522 = vrcp.f32 %v7172_v35 }
0x2eac   : > { %v7178_v61 = vpop.xlane.xlu1 %7177  ;;  %v7169_v62 = vpop.xlane.xlu0 %7168 }
0x2ead   : > { %12524 = vrcp.f32 %v7169_v62 }
0x2eb0   : > { %v11947_v41 = vpop.permute.xlu1 %11946  ;;  %v7175_v43 = vpop.xlane.xlu0 %7174 }
0x2eb1   : > { %v11949_v25 = vunpack.i.h.bf16 %v11947_v41  ;;  %v11948_v45 = vunpack.i.l.bf16 %v11947_v41  ;;  %12526 = vrcp.f32 %v7175_v43  ;;  %v10446_v43 = vld [vmem:[%s14573_s8 + $0x4] ss:$0 sm:$0xff] }
0x2eb2   : > { %12528 = vrcp.f32 %v7178_v61 }
0x2eb3   : > { %v12519_v48 = vpop.eup %12518  ;;  %v11654_v51 = vpack.c.bf16 %v11949_v25, %v11948_v45 }
0x2eb4   : > { %v11952_v52 = vpop.permute.xlu1 %11951  ;;  %v11942_v22 = vpop.permute.xlu0 %11941  ;;  %v7184_v57 = vmul.f32 %v12519_v48, %v12507_v16 }
0x2eb5   : > { %v11954_v56 = vunpack.i.h.bf16 %v11952_v52  ;;  %v11953_v58 = vunpack.i.l.bf16 %v11952_v52  ;;  %v11944_v59 = vunpack.i.h.bf16 %v11942_v22  ;;  %v11943_v60 = vunpack.i.l.bf16 %v11942_v22  ;;  %11655 = vmatprep.subr.bf16.mxu0 %v11654_v51  ;;  %v12521_v17 = vpop.eup %12520 }
0x2eb6   : > { %11353 = vmatprep.mubr.msk.f32.mxu1 %vm988_vm1, %v7184_v57  ;;  %11657 = vmatpush3.bf16.msra.mxu0 %v11654_v51  ;;  %v12523_v19 = vpop.eup %12522  ;;  %v7186_v1 = vmul.f32 %v12521_v17, %v13973_v13 }
0x2eb7   : > { %v11650_v46 = vpack.c.bf16 %v11944_v59, %v11943_v60  ;;  %11370 = vmatprep.subr.bf16.mxu0 %v12629_v21  ;;  %v12525_v63 = vpop.eup %12524  ;;  %v11658_v0 = vpack.c.bf16 %v11954_v56, %v11953_v58  ;;  %v7190_v53 = vmul.f32 %v12523_v19, %v13977_v15 }
0x2eb8   : > { %v7188_v47 = vmul.f32 %v12525_v63, %v12509_v50 }
0x2eb9   : > { %11651 = vmatprep.subr.bf16.mxu1 %v11650_v46 }
0x2eba   : > { %11653 = vmatpush3.bf16.msra.mxu1 %v11650_v46  ;;  %11360 = vmatprep.mubr.msk.f32.mxu0 %vm988_vm1, %v7188_v47 }
0x2ebb   : > { %v12527_v55 = vpop.eup %12526  ;;  %11659 = vmatprep.subr.bf16.mxu1 %v11658_v0  ;;  %11361 = vmatmul.mubr.msk.f32.vlgmr.msra.gmra.mrb[64].mxu0 %vm988_vm1, %v7190_v53 }
0x2ebc   : > { %v12529_v2 = vpop.eup %12528  ;;  %v7192_v3 = vmul.f32 %v12527_v55, %v12513_v28  ;;  %11378 = vmatprep.mubr.msk.bf16.mxu0 %vm12630_vm3, %v12629_v21  ;;  %11371 = vmatpush3.bf16.msra.mxu0 %v12210_v10  ;;  %v12225_v10 = vld [vmem:[%s14505_s10 + $0x134] ss:$8 sps:$4 sm:$0xff]  }
0x2ebd   : > { %11354 = vmatmul.mubr.msk.f32.vlgmr.msra.gmra.mrb[78].mxu1 %vm988_vm1, %v7186_v1  ;;  %v7194_v7 = vmul.f32 %v12529_v2, %v13982_v5  ;;  %11372 = vmatprep.subr.bf16.mxu0 %v12629_v21  ;;  %v12214_v1 = vld [vmem:[%s14505_s10 + $0x100] ss:$8 sps:$4 sm:$0xff]   ;;  %v12219_v2 = vld [vmem:[%s14505_s10 + $0x114] ss:$8 sps:$4 sm:$0xff]  }
0x2ebe   : > { %11661 = vmatpush3.bf16.msra.mxu1 %v11658_v0  ;;  %11367 = vmatprep.mubr.msk.f32.mxu1 %vm988_vm1, %v7192_v3  ;;  %v12217_v3 = vld [vmem:[%s14505_s10 + $0x110] ss:$8 sps:$4 sm:$0xff]  }
0x2ec0   : > { %11373 = vmatpush3.bf16.msra.mxu0 %v12211_v11  ;;  %v12226_v11 = vld [vmem:[%s14507_s12 + $0x240] sm:$0xff]  }
0x2ec1   : > { %11368 = vmatmul.mubr.msk.f32.vlgmr.msra.gmra.mrb[80].mxu1 %vm988_vm1, %v7194_v7  ;;  %11374 = vmatprep.subr.bf16.mxu0 %v12629_v21  ;;  %v12222_v7 = vld [vmem:[%s14505_s10 + $0x124] ss:$8 sps:$4 sm:$0xff]  }
0x2ec2   : > { %7781 = vmatprep.mubr.bf16.mxu1 %v12624_v18 }
0x2ec4   : > { %11375 = vmatpush3.bf16.msra.mxu0 %v12212_v12  ;;  %v12227_v12 = vld [vmem:[%s14507_s12 + $0x200] sm:$0xff]  }
0x2ec5   : > { %11376 = vmatprep.subr.bf16.mxu0 %v12629_v21 }
0x2ec8   : > { %11377 = vmatpush3.bf16.msra.mxu0 %v12213_v54  ;;  %v12228_v54 = vld [vmem:[%s14507_s12 + $0x248] sm:$0xff]  }
0x2ec9   : > { %10956 = vmatprep.subr.bf16.mxu0 %v12226_v11 }
0x2f15   : > { %v11348_v8 = vpop.f32.mrb[62].mxu0 }
0x2f16   : > { %v7267_v9 = vpop.f32.mrb[63].mxu0 }
0x2f8e   : > { %v11362_v13 = vpop.f32.mrb[64].mxu0 }
0x2f8f   : > { %v7429_v14 = vpop.f32.mrb[65].mxu0 }
0x2f90   : > { %v11355_v37 = vpop.f32.mrb[78].mxu1  ;;  %v11960_v15 = vpack.i.bf16 %v11362_v13, %v7429_v14  ;;  %v12229_v13 = vld [vmem:[%s14507_s12 + $0x208] sm:$0xff]  }
0x2f91   : > { %v7348_v16 = vpop.f32.mrb[79].mxu1 }
0x2f92   : > { %v11955_v49 = vpack.i.bf16 %v11355_v37, %v7348_v16  ;;  %11961 = vrot.lane.b32.xlu0 %v11960_v15, %s14580_s2 }
0x2f94   : > { %11956 = vrot.lane.b32.xlu1 %v11955_v49, %s14581_s5  ;;  %v11369_v20 = vpop.f32.mrb[80].mxu1 }
0x2f95   : > { %v7510_v50 = vpop.f32.mrb[81].mxu1 }
0x2f96   : > { %v11965_v5 = vpack.i.bf16 %v11369_v20, %v7510_v50 }
0x2f98   : > { %11966 = vrot.lane.b32.xlu1 %v11965_v5, %s14582_s22 }
0x3004   : > { %v11962_v27 = vpop.permute.xlu0 %11961 }
0x3005   : > { %v11964_v32 = vunpack.i.h.bf16 %v11962_v27  ;;  %v11963_v33 = vunpack.i.l.bf16 %v11962_v27 }
0x3006   : > { %v11957_v6 = vpop.permute.xlu1 %11956 }
0x3007   : > { %v11959_v28 = vunpack.i.h.bf16 %v11957_v6  ;;  %v11958_v29 = vunpack.i.l.bf16 %v11957_v6  ;;  %v10454_v6 = vld [vmem:[%s14575_s1 + $0x4] ss:$0 sm:$0xff] }
0x3009   : > { %v7544_v30 = vsel %vm988_vm1, %v11348_v8, %v11959_v28  ;;  %v7543_v31 = vsel %vm988_vm1, %v7267_v9, %v11958_v29  ;;  %v12220_v8 = vld [vmem:[%s14505_s10 + $0x120] ss:$8 sps:$4 sm:$0xff]   ;;  %v12223_v9 = vld [vmem:[%s14505_s10 + $0x130] ss:$8 sps:$4 sm:$0xff]  }
0x300a   : > { %v11967_v34 = vpop.permute.xlu1 %11966  ;;  %v7545_v35 = vsel %vm1793_vm4, %v7543_v31, %v11963_v33  ;;  %v7546_v24 = vsel %vm1793_vm4, %v7544_v30, %v11964_v32  ;;  %v10455_v30 = vld [vmem:[%s14504_s9 + $0x4] ss:$0 sm:$0xff] }
0x300b   : > { %v11969_v36 = vunpack.i.h.bf16 %v11967_v34  ;;  %v11968_v39 = vunpack.i.l.bf16 %v11967_v34 }
0x300d   : > { %v7548_v61 = vsel %vm1796_vm5, %v7546_v24, %v11969_v36  ;;  %v7547_v62 = vsel %vm1796_vm5, %v7545_v35, %v11968_v39  ;;  %v12230_v36 = vld [vmem:[%s14507_s12 + $0x250] sm:$0xff]   ;;  %v12232_v35 = vld [vmem:[%s14507_s12 + $0x258] sm:$0xff]  }
0x300e   : > { %v7549_v41 = vpack.c.bf16 %v7548_v61, %v7547_v62  ;;  %v12231_v39 = vld [vmem:[%s14507_s12 + $0x210] sm:$0xff]   ;;  %v12233_v24 = vld [vmem:[%s14507_s12 + $0x218] sm:$0xff]   ;;  %v12234_v61 = vld [vmem:[%s14507_s12 + $0x260] sm:$0xff]  }
0x300f   : > { %v12235_v62 = vld [vmem:[%s14507_s12 + $0x220] sm:$0xff]  }
0x3010   : > { %11379 = vmatmul.mubr.msk.bf16.vlgmr.msra.gmra.mrb[68].mxu0 %vm798_vm0, %v7549_v41  ;;  %v12236_v41 = vld [vmem:[%s14507_s12 + $0x268] sm:$0xff]  }
0x3011   : > { %10957 = vmatpush3.bf16.msra.mxu0 %v12227_v12 }
0x3012   : > { %10958 = vmatprep.subr.bf16.mxu0 %v12228_v54 }
0x3015   : > { %10959 = vmatpush3.bf16.msra.mxu0 %v12229_v13 }
0x3016   : > { %10960 = vmatprep.subr.bf16.mxu0 %v12230_v36 }
0x3019   : > { %10961 = vmatpush3.bf16.msra.mxu0 %v12231_v39 }
0x301a   : > { %10962 = vmatprep.subr.bf16.mxu0 %v12232_v35 }
0x301d   : > { %10963 = vmatpush3.bf16.msra.mxu0 %v12233_v24 }
0x301e   : > { %10964 = vmatprep.subr.bf16.mxu0 %v12234_v61 }
0x3021   : > { %10965 = vmatpush3.bf16.msra.mxu0 %v12235_v62 }
0x3022   : > { %10966 = vmatprep.subr.bf16.mxu0 %v12236_v41 }
0x30e3   : > { %v7628_v25 = vpop.f32.mrb[68].mxu0 }
0x30e4   : > { %v7629_v45 = vadd.f32 %v10446_v43, %v7628_v25  ;;  %v11380_v48 = vpop.f32.mrb[69].mxu0  ;;  %v12238_v25 = vld [vmem:[%s14507_s12 + $0x270] sm:$0xff]  }
0x30e5   : > { %v7631_v51 = vpop.f32.mrb[70].mxu0  ;;  %v12240_v48 = vld [vmem:[%s14507_s12 + $0x278] sm:$0xff]  }
0x30e6   : > { %v7635_v52 = vadd.f32 %v7629_v45, %v13904_v23  ;;  %v7632_v22 = vadd.f32 %v10446_v43, %v7631_v51  ;;  %v11381_v57 = vpop.f32.mrb[71].mxu0  ;;  %v12237_v43 = vld [vmem:[%s14507_s12 + $0x228] sm:$0xff]   ;;  %v12239_v45 = vld [vmem:[%s14507_s12 + $0x230] sm:$0xff]   ;;  %v12241_v51 = vld [vmem:[%s14507_s12 + $0x238] sm:$0xff]  }
0x30e7   : > { %10967 = vmatpush3.bf16.msra.mxu0 %v12237_v43 }
0x30e8   : > { %v7636_v56 = vadd.f32 %v7632_v22, %v13906_v26  ;;  %v7641_v58 = vsel %vm798_vm0, %v7635_v52, 0.0  ;;  %v12216_v26 = vld [vmem:[%s14505_s10 + $0x104] ss:$8 sps:$4 sm:$0xff]   ;;  %10968 = vmatprep.subr.bf16.mxu0 %v12238_v25 }
0x30e9   : > { %7642 = vadd.xlane.f32.xlu0 %v7641_v58  ;;  %7749 = vmatprep.subr.bf16.mxu1 %v12216_v26 }
0x30ea   : > { %v7644_v59 = vsel %vm798_vm0, %v7636_v56, 0.0  ;;  %7750 = vmatpush1.bf16.msra.mxu1 %v12214_v1 }
0x30eb   : > { %7645 = vadd.xlane.f32.xlu1 %v7644_v59  ;;  %7751 = vmatprep.subr.bf16.mxu1 %v12219_v2 }
0x30ec   : > { %10969 = vmatpush3.bf16.msra.mxu0 %v12239_v45 }
0x30ed   : > { %10970 = vmatprep.subr.bf16.mxu0 %v12240_v48 }
0x30ee   : > { %7752 = vmatpush1.bf16.msra.mxu1 %v12217_v3 }
0x30ef   : > { %7753 = vmatprep.subr.bf16.mxu1 %v12222_v7 }
0x30f0   : > { %10971 = vmatpush3.bf16.msra.mxu0 %v12241_v51 }
0x30f2   : > { %7754 = vmatpush1.bf16.msra.mxu1 %v12220_v8 }
0x30f3   : > { %7755 = vmatprep.subr.bf16.mxu1 %v12225_v10 }
0x30f6   : > { %7756 = vmatpush1.bf16.msra.mxu1 %v12223_v9 }
0x3176   : > { %v7643_v60 = vpop.xlane.xlu0 %7642 }
0x3177   : > { %v7647_v17 = vmul.f32 0.015625, %v7643_v60 }
0x3178   : > { %v7646_v19 = vpop.xlane.xlu1 %7645 }
0x3179   : > { %v7649_v46 = vsub.f32 %v7635_v52, %v7647_v17  ;;  %v7648_v63 = vmul.f32 0.015625, %v7646_v19  ;;  %v10464_v52 = vld [vmem:[%s14506_s11 + $0x8] sm:$0x3] }
0x317a   : > { %v7699_v22 = vrot.slane %v10464_v52, %v12824_v42  ;;  %v7703_v57 = vrot.slane %v10464_v52, %v12829_v44  ;;  %v12242_v52 = vld [vmem:[%s14565_s3 + $0x140] ss:$8 sps:$4 sm:$0xff]  }
0x317b   : > { %v7650_v0 = vsub.f32 %v7636_v56, %v7648_v63  ;;  %v7651_v47 = vmul.f32 %v7649_v46, %v7649_v46 }
0x317d   : > { %v7653_v53 = vsel %vm798_vm0, %v7651_v47, 0.0  ;;  %v7652_v23 = vmul.f32 %v7650_v0, %v7650_v0 }
0x317e   : > { %7654 = vadd.xlane.f32.xlu0 %v7653_v53 }
0x317f   : > { %v7656_v55 = vsel %vm798_vm0, %v7652_v23, 0.0 }
0x3182   : > { %7657 = vadd.xlane.f32.xlu0 %v7656_v55 }
0x320b   : > { %v7655_v14 = vpop.xlane.xlu0 %7654 }
0x320c   : > { %v7659_v37 = vmul.f32 0.015625, %v7655_v14 }
0x320e   : > { %v7661_v15 = vadd.f32 1e-12, %v7659_v37 }
0x320f   : > { %v7658_v16 = vpop.xlane.xlu0 %7657 }
0x3210   : > { %12530 = vrsqrt.f32 %v7661_v15  ;;  %v7660_v49 = vmul.f32 0.015625, %v7658_v16 }
0x3212   : > { %v7662_v20 = vadd.f32 1e-12, %v7660_v49 }
0x3214   : > { %12532 = vrsqrt.f32 %v7662_v20 }
0x321a   : > { %v12531_v50 = vpop.eup %12530 }
0x321b   : > { %v7665_v5 = vmul.f32 %v12531_v50, %v7649_v46  ;;  %v10507_v50 = vld [vmem:[%s14508_s13 + $0x4] ss:$0 sm:$0xff] }
0x321d   : > { %v7673_v28 = vmul.f32 %v10454_v6, %v7665_v5 }
0x321e   : > { %v12533_v27 = vpop.eup %12532 }
0x321f   : > { %v7666_v29 = vmul.f32 %v12533_v27, %v7650_v0  ;;  %v14085_v32 = vadd.f32 %v10455_v30, %v7673_v28 }
0x3221   : > { %v7674_v31 = vmul.f32 %v10454_v6, %v7666_v29 }
0x3223   : > { %v14087_v33 = vadd.f32 %v10455_v30, %v7674_v31 }
0x3225   : > { %v7683_v34 = vpack.c.bf16 %v14087_v33, %v14085_v32 }
0x3227   : > { %10473 = vmatmul.mubr.msk.bf16.vlgmr.msra.gmra.mrb[84].mxu1 %vm798_vm0, %v7683_v34 }
0x3228   : > { %8138 = vmatprep.mubr.bf16.mxu1 %v12624_v18 }
0x32fa   : > { %v7783_v56 = vpop.f32.mrb[84].mxu1 }
0x32fb   : > { %v7784_v58 = vadd.f32 %v7783_v56, %v7699_v22  ;;  %v7785_v59 = vpop.f32.mrb[85].mxu1  ;;  %v12250_v56 = vld [vmem:[%s14565_s3 + $0x164] ss:$8 sps:$4 sm:$0xff]  }
0x32fc   : > { %v7786_v60 = vadd.f32 %v7785_v59, %v7703_v57  ;;  %v7787_v17 = vpop.f32.mrb[86].mxu1  ;;  %v12251_v59 = vld [vmem:[%s14565_s3 + $0x170] ss:$8 sps:$4 sm:$0xff]  }
0x32fd   : > { %v7796_v19 = vmul.f32 0.70710677, %v7784_v58  ;;  %v7788_v46 = vadd.f32 %v7787_v17, %v7699_v22  ;;  %v7789_v63 = vpop.f32.mrb[87].mxu1  ;;  %v7792_v8 = vmul.f32 0.5, %v7784_v58  ;;  %v12247_v22 = vld [vmem:[%s14565_s3 + $0x154] ss:$8 sps:$4 sm:$0xff]  }
0x32fe   : > { %v7797_v0 = vmul.f32 0.70710677, %v7786_v60  ;;  %v7790_v47 = vadd.f32 %v7789_v63, %v7703_v57  ;;  %v7793_v11 = vmul.f32 0.5, %v7786_v60  ;;  %v12245_v57 = vld [vmem:[%s14565_s3 + $0x150] ss:$8 sps:$4 sm:$0xff]  }
0x32ff   : > { %12534 = verf.f32 %v7796_v19  ;;  %v7798_v53 = vmul.f32 0.70710677, %v7788_v46  ;;  %v7794_v9 = vmul.f32 0.5, %v7788_v46  ;;  %v12248_v58 = vld [vmem:[%s14565_s3 + $0x160] ss:$8 sps:$4 sm:$0xff]  }
0x3300   : > { %12536 = verf.f32 %v7797_v0  ;;  %v7799_v23 = vmul.f32 0.70710677, %v7790_v47  ;;  %v7795_v12 = vmul.f32 0.5, %v7790_v47  ;;  %v12253_v60 = vld [vmem:[%s14565_s3 + $0x174] ss:$8 sps:$4 sm:$0xff]  }
0x3301   : > { %12538 = verf.f32 %v7798_v53 }
0x3302   : > { %12540 = verf.f32 %v7799_v23  ;;  %v10526_v23 = vld [vmem:[%s14509_s14 + $0x4] ss:$0 sm:$0xff] }
0x3309   : > { %v12535_v55 = vpop.eup %12534 }
0x330a   : > { %v12537_v26 = vpop.eup %12536  ;;  %v7804_v1 = vadd.f32 1.0, %v12535_v55 }
0x330b   : > { %v12539_v2 = vpop.eup %12538  ;;  %v7805_v3 = vadd.f32 1.0, %v12537_v26 }
0x330c   : > { %v12541_v7 = vpop.eup %12540  ;;  %v7806_v10 = vadd.f32 1.0, %v12539_v2  ;;  %v7808_v13 = vmul.f32 %v7804_v1, %v7792_v8 }
0x330d   : > { %v7807_v54 = vadd.f32 1.0, %v12541_v7  ;;  %v7809_v37 = vmul.f32 %v7805_v3, %v7793_v11  ;;  %v10527_v3 = vld [vmem:[%s14510_s15 + $0x4] ss:$0 sm:$0xff]  ;;  %v10536_v11 = vld [vmem:[%s14568_s4 + $0xa] sm:$0x3] }
0x330e   : > { %v7810_v14 = vmul.f32 %v7806_v10, %v7794_v9 }
0x330f   : > { %v7811_v15 = vmul.f32 %v7807_v54, %v7795_v12  ;;  %v8056_v12 = vrot.slane %v10536_v11, %v12824_v42 }
0x3310   : > { %v7812_v16 = vpack.c.bf16 %v7810_v14, %v7808_v13  ;;  %v8060_v13 = vrot.slane %v10536_v11, %v12829_v44 }
0x3311   : > { %v7813_v49 = vpack.c.bf16 %v7811_v15, %v7809_v37 }
0x3313   : > { %7983 = vmatprep.mubr.bf16.mxu0 %v7813_v49 }
0x3314   : > { %7984 = vmatmul.mubr.bf16.vlgmr.msra.gmra.mrb[72].mxu0 %v7812_v16 }
0x33e7   : > { %v10972_v20 = vpop.f32.mrb[72].mxu0 }
0x33e8   : > { %v10973_v5 = vpop.f32.mrb[73].mxu0 }
0x33e9   : > { %v10974_v6 = vadd.f32 %v10973_v5, %v10972_v20  ;;  %v10975_v27 = vpop.f32.mrb[74].mxu0 }
0x33ea   : > { %v10976_v28 = vpop.f32.mrb[75].mxu0 }
0x33eb   : > { %v7986_v29 = vadd.f32 %v10974_v6, %v10507_v50  ;;  %v10977_v30 = vadd.f32 %v10976_v28, %v10975_v27 }
0x33ed   : > { %v7989_v31 = vadd.f32 %v10977_v30, %v10507_v50  ;;  %v7992_v34 = vadd.f32 %v7986_v29, %v14085_v32 }
0x33ef   : > { %v7998_v36 = vsel %vm798_vm0, %v7992_v34, 0.0  ;;  %v7993_v39 = vadd.f32 %v7989_v31, %v14087_v33  ;;  %v12244_v33 = vld [vmem:[%s14565_s3 + $0x144] ss:$8 sps:$4 sm:$0xff]  }
0x33f0   : > { %7999 = vadd.xlane.f32.xlu0 %v7998_v36  ;;  %8106 = vmatprep.subr.bf16.mxu1 %v12244_v33 }
0x33f1   : > { %v8001_v35 = vsel %vm798_vm0, %v7993_v39, 0.0  ;;  %8107 = vmatpush1.bf16.msra.mxu1 %v12242_v52 }
0x33f2   : > { %8002 = vadd.xlane.f32.xlu1 %v8001_v35  ;;  %8108 = vmatprep.subr.bf16.mxu1 %v12247_v22 }
0x33f5   : > { %8109 = vmatpush1.bf16.msra.mxu1 %v12245_v57 }
0x33f6   : > { %8110 = vmatprep.subr.bf16.mxu1 %v12250_v56 }
0x33f9   : > { %8111 = vmatpush1.bf16.msra.mxu1 %v12248_v58 }
0x33fa   : > { %8112 = vmatprep.subr.bf16.mxu1 %v12253_v60 }
0x33fd   : > { %8113 = vmatpush1.bf16.msra.mxu1 %v12251_v59 }
0x347d   : > { %v8000_v24 = vpop.xlane.xlu0 %7999 }
0x347e   : > { %v8004_v61 = vmul.f32 0.015625, %v8000_v24 }
0x347f   : > { %v8003_v62 = vpop.xlane.xlu1 %8002 }
0x3480   : > { %v8006_v41 = vsub.f32 %v7992_v34, %v8004_v61  ;;  %v8005_v43 = vmul.f32 0.015625, %v8003_v62 }
0x3482   : > { %v8007_v25 = vsub.f32 %v7993_v39, %v8005_v43  ;;  %v8008_v45 = vmul.f32 %v8006_v41, %v8006_v41 }
0x3484   : > { %v8010_v48 = vsel %vm798_vm0, %v8008_v45, 0.0  ;;  %v8009_v51 = vmul.f32 %v8007_v25, %v8007_v25 }
0x3485   : > { %8011 = vadd.xlane.f32.xlu0 %v8010_v48 }
0x3486   : > { %v8013_v32 = vsel %vm798_vm0, %v8009_v51, 0.0 }
0x3487   : > { %8014 = vadd.xlane.f32.xlu1 %v8013_v32 }
0x3512   : > { %v8012_v17 = vpop.xlane.xlu0 %8011 }
0x3513   : > { %v8016_v19 = vmul.f32 0.015625, %v8012_v17 }
0x3514   : > { %v8015_v46 = vpop.xlane.xlu1 %8014 }
0x3515   : > { %v8018_v63 = vadd.f32 1e-12, %v8016_v19  ;;  %v8017_v0 = vmul.f32 0.015625, %v8015_v46 }
0x3517   : > { %12542 = vrsqrt.f32 %v8018_v63  ;;  %v8019_v47 = vadd.f32 1e-12, %v8017_v0 }
0x3519   : > { %12544 = vrsqrt.f32 %v8019_v47 }
0x3521   : > { %v12543_v53 = vpop.eup %12542 }
0x3522   : > { %v8022_v55 = vmul.f32 %v12543_v53, %v8006_v41 }
0x3523   : > { %v12545_v26 = vpop.eup %12544 }
0x3524   : > { %v8030_v1 = vmul.f32 %v10526_v23, %v8022_v55  ;;  %v8023_v2 = vmul.f32 %v12545_v26, %v8007_v25 }
0x3526   : > { %v8031_v7 = vmul.f32 %v10526_v23, %v8023_v2  ;;  %v14173_v8 = vadd.f32 %v10527_v3, %v8030_v1 }
0x3528   : > { %v14175_v9 = vadd.f32 %v10527_v3, %v8031_v7 }
0x352a   : > { %v8040_v10 = vpack.c.bf16 %v14175_v9, %v14173_v8 }
0x352c   : > { %10545 = vmatmul.mubr.msk.bf16.vlgmr.msra.gmra.mrb[88].mxu1 %vm798_vm0, %v8040_v10 }
0x35ff   : > { %v8140_v54 = vpop.f32.mrb[88].mxu1 }
0x3600   : > { %v8141_v14 = vadd.f32 %v8140_v54, %v8056_v12  ;;  %v8142_v37 = vpop.f32.mrb[89].mxu1 }
0x3601   : > { %v8144_v15 = vpop.f32.mrb[90].mxu1  ;;  %v8143_v49 = vadd.f32 %v8142_v37, %v8060_v13 }
0x3602   : > { %v8146_v16 = vpop.f32.mrb[91].mxu1  ;;  %8155 = vrot.lane.b32.xlu1 %v8141_v14, %s14576_s30  ;;  %8151 = vrot.lane.b32.xlu0 %v8141_v14, %s14577_s26  ;;  %v8145_v50 = vadd.f32 %v8144_v15, %v8056_v12 }
0x3603   : > { %v8147_v20 = vadd.f32 %v8146_v16, %v8060_v13  ;;  %11386 = vmatprep.mubr.msk.f32.mxu1 %vm988_vm1, %v8141_v14 }
0x3604   : > { %v11970_v27 = vpack.i.bf16 %v8145_v50, %v8141_v14 }
0x3605   : > { %v11686_v5 = vpack.c.bf16 %v8147_v20, %v8143_v49  ;;  %v14188_v6 = vpack.i.bf16 %v8147_v20, %v8143_v49 }
0x3606   : > { %8153 = vrot.lane.b32.xlu1 %v8145_v50, %s14577_s26  ;;  %8159 = vrot.lane.b32.xlu0 %v8141_v14, %s14578_s29 }
0x360a   : > { %8157 = vrot.lane.b32.xlu1 %v8145_v50, %s14576_s30  ;;  %11971 = vrot.lane.b32.xlu0 %v11970_v27, %s14579_s7 }
0x360e   : > { %8161 = vrot.lane.b32.xlu1 %v8145_v50, %s14578_s29 }
0x3674   : > { %v8156_v28 = vpop.permute.xlu1 %8155  ;;  %v8152_v29 = vpop.permute.xlu0 %8151 }
0x3675   : > { %11400 = vmatprep.mubr.msk.f32.mxu0 %vm988_vm1, %v8156_v28 }
0x3678   : > { %v8154_v30 = vpop.permute.xlu1 %8153  ;;  %v8160_v31 = vpop.permute.xlu0 %8159 }
0x3679   : > { %v11975_v34 = vpack.i.bf16 %v8154_v30, %v8152_v29 }
0x367b   : > { %11976 = vrot.lane.b32.xlu1 %v11975_v34, %s14579_s7 }
0x367c   : > { %v8158_v36 = vpop.permute.xlu1 %8157  ;;  %v11972_v39 = vpop.permute.xlu0 %11971 }
0x367d   : > { %v11980_v35 = vpack.i.bf16 %v8158_v36, %v8156_v28  ;;  %v11974_v24 = vunpack.i.h.bf16 %v11972_v39  ;;  %v11973_v61 = vunpack.i.l.bf16 %v11972_v39 }
0x367f   : > { %v11662_v62 = vpack.c.bf16 %v11974_v24, %v11973_v61  ;;  %11981 = vrot.lane.b32.xlu0 %v11980_v35, %s14579_s7 }
0x3680   : > { %v8162_v41 = vpop.permute.xlu1 %8161 }
0x3681   : > { %v11985_v43 = vpack.i.bf16 %v8162_v41, %v8160_v31  ;;  %11664 = vmatprep.subr.msk.bf16.mxu1 %vm12847_vm2, %v11662_v62 }
0x3682   : > { %11667 = vmatpush3.bf16.xpose.msk.msra.mxu1 %vm12847_vm2, %v11662_v62 }
0x3683   : > { %11986 = vrot.lane.b32.xlu1 %v11985_v43, %s14579_s7 }
0x3689   : > { %11387 = vmatmul.mubr.msk.f32.vlgmr.msra.gmra.mrb[82].mxu1 %vm988_vm1, %v8145_v50 }
0x368a   : > { %11393 = vmatprep.mubr.msk.f32.mxu1 %vm988_vm1, %v8152_v29 }
0x36ed   : > { %v11977_v25 = vpop.permute.xlu1 %11976 }
0x36ee   : > { %v11979_v45 = vunpack.i.h.bf16 %v11977_v25  ;;  %v11978_v48 = vunpack.i.l.bf16 %v11977_v25 }
0x36f0   : > { %v11668_v51 = vpack.c.bf16 %v11979_v45, %v11978_v48 }
0x36f1   : > { %v11982_v32 = vpop.permute.xlu0 %11981 }
0x36f2   : > { %v11984_v33 = vunpack.i.h.bf16 %v11982_v32  ;;  %v11983_v52 = vunpack.i.l.bf16 %v11982_v32  ;;  %11670 = vmatprep.subr.msk.bf16.mxu1 %vm12847_vm2, %v11668_v51 }
0x36f3   : > { %11673 = vmatpush3.bf16.xpose.msk.msra.mxu1 %vm12847_vm2, %v11668_v51 }
0x36f4   : > { %v11674_v22 = vpack.c.bf16 %v11984_v33, %v11983_v52 }
0x36f5   : > { %v11987_v57 = vpop.permute.xlu1 %11986 }
0x36f6   : > { %v11989_v56 = vunpack.i.h.bf16 %v11987_v57  ;;  %v11988_v58 = vunpack.i.l.bf16 %v11987_v57  ;;  %11676 = vmatprep.subr.msk.bf16.mxu0 %vm12847_vm2, %v11674_v22 }
0x36f7   : > { %11679 = vmatpush3.bf16.xpose.msk.msra.mxu0 %vm12847_vm2, %v11674_v22 }
0x36f8   : > { %v11680_v59 = vpack.c.bf16 %v11989_v56, %v11988_v58  ;;  %11687 = vmatprep.subr.bf16.mxu0 %v11686_v5 }
0x36fa   : > { %11394 = vmatmul.mubr.msk.f32.vlgmr.msra.gmra.mrb[92].mxu1 %vm988_vm1, %v8154_v30  ;;  %11682 = vmatprep.subr.msk.bf16.mxu1 %vm12847_vm2, %v11680_v59 }
0x36fb   : > { %11685 = vmatpush3.bf16.xpose.msk.msra.mxu1 %vm12847_vm2, %v11680_v59  ;;  %11407 = vmatprep.mubr.msk.f32.mxu1 %vm988_vm1, %v8160_v31 }
0x36fe   : > { %11401 = vmatmul.mubr.msk.f32.vlgmr.msra.gmra.mrb[66].mxu0 %vm988_vm1, %v8158_v36 }
0x36ff   : > { %11689 = vmatpush3.bf16.msra.mxu0 %v11686_v5 }
0x3702   : > { %11408 = vmatmul.mubr.msk.f32.vlgmr.msra.gmra.mrb[94].mxu1 %vm988_vm1, %v8162_v41 }
0x375c   : > { %v11388_v60 = vpop.f32.mrb[82].mxu1 }
0x375d   : > { %v8532_v17 = vmul.f32 0.25, %v11388_v60  ;;  %v8261_v19 = vpop.f32.mrb[83].mxu1 }
0x375e   : > { %v8531_v46 = vmul.f32 0.25, %v8261_v19 }
0x375f   : > { %v8540_v63 = vadd.f32 %v13953_v38, %v8532_v17 }
0x3760   : > { %v8539_v0 = vadd.f32 %v13953_v38, %v8531_v46 }
0x3761   : > { %v8550_v47 = vsel %vm988_vm1, %v8540_v63, -inf }
0x3762   : > { %8551 = vmax.xlane.f32.xlu1 %v8550_v47  ;;  %v8547_v4 = vsel %vm988_vm1, %v8539_v0, -inf }
0x3763   : > { %8548 = vmax.xlane.f32.xlu0 %v8547_v4 }
0x37cd   : > { %v11395_v53 = vpop.f32.mrb[92].mxu1 }
0x37ce   : > { %v8534_v23 = vmul.f32 0.25, %v11395_v53  ;;  %v8348_v55 = vpop.f32.mrb[93].mxu1 }
0x37cf   : > { %v8533_v26 = vmul.f32 0.25, %v8348_v55 }
0x37d0   : > { %v8542_v1 = vadd.f32 %v13953_v38, %v8534_v23 }
0x37d1   : > { %v11402_v2 = vpop.f32.mrb[66].mxu0  ;;  %v8541_v3 = vadd.f32 %v13953_v38, %v8533_v26 }
0x37d2   : > { %v8536_v7 = vmul.f32 0.25, %v11402_v2  ;;  %v8435_v10 = vpop.f32.mrb[67].mxu0  ;;  %v8556_v11 = vsel %vm988_vm1, %v8542_v1, -inf }
0x37d3   : > { %v8535_v12 = vmul.f32 0.25, %v8435_v10  ;;  %8557 = vmax.xlane.f32.xlu0 %v8556_v11  ;;  %v8553_v49 = vsel %vm988_vm1, %v8541_v3, -inf }
0x37d4   : > { %v8544_v54 = vadd.f32 %v13953_v38, %v8536_v7 }
0x37d5   : > { %v11409_v13 = vpop.f32.mrb[94].mxu1  ;;  %v8543_v14 = vadd.f32 %v13953_v38, %v8535_v12 }
0x37d6   : > { %v8538_v37 = vmul.f32 0.25, %v11409_v13  ;;  %v8522_v15 = vpop.f32.mrb[95].mxu1  ;;  %v8562_v16 = vsel %vm988_vm1, %v8544_v54, -inf }
0x37d7   : > { %v8537_v20 = vmul.f32 0.25, %v8522_v15  ;;  %8563 = vmax.xlane.f32.xlu1 %v8562_v16  ;;  %8554 = vmax.xlane.f32.xlu0 %v8553_v49  ;;  %v8559_v27 = vsel %vm988_vm1, %v8543_v14, -inf }
0x37d8   : > { %v8546_v50 = vadd.f32 %v13953_v38, %v8538_v37 }
0x37d9   : > { %v8545_v5 = vadd.f32 %v13953_v38, %v8537_v20 }
0x37da   : > { %v8568_v28 = vsel %vm988_vm1, %v8546_v50, -inf }
0x37db   : > { %8560 = vmax.xlane.f32.xlu0 %v8559_v27  ;;  %8569 = vmax.xlane.f32.xlu1 %v8568_v28  ;;  %v8565_v29 = vsel %vm988_vm1, %v8545_v5, -inf }
0x37df   : > { %8566 = vmax.xlane.f32.xlu0 %v8565_v29 }
0x37ef   : > { %v8552_v30 = vpop.xlane.xlu1 %8551 }
0x37f0   : > { %v8572_v31 = vsub.f32 %v8540_v63, %v8552_v30  ;;  %v8549_v34 = vpop.xlane.xlu0 %8548 }
0x37f1   : > { %v8571_v36 = vsub.f32 %v8539_v0, %v8549_v34 }
0x37f2   : > { %v8581_v39 = vmul.f32 1.442695, %v8572_v31 }
0x37f3   : > { %v8579_v35 = vmul.f32 1.442695, %v8571_v36 }
0x37f4   : > { %12546 = vpow2.f32 %v8581_v39 }
0x37f5   : > { %12548 = vpow2.f32 %v8579_v35 }
0x37fe   : > { %v12547_v24 = vpop.eup %12546 }
0x37ff   : > { %v12549_v61 = vpop.eup %12548  ;;  %v8598_v38 = vsel %vm988_vm1, %v12547_v24, 0.0 }
0x3800   : > { %8599 = vadd.xlane.f32.xlu1 %v8598_v38  ;;  %v8595_v62 = vsel %vm988_vm1, %v12549_v61, 0.0 }
0x3801   : > { %8596 = vadd.xlane.f32.xlu0 %v8595_v62 }
0x3860   : > { %v8558_v41 = vpop.xlane.xlu0 %8557 }
0x3861   : > { %v8574_v43 = vsub.f32 %v8542_v1, %v8558_v41 }
0x3863   : > { %v8585_v25 = vmul.f32 1.442695, %v8574_v43 }
0x3864   : > { %v8564_v45 = vpop.xlane.xlu1 %8563  ;;  %v8555_v48 = vpop.xlane.xlu0 %8554 }
0x3865   : > { %12550 = vpow2.f32 %v8585_v25  ;;  %v8576_v51 = vsub.f32 %v8544_v54, %v8564_v45  ;;  %v8573_v32 = vsub.f32 %v8541_v3, %v8555_v48 }
0x3867   : > { %v8589_v33 = vmul.f32 1.442695, %v8576_v51  ;;  %v8583_v52 = vmul.f32 1.442695, %v8573_v32 }
0x3868   : > { %v8561_v22 = vpop.xlane.xlu0 %8560  ;;  %v8570_v57 = vpop.xlane.xlu1 %8569 }
0x3869   : > { %12552 = vpow2.f32 %v8589_v33  ;;  %v8575_v56 = vsub.f32 %v8543_v14, %v8561_v22  ;;  %v8578_v58 = vsub.f32 %v8546_v50, %v8570_v57 }
0x386a   : > { %12554 = vpow2.f32 %v8583_v52 }
0x386b   : > { %v8587_v59 = vmul.f32 1.442695, %v8575_v56  ;;  %v8593_v60 = vmul.f32 1.442695, %v8578_v58  ;;  %v12254_v56 = vld [vmem:[%s14572_s0 + $0xa0] sm:$0xff]   ;;  %v12255_v58 = vld [vmem:[%s14572_s0 + $0xa8] sm:$0xff]  }
0x386c   : > { %v8567_v17 = vpop.xlane.xlu0 %8566 }
0x386d   : > { %12556 = vpow2.f32 %v8587_v59  ;;  %v8577_v19 = vsub.f32 %v8545_v5, %v8567_v17  ;;  %v12256_v59 = vld [vmem:[%s14572_s0 + $0xb0] sm:$0xff]  }
0x386e   : > { %12558 = vpow2.f32 %v8593_v60  ;;  %v12257_v60 = vld [vmem:[%s14572_s0 + $0xb8] sm:$0xff]  }
0x386f   : > { %v14239_v46 = vpop.eup %12550  ;;  %v8591_v63 = vmul.f32 1.442695, %v8577_v19 }
0x3870   : > { %v8604_v0 = vsel %vm988_vm1, %v14239_v46, 0.0 }
0x3871   : > { %12560 = vpow2.f32 %v8591_v63  ;;  %8605 = vadd.xlane.f32.xlu1 %v8604_v0 }
0x3873   : > { %v14243_v47 = vpop.eup %12552 }
0x3874   : > { %v12555_v4 = vpop.eup %12554  ;;  %v8610_v53 = vsel %vm988_vm1, %v14243_v47, 0.0 }
0x3875   : > { %8611 = vadd.xlane.f32.xlu1 %v8610_v53  ;;  %v8601_v23 = vsel %vm988_vm1, %v12555_v4, 0.0 }
0x3876   : > { %8602 = vadd.xlane.f32.xlu0 %v8601_v23 }
0x3877   : > { %v12557_v55 = vpop.eup %12556 }
0x3878   : > { %v14248_v26 = vpop.eup %12558  ;;  %v8607_v1 = vsel %vm988_vm1, %v12557_v55, 0.0 }
0x3879   : > { %v8616_v2 = vsel %vm988_vm1, %v14248_v26, 0.0 }
0x387a   : > { %8617 = vadd.xlane.f32.xlu1 %v8616_v2  ;;  %8608 = vadd.xlane.f32.xlu0 %v8607_v1 }
0x387b   : > { %v12561_v3 = vpop.eup %12560 }
0x387c   : > { %v8613_v7 = vsel %vm988_vm1, %v12561_v3, 0.0 }
0x387e   : > { %8614 = vadd.xlane.f32.xlu0 %v8613_v7 }
0x388b   : > { %11996 = vrot.lane.b32.xlu1 %v14188_v6, %s14576_s30  ;;  %s14588_s30 = sld [smem:[#allocation18_spill]] }
0x388d   : > { %v8600_v10 = vpop.xlane.xlu1 %8599 }
0x388e   : > { %12562 = vrcp.f32 %v8600_v10  ;;  %v8597_v11 = vpop.xlane.xlu0 %8596 }
0x388f   : > { %12001 = vrot.lane.b32.xlu1 %v14188_v6, %s14578_s29  ;;  %12564 = vrcp.f32 %v8597_v11 }
0x3894   : > { %11991 = vrot.lane.b32.xlu0 %v14188_v6, %s14577_s26 }
0x3898   : > { %v12563_v12 = vpop.eup %12562 }
0x3899   : > { %v12565_v54 = vpop.eup %12564  ;;  %v8622_v14 = vmul.f32 %v12563_v12, %v12547_v24 }
0x389a   : > { %v8620_v13 = vmul.f32 %v12565_v54, %v12549_v61 }
0x389c   : > { %11414 = vmatprep.mubr.msk.f32.mxu0 %vm988_vm1, %v8620_v13 }
0x389d   : > { %11415 = vmatmul.mubr.msk.f32.vlgmr.msra.gmra.mrb[76].mxu0 %vm988_vm1, %v8622_v14 }
0x38fe   : > { %v8606_v37 = vpop.xlane.xlu1 %8605 }
0x3902   : > { %v8612_v15 = vpop.xlane.xlu1 %8611 }
0x3903   : > { %v8603_v16 = vpop.xlane.xlu0 %8602 }
0x3904   : > { %12566 = vrcp.f32 %v8603_v16 }
0x3905   : > { %12568 = vrcp.f32 %v8606_v37 }
0x3906   : > { %12570 = vrcp.f32 %v8612_v15 }
0x3907   : > { %v8618_v49 = vpop.xlane.xlu1 %8617  ;;  %v8609_v20 = vpop.xlane.xlu0 %8608 }
0x3908   : > { %12572 = vrcp.f32 %v8609_v20  ;;  %v10579_v20 = vld [vmem:[%s14573_s8 + $0x5] ss:$0 sm:$0xff] }
0x390b   : > { %v11997_v50 = vpop.permute.xlu1 %11996  ;;  %v8615_v5 = vpop.xlane.xlu0 %8614 }
0x390c   : > { %v11999_v6 = vunpack.i.h.bf16 %v11997_v50  ;;  %v11998_v27 = vunpack.i.l.bf16 %v11997_v50  ;;  %12574 = vrcp.f32 %v8615_v5 }
0x390d   : > { %12576 = vrcp.f32 %v8618_v49 }
0x390e   : > { %v12567_v28 = vpop.eup %12566  ;;  %v11694_v29 = vpack.c.bf16 %v11999_v6, %v11998_v27 }
0x390f   : > { %v12002_v30 = vpop.permute.xlu1 %12001  ;;  %v11992_v31 = vpop.permute.xlu0 %11991  ;;  %v8624_v34 = vmul.f32 %v12567_v28, %v12555_v4 }
0x3910   : > { %v12004_v36 = vunpack.i.h.bf16 %v12002_v30  ;;  %v12003_v39 = vunpack.i.l.bf16 %v12002_v30  ;;  %v11994_v35 = vunpack.i.h.bf16 %v11992_v31  ;;  %v11993_v24 = vunpack.i.l.bf16 %v11992_v31  ;;  %11695 = vmatprep.subr.bf16.mxu0 %v11694_v29  ;;  %v12569_v61 = vpop.eup %12568 }
0x3911   : > { %11421 = vmatprep.mubr.msk.f32.mxu1 %vm988_vm1, %v8624_v34  ;;  %11697 = vmatpush3.bf16.msra.mxu0 %v11694_v29  ;;  %v12571_v38 = vpop.eup %12570  ;;  %v8626_v51 = vmul.f32 %v12569_v61, %v14239_v46 }
0x3912   : > { %v11690_v62 = vpack.c.bf16 %v11994_v35, %v11993_v24  ;;  %11438 = vmatprep.subr.bf16.mxu0 %v12629_v21  ;;  %v12573_v41 = vpop.eup %12572  ;;  %v11698_v43 = vpack.c.bf16 %v12004_v36, %v12003_v39  ;;  %v8630_v45 = vmul.f32 %v12571_v38, %v14243_v47 }
0x3913   : > { %v8628_v25 = vmul.f32 %v12573_v41, %v12557_v55 }
0x3914   : > { %11691 = vmatprep.subr.bf16.mxu1 %v11690_v62 }
0x3915   : > { %11693 = vmatpush3.bf16.msra.mxu1 %v11690_v62  ;;  %11428 = vmatprep.mubr.msk.f32.mxu0 %vm988_vm1, %v8628_v25 }
0x3916   : > { %v12575_v48 = vpop.eup %12574  ;;  %11699 = vmatprep.subr.bf16.mxu1 %v11698_v43  ;;  %11429 = vmatmul.mubr.msk.f32.vlgmr.msra.gmra.mrb[78].mxu0 %vm988_vm1, %v8630_v45  ;;  %v12258_v45 = vld [vmem:[%s14505_s10 + $0x140] ss:$8 sps:$4 sm:$0xff]  }
0x3917   : > { %v12577_v32 = vpop.eup %12576  ;;  %v8632_v33 = vmul.f32 %v12575_v48, %v12561_v3  ;;  %11446 = vmatprep.mubr.msk.bf16.mxu0 %vm12630_vm3, %v12629_v21  ;;  %11439 = vmatpush3.bf16.msra.mxu0 %v12254_v56  ;;  %v12263_v48 = vld [vmem:[%s14505_s10 + $0x154] ss:$8 sps:$4 sm:$0xff]   ;;  %v12271_v56 = vld [vmem:[%s14507_s12 + $0x280] sm:$0xff]  }
0x3918   : > { %11422 = vmatmul.mubr.msk.f32.vlgmr.msra.gmra.mrb[96].mxu1 %vm988_vm1, %v8626_v51  ;;  %v8634_v52 = vmul.f32 %v12577_v32, %v14248_v26  ;;  %11440 = vmatprep.subr.bf16.mxu0 %v12629_v21  ;;  %v12261_v51 = vld [vmem:[%s14505_s10 + $0x150] ss:$8 sps:$4 sm:$0xff]   ;;  %v12266_v32 = vld [vmem:[%s14505_s10 + $0x164] ss:$8 sps:$4 sm:$0xff]  }
0x3919   : > { %11701 = vmatpush3.bf16.msra.mxu1 %v11698_v43  ;;  %11435 = vmatprep.mubr.msk.f32.mxu1 %vm988_vm1, %v8632_v33  ;;  %v12264_v33 = vld [vmem:[%s14505_s10 + $0x160] ss:$8 sps:$4 sm:$0xff]  }
0x391b   : > { %11441 = vmatpush3.bf16.msra.mxu0 %v12255_v58  ;;  %v12272_v58 = vld [vmem:[%s14507_s12 + $0x2c8] sm:$0xff]  }
0x391c   : > { %11436 = vmatmul.mubr.msk.f32.vlgmr.msra.gmra.mrb[98].mxu1 %vm988_vm1, %v8634_v52  ;;  %11442 = vmatprep.subr.bf16.mxu0 %v12629_v21  ;;  %v12267_v52 = vld [vmem:[%s14505_s10 + $0x170] ss:$8 sps:$4 sm:$0xff]  }
0x391d   : > { %9221 = vmatprep.mubr.bf16.mxu1 %v12624_v18 }
0x391f   : > { %11443 = vmatpush3.bf16.msra.mxu0 %v12256_v59  ;;  %v12273_v59 = vld [vmem:[%s14507_s12 + $0x288] sm:$0xff]  }
0x3920   : > { %11444 = vmatprep.subr.bf16.mxu0 %v12629_v21 }
0x3923   : > { %11445 = vmatpush3.bf16.msra.mxu0 %v12257_v60 }
0x3970   : > { %v11416_v22 = vpop.f32.mrb[76].mxu0 }
0x3971   : > { %v8707_v57 = vpop.f32.mrb[77].mxu0 }
0x39e9   : > { %v11430_v17 = vpop.f32.mrb[78].mxu0 }
0x39ea   : > { %v8869_v19 = vpop.f32.mrb[79].mxu0 }
0x39eb   : > { %v11423_v46 = vpop.f32.mrb[96].mxu1  ;;  %v12010_v63 = vpack.i.bf16 %v11430_v17, %v8869_v19 }
0x39ec   : > { %v8788_v0 = vpop.f32.mrb[97].mxu1 }
0x39ed   : > { %v12005_v47 = vpack.i.bf16 %v11423_v46, %v8788_v0  ;;  %12011 = vrot.lane.b32.xlu0 %v12010_v63, %s14580_s2  ;;  %s14583_s2 = sld [smem:[#allocation14_spill]] }
0x39ef   : > { %12006 = vrot.lane.b32.xlu1 %v12005_v47, %s14581_s5  ;;  %v11437_v4 = vpop.f32.mrb[98].mxu1  ;;  %s14591_s5 = sld [smem:[#allocation19_spill]] }
0x39f0   : > { %v8950_v53 = vpop.f32.mrb[99].mxu1 }
0x39f1   : > { %v12015_v23 = vpack.i.bf16 %v11437_v4, %v8950_v53  ;;  %v10587_v53 = vld [vmem:[%s14575_s1 + $0x5] ss:$0 sm:$0xff] }
0x39f3   : > { %12016 = vrot.lane.b32.xlu1 %v12015_v23, %s14582_s22 }
0x39f5   : > { %s778_s22 = scalar_lea.vmem %s14591_s5, %s14590_s21 }
0x3a5f   : > { %v12012_v26 = vpop.permute.xlu0 %12011 }
0x3a60   : > { %v12014_v10 = vunpack.i.h.bf16 %v12012_v26  ;;  %v12013_v11 = vunpack.i.l.bf16 %v12012_v26 }
0x3a61   : > { %v12007_v55 = vpop.permute.xlu1 %12006 }
0x3a62   : > { %v12009_v1 = vunpack.i.h.bf16 %v12007_v55  ;;  %v12008_v2 = vunpack.i.l.bf16 %v12007_v55 }
0x3a64   : > { %v8984_v3 = vsel %vm988_vm1, %v11416_v22, %v12009_v1  ;;  %v8983_v7 = vsel %vm988_vm1, %v8707_v57, %v12008_v2  ;;  %v12269_v22 = vld [vmem:[%s14505_s10 + $0x174] ss:$8 sps:$4 sm:$0xff]   ;;  %v12270_v57 = vld [vmem:[%s14507_s12 + $0x2c0] sm:$0xff]  }
0x3a65   : > { %v12017_v12 = vpop.permute.xlu1 %12016  ;;  %v8985_v14 = vsel %vm1793_vm4, %v8983_v7, %v12013_v11  ;;  %v8986_v37 = vsel %vm1793_vm4, %v8984_v3, %v12014_v10  ;;  %11015 = vmatprep.subr.bf16.mxu0 %v12270_v57  ;;  %v10588_v1 = vld [vmem:[%s14504_s9 + $0x5] ss:$0 sm:$0xff]  ;;  %v12274_v11 = vld [vmem:[%s14507_s12 + $0x2d0] sm:$0xff]  }
0x3a66   : > { %v12019_v54 = vunpack.i.h.bf16 %v12017_v12  ;;  %v12018_v13 = vunpack.i.l.bf16 %v12017_v12  ;;  %v12275_v12 = vld [vmem:[%s14507_s12 + $0x290] sm:$0xff]  }
0x3a68   : > { %v8988_v15 = vsel %vm1796_vm5, %v8986_v37, %v12019_v54  ;;  %v8987_v16 = vsel %vm1796_vm5, %v8985_v14, %v12018_v13  ;;  %v12276_v54 = vld [vmem:[%s14507_s12 + $0x2d8] sm:$0xff]   ;;  %v12278_v14 = vld [vmem:[%s14507_s12 + $0x2e0] sm:$0xff]  }
0x3a69   : > { %v8989_v49 = vpack.c.bf16 %v8988_v15, %v8987_v16  ;;  %v12277_v13 = vld [vmem:[%s14507_s12 + $0x298] sm:$0xff]   ;;  %v12279_v37 = vld [vmem:[%s14507_s12 + $0x2a0] sm:$0xff]   ;;  %v12280_v15 = vld [vmem:[%s14507_s12 + $0x2e8] sm:$0xff]  }
0x3a6a   : > { %v12281_v16 = vld [vmem:[%s14507_s12 + $0x2a8] sm:$0xff]  }
0x3a6b   : > { %11447 = vmatmul.mubr.msk.bf16.vlgmr.msra.gmra.mrb[80].mxu0 %vm798_vm0, %v8989_v49  ;;  %v12282_v49 = vld [vmem:[%s14507_s12 + $0x2f0] sm:$0xff]  }
0x3a6c   : > { %11016 = vmatpush3.bf16.msra.mxu0 %v12271_v56 }
0x3a6d   : > { %11017 = vmatprep.subr.bf16.mxu0 %v12272_v58 }
0x3a70   : > { %11018 = vmatpush3.bf16.msra.mxu0 %v12273_v59 }
0x3a71   : > { %11019 = vmatprep.subr.bf16.mxu0 %v12274_v11 }
0x3a74   : > { %11020 = vmatpush3.bf16.msra.mxu0 %v12275_v12 }
0x3a75   : > { %11021 = vmatprep.subr.bf16.mxu0 %v12276_v54 }
0x3a78   : > { %11022 = vmatpush3.bf16.msra.mxu0 %v12277_v13 }
0x3a79   : > { %11023 = vmatprep.subr.bf16.mxu0 %v12278_v14 }
0x3a7c   : > { %11024 = vmatpush3.bf16.msra.mxu0 %v12279_v37 }
0x3a7d   : > { %11025 = vmatprep.subr.bf16.mxu0 %v12280_v15 }
0x3a80   : > { %11026 = vmatpush3.bf16.msra.mxu0 %v12281_v16 }
0x3a81   : > { %11027 = vmatprep.subr.bf16.mxu0 %v12282_v49 }
0x3b3e   : > { %v9068_v50 = vpop.f32.mrb[80].mxu0 }
0x3b3f   : > { %v9069_v5 = vadd.f32 %v10579_v20, %v9068_v50  ;;  %v11448_v6 = vpop.f32.mrb[81].mxu0  ;;  %v12284_v50 = vld [vmem:[%s14507_s12 + $0x2f8] sm:$0xff]  }
0x3b40   : > { %v9071_v27 = vpop.f32.mrb[82].mxu0  ;;  %v10597_v6 = vld [vmem:[%s14506_s11 + $0xa] sm:$0x3] }
0x3b41   : > { %v9075_v28 = vadd.f32 %v9069_v5, %v14173_v8  ;;  %v9072_v29 = vadd.f32 %v10579_v20, %v9071_v27  ;;  %v11449_v30 = vpop.f32.mrb[83].mxu0  ;;  %v12283_v20 = vld [vmem:[%s14507_s12 + $0x2b0] sm:$0xff]   ;;  %v12285_v5 = vld [vmem:[%s14507_s12 + $0x2b8] sm:$0xff]   ;;  %v9139_v27 = vrot.slane %v10597_v6, %v12824_v42 }
0x3b42   : > { %11028 = vmatpush3.bf16.msra.mxu0 %v12283_v20 }
0x3b43   : > { %v9076_v31 = vadd.f32 %v9072_v29, %v14175_v9  ;;  %v9081_v34 = vsel %vm798_vm0, %v9075_v28, 0.0  ;;  %v12260_v9 = vld [vmem:[%s14505_s10 + $0x144] ss:$8 sps:$4 sm:$0xff]   ;;  %11029 = vmatprep.subr.bf16.mxu0 %v12284_v50 }
0x3b44   : > { %9082 = vadd.xlane.f32.xlu0 %v9081_v34  ;;  %9189 = vmatprep.subr.bf16.mxu1 %v12260_v9  ;;  %v12287_v50 = vld [vmem:[%s14511_s16 + $0x8] sm:$0xff]  }
0x3b45   : > { %v9084_v36 = vsel %vm798_vm0, %v9076_v31, 0.0  ;;  %9190 = vmatpush1.bf16.msra.mxu1 %v12258_v45 }
0x3b46   : > { %9085 = vadd.xlane.f32.xlu1 %v9084_v36  ;;  %9191 = vmatprep.subr.bf16.mxu1 %v12263_v48 }
0x3b47   : > { %11030 = vmatpush3.bf16.msra.mxu0 %v12285_v5  ;;  %v12288_v5 = vld [vmem:[%s14511_s16 + $0x10] sm:$0xff]  }
0x3b49   : > { %9192 = vmatpush1.bf16.msra.mxu1 %v12261_v51 }
0x3b4a   : > { %9193 = vmatprep.subr.bf16.mxu1 %v12266_v32 }
0x3b4d   : > { %9194 = vmatpush1.bf16.msra.mxu1 %v12264_v33 }
0x3b4e   : > { %9195 = vmatprep.subr.bf16.mxu1 %v12269_v22 }
0x3b51   : > { %9196 = vmatpush1.bf16.msra.mxu1 %v12267_v52 }
0x3b52   : > { %11450 = vmatprep.subr.bf16.mxu1 %v12629_v21 }
0x3bd1   : > { %v9083_v39 = vpop.xlane.xlu0 %9082 }
0x3bd2   : > { %v9087_v35 = vmul.f32 0.015625, %v9083_v39 }
0x3bd3   : > { %v9086_v24 = vpop.xlane.xlu1 %9085 }
0x3bd4   : > { %v9089_v61 = vsub.f32 %v9075_v28, %v9087_v35  ;;  %v9088_v38 = vmul.f32 0.015625, %v9086_v24  ;;  %v9143_v28 = vrot.slane %v10597_v6, %v12829_v44  ;;  %v12289_v6 = vld [vmem:[%s14511_s16 + $0x18] sm:$0xff]  }
0x3bd6   : > { %v9090_v62 = vsub.f32 %v9076_v31, %v9088_v38  ;;  %v9091_v41 = vmul.f32 %v9089_v61, %v9089_v61 }
0x3bd8   : > { %v9093_v43 = vsel %vm798_vm0, %v9091_v41, 0.0  ;;  %v9092_v8 = vmul.f32 %v9090_v62, %v9090_v62 }
0x3bd9   : > { %9094 = vadd.xlane.f32.xlu0 %v9093_v43 }
0x3bda   : > { %v9096_v25 = vsel %vm798_vm0, %v9092_v8, 0.0 }
0x3bdd   : > { %9097 = vadd.xlane.f32.xlu0 %v9096_v25 }
0x3c66   : > { %v9095_v60 = vpop.xlane.xlu0 %9094 }
0x3c67   : > { %v9099_v17 = vmul.f32 0.015625, %v9095_v60 }
0x3c69   : > { %v9101_v19 = vadd.f32 1e-12, %v9099_v17 }
0x3c6a   : > { %v9098_v46 = vpop.xlane.xlu0 %9097 }
0x3c6b   : > { %12578 = vrsqrt.f32 %v9101_v19  ;;  %v9100_v63 = vmul.f32 0.015625, %v9098_v46 }
0x3c6d   : > { %v9102_v0 = vadd.f32 1e-12, %v9100_v63  ;;  %v10640_v63 = vld [vmem:[%s14508_s13 + $0x5] ss:$0 sm:$0xff] }
0x3c6f   : > { %12580 = vrsqrt.f32 %v9102_v0 }
0x3c75   : > { %v12579_v47 = vpop.eup %12578 }
0x3c76   : > { %v9105_v4 = vmul.f32 %v12579_v47, %v9089_v61 }
0x3c78   : > { %v9113_v55 = vmul.f32 %v10587_v53, %v9105_v4 }
0x3c79   : > { %v12581_v23 = vpop.eup %12580 }
0x3c7a   : > { %v9106_v26 = vmul.f32 %v12581_v23, %v9090_v62  ;;  %v14352_v3 = vadd.f32 %v10588_v1, %v9113_v55 }
0x3c7c   : > { %v9114_v2 = vmul.f32 %v10587_v53, %v9106_v26 }
0x3c7e   : > { %v14354_v7 = vadd.f32 %v10588_v1, %v9114_v2 }
0x3c80   : > { %v9123_v10 = vpack.c.bf16 %v14354_v7, %v14352_v3 }
0x3c82   : > { %10606 = vmatmul.mubr.msk.bf16.vlgmr.msra.gmra.mrb[100].mxu1 %vm798_vm0, %v9123_v10 }
0x3c83   : > { %11458 = vmatprep.mubr.msk.bf16.mxu1 %vm12630_vm3, %v12629_v21 }
0x3d55   : > { %v9223_v29 = vpop.f32.mrb[100].mxu1 }
0x3d56   : > { %v9224_v30 = vadd.f32 %v9223_v29, %v9139_v27  ;;  %v9225_v31 = vpop.f32.mrb[101].mxu1 }
0x3d57   : > { %v9226_v34 = vadd.f32 %v9225_v31, %v9143_v28  ;;  %v9227_v36 = vpop.f32.mrb[102].mxu1 }
0x3d58   : > { %v9236_v39 = vmul.f32 0.70710677, %v9224_v30  ;;  %v9228_v35 = vadd.f32 %v9227_v36, %v9139_v27  ;;  %v9229_v24 = vpop.f32.mrb[103].mxu1  ;;  %v9232_v51 = vmul.f32 0.5, %v9224_v30 }
0x3d59   : > { %v9237_v61 = vmul.f32 0.70710677, %v9226_v34  ;;  %v9230_v38 = vadd.f32 %v9229_v24, %v9143_v28  ;;  %v9233_v52 = vmul.f32 0.5, %v9226_v34 }
0x3d5a   : > { %12582 = verf.f32 %v9236_v39  ;;  %v9238_v62 = vmul.f32 0.70710677, %v9228_v35  ;;  %v9234_v32 = vmul.f32 0.5, %v9228_v35  ;;  %v10659_v39 = vld [vmem:[%s14509_s14 + $0x5] ss:$0 sm:$0xff] }
0x3d5b   : > { %12584 = verf.f32 %v9237_v61  ;;  %v9239_v41 = vmul.f32 0.70710677, %v9230_v38  ;;  %v9235_v22 = vmul.f32 0.5, %v9230_v38 }
0x3d5c   : > { %12586 = verf.f32 %v9238_v62  ;;  %v10660_v62 = vld [vmem:[%s14510_s15 + $0x5] ss:$0 sm:$0xff] }
0x3d5d   : > { %12588 = verf.f32 %v9239_v41 }
0x3d64   : > { %v12583_v43 = vpop.eup %12582 }
0x3d65   : > { %v12585_v8 = vpop.eup %12584  ;;  %v9244_v25 = vadd.f32 1.0, %v12583_v43 }
0x3d66   : > { %v12587_v9 = vpop.eup %12586  ;;  %v9245_v45 = vadd.f32 1.0, %v12585_v8 }
0x3d67   : > { %v12589_v48 = vpop.eup %12588  ;;  %v9246_v33 = vadd.f32 1.0, %v12587_v9  ;;  %v9248_v56 = vmul.f32 %v9244_v25, %v9232_v51  ;;  %v10661_v9 = vld [vmem:[%s14583_s2] ss:$0 sm:$0xff]  ;;  %s14585_s2 = sld [smem:[#allocation3_spill]] }
0x3d68   : > { %v9247_v57 = vadd.f32 1.0, %v12589_v48  ;;  %v9249_v59 = vmul.f32 %v9245_v45, %v9233_v52 }
0x3d69   : > { %v9250_v58 = vmul.f32 %v9246_v33, %v9234_v32 }
0x3d6a   : > { %v9251_v60 = vmul.f32 %v9247_v57, %v9235_v22 }
0x3d6b   : > { %v9252_v17 = vpack.c.bf16 %v9250_v58, %v9248_v56 }
0x3d6c   : > { %v9253_v19 = vpack.c.bf16 %v9251_v60, %v9249_v59 }
0x3d6d   : > { %s10682_s26 = sshll.u32 %s14585_s2, 4 }
0x3d6e   : > { %9423 = vmatprep.mubr.bf16.mxu0 %v9253_v19  ;;  %s785_s19 = scalar_lea.vmem %s14589_s25, %s10682_s26 }
0x3d6f   : > { %9424 = vmatmul.mubr.bf16.vlgmr.msra.gmra.mrb[84].mxu0 %v9252_v17 }
0x3e42   : > { %v11031_v46 = vpop.f32.mrb[84].mxu0 }
0x3e43   : > { %v11032_v0 = vpop.f32.mrb[85].mxu0 }
0x3e44   : > { %v11033_v47 = vadd.f32 %v11032_v0, %v11031_v46  ;;  %v11034_v4 = vpop.f32.mrb[86].mxu0 }
0x3e45   : > { %v11035_v53 = vpop.f32.mrb[87].mxu0 }
0x3e46   : > { %v9426_v23 = vadd.f32 %v11033_v47, %v10640_v63  ;;  %v11036_v55 = vadd.f32 %v11035_v53, %v11034_v4 }
0x3e48   : > { %v9429_v26 = vadd.f32 %v11036_v55, %v10640_v63  ;;  %v9432_v1 = vadd.f32 %v9426_v23, %v14352_v3 }
0x3e4a   : > { %v9438_v2 = vsel %vm798_vm0, %v9432_v1, 0.0  ;;  %v9433_v10 = vadd.f32 %v9429_v26, %v14354_v7  ;;  %v12286_v7 = vld [vmem:[%s14511_s16] sm:$0xff]  }
0x3e4b   : > { %9439 = vadd.xlane.f32.xlu0 %v9438_v2  ;;  %11451 = vmatpush3.bf16.msra.mxu1 %v12286_v7 }
0x3e4c   : > { %v9441_v11 = vsel %vm798_vm0, %v9433_v10, 0.0  ;;  %11452 = vmatprep.subr.bf16.mxu1 %v12629_v21 }
0x3e4d   : > { %9442 = vadd.xlane.f32.xlu1 %v9441_v11 }
0x3e4f   : > { %11453 = vmatpush3.bf16.msra.mxu1 %v12287_v50 }
0x3e50   : > { %11454 = vmatprep.subr.bf16.mxu1 %v12629_v21 }
0x3e53   : > { %11455 = vmatpush3.bf16.msra.mxu1 %v12288_v5 }
0x3e54   : > { %11456 = vmatprep.subr.bf16.mxu1 %v12629_v21 }
0x3e57   : > { %11457 = vmatpush3.bf16.msra.mxu1 %v12289_v6 }
0x3ed8   : > { %v9440_v12 = vpop.xlane.xlu0 %9439 }
0x3ed9   : > { %v9444_v54 = vmul.f32 0.015625, %v9440_v12  ;;  %v12292_v12 = vld [vmem:[%s14584_s27 + $0x4] ss:$8 sps:$4 sm:$0xff]  }
0x3eda   : > { %v9443_v13 = vpop.xlane.xlu1 %9442  ;;  %9682 = vmatprep.subr.bf16.mxu1 %v12292_v12 }
0x3edb   : > { %v9446_v14 = vsub.f32 %v9432_v1, %v9444_v54  ;;  %v9445_v37 = vmul.f32 0.015625, %v9443_v13  ;;  %v12290_v54 = vld [vmem:[%s14584_s27] ss:$8 sps:$4 sm:$0xff]   ;;  %v12295_v13 = vld [vmem:[%s14584_s27 + $0x14] ss:$8 sps:$4 sm:$0xff]  }
0x3edd   : > { %v9447_v15 = vsub.f32 %v9433_v10, %v9445_v37  ;;  %v9448_v16 = vmul.f32 %v9446_v14, %v9446_v14  ;;  %v12298_v37 = vld [vmem:[%s14584_s27 + $0x24] ss:$8 sps:$4 sm:$0xff]  }
0x3edf   : > { %v9450_v49 = vsel %vm798_vm0, %v9448_v16, 0.0  ;;  %v9449_v20 = vmul.f32 %v9447_v15, %v9447_v15  ;;  %v12299_v16 = vld [vmem:[%s14584_s27 + $0x30] ss:$8 sps:$4 sm:$0xff]  }
0x3ee0   : > { %9451 = vadd.xlane.f32.xlu0 %v9450_v49  ;;  %v12301_v49 = vld [vmem:[%s14584_s27 + $0x34] ss:$8 sps:$4 sm:$0xff]  }
0x3ee1   : > { %v9453_v3 = vsel %vm798_vm0, %v9449_v20, 0.0 }
0x3ee2   : > { %9454 = vadd.xlane.f32.xlu1 %v9453_v3 }
0x3f6d   : > { %v9452_v27 = vpop.xlane.xlu0 %9451 }
0x3f6e   : > { %v9456_v28 = vmul.f32 0.015625, %v9452_v27 }
0x3f6f   : > { %v9455_v29 = vpop.xlane.xlu1 %9454 }
0x3f70   : > { %v9458_v30 = vadd.f32 1e-12, %v9456_v28  ;;  %v9457_v31 = vmul.f32 0.015625, %v9455_v29  ;;  %v10667_v28 = vld [vmem:[%s14586_s17] ss:$0 sm:$0xff] }
0x3f72   : > { %12590 = vrsqrt.f32 %v9458_v30  ;;  %v9459_v34 = vadd.f32 1e-12, %v9457_v31 }
0x3f74   : > { %12592 = vrsqrt.f32 %v9459_v34 }
0x3f7c   : > { %v12591_v36 = vpop.eup %12590 }
0x3f7d   : > { %v9462_v35 = vmul.f32 %v12591_v36, %v9446_v14  ;;  %v12293_v14 = vld [vmem:[%s14584_s27 + $0x10] ss:$8 sps:$4 sm:$0xff]   ;;  %v10668_v36 = vld [vmem:[%s14587_s6] ss:$0 sm:$0xff]  ;;  %s791_s6 = scalar_lea.vmem %s14592_s24, %s14590_s21 }
0x3f7e   : > { %v12593_v24 = vpop.eup %12592 }
0x3f7f   : > { %v9470_v61 = vmul.f32 %v10659_v39, %v9462_v35  ;;  %v9463_v38 = vmul.f32 %v12593_v24, %v9447_v15  ;;  %v12296_v15 = vld [vmem:[%s14584_s27 + $0x20] ss:$8 sps:$4 sm:$0xff]  }
0x3f81   : > { %v9471_v41 = vmul.f32 %v10659_v39, %v9463_v38  ;;  %v9478_v43 = vadd.f32 %v10660_v62, %v9470_v61  ;;  %v9627_v38 = vld [vmem:[%s14588_s30] sm:$0x3] }
0x3f83   : > { %v9479_v8 = vadd.f32 %v10660_v62, %v9471_v41  ;;  %v9632_v62 = vrot.slane %v9627_v38, %v12824_v42  ;;  %v9636_v41 = vrot.slane %v9627_v38, %v12829_v44  ;;  %v9730_v44 = vld [vmem:[%s778_s22 + $0x8] sm:$0xff] }
0x3f84   : > { %vm9785_vm11 = vcmp.ne.s32.totalorder %v9730_v44, 4294967196 }
0x3f85   : > { %v9480_v25 = vpack.c.bf16 %v9479_v8, %v9478_v43 }
0x3f87   : > { %11459 = vmatmul.mubr.msk.bf16.vlgmr.msra.gmra.mrb[104].mxu1 %vm798_vm0, %v9480_v25 }
0x3f88   : > { %9714 = vmatprep.mubr.bf16.mxu1 %v12624_v18  ;;  %9683 = vmatpush1.bf16.msra.mxu1 %v12290_v54 }
0x3f89   : > { %9684 = vmatprep.subr.bf16.mxu1 %v12295_v13 }
0x3f8c   : > { %9685 = vmatpush1.bf16.msra.mxu1 %v12293_v14 }
0x3f8d   : > { %9686 = vmatprep.subr.bf16.mxu1 %v12298_v37 }
0x3f90   : > { %9687 = vmatpush1.bf16.msra.mxu1 %v12296_v15 }
0x3f91   : > { %9688 = vmatprep.subr.bf16.mxu1 %v12301_v49 }
0x3f94   : > { %9689 = vmatpush1.bf16.msra.mxu1 %v12299_v16 }
0x405a   : > { %v9557_v45 = vpop.f32.mrb[104].mxu1 }
0x405b   : > { %v9558_v48 = vadd.f32 %v10661_v9, %v9557_v45  ;;  %v11460_v51 = vpop.f32.mrb[105].mxu1 }
0x405c   : > { %v9560_v32 = vpop.f32.mrb[106].mxu1 }
0x405d   : > { %v9566_v33 = vmul.f32 0.70710677, %v9558_v48  ;;  %v9561_v52 = vadd.f32 %v10661_v9, %v9560_v32  ;;  %v11461_v22 = vpop.f32.mrb[107].mxu1  ;;  %v9564_v58 = vmul.f32 0.5, %v9558_v48 }
0x405f   : > { %12594 = verf.f32 %v9566_v33  ;;  %v9567_v57 = vmul.f32 0.70710677, %v9561_v52  ;;  %v9565_v17 = vmul.f32 0.5, %v9561_v52  ;;  %v9729_v52 = vld [vmem:[%s778_s22] sm:$0xff] }
0x4060   : > { %vm9784_vm10 = vcmp.ne.s32.totalorder %v9729_v52, 4294967196 }
0x4061   : > { %12596 = verf.f32 %v9567_v57 }
0x4069   : > { %v12595_v56 = vpop.eup %12594 }
0x406a   : > { %v9570_v59 = vadd.f32 1.0, %v12595_v56 }
0x406b   : > { %v12597_v60 = vpop.eup %12596 }
0x406c   : > { %v9572_v18 = vmul.f32 %v9570_v59, %v9564_v58  ;;  %v9571_v19 = vadd.f32 1.0, %v12597_v60 }
0x406e   : > { %v9576_v46 = vsel %vm798_vm0, %v9572_v18, 0.0  ;;  %v9573_v63 = vmul.f32 %v9571_v19, %v9565_v17 }
0x406f   : > { %9577 = vadd.xlane.f32.xlu0 %v9576_v46 }
0x4070   : > { %v9579_v0 = vsel %vm798_vm0, %v9573_v63, 0.0 }
0x4071   : > { %9580 = vadd.xlane.f32.xlu1 %v9579_v0 }
0x40fc   : > { %v9578_v47 = vpop.xlane.xlu0 %9577 }
0x40fd   : > { %v9582_v4 = vmul.f32 0.015625, %v9578_v47 }
0x40fe   : > { %v9581_v53 = vpop.xlane.xlu1 %9580 }
0x40ff   : > { %v9584_v23 = vsub.f32 %v9572_v18, %v9582_v4  ;;  %v9583_v55 = vmul.f32 0.015625, %v9581_v53 }
0x4101   : > { %v9585_v26 = vsub.f32 %v9573_v63, %v9583_v55  ;;  %v9586_v1 = vmul.f32 %v9584_v23, %v9584_v23  ;;  %v9762_v63 = vand.u32 127, %v854_v40 }
0x4103   : > { %v9588_v2 = vsel %vm798_vm0, %v9586_v1, 0.0  ;;  %v9587_v10 = vmul.f32 %v9585_v26, %v9585_v26  ;;  %v9763_v47 = vadd.s32 128, %v9762_v63 }
0x4104   : > { %9589 = vadd.xlane.f32.xlu0 %v9588_v2 }
0x4105   : > { %v9591_v11 = vsel %vm798_vm0, %v9587_v10, 0.0 }
0x4106   : > { %9592 = vadd.xlane.f32.xlu1 %v9591_v11 }
0x4191   : > { %v9590_v20 = vpop.xlane.xlu0 %9589 }
0x4192   : > { %v9594_v3 = vmul.f32 0.015625, %v9590_v20 }
0x4193   : > { %v9593_v7 = vpop.xlane.xlu1 %9592 }
0x4194   : > { %v9596_v50 = vadd.f32 1e-12, %v9594_v3  ;;  %v9595_v5 = vmul.f32 0.015625, %v9593_v7 }
0x4196   : > { %12598 = vrsqrt.f32 %v9596_v50  ;;  %v9597_v6 = vadd.f32 1e-12, %v9595_v5  ;;  %v10678_v50 = vsel %vm9784_vm10, 1.0, %v12629_v21 }
0x4198   : > { %12600 = vrsqrt.f32 %v9597_v6 }
0x41a0   : > { %v12599_v27 = vpop.eup %12598 }
0x41a1   : > { %v9600_v29 = vmul.f32 %v12599_v27, %v9584_v23  ;;  %v10679_v27 = vsel %vm9785_vm11, 1.0, %v12629_v21 }
0x41a2   : > { %v12601_v30 = vpop.eup %12600 }
0x41a3   : > { %v9608_v31 = vmul.f32 %v10667_v28, %v9600_v29  ;;  %v9601_v34 = vmul.f32 %v12601_v30, %v9585_v26 }
0x41a5   : > { %v9609_v39 = vmul.f32 %v10667_v28, %v9601_v34  ;;  %v9616_v35 = vadd.f32 %v10668_v36, %v9608_v31 }
0x41a7   : > { %v9617_v24 = vadd.f32 %v10668_v36, %v9609_v39 }
0x41a9   : > { %v9618_v61 = vpack.c.bf16 %v9617_v24, %v9616_v35 }
0x41ab   : > { %10677 = vmatmul.mubr.msk.bf16.vlgmr.msra.gmra.mrb[108].mxu1 %vm798_vm0, %v9618_v61 }
0x427e   : > { %v9716_v43 = vpop.f32.mrb[108].mxu1 }
0x427f   : > { %v9717_v8 = vadd.f32 %v9716_v43, %v9632_v62  ;;  %v9718_v25 = vpop.f32.mrb[109].mxu1 }
0x4280   : > { %v9719_v9 = vadd.f32 %v9718_v25, %v9636_v41  ;;  %v9720_v45 = vpop.f32.mrb[110].mxu1 }
0x4281   : > { %9725 = vst [vmem:[%s785_s19] sm:$0xff] %v9717_v8  ;;  %v9721_v48 = vadd.f32 %v9720_v45, %v9632_v62  ;;  %v9722_v51 = vpop.f32.mrb[111].mxu1 }
0x4282   : > { %9726 = vst [vmem:[%s785_s19 + $0x8] sm:$0xff] %v9719_v9  ;;  %v9723_v32 = vadd.f32 %v9722_v51, %v9636_v41  ;;  %v9731_v33 = vmax.f32 %v9717_v8, %v9719_v9 }
0x4283   : > { %9727 = vst [vmem:[%s785_s19 + $0x10] sm:$0xff] %v9721_v48 }
0x4284   : > { %9728 = vst [vmem:[%s785_s19 + $0x18] sm:$0xff] %v9723_v32  ;;  %9732 = vmax.xlane.f32.xlu0 %v9731_v33  ;;  %v9734_v42 = vmax.f32 %v9721_v48, %v9723_v32 }
0x4286   : > { %9735 = vmax.xlane.f32.xlu1 %v9734_v42 }
0x4297   : > { %9768 = vperm.xlu1 %12021, %v9730_v44  }
0x429a   : > { %9765 = vperm.xlu0 %12020, %v9729_v52  }
0x4311   : > { %v9733_v22 = vpop.xlane.xlu0 %9732 }
0x4312   : > { %v9737_v57 = vsub.f32 %v9717_v8, %v9733_v22  ;;  %v9738_v56 = vsub.f32 %v9719_v9, %v9733_v22 }
0x4313   : > { %v9736_v58 = vpop.xlane.xlu1 %9735 }
0x4314   : > { %v9741_v59 = vmul.f32 1.442695, %v9737_v57  ;;  %v9743_v60 = vmul.f32 1.442695, %v9738_v56  ;;  %v9739_v17 = vsub.f32 %v9721_v48, %v9736_v58  ;;  %v9740_v18 = vsub.f32 %v9723_v32, %v9736_v58 }
0x4316   : > { %12602 = vpow2.f32 %v9741_v59  ;;  %v9745_v19 = vmul.f32 1.442695, %v9739_v17  ;;  %v9747_v46 = vmul.f32 1.442695, %v9740_v18 }
0x4317   : > { %12604 = vpow2.f32 %v9743_v60  ;;  %v9769_v23 = vpop.permute.xlu1 %9768 }
0x4318   : > { %12606 = vpow2.f32 %v9745_v19  ;;  %vm9772_vm8 = vcmp.eq.s32.totalorder %v9762_v63, %v9769_v23  ;;  %vm9773_vm9 = vcmp.eq.s32.totalorder %v9763_v47, %v9769_v23 }
0x4319   : > { %12608 = vpow2.f32 %v9747_v46  ;;  %v9766_v0 = vpop.permute.xlu0 %9765  ;;  %v9776_v54 = vsel %vm9772_vm8, %v9721_v48, 0.0  ;;  %v9777_v40 = vsel %vm9773_vm9, %v9723_v32, 0.0 }
0x431a   : > { %vm9770_vm6 = vcmp.eq.s32.totalorder %v9762_v63, %v9766_v0  ;;  %vm9771_vm7 = vcmp.eq.s32.totalorder %v9763_v47, %v9766_v0  ;;  %v9781_v13 = vadd.f32 %v9777_v40, %v9776_v54 }
0x431b   : > { %v9774_v2 = vsel %vm9770_vm6, %v9717_v8, 0.0  ;;  %v9775_v10 = vsel %vm9771_vm7, %v9719_v9, 0.0 }
0x431c   : > { %v9778_v12 = vadd.f32 %v9775_v10, %v9774_v2 }
0x4320   : > { %v12603_v4 = vpop.eup %12602 }
0x4321   : > { %v12605_v53 = vpop.eup %12604 }
0x4322   : > { %v12607_v55 = vpop.eup %12606  ;;  %v9749_v26 = vadd.f32 %v12605_v53, %v12603_v4 }
0x4323   : > { %v12609_v1 = vpop.eup %12608 }
0x4324   : > { %9750 = vadd.xlane.f32.xlu1 %v9749_v26  ;;  %v9752_v11 = vadd.f32 %v12609_v1, %v12607_v55 }
0x4326   : > { %9753 = vadd.xlane.f32.xlu0 %v9752_v11 }
0x4328   : > { %9779 = vadd.xlane.f32.xlu1 %v9778_v12 }
0x432c   : > { %9782 = vadd.xlane.f32.xlu1 %v9781_v13 }
0x43b1   : > { %v9751_v14 = vpop.xlane.xlu1 %9750 }
0x43b2   : > { %12610 = vlog2.f32 %v9751_v14 }
0x43b3   : > { %v9754_v37 = vpop.xlane.xlu0 %9753 }
0x43b4   : > { %12612 = vlog2.f32 %v9754_v37 }
0x43b5   : > { %v9780_v16 = vpop.xlane.xlu1 %9779 }
0x43b9   : > { %v9783_v28 = vpop.xlane.xlu1 %9782 }
0x43bc   : > { %v12611_v15 = vpop.eup %12610 }
0x43bd   : > { %v9756_v49 = vmul.f32 0.6931472, %v12611_v15 }
0x43be   : > { %v12613_v20 = vpop.eup %12612 }
0x43bf   : > { %v9758_v3 = vmul.f32 0.6931472, %v12613_v20  ;;  %v9759_v7 = vadd.f32 %v9756_v49, %v9733_v22 }
0x43c1   : > { %v9790_v5 = vsub.f32 %v9759_v7, %v9780_v16  ;;  %v9760_v6 = vadd.f32 %v9758_v3, %v9736_v58 }
0x43c3   : > { %v9792_v29 = vmul.f32 %v10678_v50, %v9790_v5  ;;  %v9791_v30 = vsub.f32 %v9760_v6, %v9783_v28 }
0x43c5   : > { %9795 = vst.msk [vmem:[%s791_s6] sm:$0xff] %vm9794_vm12, %v9792_v29  ;;  %v9793_v31 = vmul.f32 %v10679_v27, %v9791_v30 }
0x43c7   : > { %9796 = vst.msk [vmem:[%s791_s6 + $0x8] sm:$0xff] %vm9794_vm12, %v9793_v31 }
0x43c8 PF: > { %s14593_s23 = sld [smem:[#allocation2_spill]] }
0x43ce   : > { %s35_s5 = sadd.s32 1, %s14593_s23  }
0x43cf   : > { %p32_p5 = scmp.ge.s32.totalorder %s35_s5, 4  }
0x43d1   :  { %34 = sbr.rel (!%p32_p5) target bundleno = 18 (0x12), region = 220 }

</bundles_post_ra>
